<compile_context>
chip_gen: v6e
topology: v6e:2x2x1
jax: 0.10.0
libtpu: 0.0.40
codegen_flags: <defaults>
</compile_context>

<pallas_src>
import functools

import jax
import jax.numpy as jnp
from jax.experimental import pallas as pl
from jax.experimental.pallas import tpu as pltpu


_LANE = 128


def _round_up_lanes(c):
    return max(_LANE, ((c + _LANE - 1) // _LANE) * _LANE)


def _vmem_limit_bytes():
    """Generation-aware VMEM limit (~3/4 of physical), with a safe fallback."""
    try:
        cap = int(pltpu.get_tpu_info().vmem_capacity_bytes)
    except Exception:
        cap = 64 * 1024 * 1024
    return max(32 * 1024 * 1024, min(cap * 3 // 4, 112 * 1024 * 1024))


def _downconv_kernel(x_ref, w1_ref, b1_ref, w2_ref, b2_ref, o_ref, mid_ref,
                     *, H, W, base):
    # x_ref : (1, (H+3)*(W+2), C1p) bf16   zero-haloed input, flattened spatial
    # w1_ref: (9, C1p, C2p)         bf16   taps ordered (dy, dx)
    # b1_ref: (1, C2p)              f32
    # w2_ref: (9, C2p, C2p)         bf16
    # b2_ref: (1, C2p)              f32
    # o_ref : (1, H*(W+2), C2p)     out dtype (padded-width slab, lane-dense)
    # mid_ref: (Rs, C2p)            f32 scratch: zero-haloed conv1 output
    Wp = W + 2
    L = H * Wp
    C2p = o_ref.shape[-1]
    Rs = mid_ref.shape[0]
    interior = base + Wp + 1          # 8-aligned by construction of `base`

    # Column-validity mask over the padded-width slab: column x of each row is
    # a real output column iff x < W (cols W, W+1 wrap to the next row).
    col = jax.lax.broadcasted_iota(jnp.int32, (L, 1), 0) % Wp
    valid = col < W

    # ---- conv1: 9 f32-accumulated matmuls on contiguous sublane slices -----
    x = x_ref[0]                                     # ((H+3)*Wp, C1p) bf16
    acc1 = jnp.zeros((L, C2p), jnp.float32)
    for dy in range(3):
        for dx in range(3):
            off = dy * Wp + dx
            acc1 = acc1 + jnp.dot(x[off:off + L], w1_ref[dy * 3 + dx],
                                  preferred_element_type=jnp.float32)
    mid_val = jnp.where(valid, jnp.maximum(acc1 + b1_ref[...], 0.0), 0.0)

    # ---- write conv1 output into the zero-haloed VMEM scratch ---------------
    # Halo row ranges are re-zeroed every step (cheap and megacore-safe); the
    # masked garbage columns carry zeros into the left/right halo columns.
    mid_ref[0:interior, :] = jnp.zeros((interior, C2p), jnp.float32)
    mid_ref[interior:interior + L, :] = mid_val
    mid_ref[interior + L:Rs, :] = jnp.zeros((Rs - interior - L, C2p),
                                            jnp.float32)

    # ---- conv2: same structure, reading the haloed intermediate -------------
    m = mid_ref[...].astype(jnp.bfloat16)            # (Rs, C2p)
    acc2 = jnp.zeros((L, C2p), jnp.float32)
    for dy in range(3):
        for dx in range(3):
            off = base + dy * Wp + dx
            acc2 = acc2 + jnp.dot(m[off:off + L], w2_ref[dy * 3 + dx],
                                  preferred_element_type=jnp.float32)
    out = jnp.where(valid, jnp.maximum(acc2 + b2_ref[...], 0.0), 0.0)
    o_ref[0] = out.astype(o_ref.dtype)


def downconv_forward(x_nhwc, w1, b1, w2, b2, *, out_dtype=jnp.float32):
    """Fused DownConv (conv3x3-ReLU-conv3x3-ReLU). x_nhwc: (N, H, W, Cin)."""
    N, H, W, Cin = x_nhwc.shape
    Cout = w1.shape[-1]
    C1p = _round_up_lanes(Cin)
    C2p = _round_up_lanes(Cout)
    Wp = W + 2
    L = H * Wp
    R1 = (H + 3) * Wp                     # 1 top + 1 bottom + 1 safety row
    base = (-(Wp + 1)) % 8                # makes the scratch interior 8-aligned
    Rs = -(-(base + (H + 2) * Wp + 2) // 8) * 8

    # Spatial zero halo + lane-dense channel pad + bf16 cast + spatial flatten,
    # all fused into one pass under the surrounding jit.
    x_p = jnp.pad(x_nhwc, ((0, 0), (1, 2), (1, 1), (0, C1p - Cin)))
    x_p = x_p.astype(jnp.bfloat16).reshape(N, R1, C1p)

    w1_p = jnp.pad(w1, ((0, 0), (0, 0), (0, C1p - Cin), (0, C2p - Cout)))
    w1_p = w1_p.reshape(9, C1p, C2p).astype(jnp.bfloat16)
    w2_p = jnp.pad(w2, ((0, 0), (0, 0), (0, C2p - Cout), (0, C2p - Cout)))
    w2_p = w2_p.reshape(9, C2p, C2p).astype(jnp.bfloat16)
    b1_p = jnp.pad(b1, (0, C2p - Cout)).reshape(1, C2p).astype(jnp.float32)
    b2_p = jnp.pad(b2, (0, C2p - Cout)).reshape(1, C2p).astype(jnp.float32)

    kernel = functools.partial(_downconv_kernel, H=H, W=W, base=base)

    y_flat = pl.pallas_call(
        kernel,
        out_shape=jax.ShapeDtypeStruct((N, L, C2p), out_dtype),
        grid_spec=pltpu.PrefetchScalarGridSpec(
            num_scalar_prefetch=0,
            grid=(N,),
            in_specs=[
                pl.BlockSpec((1, R1, C1p), lambda n: (n, 0, 0)),
                pl.BlockSpec((9, C1p, C2p), lambda n: (0, 0, 0)),
                pl.BlockSpec((1, C2p), lambda n: (0, 0)),
                pl.BlockSpec((9, C2p, C2p), lambda n: (0, 0, 0)),
                pl.BlockSpec((1, C2p), lambda n: (0, 0)),
            ],
            out_specs=pl.BlockSpec((1, L, C2p), lambda n: (n, 0, 0)),
            scratch_shapes=[pltpu.VMEM((Rs, C2p), jnp.float32)],
        ),
        compiler_params=pltpu.CompilerParams(
            dimension_semantics=("parallel",),
            vmem_limit_bytes=_vmem_limit_bytes(),
        ),
    )(x_p, w1_p, b1_p, w2_p, b2_p)

    # Drop the 2 padded-width columns and the channel padding outside the
    # kernel (stays fused in the surrounding jit).
    return y_flat.reshape(N, H, Wp, C2p)[:, :, :W, :Cout]


def init_bottleneck_params(key, in_channels, out_channels):
    """Deterministic synthetic parameters for the two conv layers."""
    k1, k2, k3, k4 = jax.random.split(key, 4)
    fan1 = in_channels * 9
    fan2 = out_channels * 9
    w1 = jax.random.normal(k1, (3, 3, in_channels, out_channels),
                           jnp.float32) * (2.0 / fan1) ** 0.5
    b1 = jax.random.normal(k2, (out_channels,), jnp.float32) * 0.01
    w2 = jax.random.normal(k3, (3, 3, out_channels, out_channels),
                           jnp.float32) * (2.0 / fan2) ** 0.5
    b2 = jax.random.normal(k4, (out_channels,), jnp.float32) * 0.01
    return {"w1": w1, "b1": b1, "w2": w2, "b2": b2}


@jax.jit
def bottleneck_forward(params, x_nchw):
    """Bottleneck forward. Input/output in PyTorch NCHW layout."""
    x = jnp.transpose(x_nchw, (0, 2, 3, 1))              # NCHW -> NHWC
    y = downconv_forward(x, params["w1"], params["b1"],
                         params["w2"], params["b2"],
                         out_dtype=x_nchw.dtype)
    return jnp.transpose(y, (0, 3, 1, 2))                # NHWC -> NCHW


def _reference_forward(params, x_nchw):
    """Pure-JAX reference (conv3x3+ReLU twice) for a smoke correctness check."""
    dn = ("NHWC", "HWIO", "NHWC")
    x = jnp.transpose(x_nchw, (0, 2, 3, 1))
    y = jax.lax.conv_general_dilated(x, params["w1"], (1, 1), "SAME",
                                     dimension_numbers=dn)
    y = jnp.maximum(y + params["b1"], 0.0)
    y = jax.lax.conv_general_dilated(y, params["w2"], (1, 1), "SAME",
                                     dimension_numbers=dn)
    y = jnp.maximum(y + params["b2"], 0.0)
    return jnp.transpose(y, (0, 3, 1, 2))


if __name__ == "__main__":
    key = jax.random.PRNGKey(0)
    k_param, k_x = jax.random.split(key)

    batch, in_channels, out_channels, spatial = 2, 4, 8, 16
    x = jax.random.normal(k_x, (batch, in_channels, spatial, spatial),
                          jnp.float32)

    params = init_bottleneck_params(k_param, in_channels, out_channels)

    y = bottleneck_forward(params, x)
    y = jax.block_until_ready(y)

    assert y.shape == (batch, out_channels, spatial, spatial), y.shape
    assert bool(jnp.all(jnp.isfinite(y)))

    # bf16 MXU operands / f32 accumulation -> loose tolerance vs f32 reference.
    ref = _reference_forward(params, x)
    max_err = float(jnp.max(jnp.abs(y - ref)))
    assert max_err < 2.5e-1, f"max abs error vs reference: {max_err}"

    print("KERNEL_OK")
</pallas_src>

<mosaic_0001>
module attributes {stable_mosaic.version = 11 : i64} {
  func.func @_downconv_kernel(%arg0: i32, %arg1: memref<1x342x128xbf16, #tpu.memory_space<vmem>>, %arg2: memref<9x128x128xbf16, #tpu.memory_space<vmem>>, %arg3: memref<1x128xf32, #tpu.memory_space<vmem>>, %arg4: memref<9x128x128xbf16, #tpu.memory_space<vmem>>, %arg5: memref<1x128xf32, #tpu.memory_space<vmem>>, %arg6: memref<1x288x128xf32, #tpu.memory_space<vmem>>, %arg7: memref<336x128xf32, #tpu.memory_space<vmem>>) attributes {dimension_semantics = [#tpu.dimension_semantics<parallel>], iteration_bounds = array<i64: 2>, scalar_prefetch = 0 : i64, scratch_operands = 1 : i64, tpu.core_type = #tpu.core_type<tc>, window_params = [{transform_indices = @transform_0, window_bounds = array<i64: 1, 342, 128>}, {pipeline_mode = #tpu.pipeline_mode<synchronous>, transform_indices = @transform_1, window_bounds = array<i64: 9, 128, 128>}, {pipeline_mode = #tpu.pipeline_mode<synchronous>, transform_indices = @transform_2, window_bounds = array<i64: 1, 128>}, {pipeline_mode = #tpu.pipeline_mode<synchronous>, transform_indices = @transform_3, window_bounds = array<i64: 9, 128, 128>}, {pipeline_mode = #tpu.pipeline_mode<synchronous>, transform_indices = @transform_4, window_bounds = array<i64: 1, 128>}, {transform_indices = @transform_5, window_bounds = array<i64: 1, 288, 128>}]} {
    %0 = tpu.iota {dimensions = array<i32: 0>} : vector<288x1xi32>
    %c18_i32 = arith.constant 18 : i32
    %c0_i32 = arith.constant 0 : i32
    %1 = arith.cmpi eq, %c18_i32, %c0_i32 : i32
    %c1_i32 = arith.constant 1 : i32
    %2 = arith.select %1, %c1_i32, %c18_i32 : i32
    %3 = vector.broadcast %2 : i32 to vector<288x1xi32>
    %4 = arith.remsi %0, %3 : vector<288x1xi32>
    %c0_i32_0 = arith.constant 0 : i32
    %5 = vector.broadcast %c0_i32_0 : i32 to vector<288x1xi32>
    %6 = arith.cmpi ne, %4, %5 : vector<288x1xi32>
    %c0_i32_1 = arith.constant 0 : i32
    %7 = vector.broadcast %c0_i32_1 : i32 to vector<288x1xi32>
    %8 = arith.cmpi slt, %4, %7 : vector<288x1xi32>
    %c0_i32_2 = arith.constant 0 : i32
    %9 = arith.cmpi slt, %2, %c0_i32_2 : i32
    %10 = vector.broadcast %9 : i1 to vector<288x1xi1>
    %11 = vector.broadcast %10 : vector<288x1xi1> to vector<288x1xi1>
    %12 = arith.xori %8, %11 : vector<288x1xi1>
    %13 = arith.andi %12, %6 : vector<288x1xi1>
    %14 = vector.broadcast %2 : i32 to vector<288x1xi32>
    %15 = arith.addi %4, %14 : vector<288x1xi32>
    %16 = arith.select %13, %15, %4 : vector<288x1xi1>, vector<288x1xi32>
    %c16_i32 = arith.constant 16 : i32
    %17 = vector.broadcast %c16_i32 : i32 to vector<288x1xi32>
    %18 = arith.cmpi slt, %16, %17 : vector<288x1xi32>
    %c0 = arith.constant 0 : index
    %c0_3 = arith.constant 0 : index
    %c0_4 = arith.constant 0 : index
    %19 = vector.load %arg1[%c0, %c0_3, %c0_4] : memref<1x342x128xbf16, #tpu.memory_space<vmem>>, vector<1x342x128xbf16>
    %20 = vector.shape_cast %19 : vector<1x342x128xbf16> to vector<342x128xbf16>
    %cst = arith.constant 0.000000e+00 : f32
    %21 = vector.broadcast %cst : f32 to vector<288x128xf32>
    %22 = vector.extract_strided_slice %20 {offsets = [0, 0], sizes = [288, 128], strides = [1, 1]} : vector<342x128xbf16> to vector<288x128xbf16>
    %c0_5 = arith.constant 0 : index
    %c0_6 = arith.constant 0 : index
    %c0_7 = arith.constant 0 : index
    %23 = vector.load %arg2[%c0_5, %c0_6, %c0_7] : memref<9x128x128xbf16, #tpu.memory_space<vmem>>, vector<1x128x128xbf16>
    %24 = vector.shape_cast %23 : vector<1x128x128xbf16> to vector<128x128xbf16>
    %cst_8 = arith.constant dense<0.000000e+00> : vector<288x128xf32>
    %25 = tpu.matmul %22, %24, %cst_8 {dimension_numbers = #tpu.dot_dimension_numbers<[1], [0], [0], [1], [0, 0, 1, 1], [], []>} : vector<288x128xbf16>, vector<128x128xbf16>, vector<288x128xf32> -> vector<288x128xf32>
    %26 = arith.addf %21, %25 : vector<288x128xf32>
    %27 = vector.extract_strided_slice %20 {offsets = [1, 0], sizes = [288, 128], strides = [1, 1]} : vector<342x128xbf16> to vector<288x128xbf16>
    %c1 = arith.constant 1 : index
    %c0_9 = arith.constant 0 : index
    %c0_10 = arith.constant 0 : index
    %28 = vector.load %arg2[%c1, %c0_9, %c0_10] : memref<9x128x128xbf16, #tpu.memory_space<vmem>>, vector<1x128x128xbf16>
    %29 = vector.shape_cast %28 : vector<1x128x128xbf16> to vector<128x128xbf16>
    %cst_11 = arith.constant dense<0.000000e+00> : vector<288x128xf32>
    %30 = tpu.matmul %27, %29, %cst_11 {dimension_numbers = #tpu.dot_dimension_numbers<[1], [0], [0], [1], [0, 0, 1, 1], [], []>} : vector<288x128xbf16>, vector<128x128xbf16>, vector<288x128xf32> -> vector<288x128xf32>
    %31 = arith.addf %26, %30 : vector<288x128xf32>
    %32 = vector.extract_strided_slice %20 {offsets = [2, 0], sizes = [288, 128], strides = [1, 1]} : vector<342x128xbf16> to vector<288x128xbf16>
    %c2 = arith.constant 2 : index
    %c0_12 = arith.constant 0 : index
    %c0_13 = arith.constant 0 : index
    %33 = vector.load %arg2[%c2, %c0_12, %c0_13] : memref<9x128x128xbf16, #tpu.memory_space<vmem>>, vector<1x128x128xbf16>
    %34 = vector.shape_cast %33 : vector<1x128x128xbf16> to vector<128x128xbf16>
    %cst_14 = arith.constant dense<0.000000e+00> : vector<288x128xf32>
    %35 = tpu.matmul %32, %34, %cst_14 {dimension_numbers = #tpu.dot_dimension_numbers<[1], [0], [0], [1], [0, 0, 1, 1], [], []>} : vector<288x128xbf16>, vector<128x128xbf16>, vector<288x128xf32> -> vector<288x128xf32>
    %36 = arith.addf %31, %35 : vector<288x128xf32>
    %37 = vector.extract_strided_slice %20 {offsets = [18, 0], sizes = [288, 128], strides = [1, 1]} : vector<342x128xbf16> to vector<288x128xbf16>
    %c3 = arith.constant 3 : index
    %c0_15 = arith.constant 0 : index
    %c0_16 = arith.constant 0 : index
    %38 = vector.load %arg2[%c3, %c0_15, %c0_16] : memref<9x128x128xbf16, #tpu.memory_space<vmem>>, vector<1x128x128xbf16>
    %39 = vector.shape_cast %38 : vector<1x128x128xbf16> to vector<128x128xbf16>
    %cst_17 = arith.constant dense<0.000000e+00> : vector<288x128xf32>
    %40 = tpu.matmul %37, %39, %cst_17 {dimension_numbers = #tpu.dot_dimension_numbers<[1], [0], [0], [1], [0, 0, 1, 1], [], []>} : vector<288x128xbf16>, vector<128x128xbf16>, vector<288x128xf32> -> vector<288x128xf32>
    %41 = arith.addf %36, %40 : vector<288x128xf32>
    %42 = vector.extract_strided_slice %20 {offsets = [19, 0], sizes = [288, 128], strides = [1, 1]} : vector<342x128xbf16> to vector<288x128xbf16>
    %c4 = arith.constant 4 : index
    %c0_18 = arith.constant 0 : index
    %c0_19 = arith.constant 0 : index
    %43 = vector.load %arg2[%c4, %c0_18, %c0_19] : memref<9x128x128xbf16, #tpu.memory_space<vmem>>, vector<1x128x128xbf16>
    %44 = vector.shape_cast %43 : vector<1x128x128xbf16> to vector<128x128xbf16>
    %cst_20 = arith.constant dense<0.000000e+00> : vector<288x128xf32>
    %45 = tpu.matmul %42, %44, %cst_20 {dimension_numbers = #tpu.dot_dimension_numbers<[1], [0], [0], [1], [0, 0, 1, 1], [], []>} : vector<288x128xbf16>, vector<128x128xbf16>, vector<288x128xf32> -> vector<288x128xf32>
    %46 = arith.addf %41, %45 : vector<288x128xf32>
    %47 = vector.extract_strided_slice %20 {offsets = [20, 0], sizes = [288, 128], strides = [1, 1]} : vector<342x128xbf16> to vector<288x128xbf16>
    %c5 = arith.constant 5 : index
    %c0_21 = arith.constant 0 : index
    %c0_22 = arith.constant 0 : index
    %48 = vector.load %arg2[%c5, %c0_21, %c0_22] : memref<9x128x128xbf16, #tpu.memory_space<vmem>>, vector<1x128x128xbf16>
    %49 = vector.shape_cast %48 : vector<1x128x128xbf16> to vector<128x128xbf16>
    %cst_23 = arith.constant dense<0.000000e+00> : vector<288x128xf32>
    %50 = tpu.matmul %47, %49, %cst_23 {dimension_numbers = #tpu.dot_dimension_numbers<[1], [0], [0], [1], [0, 0, 1, 1], [], []>} : vector<288x128xbf16>, vector<128x128xbf16>, vector<288x128xf32> -> vector<288x128xf32>
    %51 = arith.addf %46, %50 : vector<288x128xf32>
    %52 = vector.extract_strided_slice %20 {offsets = [36, 0], sizes = [288, 128], strides = [1, 1]} : vector<342x128xbf16> to vector<288x128xbf16>
    %c6 = arith.constant 6 : index
    %c0_24 = arith.constant 0 : index
    %c0_25 = arith.constant 0 : index
    %53 = vector.load %arg2[%c6, %c0_24, %c0_25] : memref<9x128x128xbf16, #tpu.memory_space<vmem>>, vector<1x128x128xbf16>
    %54 = vector.shape_cast %53 : vector<1x128x128xbf16> to vector<128x128xbf16>
    %cst_26 = arith.constant dense<0.000000e+00> : vector<288x128xf32>
    %55 = tpu.matmul %52, %54, %cst_26 {dimension_numbers = #tpu.dot_dimension_numbers<[1], [0], [0], [1], [0, 0, 1, 1], [], []>} : vector<288x128xbf16>, vector<128x128xbf16>, vector<288x128xf32> -> vector<288x128xf32>
    %56 = arith.addf %51, %55 : vector<288x128xf32>
    %57 = vector.extract_strided_slice %20 {offsets = [37, 0], sizes = [288, 128], strides = [1, 1]} : vector<342x128xbf16> to vector<288x128xbf16>
    %c7 = arith.constant 7 : index
    %c0_27 = arith.constant 0 : index
    %c0_28 = arith.constant 0 : index
    %58 = vector.load %arg2[%c7, %c0_27, %c0_28] : memref<9x128x128xbf16, #tpu.memory_space<vmem>>, vector<1x128x128xbf16>
    %59 = vector.shape_cast %58 : vector<1x128x128xbf16> to vector<128x128xbf16>
    %cst_29 = arith.constant dense<0.000000e+00> : vector<288x128xf32>
    %60 = tpu.matmul %57, %59, %cst_29 {dimension_numbers = #tpu.dot_dimension_numbers<[1], [0], [0], [1], [0, 0, 1, 1], [], []>} : vector<288x128xbf16>, vector<128x128xbf16>, vector<288x128xf32> -> vector<288x128xf32>
    %61 = arith.addf %56, %60 : vector<288x128xf32>
    %62 = vector.extract_strided_slice %20 {offsets = [38, 0], sizes = [288, 128], strides = [1, 1]} : vector<342x128xbf16> to vector<288x128xbf16>
    %c8 = arith.constant 8 : index
    %c0_30 = arith.constant 0 : index
    %c0_31 = arith.constant 0 : index
    %63 = vector.load %arg2[%c8, %c0_30, %c0_31] : memref<9x128x128xbf16, #tpu.memory_space<vmem>>, vector<1x128x128xbf16>
    %64 = vector.shape_cast %63 : vector<1x128x128xbf16> to vector<128x128xbf16>
    %cst_32 = arith.constant dense<0.000000e+00> : vector<288x128xf32>
    %65 = tpu.matmul %62, %64, %cst_32 {dimension_numbers = #tpu.dot_dimension_numbers<[1], [0], [0], [1], [0, 0, 1, 1], [], []>} : vector<288x128xbf16>, vector<128x128xbf16>, vector<288x128xf32> -> vector<288x128xf32>
    %66 = arith.addf %61, %65 : vector<288x128xf32>
    %c0_33 = arith.constant 0 : index
    %c0_34 = arith.constant 0 : index
    %67 = vector.load %arg3[%c0_33, %c0_34] : memref<1x128xf32, #tpu.memory_space<vmem>>, vector<1x128xf32>
    %68 = vector.broadcast %67 : vector<1x128xf32> to vector<288x128xf32>
    %69 = arith.addf %66, %68 : vector<288x128xf32>
    %cst_35 = arith.constant 0.000000e+00 : f32
    %70 = vector.broadcast %cst_35 : f32 to vector<288x128xf32>
    %71 = arith.maximumf %69, %70 : vector<288x128xf32>
    %cst_36 = arith.constant 0.000000e+00 : f32
    %72 = vector.shape_cast %18 : vector<288x1xi1> to vector<288x1xi1>
    %73 = vector.broadcast %72 : vector<288x1xi1> to vector<288x128xi1>
    %74 = vector.broadcast %cst_36 : f32 to vector<288x128xf32>
    %75 = arith.select %73, %71, %74 : vector<288x128xi1>, vector<288x128xf32>
    %cst_37 = arith.constant 0.000000e+00 : f32
    %76 = vector.broadcast %cst_37 : f32 to vector<24x128xf32>
    %c0_38 = arith.constant 0 : index
    %c0_39 = arith.constant 0 : index
    %77 = vector.load %arg7[%c0_38, %c0_39] : memref<336x128xf32, #tpu.memory_space<vmem>>, vector<24x128xf32>
    tpu.vector_store %arg7[%c0_38, %c0_39], %76 {strides = array<i32>} : memref<336x128xf32, #tpu.memory_space<vmem>>, vector<24x128xf32>,
    %c24 = arith.constant 24 : index
    %c0_40 = arith.constant 0 : index
    %78 = vector.load %arg7[%c24, %c0_40] : memref<336x128xf32, #tpu.memory_space<vmem>>, vector<288x128xf32>
    tpu.vector_store %arg7[%c24, %c0_40], %75 {strides = array<i32>} : memref<336x128xf32, #tpu.memory_space<vmem>>, vector<288x128xf32>,
    %cst_41 = arith.constant 0.000000e+00 : f32
    %79 = vector.broadcast %cst_41 : f32 to vector<24x128xf32>
    %c312 = arith.constant 312 : index
    %c0_42 = arith.constant 0 : index
    %80 = vector.load %arg7[%c312, %c0_42] : memref<336x128xf32, #tpu.memory_space<vmem>>, vector<24x128xf32>
    tpu.vector_store %arg7[%c312, %c0_42], %79 {strides = array<i32>} : memref<336x128xf32, #tpu.memory_space<vmem>>, vector<24x128xf32>,
    %c0_43 = arith.constant 0 : index
    %c0_44 = arith.constant 0 : index
    %81 = vector.load %arg7[%c0_43, %c0_44] : memref<336x128xf32, #tpu.memory_space<vmem>>, vector<336x128xf32>
    %82 = arith.truncf %81 : vector<336x128xf32> to vector<336x128xbf16>
    %cst_45 = arith.constant 0.000000e+00 : f32
    %83 = vector.broadcast %cst_45 : f32 to vector<288x128xf32>
    %84 = vector.extract_strided_slice %82 {offsets = [5, 0], sizes = [288, 128], strides = [1, 1]} : vector<336x128xbf16> to vector<288x128xbf16>
    %c0_46 = arith.constant 0 : index
    %c0_47 = arith.constant 0 : index
    %c0_48 = arith.constant 0 : index
    %85 = vector.load %arg4[%c0_46, %c0_47, %c0_48] : memref<9x128x128xbf16, #tpu.memory_space<vmem>>, vector<1x128x128xbf16>
    %86 = vector.shape_cast %85 : vector<1x128x128xbf16> to vector<128x128xbf16>
    %cst_49 = arith.constant dense<0.000000e+00> : vector<288x128xf32>
    %87 = tpu.matmul %84, %86, %cst_49 {dimension_numbers = #tpu.dot_dimension_numbers<[1], [0], [0], [1], [0, 0, 1, 1], [], []>} : vector<288x128xbf16>, vector<128x128xbf16>, vector<288x128xf32> -> vector<288x128xf32>
    %88 = arith.addf %83, %87 : vector<288x128xf32>
    %89 = vector.extract_strided_slice %82 {offsets = [6, 0], sizes = [288, 128], strides = [1, 1]} : vector<336x128xbf16> to vector<288x128xbf16>
    %c1_50 = arith.constant 1 : index
    %c0_51 = arith.constant 0 : index
    %c0_52 = arith.constant 0 : index
    %90 = vector.load %arg4[%c1_50, %c0_51, %c0_52] : memref<9x128x128xbf16, #tpu.memory_space<vmem>>, vector<1x128x128xbf16>
    %91 = vector.shape_cast %90 : vector<1x128x128xbf16> to vector<128x128xbf16>
    %cst_53 = arith.constant dense<0.000000e+00> : vector<288x128xf32>
    %92 = tpu.matmul %89, %91, %cst_53 {dimension_numbers = #tpu.dot_dimension_numbers<[1], [0], [0], [1], [0, 0, 1, 1], [], []>} : vector<288x128xbf16>, vector<128x128xbf16>, vector<288x128xf32> -> vector<288x128xf32>
    %93 = arith.addf %88, %92 : vector<288x128xf32>
    %94 = vector.extract_strided_slice %82 {offsets = [7, 0], sizes = [288, 128], strides = [1, 1]} : vector<336x128xbf16> to vector<288x128xbf16>
    %c2_54 = arith.constant 2 : index
    %c0_55 = arith.constant 0 : index
    %c0_56 = arith.constant 0 : index
    %95 = vector.load %arg4[%c2_54, %c0_55, %c0_56] : memref<9x128x128xbf16, #tpu.memory_space<vmem>>, vector<1x128x128xbf16>
    %96 = vector.shape_cast %95 : vector<1x128x128xbf16> to vector<128x128xbf16>
    %cst_57 = arith.constant dense<0.000000e+00> : vector<288x128xf32>
    %97 = tpu.matmul %94, %96, %cst_57 {dimension_numbers = #tpu.dot_dimension_numbers<[1], [0], [0], [1], [0, 0, 1, 1], [], []>} : vector<288x128xbf16>, vector<128x128xbf16>, vector<288x128xf32> -> vector<288x128xf32>
    %98 = arith.addf %93, %97 : vector<288x128xf32>
    %99 = vector.extract_strided_slice %82 {offsets = [23, 0], sizes = [288, 128], strides = [1, 1]} : vector<336x128xbf16> to vector<288x128xbf16>
    %c3_58 = arith.constant 3 : index
    %c0_59 = arith.constant 0 : index
    %c0_60 = arith.constant 0 : index
    %100 = vector.load %arg4[%c3_58, %c0_59, %c0_60] : memref<9x128x128xbf16, #tpu.memory_space<vmem>>, vector<1x128x128xbf16>
    %101 = vector.shape_cast %100 : vector<1x128x128xbf16> to vector<128x128xbf16>
    %cst_61 = arith.constant dense<0.000000e+00> : vector<288x128xf32>
    %102 = tpu.matmul %99, %101, %cst_61 {dimension_numbers = #tpu.dot_dimension_numbers<[1], [0], [0], [1], [0, 0, 1, 1], [], []>} : vector<288x128xbf16>, vector<128x128xbf16>, vector<288x128xf32> -> vector<288x128xf32>
    %103 = arith.addf %98, %102 : vector<288x128xf32>
    %104 = vector.extract_strided_slice %82 {offsets = [24, 0], sizes = [288, 128], strides = [1, 1]} : vector<336x128xbf16> to vector<288x128xbf16>
    %c4_62 = arith.constant 4 : index
    %c0_63 = arith.constant 0 : index
    %c0_64 = arith.constant 0 : index
    %105 = vector.load %arg4[%c4_62, %c0_63, %c0_64] : memref<9x128x128xbf16, #tpu.memory_space<vmem>>, vector<1x128x128xbf16>
    %106 = vector.shape_cast %105 : vector<1x128x128xbf16> to vector<128x128xbf16>
    %cst_65 = arith.constant dense<0.000000e+00> : vector<288x128xf32>
    %107 = tpu.matmul %104, %106, %cst_65 {dimension_numbers = #tpu.dot_dimension_numbers<[1], [0], [0], [1], [0, 0, 1, 1], [], []>} : vector<288x128xbf16>, vector<128x128xbf16>, vector<288x128xf32> -> vector<288x128xf32>
    %108 = arith.addf %103, %107 : vector<288x128xf32>
    %109 = vector.extract_strided_slice %82 {offsets = [25, 0], sizes = [288, 128], strides = [1, 1]} : vector<336x128xbf16> to vector<288x128xbf16>
    %c5_66 = arith.constant 5 : index
    %c0_67 = arith.constant 0 : index
    %c0_68 = arith.constant 0 : index
    %110 = vector.load %arg4[%c5_66, %c0_67, %c0_68] : memref<9x128x128xbf16, #tpu.memory_space<vmem>>, vector<1x128x128xbf16>
    %111 = vector.shape_cast %110 : vector<1x128x128xbf16> to vector<128x128xbf16>
    %cst_69 = arith.constant dense<0.000000e+00> : vector<288x128xf32>
    %112 = tpu.matmul %109, %111, %cst_69 {dimension_numbers = #tpu.dot_dimension_numbers<[1], [0], [0], [1], [0, 0, 1, 1], [], []>} : vector<288x128xbf16>, vector<128x128xbf16>, vector<288x128xf32> -> vector<288x128xf32>
    %113 = arith.addf %108, %112 : vector<288x128xf32>
    %114 = vector.extract_strided_slice %82 {offsets = [41, 0], sizes = [288, 128], strides = [1, 1]} : vector<336x128xbf16> to vector<288x128xbf16>
    %c6_70 = arith.constant 6 : index
    %c0_71 = arith.constant 0 : index
    %c0_72 = arith.constant 0 : index
    %115 = vector.load %arg4[%c6_70, %c0_71, %c0_72] : memref<9x128x128xbf16, #tpu.memory_space<vmem>>, vector<1x128x128xbf16>
    %116 = vector.shape_cast %115 : vector<1x128x128xbf16> to vector<128x128xbf16>
    %cst_73 = arith.constant dense<0.000000e+00> : vector<288x128xf32>
    %117 = tpu.matmul %114, %116, %cst_73 {dimension_numbers = #tpu.dot_dimension_numbers<[1], [0], [0], [1], [0, 0, 1, 1], [], []>} : vector<288x128xbf16>, vector<128x128xbf16>, vector<288x128xf32> -> vector<288x128xf32>
    %118 = arith.addf %113, %117 : vector<288x128xf32>
    %119 = vector.extract_strided_slice %82 {offsets = [42, 0], sizes = [288, 128], strides = [1, 1]} : vector<336x128xbf16> to vector<288x128xbf16>
    %c7_74 = arith.constant 7 : index
    %c0_75 = arith.constant 0 : index
    %c0_76 = arith.constant 0 : index
    %120 = vector.load %arg4[%c7_74, %c0_75, %c0_76] : memref<9x128x128xbf16, #tpu.memory_space<vmem>>, vector<1x128x128xbf16>
    %121 = vector.shape_cast %120 : vector<1x128x128xbf16> to vector<128x128xbf16>
    %cst_77 = arith.constant dense<0.000000e+00> : vector<288x128xf32>
    %122 = tpu.matmul %119, %121, %cst_77 {dimension_numbers = #tpu.dot_dimension_numbers<[1], [0], [0], [1], [0, 0, 1, 1], [], []>} : vector<288x128xbf16>, vector<128x128xbf16>, vector<288x128xf32> -> vector<288x128xf32>
    %123 = arith.addf %118, %122 : vector<288x128xf32>
    %124 = vector.extract_strided_slice %82 {offsets = [43, 0], sizes = [288, 128], strides = [1, 1]} : vector<336x128xbf16> to vector<288x128xbf16>
    %c8_78 = arith.constant 8 : index
    %c0_79 = arith.constant 0 : index
    %c0_80 = arith.constant 0 : index
    %125 = vector.load %arg4[%c8_78, %c0_79, %c0_80] : memref<9x128x128xbf16, #tpu.memory_space<vmem>>, vector<1x128x128xbf16>
    %126 = vector.shape_cast %125 : vector<1x128x128xbf16> to vector<128x128xbf16>
    %cst_81 = arith.constant dense<0.000000e+00> : vector<288x128xf32>
    %127 = tpu.matmul %124, %126, %cst_81 {dimension_numbers = #tpu.dot_dimension_numbers<[1], [0], [0], [1], [0, 0, 1, 1], [], []>} : vector<288x128xbf16>, vector<128x128xbf16>, vector<288x128xf32> -> vector<288x128xf32>
    %128 = arith.addf %123, %127 : vector<288x128xf32>
    %c0_82 = arith.constant 0 : index
    %c0_83 = arith.constant 0 : index
    %129 = vector.load %arg5[%c0_82, %c0_83] : memref<1x128xf32, #tpu.memory_space<vmem>>, vector<1x128xf32>
    %130 = vector.broadcast %129 : vector<1x128xf32> to vector<288x128xf32>
    %131 = arith.addf %128, %130 : vector<288x128xf32>
    %cst_84 = arith.constant 0.000000e+00 : f32
    %132 = vector.broadcast %cst_84 : f32 to vector<288x128xf32>
    %133 = arith.maximumf %131, %132 : vector<288x128xf32>
    %cst_85 = arith.constant 0.000000e+00 : f32
    %134 = vector.shape_cast %18 : vector<288x1xi1> to vector<288x1xi1>
    %135 = vector.broadcast %134 : vector<288x1xi1> to vector<288x128xi1>
    %136 = vector.broadcast %cst_85 : f32 to vector<288x128xf32>
    %137 = arith.select %135, %133, %136 : vector<288x128xi1>, vector<288x128xf32>
    %c0_86 = arith.constant 0 : index
    %c0_87 = arith.constant 0 : index
    %c0_88 = arith.constant 0 : index
    %138 = vector.load %arg6[%c0_86, %c0_87, %c0_88] : memref<1x288x128xf32, #tpu.memory_space<vmem>>, vector<1x288x128xf32>
    %139 = vector.shape_cast %138 : vector<1x288x128xf32> to vector<288x128xf32>
    %140 = vector.shape_cast %137 : vector<288x128xf32> to vector<1x288x128xf32>
    tpu.vector_store %arg6[%c0_86, %c0_87, %c0_88], %140 {strides = array<i32>} : memref<1x288x128xf32, #tpu.memory_space<vmem>>, vector<1x288x128xf32>,
    return
  }
  func.func @transform_0(%arg0: i32) -> (i32, i32, i32) {
    %c0_i32 = arith.constant 0 : i32
    %c0_i32_0 = arith.constant 0 : i32
    %c0_i32_1 = arith.constant 0 : i32
    return %arg0, %c0_i32, %c0_i32_0 : i32, i32, i32
  }
  func.func @transform_1(%arg0: i32) -> (i32, i32, i32) {
    %c0_i32 = arith.constant 0 : i32
    %c0_i32_0 = arith.constant 0 : i32
    %c0_i32_1 = arith.constant 0 : i32
    %c0_i32_2 = arith.constant 0 : i32
    return %c0_i32, %c0_i32_0, %c0_i32_1 : i32, i32, i32
  }
  func.func @transform_2(%arg0: i32) -> (i32, i32) {
    %c0_i32 = arith.constant 0 : i32
    %c0_i32_0 = arith.constant 0 : i32
    %c0_i32_1 = arith.constant 0 : i32
    return %c0_i32, %c0_i32_0 : i32, i32
  }
  func.func @transform_3(%arg0: i32) -> (i32, i32, i32) {
    %c0_i32 = arith.constant 0 : i32
    %c0_i32_0 = arith.constant 0 : i32
    %c0_i32_1 = arith.constant 0 : i32
    %c0_i32_2 = arith.constant 0 : i32
    return %c0_i32, %c0_i32_0, %c0_i32_1 : i32, i32, i32
  }
  func.func @transform_4(%arg0: i32) -> (i32, i32) {
    %c0_i32 = arith.constant 0 : i32
    %c0_i32_0 = arith.constant 0 : i32
    %c0_i32_1 = arith.constant 0 : i32
    return %c0_i32, %c0_i32_0 : i32, i32
  }
  func.func @transform_5(%arg0: i32) -> (i32, i32, i32) {
    %c0_i32 = arith.constant 0 : i32
    %c0_i32_0 = arith.constant 0 : i32
    %c0_i32_1 = arith.constant 0 : i32
    return %arg0, %c0_i32, %c0_i32_0 : i32, i32, i32
  }
}

</mosaic_0001>

<bundles_post_ra>
// kernel: bottleneck_forward.1
= control target key start
LH: loop header
LB: loop body
LE: loop exit
PB: predicated region body
PF: predicated region fallthrough
CT: control target
= control target key end

     0   :  { %s9778_s18 = smov 0   ;;  %s14350_s0 = inlined_call_operand.vmem [shape: bf16[2,342,128], index: 0, kind: input, shape index: {}]   ;;  %s14351_s1 = inlined_call_operand.vmem [shape: bf16[9,128,128], index: 1, kind: input, shape index: {}]   ;;  %s14352_s2 = inlined_call_operand.vmem [shape: f32[1,128], index: 2, kind: input, shape index: {}]   ;;  %s14353_s3 = inlined_call_operand.vmem [shape: bf16[9,128,128], index: 3, kind: input, shape index: {}]   ;;  %s14354_s4 = inlined_call_operand.vmem [shape: f32[1,128], index: 4, kind: input, shape index: {}]   ;;  %s14355_s5 = inlined_call_operand.vmem [shape: f32[2,288,128], index: 5, kind: output, shape index: {}]  }
   0x1 LB: > { %s7628_s19 = sadd.s32 4294967295, %s9743_s18   ;;  %p7632_p0 = scmp.ge.s32.totalorder %s9743_s18, 1  ;;  %s9743_s18 = sphi %s9778_s18, %s15_s18  }
   0x2   : > { %p187_p1 = scmp.lt.s32.totalorder %s9743_s18, 3 }
   0x4   : > { %p188_p2 = pnand %p7632_p0, %p187_p1 }
   0x6   : > { %191 = sbr.rel (%p188_p2) target bundleno = 1155 (0x483), region = 40 }
   0xb   : > { %v9551_v0 = vld [vmem:[%s14351_s1 + $0x78] sm:$0xff]   ;;  %v9553_v2 = vld [vmem:[%s14351_s1 + $0x70] sm:$0xff]   ;;  %p215_p3 = scmp.lt.s32.totalorder %s7628_s19, 1  ;;  %v9555_v4 = vld [vmem:[%s14351_s1 + $0x68] sm:$0xff]   ;;  %vm1042_vm0 = vsmask.f32 7424 }
   0xc   : > { %v9552_v1 = vld [vmem:[%s14351_s1 + $0x38] sm:$0xff]   ;;  %8530 = vmatprep.subr.bf16.mxu0 %v9551_v0  ;;  %v9554_v3 = vld [vmem:[%s14351_s1 + $0x30] sm:$0xff]   ;;  %v9556_v5 = vld [vmem:[%s14351_s1 + $0x28] sm:$0xff]   ;;  %vm1694_vm1 = vcmask 1046528   ;;  %vm2318_vm2 = vsmask.f32 6400 }
   0xd   : > { %8582 = vmatprep.subr.bf16.mxu1 %v9552_v1  ;;  %8531 = vmatpush3.bf16.msra.mxu0 %v9551_v0  ;;  %s15453_s19 = smov (!%p215_p3, %s7628_s19), 1  ;;  %v9557_v6 = vld [vmem:[%s14351_s1 + $0x60] sm:$0xff]   ;;  %v9559_v8 = vld [vmem:[%s14351_s1 + $0x58] sm:$0xff]   ;;  %v9561_v10 = vld [vmem:[%s14351_s1 + $0x50] sm:$0xff]   ;;  %vm2700_vm3 = vcmask 1045504   ;;  %vm14412_vm5 = vcmask 1044480  }
   0xe   : > { %8583 = vmatpush3.bf16.msra.mxu1 %v9552_v1  ;;  %8532 = vmatprep.subr.bf16.mxu0 %v9553_v2  ;;  %v9558_v7 = vld [vmem:[%s14351_s1 + $0x20] sm:$0xff]   ;;  %s9466_s11 = smul.u32 172, %s15453_s19  ;;  %v9560_v9 = vld [vmem:[%s14351_s1 + $0x18] sm:$0xff]   ;;  %v9562_v11 = vld [vmem:[%s14351_s1 + $0x10] sm:$0xff]   ;;  %vm14411_vm4 = vsmask.f32 5376 }
   0xf   : > { %8584 = vmatprep.subr.bf16.mxu1 %v9554_v3  ;;  %v9563_v18 = vld [vmem:[%s14351_s1 + $0x48] sm:$0xff]   ;;  %v9565_v26 = vld [vmem:[%s14351_s1 + $0x40] sm:$0xff]   ;;  %v9570_v34 = vld [vmem:[%s14351_s1 + $0xb8] sm:$0xff]   ;;  %s9467_s24 = smul.u32 288, %s15453_s19 }
  0x10   : > { %s9825_s22 = scalar_lea.vmem %s14350_s0, %s9466_s11  ;;  %v9564_v19 = vld [vmem:[%s14351_s1 + $0x8] sm:$0xff]   ;;  %v9566_v27 = vld [vmem:[%s14351_s1] sm:$0xff]   ;;  %v9573_v44 = vld [vmem:[%s14351_s1 + $0xb0] sm:$0xff]  }
  0x11   : > { %8533 = vmatpush3.bf16.msra.mxu0 %v9553_v2  ;;  %v9831_v12 = vld [vmem:[%s9825_s22] sm:$0xff]   ;;  %v9834_v13 = vld [vmem:[%s9825_s22 + $0x8] sm:$0xff]   ;;  %v9841_v17 = vld [vmem:[%s9825_s22 + $0x10] sm:$0xff]   ;;  %s14129_s27 = scalar_lea.vmem %s14355_s5, %s9467_s24 }
  0x12   : > { %8585 = vmatpush3.bf16.msra.mxu1 %v9554_v3  ;;  %8534 = vmatprep.subr.bf16.mxu0 %v9555_v4  ;;  %v1044_v14 = vshrl.u32 %v9831_v12, 16  ;;  %v1046_v15 = vshll.u32 %v9831_v12, 16  ;;  %v1051_v16 = vshll.u32 %v9834_v13, 16  ;;  %v9852_v22 = vld [vmem:[%s9825_s22 + $0x18] sm:$0xff]   ;;  %v1055_v24 = vshrl.u32 %v9834_v13, 16  ;;  %v9872_v31 = vld [vmem:[%s9825_s22 + $0x20] sm:$0xff]  }
  0x13   : > { %8586 = vmatprep.subr.bf16.mxu1 %v9556_v5  ;;  %8598 = vmatprep.mubr.bf16.mxu1 %v9831_v12  ;;  %v9856_v25 = vshll.u32 %v9841_v17, 16  ;;  %v9866_v29 = vshrl.u32 %v9841_v17, 16  ;;  %v9869_v30 = vshll.u32 %v9852_v22, 16  ;;  %v9881_v35 = vld [vmem:[%s9825_s22 + $0x28] sm:$0xff]   ;;  %v9886_v38 = vshrl.u32 %v9852_v22, 16  ;;  %v9904_v46 = vld [vmem:[%s9825_s22 + $0x30] sm:$0xff]  }
  0x14   : > { %v1048_v20 = vrot.slane %v1046_v15, 1  ;;  %v1053_v21 = vrot.slane %v1051_v16, 1  ;;  %v9889_v39 = vshll.u32 %v9872_v31, 16  ;;  %v9893_v41 = vshrl.u32 %v9872_v31, 16  ;;  %v9576_v48 = vld [vmem:[%s14351_s1 + $0xa8] sm:$0xff]   ;;  %v9915_v51 = vld [vmem:[%s9825_s22 + $0x38] sm:$0xff]  }
  0x15   : > { %8535 = vmatpush3.bf16.msra.mxu0 %v9555_v4  ;;  %v1061_v33 = vrot.slane %v9856_v25, 1  ;;  %v1069_v37 = vrot.slane %v9869_v30, 1  ;;  %v9896_v42 = vshll.u32 %v9881_v35, 16  ;;  %v9585_v52 = vld [vmem:[%s14351_s1 + $0xf8] sm:$0xff]   ;;  %v9921_v53 = vshll.u32 %v9904_v46, 16  ;;  %v9587_v56 = vld [vmem:[%s14351_s1 + $0xf0] sm:$0xff]  }
  0x16   : > { %8587 = vmatpush3.bf16.msra.mxu1 %v9556_v5  ;;  %8536 = vmatprep.subr.bf16.mxu0 %v9557_v6  ;;  %v1049_v23 = vor.u32 %v1048_v20, %v1044_v14  ;;  %v1057_v32 = vor.u32 %v1055_v24, %v1053_v21  ;;  %v1077_v45 = vrot.slane %v9889_v39, 1  ;;  %v9925_v55 = vshrl.u32 %v9881_v35, 16  ;;  %v9579_v60 = vld [vmem:[%s14351_s1 + $0xa0] sm:$0xff]   ;;  %v9590_v0 = vld [vmem:[%s14351_s1 + $0xe8] sm:$0xff]   ;;  %v9582_v4 = vld [vmem:[%s14351_s1 + $0x98] sm:$0xff]  }
  0x17   : > { %8588 = vmatprep.subr.bf16.mxu1 %v9558_v7  ;;  %v1065_v36 = vor.u32 %v9866_v29, %v1061_v33  ;;  %v1073_v47 = vor.u32 %v9886_v38, %v1069_v37  ;;  %v1085_v50 = vrot.slane %v9896_v42, 1  ;;  %v9932_v58 = vshrl.u32 %v9904_v46, 16  ;;  %v9942_v62 = vld [vmem:[%s9825_s22 + $0x40] sm:$0xff]   ;;  %v9953_v3 = vld [vmem:[%s9825_s22 + $0x48] sm:$0xff]   ;;  %v9978_v15 = vld [vmem:[%s9825_s22 + $0x50] sm:$0xff]  }
  0x18   : > { %v1054_v28 = vsel %vm1042_vm0, %v1049_v23, %v1053_v21  ;;  %v1062_v40 = vsel %vm1042_vm0, %v1057_v32, %v1061_v33  ;;  %v1081_v49 = vor.u32 %v9893_v41, %v1077_v45  ;;  %v9935_v59 = vshll.u32 %v9915_v51, 16  ;;  %v9595_v21 = vld [vmem:[%s14351_s1 + $0xd8] sm:$0xff]   ;;  %v9591_v32 = vld [vmem:[%s14351_s1 + $0x88] sm:$0xff]  }
  0x19   : > { %8537 = vmatpush3.bf16.msra.mxu0 %v9557_v6  ;;  %8546 = vmatprep.mubr.bf16.mxu0 %v1054_v28  ;;  %v1070_v43 = vsel %vm1042_vm0, %v1065_v36, %v1069_v37  ;;  %v1078_v54 = vsel %vm1042_vm0, %v1073_v47, %v1077_v45  ;;  %v1093_v61 = vrot.slane %v9921_v53, 1  ;;  %v1089_v63 = vor.u32 %v9925_v55, %v1085_v50  ;;  %v10021_v45 = vld [vmem:[%s9825_s22 + $0x60] sm:$0xff]  }
  0x1a   : > { %8589 = vmatpush3.bf16.msra.mxu1 %v9558_v7  ;;  %8538 = vmatprep.subr.bf16.mxu0 %v9559_v8  ;;  %v1086_v57 = vsel %vm1042_vm0, %v1081_v49, %v1085_v50  ;;  %v1101_v2 = vrot.slane %v9935_v59, 1  ;;  %v1695_v5 = vrot.slane %v9831_v12, 1  ;;  %v9960_v6 = vshll.u32 %v9942_v62, 16  ;;  %v9592_v7 = vld [vmem:[%s14351_s1 + $0xe0] sm:$0xff]   ;;  %v9601_v49 = vld [vmem:[%s14351_s1 + $0xc8] sm:$0xff]  }
  0x1b   : > { %8590 = vmatprep.subr.bf16.mxu1 %v9560_v9  ;;  %v1097_v1 = vor.u32 %v9932_v58, %v1093_v61  ;;  %v9972_v12 = vshrl.u32 %v9942_v62, 16  ;;  %v9975_v14 = vshll.u32 %v9953_v3, 16  ;;  %v10004_v33 = vshll.u32 %v9978_v15, 16  ;;  %v9598_v47 = vld [vmem:[%s14351_s1 + $0x80] sm:$0xff]  }
  0x1c   : > { %v1109_v20 = vrot.slane %v9960_v6, 1  ;;  %v10011_v37 = vshrl.u32 %v9953_v3, 16 }
  0x1d   : > { %8539 = vmatpush3.bf16.msra.mxu0 %v9559_v8  ;;  %v1094_v8 = vsel %vm1042_vm0, %v1089_v63, %v1093_v61  ;;  %v1117_v28 = vrot.slane %v9975_v14, 1  ;;  %v10047_v61 = vld [vmem:[%s14351_s1 + $0x138] sm:$0xff]   ;;  %v9602_v63 = vld [vmem:[%s14351_s1 + $0xc0] sm:$0xff]  }
  0x1e   : > { %8591 = vmatpush3.bf16.msra.mxu1 %v9560_v9  ;;  %8540 = vmatprep.subr.bf16.mxu0 %v9561_v10  ;;  %v9967_v9 = vshrl.u32 %v9915_v51, 16 }
  0x1f   : > { %8592 = vmatprep.subr.bf16.mxu1 %v9562_v11  ;;  %v1121_v50 = vor.u32 %v10011_v37, %v1117_v28 }
  0x20   : > { %v1105_v23 = vor.u32 %v9967_v9, %v1101_v2 }
  0x21   : > { %8541 = vmatpush3.bf16.msra.mxu0 %v9561_v10  ;;  %v14356_v10 = vrot.slane %v9834_v13, 1 }
  0x22   : > { %8593 = vmatpush3.bf16.msra.mxu1 %v9562_v11  ;;  %8542 = vmatprep.subr.bf16.mxu0 %v9563_v18  ;;  %v1102_v11 = vsel %vm1042_vm0, %v1097_v1, %v1101_v2  ;;  %v1110_v36 = vsel %vm1042_vm0, %v1105_v23, %v1109_v20 }
  0x23   : > { %8594 = vmatprep.subr.bf16.mxu1 %v9564_v19 }
  0x25   : > { %8543 = vmatpush3.bf16.msra.mxu0 %v9563_v18  ;;  %v9586_v18 = vld [vmem:[%s14351_s1 + $0x90] sm:$0xff]  }
  0x26   : > { %8595 = vmatpush3.bf16.msra.mxu1 %v9564_v19  ;;  %8544 = vmatprep.subr.bf16.mxu0 %v9565_v26  ;;  %v9986_v19 = vsel %vm1694_vm1, %v1695_v5, %v14356_v10  ;;  %v10061_v5 = vshrl.u32 %v10021_v45, 16 }
  0x27   : > { %8596 = vmatprep.subr.bf16.mxu1 %v9566_v27 }
  0x29   : > { %8545 = vmatpush3.bf16.msra.mxu0 %v9565_v26  ;;  %v9995_v26 = vld [vmem:[%s9825_s22 + $0x58] sm:$0xff]  }
  0x2a   : > { %8597 = vmatpush3.bf16.msra.mxu1 %v9566_v27  ;;  %8634 = vmatprep.subr.bf16.mxu0 %v9570_v34  ;;  %v1113_v27 = vor.u32 %v9972_v12, %v1109_v20  ;;  %v10054_v1 = vshrl.u32 %v9995_v26, 16  ;;  %v10076_v20 = vld [vmem:[%s14351_s1 + $0x178] sm:$0xff]  }
  0x2b   : > { %8686 = vmatprep.subr.bf16.mxu1 %v9585_v52 }
  0x2c   : > { %8547 = vmatmul.mubr.bf16.vlgmr.msra.gmra.mxu0 %v1062_v40  ;;  %v10014_v40 = vshll.u32 %v9995_v26, 16 }
  0x2d   : > { %8599 = vmatmul.mubr.bf16.vlgmr.msra.gmra.mxu1 %v9834_v13  ;;  %8635 = vmatpush3.bf16.msra.mxu0 %v9570_v34  ;;  %v9596_v34 = vld [vmem:[%s14351_s1 + $0xd0] sm:$0xff]  }
  0x2e   : > { %8550 = vmatprep.mubr.bf16.mxu0 %v1070_v43  ;;  %8602 = vmatprep.mubr.bf16.mxu1 %v9841_v17  ;;  %v1118_v43 = vsel %vm1042_vm0, %v1113_v27, %v1117_v28 }
  0x2f   : > { %8636 = vmatprep.subr.bf16.mxu0 %v9573_v44  ;;  %8687 = vmatpush3.bf16.msra.mxu1 %v9585_v52  ;;  %v1133_v52 = vrot.slane %v10014_v40, 1 }
  0x30   : > { %8688 = vmatprep.subr.bf16.mxu1 %v9587_v56 }
  0x31   : > { %8637 = vmatpush3.bf16.msra.mxu0 %v9573_v44  ;;  %v10018_v44 = vshrl.u32 %v9978_v15, 16  ;;  %v1137_v27 = vor.u32 %v10054_v1, %v1133_v52 }
  0x32   : > { %8638 = vmatprep.subr.bf16.mxu0 %v9576_v48 }
  0x33   : > { %8689 = vmatpush3.bf16.msra.mxu1 %v9587_v56 }
  0x34   : > { %8551 = vmatmul.mubr.bf16.gmra.mxu0 %v1078_v54  ;;  %8690 = vmatprep.subr.bf16.mxu1 %v9590_v0  ;;  %v10034_v54 = vld [vmem:[%s9825_s22 + $0x68] sm:$0xff]  }
  0x35   : > { %8603 = vmatmul.mubr.bf16.gmra.mxu1 %v9852_v22  ;;  %8554 = vmatprep.mubr.bf16.mxu0 %v1086_v57  ;;  %v10039_v57 = vld [vmem:[%s9825_s22 + $0x90] sm:$0xf]  ;;  %v10057_v2 = vshll.u32 %v10034_v54, 16 }
  0x36   : > { %8606 = vmatprep.mubr.bf16.mxu1 %v9872_v31  ;;  %8639 = vmatpush3.bf16.msra.mxu0 %v9576_v48  ;;  %v1125_v48 = vrot.slane %v10004_v33, 1 }
  0x37   : > { %8640 = vmatprep.subr.bf16.mxu0 %v9579_v60  ;;  %8691 = vmatpush3.bf16.msra.mxu1 %v9590_v0  ;;  %v1149_v28 = vrot.slane %v10057_v2, 1 }
  0x38   : > { %8692 = vmatprep.subr.bf16.mxu1 %v9592_v7  ;;  %v1129_v56 = vor.u32 %v10018_v44, %v1125_v48  ;;  %v1126_v0 = vsel %vm1042_vm0, %v1121_v50, %v1125_v48  ;;  %v10107_v50 = vshrl.u32 %v10034_v54, 16 }
  0x3a   : > { %8641 = vmatpush3.bf16.msra.mxu0 %v9579_v60  ;;  %v10042_v60 = vshll.u32 %v10021_v45, 16 }
  0x3b   : > { %8642 = vmatprep.subr.bf16.mxu0 %v9582_v4  ;;  %8693 = vmatpush3.bf16.msra.mxu1 %v9592_v7  ;;  %v10064_v7 = vld [vmem:[%s9825_s22 + $0x70] sm:$0xff]  }
  0x3c   : > { %8555 = vmatmul.mubr.bf16.gmra.mxu0 %v1094_v8  ;;  %8694 = vmatprep.subr.bf16.mxu1 %v9595_v21  ;;  %v10067_v8 = vld [vmem:[%s9825_s22 + $0x88] sm:$0xff]   ;;  %v10102_v48 = vshll.u32 %v10064_v7, 16 }
  0x3d   : > { %8607 = vmatmul.mubr.bf16.gmra.mxu1 %v9881_v35  ;;  %8558 = vmatprep.mubr.bf16.mxu0 %v1102_v11  ;;  %v7669_v11 = vcombine.low %v10039_v57, %v10039_v57 }
  0x3e   : > { %8610 = vmatprep.mubr.bf16.mxu1 %v9904_v46  ;;  %8643 = vmatpush3.bf16.msra.mxu0 %v9582_v4  ;;  %v1134_v4 = vsel %vm1042_vm0, %v1129_v56, %v1133_v52  ;;  %14646 = vst [vmem:[#allocation3_spill] sm:$0xff] %v10102_v48  ;;  %v10113_v56 = vshrl.u32 %v10064_v7, 16 }
  0x3f   : > { %8644 = vmatprep.subr.bf16.mxu0 %v9586_v18  ;;  %8695 = vmatpush3.bf16.msra.mxu1 %v9595_v21  ;;  %v10079_v21 = vrot.slane %v10067_v8, 1  ;;  %v1730_v23 = vrot.slane %v7669_v11, 1 }
  0x40   : > { %8696 = vmatprep.subr.bf16.mxu1 %v9596_v34  ;;  %14647 = vst [vmem:[#allocation4_spill] sm:$0xff] %v10113_v56 }
  0x42   : > { %8645 = vmatpush3.bf16.msra.mxu0 %v9586_v18  ;;  %v1141_v18 = vrot.slane %v10042_v60, 1 }
  0x43   : > { %8646 = vmatprep.subr.bf16.mxu0 %v9591_v32  ;;  %8697 = vmatpush3.bf16.msra.mxu1 %v9596_v34  ;;  %v10087_v34 = vld [vmem:[%s9825_s22 + $0x78] sm:$0xff]  }
  0x44   : > { %8559 = vmatmul.mubr.bf16.gmra.mxu0 %v1110_v36  ;;  %8698 = vmatprep.subr.bf16.mxu1 %v9601_v49  ;;  %v10091_v36 = vsel %vm1694_vm1, %v10079_v21, %v1730_v23 }
  0x45   : > { %8611 = vmatmul.mubr.bf16.gmra.mxu1 %v9915_v51  ;;  %8562 = vmatprep.mubr.bf16.mxu0 %v1118_v43  ;;  %v10095_v43 = vrot.slane %v1055_v24, 1 }
  0x46   : > { %8614 = vmatprep.mubr.bf16.mxu1 %v9942_v62  ;;  %8647 = vmatpush3.bf16.msra.mxu0 %v9591_v32  ;;  %v1145_v32 = vor.u32 %v10061_v5, %v1141_v18 }
  0x47   : > { %8648 = vmatprep.subr.bf16.mxu0 %v9598_v47  ;;  %8699 = vmatpush3.bf16.msra.mxu1 %v9601_v49  ;;  %v1142_v49 = vsel %vm1042_vm0, %v1137_v27, %v1141_v18 }
  0x48   : > { %8700 = vmatprep.subr.bf16.mxu1 %v9602_v63  ;;  %v1150_v24 = vsel %vm1042_vm0, %v1145_v32, %v1149_v28 }
  0x4a   : > { %8649 = vmatpush3.bf16.msra.mxu0 %v9598_v47  ;;  %v10099_v47 = vrot.slane %v1051_v16, 2  ;;  %v10116_v16 = vshll.u32 %v10087_v34, 16 }
  0x4b   : > { %8738 = vmatprep.subr.bf16.mxu0 %v10047_v61  ;;  %8701 = vmatpush3.bf16.msra.mxu1 %v9602_v63  ;;  %v1157_v63 = vrot.slane %v10102_v48, 1  ;;  %v10149_v48 = vshrl.u32 %v10067_v8, 16 }
  0x4c   : > { %8563 = vmatmul.mubr.bf16.gmra.mxu0 %v1126_v0  ;;  %8790 = vmatprep.subr.bf16.mxu1 %v10076_v20  ;;  %14648 = vst [vmem:[#allocation5_spill] sm:$0xff] %v10116_v16  ;;  %v10120_v0 = vld [vmem:[%s9825_s22 + $0x80] sm:$0xff]   ;;  %v1165_v23 = vrot.slane %v10116_v16, 1 }
  0x4d   : > { %8615 = vmatmul.mubr.bf16.gmra.mxu1 %v9953_v3  ;;  %8566 = vmatprep.mubr.bf16.mxu0 %v1134_v4  ;;  %v1153_v4 = vor.u32 %v10107_v50, %v1149_v28  ;;  %v1161_v18 = vor.u32 %v10113_v56, %v1157_v63  ;;  %v10128_v27 = vshll.u32 %v10120_v0, 16  ;;  %v10139_v28 = vshll.u32 %v10067_v8, 16  ;;  %14651 = vst [vmem:[#allocation8_spill] sm:$0xff] %v10149_v48 }
  0x4e   : > { %8618 = vmatprep.mubr.bf16.mxu1 %v9978_v15  ;;  %v1187_v56 = vshll.u32 %v7669_v11, 16 }
  0x4f   : > { %14649 = vst [vmem:[#allocation6_spill] sm:$0xff] %v10128_v27  ;;  %v1158_v32 = vsel %vm1042_vm0, %v1153_v4, %v1157_v63  ;;  %v1166_v52 = vsel %vm1042_vm0, %v1161_v18, %v1165_v23  ;;  %14650 = vst [vmem:[#allocation7_spill] sm:$0xff] %v10139_v28  ;;  %v1173_v10 = vrot.slane %v10128_v27, 1  ;;  %v1181_v4 = vrot.slane %v10139_v28, 1 }
  0x50   : > { %v1698_v28 = vrot.slane %v9841_v17, 1 }
  0x54   : > { %8567 = vmatmul.mubr.bf16.gmra.mxu0 %v1142_v49  ;;  %v10132_v49 = vshrl.u32 %v10087_v34, 16 }
  0x55   : > { %8619 = vmatmul.mubr.bf16.gmra.mxu1 %v9995_v26  ;;  %8570 = vmatprep.mubr.bf16.mxu0 %v1150_v24  ;;  %v10136_v24 = vshrl.u32 %v10120_v0, 16 }
  0x56   : > { %8622 = vmatprep.mubr.bf16.mxu1 %v10021_v45  ;;  %v1169_v16 = vor.u32 %v10132_v49, %v1165_v23  ;;  %v1189_v23 = vrot.slane %v1187_v56, 1  ;;  %v1702_v56 = vrot.slane %v9872_v31, 1 }
  0x57   : > { %v1177_v63 = vor.u32 %v10136_v24, %v1173_v10 }
  0x58   : > { %v1174_v18 = vsel %vm1042_vm0, %v1169_v16, %v1173_v10  ;;  %v14652_v16 = vrot.slane %v9834_v13, 1 }
  0x5a   : > { %v1699_v11 = vsel %vm1694_vm1, %v14652_v16, %v1698_v28 }
  0x5c   : > { %8571 = vmatmul.mubr.bf16.gmra.mxu0 %v1158_v32  ;;  %v1182_v32 = vsel %vm1042_vm0, %v1177_v63, %v1181_v4  ;;  %v1700_v63 = vrot.slane %v9852_v22, 1  ;;  %v9610_v22 = vld [vmem:[%s14351_s1 + $0x170] sm:$0xff]  }
  0x5d   : > { %8623 = vmatmul.mubr.bf16.gmra.mxu1 %v10034_v54  ;;  %8574 = vmatprep.mubr.bf16.mxu0 %v1166_v52  ;;  %v1185_v52 = vor.u32 %v10149_v48, %v1181_v4  ;;  %v912_v4 = vld [vmem:[%s9825_s22 + $0x94] sm:$0xf] }
  0x5e   : > { %8626 = vmatprep.mubr.bf16.mxu1 %v10064_v7  ;;  %v1701_v17 = vsel %vm1694_vm1, %v1698_v28, %v1700_v63  ;;  %v1703_v13 = vsel %vm1694_vm1, %v1700_v63, %v1702_v56  ;;  %v9605_v28 = vld [vmem:[%s14351_s1 + $0x128] sm:$0xff]  }
  0x5f   : > { %v1190_v10 = vsel %vm1042_vm0, %v1185_v52, %v1189_v23 }
  0x64   : > { %8575 = vmatmul.mubr.bf16.gmra.mxu0 %v1174_v18  ;;  %v913_v18 = vld [vmem:[%s9825_s22 + $0x98] sm:$0xf] }
  0x65   : > { %8627 = vmatmul.mubr.bf16.gmra.mxu1 %v10087_v34  ;;  %8578 = vmatprep.mubr.bf16.mxu0 %v1182_v32  ;;  %v10168_v32 = vcombine.low %v10039_v57, %v912_v4  ;;  %v10178_v31 = vcombine.low %v913_v18, %v913_v18  ;;  %v1706_v57 = vrot.slane %v9904_v46, 1  ;;  %v9606_v4 = vld [vmem:[%s14351_s1 + $0x120] sm:$0xff]  }
  0x66   : > { %8630 = vmatprep.mubr.bf16.mxu1 %v10120_v0 }
  0x67   : > { %v14368_v52 = vshrl.u32 %v10168_v32, 16  ;;  %v14367_v23 = vshll.u32 %v10168_v32, 16 }
  0x69   : > { %v2389_v46 = vrot.slane %v14368_v52, 1  ;;  %v2392_v16 = vrot.slane %v14367_v23, 2  ;;  %v1708_v23 = vrot.slane %v9915_v51, 1  ;;  %v9614_v51 = vld [vmem:[%s14351_s1 + $0x158] sm:$0xff]  }
  0x6b   : > { %v10200_v18 = vor.u32 %v2392_v16, %v2389_v46  ;;  %v1716_v46 = vrot.slane %v9995_v26, 1  ;;  %v1718_v26 = vrot.slane %v10021_v45, 1 }
  0x6c   : > { %8579 = vmatmul.mubr.bf16.gmra.mxu0 %v1190_v10  ;;  %v2396_v10 = vshrl.u32 %v10178_v31, 16 }
  0x6d   : > { %8631 = vmatmul.mubr.bf16.gmra.mxu1 %v10067_v8  ;;  %8650 = vmatprep.mubr.bf16.mxu0 %v9986_v19  ;;  %v9604_v8 = vld [vmem:[%s14351_s1 + $0x130] sm:$0xff]   ;;  %v1704_v19 = vrot.slane %v9881_v35, 1  ;;  %v9611_v35 = vld [vmem:[%s14351_s1 + $0x168] sm:$0xff]  }
  0x6e   : > { %8702 = vmatprep.mubr.bf16.mxu1 %v1699_v11 }
  0x6f   : > { %v1707_v48 = vsel %vm1694_vm1, %v1704_v19, %v1706_v57 }
  0x74   : > { %8651 = vmatmul.mubr.bf16.vlgmr.msra.gmra.mxu0 %v1699_v11  ;;  %v2398_v11 = vrot.slane %v2396_v10, 1 }
  0x75   : > { %8739 = vmatpush3.bf16.msra.mxu0 %v10047_v61  ;;  %8703 = vmatmul.mubr.bf16.vlgmr.msra.gmra.mxu1 %v1701_v17  ;;  %v2399_v61 = vshll.u32 %v10178_v31, 16 }
  0x76   : > { %8654 = vmatprep.mubr.bf16.mxu0 %v1701_v17  ;;  %8706 = vmatprep.mubr.bf16.mxu1 %v1703_v13  ;;  %v1705_v17 = vsel %vm1694_vm1, %v1702_v56, %v1704_v19  ;;  %v1710_v56 = vrot.slane %v9942_v62, 1  ;;  %v9607_v19 = vld [vmem:[%s14351_s1 + $0x118] sm:$0xff]   ;;  %v9609_v62 = vld [vmem:[%s14351_s1 + $0x110] sm:$0xff]  }
  0x77   : > { %8740 = vmatprep.subr.bf16.mxu0 %v9604_v8  ;;  %8791 = vmatpush3.bf16.msra.mxu1 %v10076_v20  ;;  %v2401_v63 = vrot.slane %v2399_v61, 2  ;;  %v1714_v61 = vrot.slane %v9978_v15, 1  ;;  %v9619_v15 = vld [vmem:[%s14351_s1 + $0x140] sm:$0xff]  }
  0x78   : > { %8792 = vmatprep.subr.bf16.mxu1 %v9610_v22 }
  0x79   : > { %8741 = vmatpush3.bf16.msra.mxu0 %v9604_v8  ;;  %v2402_v20 = vor.u32 %v2401_v63, %v2398_v11  ;;  %v9613_v8 = vld [vmem:[%s14351_s1 + $0x160] sm:$0xff]   ;;  %v10247_v11 = vld [vmem:[%s14351_s1 + $0x1b8] sm:$0xff]  }
  0x7a   : > { %8742 = vmatprep.subr.bf16.mxu0 %v9605_v28  ;;  %v10253_v63 = vld [vmem:[%s14351_s1 + $0x1f8] sm:$0xff]  }
  0x7b   : > { %8793 = vmatpush3.bf16.msra.mxu1 %v9610_v22  ;;  %v10210_v10 = vsel %vm2318_vm2, %v10200_v18, %v2402_v20  ;;  %v1711_v22 = vsel %vm1694_vm1, %v1708_v23, %v1710_v56  ;;  %v1722_v20 = vrot.slane %v10064_v7, 1 }
  0x7c   : > { %8655 = vmatmul.mubr.bf16.gmra.mxu0 %v1703_v13  ;;  %8794 = vmatprep.subr.bf16.mxu1 %v9611_v35  ;;  %v1709_v13 = vsel %vm1694_vm1, %v1706_v57, %v1708_v23  ;;  %v9612_v57 = vld [vmem:[%s14351_s1 + $0x108] sm:$0xff]  }
  0x7d   : > { %8707 = vmatmul.mubr.bf16.gmra.mxu1 %v1705_v17  ;;  %8658 = vmatprep.mubr.bf16.mxu0 %v1705_v17  ;;  %v1720_v17 = vrot.slane %v10034_v54, 1  ;;  %v1726_v54 = vrot.slane %v10120_v0, 1  ;;  %v2322_v0 = vrot.slane %v9866_v29, 1 }
  0x7e   : > { %8710 = vmatprep.mubr.bf16.mxu1 %v1707_v48  ;;  %8743 = vmatpush3.bf16.msra.mxu0 %v9605_v28  ;;  %v1712_v28 = vrot.slane %v9953_v3, 1  ;;  %v9616_v3 = vld [vmem:[%s14351_s1 + $0x100] sm:$0xff]  }
  0x7f   : > { %8744 = vmatprep.subr.bf16.mxu0 %v9606_v4  ;;  %8795 = vmatpush3.bf16.msra.mxu1 %v9611_v35  ;;  %v9615_v35 = vld [vmem:[%s14351_s1 + $0x150] sm:$0xff]   ;;  %v1721_v45 = vsel %vm1694_vm1, %v1718_v26, %v1720_v17  ;;  %v1723_v7 = vsel %vm1694_vm1, %v1720_v17, %v1722_v20  ;;  %v2331_v17 = vrot.slane %v9889_v39, 2 }
  0x80   : > { %8796 = vmatprep.subr.bf16.mxu1 %v9613_v8  ;;  %v1713_v23 = vsel %vm1694_vm1, %v1710_v56, %v1712_v28  ;;  %v1715_v16 = vsel %vm1694_vm1, %v1712_v28, %v1714_v61  ;;  %v1724_v56 = vrot.slane %v10087_v34, 1  ;;  %v1729_v34 = vsel %vm1694_vm1, %v1726_v54, %v10079_v21 }
  0x81   : > { %v2036_v28 = vrot.slane %v10178_v31, 1 }
  0x82   : > { %8745 = vmatpush3.bf16.msra.mxu0 %v9606_v4  ;;  %v1717_v4 = vsel %vm1694_vm1, %v1714_v61, %v1716_v46 }
  0x83   : > { %8746 = vmatprep.subr.bf16.mxu0 %v9607_v19  ;;  %8797 = vmatpush3.bf16.msra.mxu1 %v9613_v8  ;;  %v1719_v8 = vsel %vm1694_vm1, %v1716_v46, %v1718_v26 }
  0x84   : > { %8659 = vmatmul.mubr.bf16.gmra.mxu0 %v1707_v48  ;;  %8798 = vmatprep.subr.bf16.mxu1 %v9614_v51  ;;  %v9618_v48 = vld [vmem:[%s14351_s1 + $0x148] sm:$0xff]  }
  0x85   : > { %8711 = vmatmul.mubr.bf16.gmra.mxu1 %v1709_v13  ;;  %8662 = vmatprep.mubr.bf16.mxu0 %v1709_v13  ;;  %v1727_v13 = vsel %vm1694_vm1, %v1724_v56, %v1726_v54 }
  0x86   : > { %8714 = vmatprep.mubr.bf16.mxu1 %v1711_v22  ;;  %8747 = vmatpush3.bf16.msra.mxu0 %v9607_v19  ;;  %v1725_v19 = vsel %vm1694_vm1, %v1722_v20, %v1724_v56 }
  0x87   : > { %8748 = vmatprep.subr.bf16.mxu0 %v9609_v62  ;;  %8799 = vmatpush3.bf16.msra.mxu1 %v9614_v51  ;;  %v2034_v51 = vrot.slane %v10168_v32, 1 }
  0x88   : > { %8800 = vmatprep.subr.bf16.mxu1 %v9615_v35 }
  0x89   : > { %v2037_v46 = vsel %vm1694_vm1, %v2034_v51, %v2036_v28 }
  0x8a   : > { %8749 = vmatpush3.bf16.msra.mxu0 %v9609_v62  ;;  %v2323_v62 = vrot.slane %v9856_v25, 2 }
  0x8b   : > { %8750 = vmatprep.subr.bf16.mxu0 %v9612_v57  ;;  %8801 = vmatpush3.bf16.msra.mxu1 %v9615_v35 }
  0x8c   : > { %8663 = vmatmul.mubr.bf16.gmra.mxu0 %v1711_v22  ;;  %8802 = vmatprep.subr.bf16.mxu1 %v9618_v48  ;;  %v2035_v22 = vsel %vm1694_vm1, %v10079_v21, %v2034_v51  ;;  %v2324_v35 = vor.u32 %v2323_v62, %v2322_v0  ;;  %v2327_v21 = vrot.slane %v9869_v30, 2  ;;  %v2338_v51 = vrot.slane %v9932_v58, 1  ;;  %v9621_v62 = vld [vmem:[%s14351_s1 + $0x1b0] sm:$0xff]  }
  0x8d   : > { %8715 = vmatmul.mubr.bf16.gmra.mxu1 %v1713_v23  ;;  %8666 = vmatprep.mubr.bf16.mxu0 %v1713_v23  ;;  %v2326_v23 = vrot.slane %v9886_v38, 1 }
  0x8e   : > { %8718 = vmatprep.mubr.bf16.mxu1 %v1715_v16  ;;  %8751 = vmatpush3.bf16.msra.mxu0 %v9612_v57  ;;  %v9718_v57 = vld [vmem:[%s9825_s22 + $0x8] sm:$0xff]  }
  0x8f   : > { %8752 = vmatprep.subr.bf16.mxu0 %v9616_v3  ;;  %8803 = vmatpush3.bf16.msra.mxu1 %v9618_v48  ;;  %v2701_v61 = vrot.slane %v9718_v57, 2  ;;  %v10277_v48 = vld [vmem:[%s9825_s22 + $0x10] sm:$0xff]   ;;  %v2328_v20 = vor.u32 %v2327_v21, %v2326_v23  ;;  %v9628_v21 = vld [vmem:[%s14351_s1 + $0x1e8] sm:$0xff]  }
  0x90   : > { %8804 = vmatprep.subr.bf16.mxu1 %v9619_v15  ;;  %14653 = vst [vmem:[#allocation9_spill] sm:$0xff] %v10277_v48  ;;  %v10328_v23 = vld [vmem:[%s9825_s22 + $0x30] sm:$0xff]  }
  0x91   : > { %v2329_v54 = vsel %vm2318_vm2, %v2324_v35, %v2328_v20  ;;  %14658 = vst [vmem:[#allocation13_spill] sm:$0xff] %v10328_v23 }
  0x92   : > { %8753 = vmatpush3.bf16.msra.mxu0 %v9616_v3  ;;  %v2702_v3 = vrot.slane %v10277_v48, 2  ;;  %v14674_v48 = vld [vmem:[#allocation7_spill] sm:$0xff] }
  0x93   : > { %8805 = vmatpush3.bf16.msra.mxu1 %v9619_v15  ;;  %8842 = vmatprep.subr.bf16.mxu0 %v10247_v11  ;;  %v14654_v15 = vor.u32 %v10099_v47, %v10095_v43  ;;  %v10296_v43 = vld [vmem:[%s9825_s22 + $0x20] sm:$0xff]  }
  0x94   : > { %8667 = vmatmul.mubr.bf16.gmra.mxu0 %v1715_v16  ;;  %8894 = vmatprep.subr.bf16.mxu1 %v10253_v63  ;;  %v2703_v26 = vsel %vm2700_vm3, %v2701_v61, %v2702_v3  ;;  %14656 = vst [vmem:[#allocation11_spill] sm:$0xff] %v10296_v43  ;;  %v2706_v47 = vrot.slane %v10296_v43, 2 }
  0x95   : > { %8719 = vmatmul.mubr.bf16.gmra.mxu1 %v1717_v4  ;;  %8670 = vmatprep.mubr.bf16.mxu0 %v1717_v4  ;;  %v2325_v16 = vsel %vm2318_vm2, %v14654_v15, %v2324_v35  ;;  %v2330_v4 = vrot.slane %v9893_v41, 1  ;;  %v10321_v35 = vld [vmem:[%s9825_s22 + $0x28] sm:$0xff]   ;;  %v2342_v15 = vrot.slane %v9967_v9, 1 }
  0x96   : > { %8722 = vmatprep.mubr.bf16.mxu1 %v1719_v8  ;;  %14657 = vst [vmem:[#allocation12_spill] sm:$0xff] %v10321_v35  ;;  %v2708_v57 = vrot.slane %v10321_v35, 2 }
  0x97   : > { %v2332_v56 = vor.u32 %v2331_v17, %v2330_v4  ;;  %v2347_v17 = vrot.slane %v9960_v6, 2 }
  0x9c   : > { %8671 = vmatmul.mubr.bf16.gmra.mxu0 %v1719_v8  ;;  %v10292_v8 = vld [vmem:[%s9825_s22 + $0x18] sm:$0xff]  }
  0x9d   : > { %8723 = vmatmul.mubr.bf16.gmra.mxu1 %v1721_v45  ;;  %8674 = vmatprep.mubr.bf16.mxu0 %v1721_v45  ;;  %14655 = vst [vmem:[#allocation10_spill] sm:$0xff] %v10292_v8  ;;  %v2704_v45 = vrot.slane %v10292_v8, 2  ;;  %v14673_v8 = vld [vmem:[#allocation8_spill] sm:$0xff] }
  0x9e   : > { %8726 = vmatprep.mubr.bf16.mxu1 %v1723_v7 }
  0x9f   : > { %v10309_v0 = vsel %vm2700_vm3, %v2704_v45, %v2706_v47 }
  0xa4   : > { %8675 = vmatmul.mubr.bf16.gmra.mxu0 %v1723_v7  ;;  %v2334_v7 = vrot.slane %v9925_v55, 1 }
  0xa5   : > { %8727 = vmatmul.mubr.bf16.gmra.mxu1 %v1725_v19  ;;  %8678 = vmatprep.mubr.bf16.mxu0 %v1725_v19  ;;  %v10303_v19 = vsel %vm2700_vm3, %v2702_v3, %v2704_v45  ;;  %v9622_v3 = vld [vmem:[%s14351_s1 + $0x1a8] sm:$0xff]   ;;  %v9623_v45 = vld [vmem:[%s14351_s1 + $0x1a0] sm:$0xff]  }
  0xa6   : > { %8730 = vmatprep.mubr.bf16.mxu1 %v1727_v13 }
  0xac   : > { %8679 = vmatmul.mubr.bf16.gmra.mxu0 %v1727_v13  ;;  %v2339_v13 = vrot.slane %v9921_v53, 2 }
  0xad   : > { %8731 = vmatmul.mubr.bf16.gmra.mxu1 %v1729_v34  ;;  %8682 = vmatprep.mubr.bf16.mxu0 %v1729_v34  ;;  %v2333_v34 = vsel %vm2318_vm2, %v2328_v20, %v2332_v56 }
  0xae   : > { %8734 = vmatprep.mubr.bf16.mxu1 %v2035_v22  ;;  %v9627_v22 = vld [vmem:[%s14351_s1 + $0x1f0] sm:$0xff]   ;;  %v2340_v61 = vor.u32 %v2339_v13, %v2338_v51  ;;  %v10360_v51 = vld [vmem:[%s9825_s22 + $0x40] sm:$0xff]  }
  0xaf   : > { %14660 = vst [vmem:[#allocation15_spill] sm:$0xff] %v10360_v51  ;;  %v2714_v13 = vrot.slane %v10360_v51, 2 }
  0xb4   : > { %8683 = vmatmul.mubr.bf16.gmra.mxu0 %v10091_v36  ;;  %v2335_v36 = vrot.slane %v9896_v42, 2 }
  0xb5   : > { %8735 = vmatmul.mubr.bf16.gmra.mxu1 %v2037_v46  ;;  %8754 = vmatprep.mubr.bf16.mxu0 %v2325_v16  ;;  %v2343_v16 = vrot.slane %v9935_v59, 2 }
  0xb6   : > { %8806 = vmatprep.mubr.bf16.mxu1 %v2703_v26  ;;  %v2336_v28 = vor.u32 %v2335_v36, %v2334_v7  ;;  %v10339_v26 = vsel %vm2700_vm3, %v2706_v47, %v2708_v57 }
  0xb7   : > { %v2344_v47 = vor.u32 %v2343_v16, %v2342_v15  ;;  %v2355_v15 = vrot.slane %v10004_v33, 2 }
  0xb8   : > { %v2337_v46 = vsel %vm2318_vm2, %v2332_v56, %v2336_v28  ;;  %v2341_v4 = vsel %vm2318_vm2, %v2336_v28, %v2340_v61  ;;  %v9630_v56 = vld [vmem:[%s14351_s1 + $0x1e0] sm:$0xff]   ;;  %v2350_v28 = vrot.slane %v10011_v37, 1 }
  0xbc   : > { %8755 = vmatmul.mubr.bf16.vlgmr.msra.gmra.mxu0 %v2329_v54  ;;  %v10356_v54 = vld [vmem:[%s9825_s22 + $0x38] sm:$0xff]  }
  0xbd   : > { %8843 = vmatpush3.bf16.msra.mxu0 %v10247_v11  ;;  %8807 = vmatmul.mubr.bf16.vlgmr.msra.gmra.mxu1 %v10303_v19  ;;  %v2710_v11 = vrot.slane %v10328_v23, 2  ;;  %14659 = vst [vmem:[#allocation14_spill] sm:$0xff] %v10356_v54  ;;  %v2712_v7 = vrot.slane %v10356_v54, 2  ;;  %v14669_v23 = vld [vmem:[#allocation5_spill] sm:$0xff] }
  0xbe   : > { %8758 = vmatprep.mubr.bf16.mxu0 %v2333_v34  ;;  %8810 = vmatprep.mubr.bf16.mxu1 %v10309_v0  ;;  %v9624_v34 = vld [vmem:[%s14351_s1 + $0x198] sm:$0xff]  }
  0xbf   : > { %8844 = vmatprep.subr.bf16.mxu0 %v9621_v62  ;;  %8895 = vmatpush3.bf16.msra.mxu1 %v10253_v63  ;;  %v2346_v63 = vrot.slane %v9972_v12, 1  ;;  %v10345_v20 = vsel %vm2700_vm3, %v2708_v57, %v2710_v11  ;;  %v2351_v57 = vrot.slane %v9975_v14, 2  ;;  %v10379_v16 = vsel %vm2700_vm3, %v2712_v7, %v2714_v13 }
  0xc0   : > { %8896 = vmatprep.subr.bf16.mxu1 %v9627_v22 }
  0xc1   : > { %8845 = vmatpush3.bf16.msra.mxu0 %v9621_v62  ;;  %v2348_v36 = vor.u32 %v2347_v17, %v2346_v63  ;;  %v9631_v62 = vld [vmem:[%s14351_s1 + $0x1d8] sm:$0xff]   ;;  %v10390_v63 = vld [vmem:[%s9825_s22 + $0x48] sm:$0xff]  }
  0xc2   : > { %8846 = vmatprep.subr.bf16.mxu0 %v9622_v3  ;;  %14661 = vst [vmem:[#allocation16_spill] sm:$0xff] %v10390_v63  ;;  %v2716_v17 = vrot.slane %v10390_v63, 2  ;;  %v10428_v63 = vld [vmem:[%s9825_s22 + $0x60] sm:$0xff]  }
  0xc3   : > { %8897 = vmatpush3.bf16.msra.mxu1 %v9627_v22  ;;  %v2345_v22 = vsel %vm2318_vm2, %v2340_v61, %v2344_v47  ;;  %v9626_v61 = vld [vmem:[%s14351_s1 + $0x190] sm:$0xff]   ;;  %14664 = vst [vmem:[#allocation19_spill] sm:$0xff] %v10428_v63 }
  0xc4   : > { %8759 = vmatmul.mubr.bf16.gmra.mxu0 %v2337_v46  ;;  %8898 = vmatprep.subr.bf16.mxu1 %v9628_v21  ;;  %v2349_v46 = vsel %vm2318_vm2, %v2344_v47, %v2348_v36  ;;  %v10394_v47 = vld [vmem:[%s9825_s22 + $0x50] sm:$0xff]  }
  0xc5   : > { %8811 = vmatmul.mubr.bf16.gmra.mxu1 %v10339_v26  ;;  %8762 = vmatprep.mubr.bf16.mxu0 %v2341_v4  ;;  %v2352_v4 = vor.u32 %v2351_v57, %v2350_v28  ;;  %14662 = vst [vmem:[#allocation17_spill] sm:$0xff] %v10394_v47  ;;  %v2358_v57 = vrot.slane %v10054_v1, 1 }
  0xc6   : > { %8814 = vmatprep.mubr.bf16.mxu1 %v10345_v20  ;;  %8847 = vmatpush3.bf16.msra.mxu0 %v9622_v3  ;;  %v10373_v3 = vsel %vm2700_vm3, %v2710_v11, %v2712_v7  ;;  %v9632_v11 = vld [vmem:[%s14351_s1 + $0x1d0] sm:$0xff]   ;;  %v9629_v7 = vld [vmem:[%s14351_s1 + $0x188] sm:$0xff]  }
  0xc7   : > { %8848 = vmatprep.subr.bf16.mxu0 %v9623_v45  ;;  %8899 = vmatpush3.bf16.msra.mxu1 %v9628_v21  ;;  %v2354_v21 = vrot.slane %v10018_v44, 1  ;;  %v2353_v28 = vsel %vm2318_vm2, %v2348_v36, %v2352_v4  ;;  %v9633_v36 = vld [vmem:[%s14351_s1 + $0x180] sm:$0xff]  }
  0xc8   : > { %8900 = vmatprep.subr.bf16.mxu1 %v9630_v56 }
  0xca   : > { %8849 = vmatpush3.bf16.msra.mxu0 %v9623_v45  ;;  %v2356_v45 = vor.u32 %v2355_v15, %v2354_v21  ;;  %v2362_v15 = vrot.slane %v10061_v5, 1 }
  0xcb   : > { %8850 = vmatprep.subr.bf16.mxu0 %v9624_v34  ;;  %8901 = vmatpush3.bf16.msra.mxu1 %v9630_v56  ;;  %v2718_v56 = vrot.slane %v10394_v47, 2 }
  0xcc   : > { %8763 = vmatmul.mubr.bf16.gmra.mxu0 %v2345_v22  ;;  %8902 = vmatprep.subr.bf16.mxu1 %v9631_v62  ;;  %v9634_v22 = vld [vmem:[%s14351_s1 + $0x1c8] sm:$0xff]   ;;  %v2357_v21 = vsel %vm2318_vm2, %v2352_v4, %v2356_v45  ;;  %v10424_v4 = vld [vmem:[%s9825_s22 + $0x58] sm:$0xff]  }
  0xcd   : > { %8815 = vmatmul.mubr.bf16.gmra.mxu1 %v10373_v3  ;;  %8766 = vmatprep.mubr.bf16.mxu0 %v2349_v46  ;;  %v10407_v46 = vsel %vm2700_vm3, %v2714_v13, %v2716_v17  ;;  %v10413_v52 = vsel %vm2700_vm3, %v2716_v17, %v2718_v56  ;;  %v9635_v13 = vld [vmem:[%s14351_s1 + $0x1c0] sm:$0xff]   ;;  %14663 = vst [vmem:[#allocation18_spill] sm:$0xff] %v10424_v4  ;;  %v2720_v17 = vrot.slane %v10424_v4, 2 }
  0xce   : > { %8818 = vmatprep.mubr.bf16.mxu1 %v10379_v16  ;;  %8851 = vmatpush3.bf16.msra.mxu0 %v9624_v34  ;;  %v2359_v34 = vrot.slane %v10014_v40, 2 }
  0xcf   : > { %8852 = vmatprep.subr.bf16.mxu0 %v9626_v61  ;;  %8903 = vmatpush3.bf16.msra.mxu1 %v9631_v62  ;;  %v2363_v62 = vrot.slane %v10042_v60, 2 }
  0xd0   : > { %8904 = vmatprep.subr.bf16.mxu1 %v9632_v11 }
  0xd1   : > { %v2364_v47 = vor.u32 %v2363_v62, %v2362_v15 }
  0xd2   : > { %8853 = vmatpush3.bf16.msra.mxu0 %v9626_v61  ;;  %v2360_v61 = vor.u32 %v2359_v34, %v2358_v57  ;;  %v2366_v34 = vrot.slane %v10107_v50, 1 }
  0xd3   : > { %8854 = vmatprep.subr.bf16.mxu0 %v9629_v7  ;;  %8905 = vmatpush3.bf16.msra.mxu1 %v9632_v11  ;;  %v2722_v11 = vrot.slane %v10428_v63, 2  ;;  %v14666_v63 = vld [vmem:[#allocation3_spill] sm:$0xff] }
  0xd4   : > { %8767 = vmatmul.mubr.bf16.gmra.mxu0 %v2353_v28  ;;  %8906 = vmatprep.subr.bf16.mxu1 %v9634_v22  ;;  %v10434_v28 = vld [vmem:[%s14351_s1 + $0x238] sm:$0xff]   ;;  %v2361_v57 = vsel %vm2318_vm2, %v2356_v45, %v2360_v61  ;;  %v2365_v15 = vsel %vm2318_vm2, %v2360_v61, %v2364_v47  ;;  %v2371_v4 = vrot.slane %v14666_v63, 2 }
  0xd5   : > { %8819 = vmatmul.mubr.bf16.gmra.mxu1 %v10407_v46  ;;  %8770 = vmatprep.mubr.bf16.mxu0 %v2357_v21  ;;  %v2367_v21 = vrot.slane %v10057_v2, 2  ;;  %v10446_v51 = vsel %vm2700_vm3, %v2720_v17, %v2722_v11 }
  0xd6   : > { %8822 = vmatprep.mubr.bf16.mxu1 %v10413_v52  ;;  %8855 = vmatpush3.bf16.msra.mxu0 %v9629_v7  ;;  %v10440_v7 = vsel %vm2700_vm3, %v2718_v56, %v2720_v17  ;;  %v10452_v56 = vld [vmem:[%s9825_s22 + $0x68] sm:$0xff]  }
  0xd7   : > { %8856 = vmatprep.subr.bf16.mxu0 %v9633_v36  ;;  %8907 = vmatpush3.bf16.msra.mxu1 %v9634_v22  ;;  %v14665_v22 = vld [vmem:[#allocation4_spill] sm:$0xff]  ;;  %v2368_v45 = vor.u32 %v2367_v21, %v2366_v34  ;;  %v2724_v61 = vrot.slane %v10452_v56, 2 }
  0xd8   : > { %8908 = vmatprep.subr.bf16.mxu1 %v9635_v13  ;;  %v2370_v62 = vrot.slane %v14665_v22, 1  ;;  %14667 = vst [vmem:[#allocation4_spill] sm:$0xff] %v10452_v56  ;;  %v2378_v56 = vrot.slane %v10136_v24, 1 }
  0xd9   : > { %v10463_v34 = vsel %vm2700_vm3, %v2722_v11, %v2724_v61 }
  0xda   : > { %8857 = vmatpush3.bf16.msra.mxu0 %v9633_v36  ;;  %v2372_v54 = vor.u32 %v2371_v4, %v2370_v62  ;;  %v10456_v36 = vld [vmem:[%s9825_s22 + $0x70] sm:$0xff]   ;;  %v2379_v4 = vrot.slane %v10128_v27, 2  ;;  %v2383_v27 = vrot.slane %v14674_v48, 2 }
  0xdb   : > { %8909 = vmatpush3.bf16.msra.mxu1 %v9635_v13  ;;  %8946 = vmatprep.subr.bf16.mxu0 %v10434_v28  ;;  %14668 = vst [vmem:[#allocation3_spill] sm:$0xff] %v10456_v36  ;;  %v2726_v17 = vrot.slane %v10456_v36, 2  ;;  %v2369_v13 = vsel %vm2318_vm2, %v2364_v47, %v2368_v45  ;;  %v10474_v36 = vld [vmem:[%s9825_s22 + $0x78] sm:$0xff]  }
  0xdc   : > { %8771 = vmatmul.mubr.bf16.gmra.mxu0 %v2361_v57  ;;  %v2374_v57 = vrot.slane %v10132_v49, 1  ;;  %v2373_v21 = vsel %vm2318_vm2, %v2368_v45, %v2372_v54  ;;  %14671 = vst [vmem:[#allocation20_spill] sm:$0xff] %v10474_v36  ;;  %v2728_v11 = vrot.slane %v10474_v36, 2  ;;  %v2380_v35 = vor.u32 %v2379_v4, %v2378_v56  ;;  %v10478_v45 = vld [vmem:[%s9825_s22 + $0x80] sm:$0xff]  }
  0xdd   : > { %8823 = vmatmul.mubr.bf16.gmra.mxu1 %v10440_v7  ;;  %8774 = vmatprep.mubr.bf16.mxu0 %v2365_v15  ;;  %v2375_v15 = vrot.slane %v14669_v23, 2  ;;  %v10469_v62 = vsel %vm2700_vm3, %v2724_v61, %v2726_v17  ;;  %14672 = vst [vmem:[#allocation21_spill] sm:$0xff] %v10478_v45  ;;  %v2730_v43 = vrot.slane %v10478_v45, 2 }
  0xde   : > { %8826 = vmatprep.mubr.bf16.mxu1 %v10446_v51  ;;  %14670 = vst [vmem:[#allocation5_spill] sm:$0xff] %v10469_v62 }
  0xdf   : > { %v2376_v47 = vor.u32 %v2375_v15, %v2374_v57  ;;  %v10485_v57 = vsel %vm2700_vm3, %v2726_v17, %v2728_v11 }
  0xe1   : > { %v2377_v61 = vsel %vm2318_vm2, %v2372_v54, %v2376_v47  ;;  %v2381_v15 = vsel %vm2318_vm2, %v2376_v47, %v2380_v35  ;;  %v10500_v47 = vrot.slane %v10168_v32, 2 }
  0xe4   : > { %8775 = vmatmul.mubr.bf16.gmra.mxu0 %v2369_v13  ;;  %v2382_v13 = vrot.slane %v14673_v8, 1 }
  0xe5   : > { %8827 = vmatmul.mubr.bf16.gmra.mxu1 %v10463_v34  ;;  %8778 = vmatprep.mubr.bf16.mxu0 %v2373_v21  ;;  %v10489_v21 = vsel %vm2700_vm3, %v2728_v11, %v2730_v43 }
  0xe6   : > { %8830 = vmatprep.mubr.bf16.mxu1 %v10469_v62  ;;  %v2384_v45 = vor.u32 %v2383_v27, %v2382_v13  ;;  %v10496_v62 = vld [vmem:[%s9825_s22 + $0x88] sm:$0xff]  }
  0xe7   : > { %14676 = vst [vmem:[#allocation23_spill] sm:$0xff] %v10496_v62  ;;  %v2732_v17 = vrot.slane %v10496_v62, 2 }
  0xe9   : > { %v10514_v62 = vsel %vm2700_vm3, %v2732_v17, %v10500_v47 }
  0xec   : > { %v8548_v56 = vpop.f32.mrf.mxu0  ;;  %8779 = vmatmul.mubr.bf16.gmra.mxu0 %v2377_v61 }
  0xed   : > { %v8600_v4 = vpop.f32.mrf.mxu1  ;;  %8831 = vmatmul.mubr.bf16.gmra.mxu1 %v10485_v57  ;;  %8782 = vmatprep.mubr.bf16.mxu0 %v2381_v15  ;;  %v2385_v15 = vsel %vm2318_vm2, %v2380_v35, %v2384_v45  ;;  %v3328_v35 = vrot.slane %v9886_v38, 2 }
  0xee   : > { %v10492_v54 = vadd.f32 %v8600_v4, %v8548_v56  ;;  %v1291_v36 = vpop.f32.mrf.mxu0  ;;  %8834 = vmatprep.mubr.bf16.mxu1 %v10489_v21  ;;  %v10508_v56 = vsel %vm2700_vm3, %v2730_v43, %v2732_v17  ;;  %v2394_v4 = vsel %vm2318_vm2, %v2384_v45, %v10200_v18 }
  0xef   : > { %v1534_v11 = vpop.f32.mrf.mxu1 }
  0xf0   : > { %14675 = vst [vmem:[#allocation22_spill] sm:$0xff] %v10492_v54  ;;  %v10502_v48 = vadd.f32 %v1534_v11, %v1291_v36  ;;  %v8549_v61 = vpop.f32.mrf.mxu0  ;;  %v3325_v36 = vrot.slane %v9866_v29, 2  ;;  %v3326_v11 = vrot.slane %v9856_v25, 3  ;;  %v2736_v29 = vrot.slane %v10178_v31, 2 }
  0xf1   : > { %v8601_v8 = vpop.f32.mrf.mxu1 }
  0xf2   : > { %14677 = vst [vmem:[#allocation24_spill] sm:$0xff] %v10502_v48  ;;  %v10505_v27 = vadd.f32 %v8601_v8, %v8549_v61  ;;  %v1294_v13 = vpop.f32.mrf.mxu0  ;;  %v3329_v8 = vrot.slane %v9869_v30, 3  ;;  %v3327_v17 = vor.u32 %v3326_v11, %v3325_v36  ;;  %v3336_v36 = vrot.slane %v9925_v55, 2 }
  0xf3   : > { %v1537_v54 = vpop.f32.mrf.mxu1  ;;  %v3337_v11 = vrot.slane %v9896_v42, 3 }
  0xf4   : > { %14678 = vst [vmem:[#allocation25_spill] sm:$0xff] %v10505_v27  ;;  %v10520_v61 = vadd.f32 %v1537_v54, %v1294_v13  ;;  %v8552_v43 = vpop.f32.mrf.mxu0  ;;  %8783 = vmatmul.mubr.bf16.gmra.mxu0 %v2385_v15  ;;  %v3330_v38 = vor.u32 %v3329_v8, %v3328_v35 }
  0xf5   : > { %v8604_v27 = vpop.f32.mrf.mxu1  ;;  %8835 = vmatmul.mubr.bf16.gmra.mxu1 %v10508_v56  ;;  %8786 = vmatprep.mubr.bf16.mxu0 %v2394_v4  ;;  %v3332_v4 = vrot.slane %v9893_v41, 2 }
  0xf6   : > { %v10523_v18 = vadd.f32 %v8604_v27, %v8552_v43  ;;  %v1307_v45 = vpop.f32.mrf.mxu0  ;;  %8838 = vmatprep.mubr.bf16.mxu1 %v10514_v62  ;;  %v2737_v27 = vsel %vm2700_vm3, %v10500_v47, %v2736_v29  ;;  %v3333_v43 = vrot.slane %v9889_v39, 3  ;;  %v3331_v31 = vsel %vm14411_vm4, %v3327_v17, %v3330_v38 }
  0xf7   : > { %v1550_v25 = vpop.f32.mrf.mxu1  ;;  %v3338_v17 = vor.u32 %v3337_v11, %v3336_v36 }
  0xf8   : > { %14679 = vst [vmem:[#allocation26_spill] sm:$0xff] %v10523_v18  ;;  %v10527_v48 = vadd.f32 %v1550_v25, %v1307_v45  ;;  %v8553_v30 = vpop.f32.mrf.mxu0  ;;  %v3334_v39 = vor.u32 %v3333_v43, %v3332_v4  ;;  %v9637_v4 = vld [vmem:[%s14351_s1 + $0x230] sm:$0xff]   ;;  %v3344_v43 = vrot.slane %v9967_v9, 2 }
  0xf9   : > { %v8605_v54 = vpop.f32.mrf.mxu1 }
  0xfa   : > { %v10529_v15 = vadd.f32 %v8605_v54, %v8553_v30  ;;  %v1310_v13 = vpop.f32.mrf.mxu0 }
  0xfb   : > { %v1553_v18 = vpop.f32.mrf.mxu1 }
  0xfc   : > { %v10538_v35 = vadd.f32 %v1553_v18, %v1310_v13  ;;  %v8556_v8 = vpop.f32.mrf.mxu0  ;;  %8787 = vmatmul.mubr.bf16.gmra.mxu0 %v10210_v10  ;;  %v3335_v10 = vsel %vm14411_vm4, %v3330_v38, %v3334_v39  ;;  %v3340_v13 = vrot.slane %v9932_v58, 2 }
  0xfd   : > { %v8608_v45 = vpop.f32.mrf.mxu1  ;;  %8839 = vmatmul.mubr.bf16.gmra.mxu1 %v2737_v27  ;;  %8858 = vmatprep.mubr.bf16.mxu0 %v10303_v19  ;;  %v3341_v19 = vrot.slane %v9921_v53, 3 }
  0xfe   : > { %v10542_v29 = vadd.f32 %v8608_v45, %v8556_v8  ;;  %v1323_v41 = vpop.f32.mrf.mxu0  ;;  %8910 = vmatprep.mubr.bf16.mxu1 %v3331_v31  ;;  %v3339_v8 = vsel %vm14411_vm4, %v3334_v39, %v3338_v17  ;;  %v3345_v31 = vrot.slane %v9935_v59, 3  ;;  %v9638_v59 = vld [vmem:[%s14351_s1 + $0x228] sm:$0xff]  }
  0xff   : > { %v1566_v25 = vpop.f32.mrf.mxu1  ;;  %v3342_v45 = vor.u32 %v3341_v19, %v3340_v13  ;;  %v3352_v19 = vrot.slane %v10011_v37, 2 }
 0x100   : > { %v10544_v30 = vadd.f32 %v1566_v25, %v1323_v41  ;;  %v8557_v55 = vpop.f32.mrf.mxu0  ;;  %v3346_v41 = vor.u32 %v3345_v31, %v3344_v43 }
 0x101   : > { %v8609_v42 = vpop.f32.mrf.mxu1 }
 0x102   : > { %v10546_v18 = vadd.f32 %v8609_v42, %v8557_v55  ;;  %v1326_v54 = vpop.f32.mrf.mxu0  ;;  %v3343_v42 = vsel %vm14411_vm4, %v3338_v17, %v3342_v45  ;;  %v3347_v13 = vsel %vm14411_vm4, %v3342_v45, %v3346_v41 }
 0x103   : > { %v1569_v27 = vpop.f32.mrf.mxu1 }
 0x104   : > { %v10557_v36 = vadd.f32 %v1569_v27, %v1326_v54  ;;  %v8560_v11 = vpop.f32.mrf.mxu0  ;;  %8859 = vmatmul.mubr.bf16.vlgmr.msra.gmra.mxu0 %v10309_v0  ;;  %v3349_v54 = vrot.slane %v9960_v6, 3  ;;  %v3353_v27 = vrot.slane %v9975_v14, 3 }
 0x105   : > { %v8612_v38 = vpop.f32.mrf.mxu1  ;;  %8947 = vmatpush3.bf16.msra.mxu0 %v10434_v28  ;;  %8911 = vmatmul.mubr.bf16.vlgmr.msra.gmra.mxu1 %v3335_v10 }
 0x106   : > { %v10561_v53 = vadd.f32 %v8612_v38, %v8560_v11  ;;  %v1339_v58 = vpop.f32.mrf.mxu0  ;;  %8862 = vmatprep.mubr.bf16.mxu0 %v10339_v26  ;;  %8914 = vmatprep.mubr.bf16.mxu1 %v3339_v8  ;;  %v3348_v26 = vrot.slane %v9972_v12, 2  ;;  %v9639_v8 = vld [vmem:[%s14351_s1 + $0x220] sm:$0xff]   ;;  %v3354_v31 = vor.u32 %v3353_v27, %v3352_v19  ;;  %v9640_v11 = vld [vmem:[%s14351_s1 + $0x218] sm:$0xff]   ;;  %v9642_v27 = vld [vmem:[%s14351_s1 + $0x208] sm:$0xff]  }
 0x107   : > { %v1582_v9 = vpop.f32.mrf.mxu1  ;;  %8948 = vmatprep.subr.bf16.mxu0 %v9637_v4 }
 0x108   : > { %v10567_v39 = vadd.f32 %v1582_v9, %v1339_v58  ;;  %v8561_v0 = vpop.f32.mrf.mxu0  ;;  %v3350_v37 = vor.u32 %v3349_v54, %v3348_v26  ;;  %v3361_v26 = vrot.slane %v10014_v40, 3  ;;  %v9641_v54 = vld [vmem:[%s14351_s1 + $0x210] sm:$0xff]  }
 0x109   : > { %v8613_v25 = vpop.f32.mrf.mxu1  ;;  %8949 = vmatpush3.bf16.msra.mxu0 %v9637_v4 }
 0x10a   : > { %v10569_v28 = vadd.f32 %v8613_v25, %v8561_v0  ;;  %v1342_v55 = vpop.f32.mrf.mxu0  ;;  %8950 = vmatprep.subr.bf16.mxu0 %v9638_v59  ;;  %v3351_v9 = vsel %vm14411_vm4, %v3346_v41, %v3350_v37  ;;  %v3356_v0 = vrot.slane %v10018_v44, 2 }
 0x10b   : > { %v1585_v10 = vpop.f32.mrf.mxu1 }
 0x10c   : > { %v10580_v4 = vadd.f32 %v1585_v10, %v1342_v55  ;;  %v8564_v43 = vpop.f32.mrf.mxu0  ;;  %8863 = vmatmul.mubr.bf16.gmra.mxu0 %v10345_v20  ;;  %v3355_v55 = vsel %vm14411_vm4, %v3350_v37, %v3354_v31  ;;  %v3364_v37 = vrot.slane %v10061_v5, 2 }
 0x10d   : > { %v8616_v12 = vpop.f32.mrf.mxu1  ;;  %8915 = vmatmul.mubr.bf16.gmra.mxu1 %v3343_v42  ;;  %8866 = vmatprep.mubr.bf16.mxu0 %v10373_v3  ;;  %v3360_v42 = vrot.slane %v10054_v1, 2 }
 0x10e   : > { %v10584_v6 = vadd.f32 %v8616_v12, %v8564_v43  ;;  %v1355_v17 = vpop.f32.mrf.mxu0  ;;  %8918 = vmatprep.mubr.bf16.mxu1 %v3347_v13  ;;  %8951 = vmatpush3.bf16.msra.mxu0 %v9638_v59  ;;  %v3357_v59 = vrot.slane %v10004_v33, 3 }
 0x10f   : > { %v1598_v14 = vpop.f32.mrf.mxu1  ;;  %8952 = vmatprep.subr.bf16.mxu0 %v9639_v8  ;;  %v3362_v19 = vor.u32 %v3361_v26, %v3360_v42 }
 0x110   : > { %v10589_v38 = vadd.f32 %v1598_v14, %v1355_v17  ;;  %v8565_v20 = vpop.f32.mrf.mxu0  ;;  %v3358_v1 = vor.u32 %v3357_v59, %v3356_v0  ;;  %v3365_v14 = vrot.slane %v10042_v60, 3 }
 0x111   : > { %v8617_v58 = vpop.f32.mrf.mxu1 }
 0x112   : > { %v10591_v45 = vadd.f32 %v8617_v58, %v8565_v20  ;;  %v1358_v3 = vpop.f32.mrf.mxu0  ;;  %8953 = vmatpush3.bf16.msra.mxu0 %v9639_v8  ;;  %v3359_v17 = vsel %vm14411_vm4, %v3354_v31, %v3358_v1  ;;  %v3363_v20 = vsel %vm14411_vm4, %v3358_v1, %v3362_v19  ;;  %v3368_v58 = vrot.slane %v10107_v50, 2 }
 0x113   : > { %v1601_v25 = vpop.f32.mrf.mxu1  ;;  %8954 = vmatprep.subr.bf16.mxu0 %v9640_v11  ;;  %v3366_v50 = vor.u32 %v3365_v14, %v3364_v37  ;;  %v914_v14 = vld [vmem:[%s9825_s22 + $0x9c] sm:$0xf] }
 0x114   : > { %v10602_v10 = vadd.f32 %v1601_v25, %v1358_v3  ;;  %v8568_v41 = vpop.f32.mrf.mxu0  ;;  %8867 = vmatmul.mubr.bf16.gmra.mxu0 %v10379_v16  ;;  %v3369_v3 = vrot.slane %v10057_v2, 3 }
 0x115   : > { %v8620_v44 = vpop.f32.mrf.mxu1  ;;  %8919 = vmatmul.mubr.bf16.gmra.mxu1 %v3351_v9  ;;  %8870 = vmatprep.mubr.bf16.mxu0 %v10407_v46  ;;  %v9644_v9 = vld [vmem:[%s14351_s1 + $0x200] sm:$0xff]  }
 0x116   : > { %v10606_v33 = vadd.f32 %v8620_v44, %v8568_v41  ;;  %v1371_v13 = vpop.f32.mrf.mxu0  ;;  %8922 = vmatprep.mubr.bf16.mxu1 %v3355_v55  ;;  %8955 = vmatpush3.bf16.msra.mxu0 %v9640_v11  ;;  %v3370_v25 = vor.u32 %v3369_v3, %v3368_v58  ;;  %v3367_v41 = vsel %vm14411_vm4, %v3362_v19, %v3366_v50  ;;  %v3373_v44 = vrot.slane %v14666_v63, 3  ;;  %v14680_v3 = vld [vmem:[#allocation6_spill] sm:$0xff] }
 0x117   : > { %v1614_v40 = vpop.f32.mrf.mxu1  ;;  %8956 = vmatprep.subr.bf16.mxu0 %v9641_v54 }
 0x118   : > { %v10611_v8 = vadd.f32 %v1614_v40, %v1371_v13  ;;  %v8569_v16 = vpop.f32.mrf.mxu0  ;;  %v3371_v1 = vsel %vm14411_vm4, %v3366_v50, %v3370_v25  ;;  %v3376_v40 = vrot.slane %v10132_v49, 2 }
 0x119   : > { %v8621_v43 = vpop.f32.mrf.mxu1 }
 0x11a   : > { %v10613_v12 = vadd.f32 %v8621_v43, %v8569_v16  ;;  %v1374_v46 = vpop.f32.mrf.mxu0  ;;  %8957 = vmatpush3.bf16.msra.mxu0 %v9641_v54 }
 0x11b   : > { %v1617_v11 = vpop.f32.mrf.mxu1  ;;  %8958 = vmatprep.subr.bf16.mxu0 %v9642_v27 }
 0x11c   : > { %v10624_v0 = vadd.f32 %v1617_v11, %v1374_v46  ;;  %v8572_v31 = vpop.f32.mrf.mxu0  ;;  %8871 = vmatmul.mubr.bf16.gmra.mxu0 %v10413_v52 }
 0x11d   : > { %v8624_v5 = vpop.f32.mrf.mxu1  ;;  %8923 = vmatmul.mubr.bf16.gmra.mxu1 %v3359_v17  ;;  %8874 = vmatprep.mubr.bf16.mxu0 %v10440_v7  ;;  %v3372_v7 = vrot.slane %v14665_v22, 2 }
 0x11e   : > { %v10628_v60 = vadd.f32 %v8624_v5, %v8572_v31  ;;  %v1387_v59 = vpop.f32.mrf.mxu0  ;;  %8926 = vmatprep.mubr.bf16.mxu1 %v3363_v20  ;;  %8959 = vmatpush3.bf16.msra.mxu0 %v9642_v27  ;;  %v3377_v27 = vrot.slane %v14669_v23, 3 }
 0x11f   : > { %v1630_v2 = vpop.f32.mrf.mxu1  ;;  %8960 = vmatprep.subr.bf16.mxu0 %v9644_v9  ;;  %v3374_v19 = vor.u32 %v3373_v44, %v3372_v7  ;;  %v14683_v44 = vld [vmem:[#allocation5_spill] sm:$0xff] }
 0x120   : > { %v10630_v55 = vadd.f32 %v1630_v2, %v1387_v59  ;;  %v8573_v42 = vpop.f32.mrf.mxu0  ;;  %v3378_v49 = vor.u32 %v3377_v27, %v3376_v40  ;;  %v14681_v59 = vld [vmem:[#allocation8_spill] sm:$0xff]  ;;  %v14682_v2 = vld [vmem:[#allocation7_spill] sm:$0xff] }
 0x121   : > { %v8625_v26 = vpop.f32.mrf.mxu1  ;;  %v3375_v58 = vsel %vm14411_vm4, %v3370_v25, %v3374_v19  ;;  %v3384_v50 = vrot.slane %v14681_v59, 2 }
 0x122   : > { %v10632_v54 = vadd.f32 %v8625_v26, %v8573_v42  ;;  %v1390_v52 = vpop.f32.mrf.mxu0  ;;  %8961 = vmatpush3.bf16.msra.mxu0 %v9644_v9  ;;  %v3381_v9 = vrot.slane %v14680_v3, 3  ;;  %v3379_v5 = vsel %vm14411_vm4, %v3374_v19, %v3378_v49  ;;  %v3385_v42 = vrot.slane %v14682_v2, 3  ;;  %v9735_v26 = vld [vmem:[%s9825_s22 + $0x98] sm:$0xf]  ;;  %v10680_v3 = vld [vmem:[%s9825_s22 + $0xa0] ss:$0 sps:$4 sm:$0xff]  }
 0x123   : > { %v1633_v13 = vpop.f32.mrf.mxu1  ;;  %v14686_v2 = vld [vmem:[#allocation22_spill] sm:$0xff] }
 0x124   : > { %v10640_v16 = vadd.f32 %v1633_v13, %v1390_v52  ;;  %v8576_v43 = vpop.f32.mrf.mxu0  ;;  %8875 = vmatmul.mubr.bf16.gmra.mxu0 %v10446_v51  ;;  %v10658_v52 = vcombine.low %v9735_v26, %v914_v14  ;;  %v3386_v27 = vor.u32 %v3385_v42, %v3384_v50 }
 0x125   : > { %v8628_v46 = vpop.f32.mrf.mxu1  ;;  %8927 = vmatmul.mubr.bf16.gmra.mxu1 %v3367_v41  ;;  %8878 = vmatprep.mubr.bf16.mxu0 %v10463_v34  ;;  %v3380_v34 = vrot.slane %v10136_v24, 2 }
 0x126   : > { %v10644_v22 = vadd.f32 %v8628_v46, %v8576_v43  ;;  %v1403_v63 = vpop.f32.mrf.mxu0  ;;  %8930 = vmatprep.mubr.bf16.mxu1 %v3371_v1  ;;  %v3393_v43 = vshrl.u32 %v10658_v52, 16  ;;  %v3396_v46 = vshll.u32 %v10658_v52, 16 }
 0x127   : > { %v1646_v17 = vpop.f32.mrf.mxu1  ;;  %v3382_v1 = vor.u32 %v3381_v9, %v3380_v34 }
 0x128   : > { %v10646_v37 = vadd.f32 %v1646_v17, %v1403_v63  ;;  %v8577_v23 = vpop.f32.mrf.mxu0  ;;  %v3398_v59 = vrot.slane %v3396_v46, 3 }
 0x129   : > { %v8629_v11 = vpop.f32.mrf.mxu1 }
 0x12a   : > { %v10649_v20 = vadd.f32 %v8629_v11, %v8577_v23  ;;  %v1406_v51 = vpop.f32.mrf.mxu0  ;;  %v14684_v11 = vshrl.u32 %v10168_v32, 16 }
 0x12b   : > { %v1649_v31 = vpop.f32.mrf.mxu1 }
 0x12c   : > { %v10660_v41 = vadd.f32 %v1649_v31, %v1406_v51  ;;  %v8580_v7 = vpop.f32.mrf.mxu0  ;;  %8879 = vmatmul.mubr.bf16.gmra.mxu0 %v14683_v44  ;;  %v3388_v51 = vrot.slane %v14684_v11, 2  ;;  %v3387_v31 = vsel %vm14411_vm4, %v3382_v1, %v3386_v27  ;;  %v3040_v44 = vrot.slane %v10658_v52, 2 }
 0x12d   : > { %v8632_v25 = vpop.f32.mrf.mxu1  ;;  %8931 = vmatmul.mubr.bf16.gmra.mxu1 %v3375_v58  ;;  %8882 = vmatprep.mubr.bf16.mxu0 %v10485_v57  ;;  %v3383_v57 = vsel %vm14411_vm4, %v3378_v49, %v3382_v1  ;;  %v14685_v58 = vshll.u32 %v10168_v32, 16  ;;  %v14687_v1 = vld [vmem:[#allocation24_spill] sm:$0xff] }
 0x12e   : > { %v10664_v24 = vadd.f32 %v8632_v25, %v8580_v7  ;;  %v1419_v13 = vpop.f32.mrf.mxu0  ;;  %8934 = vmatprep.mubr.bf16.mxu1 %v3379_v5  ;;  %v3395_v5 = vrot.slane %v3393_v43, 2  ;;  %v3402_v25 = vshrl.u32 %v10680_v3, 16 }
 0x12f   : > { %v1662_v40 = vpop.f32.mrf.mxu1  ;;  %v3389_v34 = vrot.slane %v14685_v58, 3 }
 0x130   : > { %v10668_v63 = vadd.f32 %v1662_v40, %v1419_v13  ;;  %v8581_v19 = vpop.f32.mrf.mxu0  ;;  %v3405_v13 = vshll.u32 %v10680_v3, 16  ;;  %v3399_v46 = vor.u32 %v3398_v59, %v3395_v5 }
 0x131   : > { %v8633_v17 = vpop.f32.mrf.mxu1  ;;  %v3390_v7 = vor.u32 %v3389_v34, %v3388_v51  ;;  %v3041_v34 = vsel %vm2700_vm3, %v10500_v47, %v3040_v44  ;;  %v3042_v47 = vrot.slane %v10680_v3, 2 }
 0x132   : > { %v10670_v23 = vadd.f32 %v8633_v17, %v8581_v19  ;;  %v10672_v14 = vpop.f32.mrf.mxu0  ;;  %v14688_v17 = vld [vmem:[#allocation25_spill] sm:$0xff] }
 0x133   : > { %v10682_v9 = vpop.f32.mrf.mxu1  ;;  %v3391_v51 = vsel %vm14411_vm4, %v3386_v27, %v3390_v7  ;;  %v3400_v59 = vsel %vm14411_vm4, %v3390_v7, %v3399_v46 }
 0x134   : > { %v8652_v50 = vpop.f32.mrf.mxu0  ;;  %8883 = vmatmul.mubr.bf16.gmra.mxu0 %v10489_v21 }
 0x135   : > { %v1977_v42 = vadd.f32 %v8652_v50, %v14686_v2  ;;  %v8704_v49 = vpop.f32.mrf.mxu1  ;;  %8935 = vmatmul.mubr.bf16.gmra.mxu1 %v3383_v57  ;;  %8886 = vmatprep.mubr.bf16.mxu0 %v10508_v56  ;;  %v3407_v50 = vrot.slane %v3405_v13, 3  ;;  %v14690_v13 = vld [vmem:[#allocation9_spill] sm:$0xff] }
 0x136   : > { %v1832_v26 = vpop.f32.mrf.mxu0  ;;  %8938 = vmatprep.mubr.bf16.mxu1 %v3387_v31  ;;  %v3404_v31 = vrot.slane %v3402_v25, 2 }
 0x137   : > { %v1975_v40 = vadd.f32 %v1832_v26, %v14687_v1  ;;  %v10692_v43 = vadd.f32 %v8704_v49, %v1977_v42  ;;  %v2122_v21 = vpop.f32.mrf.mxu1  ;;  %v14689_v26 = vld [vmem:[#allocation26_spill] sm:$0xff] }
 0x138   : > { %v8653_v19 = vpop.f32.mrf.mxu0 }
 0x139   : > { %v1978_v57 = vadd.f32 %v8653_v19, %v14688_v17  ;;  %v10695_v11 = vadd.f32 %v2122_v21, %v1975_v40  ;;  %v8705_v56 = vpop.f32.mrf.mxu1  ;;  %v3707_v40 = vrot.slane %v14690_v13, 3  ;;  %v14691_v21 = vld [vmem:[#allocation10_spill] sm:$0xff] }
 0x13a   : > { %v1835_v58 = vpop.f32.mrf.mxu0  ;;  %v3708_v19 = vrot.slane %v14691_v21, 3 }
 0x13b   : > { %v10701_v2 = vadd.f32 %v1835_v58, %v10520_v61  ;;  %v10703_v42 = vadd.f32 %v8705_v56, %v1978_v57  ;;  %v10705_v5 = vpop.f32.mrf.mxu1  ;;  %v3408_v61 = vor.u32 %v3407_v50, %v3404_v31 }
 0x13c   : > { %v8656_v49 = vpop.f32.mrf.mxu0  ;;  %8887 = vmatmul.mubr.bf16.gmra.mxu0 %v10514_v62  ;;  %v3709_v50 = vsel %vm14412_vm5, %v3707_v40, %v3708_v19 }
 0x13d   : > { %v1981_v1 = vadd.f32 %v8656_v49, %v14689_v26  ;;  %v8708_v27 = vpop.f32.mrf.mxu1  ;;  %8939 = vmatmul.mubr.bf16.gmra.mxu1 %v3391_v51  ;;  %8890 = vmatprep.mubr.bf16.mxu0 %v3041_v34  ;;  %v3043_v34 = vsel %vm2700_vm3, %v3040_v44, %v3042_v47  ;;  %v3409_v31 = vsel %vm14411_vm4, %v3399_v46, %v3408_v61  ;;  %v14692_v44 = vld [vmem:[#allocation11_spill] sm:$0xff]  ;;  %v14693_v46 = vld [vmem:[#allocation12_spill] sm:$0xff] }
 0x13e   : > { %v1848_v25 = vpop.f32.mrf.mxu0  ;;  %8942 = vmatprep.mubr.bf16.mxu1 %v3400_v59  ;;  %v3710_v47 = vrot.slane %v14692_v44, 3  ;;  %v3712_v61 = vrot.slane %v14693_v46, 3 }
 0x13f   : > { %v1979_v17 = vadd.f32 %v1848_v25, %v10527_v48  ;;  %v10714_v7 = vadd.f32 %v8708_v27, %v1981_v1  ;;  %v2138_v57 = vpop.f32.mrf.mxu1 }
 0x140   : > { %v8657_v62 = vpop.f32.mrf.mxu0 }
 0x141   : > { %v1982_v56 = vadd.f32 %v8657_v62, %v10529_v15  ;;  %v10717_v58 = vadd.f32 %v2138_v57, %v1979_v17  ;;  %v8709_v51 = vpop.f32.mrf.mxu1 }
 0x142   : > { %v1851_v59 = vpop.f32.mrf.mxu0 }
 0x143   : > { %v10723_v49 = vadd.f32 %v1851_v59, %v10538_v35  ;;  %v10725_v48 = vadd.f32 %v8709_v51, %v1982_v56  ;;  %v10727_v26 = vpop.f32.mrf.mxu1  ;;  %v3713_v51 = vsel %vm14412_vm5, %v3710_v47, %v3712_v61 }
 0x144   : > { %v8660_v1 = vpop.f32.mrf.mxu0  ;;  %8891 = vmatmul.mubr.bf16.gmra.mxu0 %v3043_v34 }
 0x145   : > { %v1985_v15 = vadd.f32 %v8660_v1, %v10542_v29  ;;  %v8712_v27 = vpop.f32.mrf.mxu1  ;;  %8943 = vmatmul.mubr.bf16.gmra.mxu1 %v3409_v31  ;;  %8962 = vmatprep.mubr.bf16.mxu0 %v3709_v50  ;;  %v3711_v29 = vsel %vm14412_vm5, %v3708_v19, %v3710_v47  ;;  %v14694_v1 = vld [vmem:[#allocation13_spill] sm:$0xff]  ;;  %v14695_v19 = vld [vmem:[#allocation14_spill] sm:$0xff] }
 0x146   : > { %v1864_v25 = vpop.f32.mrf.mxu0  ;;  %v3716_v44 = vrot.slane %v14695_v19, 3 }
 0x147   : > { %v1983_v13 = vadd.f32 %v1864_v25, %v10544_v30  ;;  %v10733_v35 = vadd.f32 %v8712_v27, %v1985_v15  ;;  %v2154_v40 = vpop.f32.mrf.mxu1  ;;  %v3714_v15 = vrot.slane %v14694_v1, 3 }
 0x148   : > { %v8661_v21 = vpop.f32.mrf.mxu0 }
 0x149   : > { %v1986_v17 = vadd.f32 %v8661_v21, %v10546_v18  ;;  %v10736_v57 = vadd.f32 %v2154_v40, %v1983_v13  ;;  %v8713_v62 = vpop.f32.mrf.mxu1 }
 0x14a   : > { %v1867_v56 = vpop.f32.mrf.mxu0 }
 0x14b   : > { %v10741_v34 = vadd.f32 %v1867_v56, %v10557_v36  ;;  %v10743_v59 = vadd.f32 %v8713_v62, %v1986_v17  ;;  %v10745_v30 = vpop.f32.mrf.mxu1  ;;  %v3717_v62 = vsel %vm14412_vm5, %v3714_v15, %v3716_v44 }
 0x14c   : > { %v8664_v31 = vpop.f32.mrf.mxu0  ;;  %8963 = vmatmul.mubr.bf16.vlgmr.msra.gmra.mxu0 %v3711_v29 }
 0x14d   : > { %v1989_v50 = vadd.f32 %v8664_v31, %v10561_v53  ;;  %v8716_v18 = vpop.f32.mrf.mxu1  ;;  %8966 = vmatprep.mubr.bf16.mxu0 %v3713_v51  ;;  %v3715_v53 = vsel %vm14412_vm5, %v3712_v61, %v3714_v15  ;;  %v14697_v61 = vld [vmem:[#allocation16_spill] sm:$0xff] }
 0x14e   : > { %v1880_v27 = vpop.f32.mrf.mxu0 }
 0x14f   : > { %v1987_v47 = vadd.f32 %v1880_v27, %v10567_v39  ;;  %v10751_v25 = vadd.f32 %v8716_v18, %v1989_v50  ;;  %v2170_v36 = vpop.f32.mrf.mxu1  ;;  %v14696_v50 = vld [vmem:[#allocation15_spill] sm:$0xff]  ;;  %v3720_v27 = vrot.slane %v14697_v61, 3  ;;  %v14699_v61 = vld [vmem:[#allocation18_spill] sm:$0xff] }
 0x150   : > { %v8665_v46 = vpop.f32.mrf.mxu0  ;;  %v3718_v18 = vrot.slane %v14696_v50, 3  ;;  %v14698_v50 = vld [vmem:[#allocation17_spill] sm:$0xff] }
 0x151   : > { %v1990_v13 = vadd.f32 %v8665_v46, %v10569_v28  ;;  %v10754_v40 = vadd.f32 %v2170_v36, %v1987_v47  ;;  %v8717_v21 = vpop.f32.mrf.mxu1  ;;  %v9646_v47 = vld [vmem:[%s14353_s3 + $0x78] sm:$0xff]  }
 0x152   : > { %v1883_v17 = vpop.f32.mrf.mxu0  ;;  %8998 = vmatprep.subr.bf16.mxu1 %v9646_v47 }
 0x153   : > { %v10759_v29 = vadd.f32 %v1883_v17, %v10580_v4  ;;  %v10761_v56 = vadd.f32 %v8717_v21, %v1990_v13  ;;  %v10763_v39 = vpop.f32.mrf.mxu1  ;;  %v3719_v21 = vsel %vm14412_vm5, %v3716_v44, %v3718_v18  ;;  %v3721_v17 = vsel %vm14412_vm5, %v3718_v18, %v3720_v27  ;;  %8999 = vmatpush3.bf16.msra.mxu1 %v9646_v47 }
 0x154   : > { %v8668_v51 = vpop.f32.mrf.mxu0  ;;  %8967 = vmatmul.mubr.bf16.gmra.mxu0 %v3715_v53  ;;  %v3722_v44 = vrot.slane %v14698_v50, 3  ;;  %v14700_v50 = vld [vmem:[#allocation19_spill] sm:$0xff] }
 0x155   : > { %v1993_v31 = vadd.f32 %v8668_v51, %v10584_v6  ;;  %v8720_v28 = vpop.f32.mrf.mxu1  ;;  %8970 = vmatprep.mubr.bf16.mxu0 %v3717_v62 }
 0x156   : > { %v1896_v1 = vpop.f32.mrf.mxu0 }
 0x157   : > { %v1991_v15 = vadd.f32 %v1896_v1, %v10589_v38  ;;  %v10769_v19 = vadd.f32 %v8720_v28, %v1993_v31  ;;  %v2186_v4 = vpop.f32.mrf.mxu1 }
 0x158   : > { %v8669_v36 = vpop.f32.mrf.mxu0 }
 0x159   : > { %v1994_v46 = vadd.f32 %v8669_v36, %v10591_v45  ;;  %v10775_v6 = vadd.f32 %v2186_v4, %v1991_v15  ;;  %v8721_v13 = vpop.f32.mrf.mxu1  ;;  %v3724_v15 = vrot.slane %v14699_v61, 3 }
 0x15a   : > { %v1899_v53 = vpop.f32.mrf.mxu0 }
 0x15b   : > { %v10780_v38 = vadd.f32 %v1899_v53, %v10602_v10  ;;  %v10782_v62 = vadd.f32 %v8721_v13, %v1994_v46  ;;  %v10784_v51 = vpop.f32.mrf.mxu1 }
 0x15c   : > { %v8672_v31 = vpop.f32.mrf.mxu0  ;;  %8971 = vmatmul.mubr.bf16.gmra.mxu0 %v3719_v21  ;;  %v9647_v21 = vld [vmem:[%s14353_s3 + $0x70] sm:$0xff]  }
 0x15d   : > { %v1997_v45 = vadd.f32 %v8672_v31, %v10606_v33  ;;  %v8724_v28 = vpop.f32.mrf.mxu1  ;;  %8974 = vmatprep.mubr.bf16.mxu0 %v3721_v17  ;;  %v3723_v33 = vsel %vm14412_vm5, %v3720_v27, %v3722_v44  ;;  %v3725_v17 = vsel %vm14412_vm5, %v3722_v44, %v3724_v15  ;;  %9000 = vmatprep.subr.bf16.mxu1 %v9647_v21 }
 0x15e   : > { %v1912_v1 = vpop.f32.mrf.mxu0  ;;  %9001 = vmatpush3.bf16.msra.mxu1 %v9647_v21  ;;  %v9648_v21 = vld [vmem:[%s14353_s3 + $0x68] sm:$0xff]  }
 0x15f   : > { %v1995_v18 = vadd.f32 %v1912_v1, %v10611_v8  ;;  %v10790_v4 = vadd.f32 %v8724_v28, %v1997_v45  ;;  %v2202_v10 = vpop.f32.mrf.mxu1  ;;  %v3726_v1 = vrot.slane %v14700_v50, 3  ;;  %9002 = vmatprep.subr.bf16.mxu1 %v9648_v21 }
 0x160   : > { %v8673_v47 = vpop.f32.mrf.mxu0 }
 0x161   : > { %v1998_v36 = vadd.f32 %v8673_v47, %v10613_v12  ;;  %v10793_v46 = vadd.f32 %v2202_v10, %v1995_v18  ;;  %v8725_v13 = vpop.f32.mrf.mxu1  ;;  %v14701_v18 = vld [vmem:[#allocation4_spill] sm:$0xff] }
 0x162   : > { %v1915_v53 = vpop.f32.mrf.mxu0  ;;  %v3728_v44 = vrot.slane %v14701_v18, 3  ;;  %9003 = vmatpush3.bf16.msra.mxu1 %v9648_v21 }
 0x163   : > { %v10801_v8 = vadd.f32 %v1915_v53, %v10624_v0  ;;  %v10803_v31 = vadd.f32 %v8725_v13, %v1998_v36  ;;  %v10805_v45 = vpop.f32.mrf.mxu1 }
 0x164   : > { %v8676_v12 = vpop.f32.mrf.mxu0  ;;  %8975 = vmatmul.mubr.bf16.gmra.mxu0 %v3723_v33 }
 0x165   : > { %v2001_v27 = vadd.f32 %v8676_v12, %v10628_v60  ;;  %v8728_v28 = vpop.f32.mrf.mxu1  ;;  %8978 = vmatprep.mubr.bf16.mxu0 %v3725_v17  ;;  %v3727_v60 = vsel %vm14412_vm5, %v3724_v15, %v3726_v1  ;;  %v3729_v12 = vsel %vm14412_vm5, %v3726_v1, %v3728_v44 }
 0x166   : > { %v1928_v61 = vpop.f32.mrf.mxu0 }
 0x167   : > { %v1999_v0 = vadd.f32 %v1928_v61, %v10630_v55  ;;  %v10811_v10 = vadd.f32 %v8728_v28, %v2001_v27  ;;  %v2218_v47 = vpop.f32.mrf.mxu1  ;;  %v14703_v61 = vld [vmem:[#allocation3_spill] sm:$0xff] }
 0x168   : > { %v8677_v36 = vpop.f32.mrf.mxu0  ;;  %v3730_v18 = vrot.slane %v14703_v61, 3 }
 0x169   : > { %v2002_v13 = vadd.f32 %v8677_v36, %v10632_v54  ;;  %v10814_v53 = vadd.f32 %v2218_v47, %v1999_v0  ;;  %v8729_v33 = vpop.f32.mrf.mxu1  ;;  %v14704_v47 = vld [vmem:[#allocation20_spill] sm:$0xff] }
 0x16a   : > { %v1931_v17 = vpop.f32.mrf.mxu0  ;;  %v3732_v1 = vrot.slane %v14704_v47, 3 }
 0x16b   : > { %v10822_v55 = vadd.f32 %v1931_v17, %v10640_v16  ;;  %v10824_v27 = vadd.f32 %v8729_v33, %v2002_v13  ;;  %v10826_v28 = vpop.f32.mrf.mxu1 }
 0x16c   : > { %v8680_v54 = vpop.f32.mrf.mxu0  ;;  %8979 = vmatmul.mubr.bf16.gmra.mxu0 %v3727_v60 }
 0x16d   : > { %14702 = vst [vmem:[#allocation6_spill] sm:$0xff] %v10824_v27  ;;  %v2005_v15 = vadd.f32 %v8680_v54, %v10644_v22  ;;  %v8732_v50 = vpop.f32.mrf.mxu1  ;;  %8982 = vmatprep.mubr.bf16.mxu0 %v3729_v12  ;;  %v3731_v22 = vsel %vm14412_vm5, %v3728_v44, %v3730_v18  ;;  %v3733_v12 = vsel %vm14412_vm5, %v3730_v18, %v3732_v1  ;;  %v14706_v44 = vld [vmem:[#allocation21_spill] sm:$0xff] }
 0x16e   : > { %v1944_v0 = vpop.f32.mrf.mxu0  ;;  %v3734_v47 = vrot.slane %v14706_v44, 3 }
 0x16f   : > { %v2003_v16 = vadd.f32 %v1944_v0, %v10646_v37  ;;  %v10832_v36 = vadd.f32 %v8732_v50, %v2005_v15  ;;  %v2234_v13 = vpop.f32.mrf.mxu1  ;;  %v9649_v15 = vld [vmem:[%s14353_s3 + $0x60] sm:$0xff]  }
 0x170   : > { %v8681_v33 = vpop.f32.mrf.mxu0  ;;  %9004 = vmatprep.subr.bf16.mxu1 %v9649_v15 }
 0x171   : > { %v2006_v17 = vadd.f32 %v8681_v33, %v10649_v20  ;;  %v10835_v27 = vadd.f32 %v2234_v13, %v2003_v16  ;;  %v8733_v60 = vpop.f32.mrf.mxu1  ;;  %9005 = vmatpush3.bf16.msra.mxu1 %v9649_v15 }
 0x172   : > { %v1947_v21 = vpop.f32.mrf.mxu0 }
 0x173   : > { %v10840_v54 = vadd.f32 %v1947_v21, %v10660_v41  ;;  %v10842_v61 = vadd.f32 %v8733_v60, %v2006_v17  ;;  %v10844_v37 = vpop.f32.mrf.mxu1  ;;  %v14707_v41 = vld [vmem:[#allocation23_spill] sm:$0xff] }
 0x174   : > { %v8684_v20 = vpop.f32.mrf.mxu0  ;;  %8983 = vmatmul.mubr.bf16.gmra.mxu0 %v3731_v22  ;;  %v3736_v16 = vrot.slane %v14707_v41, 3 }
 0x175   : > { %14705 = vst [vmem:[#allocation8_spill] sm:$0xff] %v10842_v61  ;;  %v2009_v50 = vadd.f32 %v8684_v20, %v10664_v24  ;;  %v8736_v0 = vpop.f32.mrf.mxu1  ;;  %8986 = vmatprep.mubr.bf16.mxu0 %v3733_v12  ;;  %v3735_v12 = vsel %vm14412_vm5, %v3732_v1, %v3734_v47  ;;  %v3738_v1 = vrot.slane %v10168_v32, 3 }
 0x176   : > { %v1960_v18 = vpop.f32.mrf.mxu0  ;;  %v3737_v44 = vsel %vm14412_vm5, %v3734_v47, %v3736_v16  ;;  %v3740_v47 = vrot.slane %v10658_v52, 3  ;;  %v9651_v52 = vld [vmem:[%s14353_s3 + $0x38] sm:$0xff]  }
 0x177   : > { %v2007_v13 = vadd.f32 %v1960_v18, %v10668_v63  ;;  %v10853_v33 = vadd.f32 %v8736_v0, %v2009_v50  ;;  %v2250_v17 = vpop.f32.mrf.mxu1  ;;  %v9650_v63 = vld [vmem:[%s14353_s3 + $0x58] sm:$0xff]   ;;  %9050 = vmatprep.subr.bf16.mxu0 %v9651_v52 }
 0x178   : > { %v8685_v60 = vpop.f32.mrf.mxu0  ;;  %9006 = vmatprep.subr.bf16.mxu1 %v9650_v63  ;;  %v3741_v32 = vsel %vm14412_vm5, %v3738_v1, %v3740_v47  ;;  %9051 = vmatpush3.bf16.msra.mxu0 %v9651_v52 }
 0x179   : > { %v2010_v21 = vadd.f32 %v8685_v60, %v10670_v23  ;;  %v10856_v22 = vadd.f32 %v2250_v17, %v2007_v13  ;;  %v8737_v24 = vpop.f32.mrf.mxu1  ;;  %9007 = vmatpush3.bf16.msra.mxu1 %v9650_v63 }
 0x17a   : > { %v10859_v20 = vpop.f32.mrf.mxu0 }
 0x17b   : > { %v10862_v61 = vadd.f32 %v8737_v24, %v2010_v21  ;;  %v10864_v15 = vpop.f32.mrf.mxu1 }
 0x17c   : > { %v8756_v50 = vpop.f32.mrf.mxu0  ;;  %8987 = vmatmul.mubr.bf16.gmra.mxu0 %v3735_v12  ;;  %v3739_v12 = vsel %vm14412_vm5, %v3736_v16, %v3738_v1  ;;  %v3742_v16 = vrot.slane %v10680_v3, 3  ;;  %v9652_v1 = vld [vmem:[%s14353_s3 + $0x50] sm:$0xff]  }
 0x17d   : > { %v2649_v23 = vadd.f32 %v8756_v50, %v10692_v43  ;;  %v8808_v0 = vpop.f32.mrf.mxu1  ;;  %8990 = vmatprep.mubr.bf16.mxu0 %v3737_v44  ;;  %v226_v50 = vlaneseq  ;;  %9008 = vmatprep.subr.bf16.mxu1 %v9652_v1 }
 0x17e   : > { %v2504_v18 = vpop.f32.mrf.mxu0  ;;  %9009 = vmatpush3.bf16.msra.mxu1 %v9652_v1  ;;  %v3743_v52 = vsel %vm14412_vm5, %v3740_v47, %v3742_v16 }
 0x17f   : > { %v2647_v41 = vadd.f32 %v2504_v18, %v10695_v11  ;;  %v10873_v13 = vadd.f32 %v8808_v0, %v2649_v23  ;;  %v2838_v17 = vpop.f32.mrf.mxu1 }
 0x180   : > { %v8757_v60 = vpop.f32.mrf.mxu0 }
 0x181   : > { %v2650_v21 = vadd.f32 %v8757_v60, %v10703_v42  ;;  %v10876_v24 = vadd.f32 %v2838_v17, %v2647_v41  ;;  %v8809_v43 = vpop.f32.mrf.mxu1  ;;  %v9653_v41 = vld [vmem:[%s14353_s3 + $0x30] sm:$0xff]  }
 0x182   : > { %v10879_v44 = vpop.f32.mrf.mxu0  ;;  %9052 = vmatprep.subr.bf16.mxu0 %v9653_v41 }
 0x183   : > { %14708 = vst [vmem:[#allocation7_spill] sm:$0xff] %v10876_v24  ;;  %v10885_v11 = vadd.f32 %v8809_v43, %v2650_v21  ;;  %v10887_v63 = vpop.f32.mrf.mxu1  ;;  %9053 = vmatpush3.bf16.msra.mxu0 %v9653_v41 }
 0x184   : > { %v8760_v23 = vpop.f32.mrf.mxu0  ;;  %8991 = vmatmul.mubr.bf16.gmra.mxu0 %v3739_v12 }
 0x185   : > { %14709 = vst [vmem:[#allocation5_spill] sm:$0xff] %v10885_v11  ;;  %v2653_v42 = vadd.f32 %v8760_v23, %v10714_v7  ;;  %v8812_v0 = vpop.f32.mrf.mxu1  ;;  %8994 = vmatprep.mubr.bf16.mxu0 %v3741_v32  ;;  %v10900_v7 = vshrl.u32 %v226_v50, 7 }
 0x186   : > { %v2520_v18 = vpop.f32.mrf.mxu0 }
 0x187   : > { %v2651_v17 = vadd.f32 %v2520_v18, %v10717_v58  ;;  %v10898_v60 = vadd.f32 %v8812_v0, %v2653_v42  ;;  %v2854_v21 = vpop.f32.mrf.mxu1  ;;  %v9654_v58 = vld [vmem:[%s14353_s3 + $0x28] sm:$0xff]   ;;  %v10916_v0 = vadd.s32 16, %v10900_v7  ;;  %v9656_v18 = vld [vmem:[%s14353_s3 + $0x20] sm:$0xff]  }
 0x188   : > { %v8761_v43 = vpop.f32.mrf.mxu0  ;;  %9054 = vmatprep.subr.bf16.mxu0 %v9654_v58 }
 0x189   : > { %14710 = vst [vmem:[#allocation22_spill] sm:$0xff] %v10898_v60  ;;  %v2654_v3 = vadd.f32 %v8761_v43, %v10725_v48  ;;  %v10903_v12 = vadd.f32 %v2854_v21, %v2651_v17  ;;  %v8813_v32 = vpop.f32.mrf.mxu1  ;;  %9055 = vmatpush3.bf16.msra.mxu0 %v9654_v58 }
 0x18a   : > { %v10906_v23 = vpop.f32.mrf.mxu0  ;;  %9056 = vmatprep.subr.bf16.mxu0 %v9656_v18 }
 0x18b   : > { %14711 = vst [vmem:[#allocation24_spill] sm:$0xff] %v10903_v12  ;;  %v10911_v42 = vadd.f32 %v8813_v32, %v2654_v3  ;;  %v10913_v50 = vpop.f32.mrf.mxu1  ;;  %v10926_v43 = vmul.u32.u64.low 3817748708, %v10916_v0  ;;  %v10927_v3 = vmul.u32.u64.high 3817748708, %v10916_v0, %v10926_v43 }
 0x18c   : > { %v8764_v48 = vpop.f32.mrf.mxu0  ;;  %8995 = vmatmul.mubr.bf16.gmra.mxu0 %v3743_v52 }
 0x18d   : > { %14712 = vst [vmem:[#allocation25_spill] sm:$0xff] %v10911_v42  ;;  %v2657_v1 = vadd.f32 %v8764_v48, %v10733_v35  ;;  %v8816_v47 = vpop.f32.mrf.mxu1  ;;  %v10930_v52 = vmul.u32.u64.low 3817748708, %v10900_v7  ;;  %v10931_v35 = vmul.u32.u64.high 3817748708, %v10900_v7, %v10930_v52  ;;  %9057 = vmatpush3.bf16.msra.mxu0 %v9656_v18  ;;  %v10952_v18 = vadd.s32 8, %v10900_v7 }
 0x18e   : > { %v2536_v16 = vpop.f32.mrf.mxu0 }
 0x18f   : > { %v2655_v41 = vadd.f32 %v2536_v16, %v10736_v57  ;;  %v10923_v17 = vadd.f32 %v8816_v47, %v2657_v1  ;;  %v2870_v21 = vpop.f32.mrf.mxu1  ;;  %v10939_v1 = vadd.s32 24, %v10900_v7  ;;  %v9657_v47 = vld [vmem:[%s14353_s3 + $0x18] sm:$0xff]  }
 0x190   : > { %v8765_v32 = vpop.f32.mrf.mxu0  ;;  %9058 = vmatprep.subr.bf16.mxu0 %v9657_v47 }
 0x191   : > { %14713 = vst [vmem:[#allocation26_spill] sm:$0xff] %v10923_v17  ;;  %v2658_v58 = vadd.f32 %v8765_v32, %v10743_v59  ;;  %v10934_v48 = vadd.f32 %v2870_v21, %v2655_v41  ;;  %v8817_v42 = vpop.f32.mrf.mxu1  ;;  %v9655_v59 = vld [vmem:[%s14353_s3 + $0x48] sm:$0xff]   ;;  %9059 = vmatpush3.bf16.msra.mxu0 %v9657_v47 }
 0x192   : > { %v10936_v57 = vpop.f32.mrf.mxu0  ;;  %9010 = vmatprep.subr.bf16.mxu1 %v9655_v59 }
 0x193   : > { %14714 = vst [vmem:[#allocation9_spill] sm:$0xff] %v10934_v48  ;;  %v10944_v16 = vadd.f32 %v8817_v42, %v2658_v58  ;;  %v10946_v43 = vpop.f32.mrf.mxu1  ;;  %9011 = vmatpush3.bf16.msra.mxu1 %v9655_v59  ;;  %v10956_v42 = vmul.u32.u64.low 3817748708, %v10939_v1  ;;  %v10957_v58 = vmul.u32.u64.high 3817748708, %v10939_v1, %v10956_v42  ;;  %v269_v59 = vshrl.u32 %v10931_v35, 4  ;;  %v9660_v35 = vld [vmem:[%s14353_s3 + $0x8] sm:$0xff]  }
 0x194   : > { %v8768_v41 = vpop.f32.mrf.mxu0  ;;  %v10971_v60 = vmul.u32.u64.low 3817748708, %v10952_v18  ;;  %v10972_v42 = vmul.u32.u64.high 3817748708, %v10952_v18, %v10971_v60 }
 0x195   : > { %14715 = vst [vmem:[#allocation10_spill] sm:$0xff] %v10944_v16  ;;  %v2661_v21 = vadd.f32 %v8768_v41, %v10751_v25  ;;  %v8820_v32 = vpop.f32.mrf.mxu1  ;;  %v9659_v16 = vld [vmem:[%s14353_s3 + $0x10] sm:$0xff]   ;;  %v291_v25 = vshrl.u32 %v10927_v3, 4  ;;  %v10967_v41 = vadd.s32 48, %v10900_v7  ;;  %v9658_v3 = vld [vmem:[%s14353_s3 + $0x40] sm:$0xff]  }
 0x196   : > { %v2552_v52 = vpop.f32.mrf.mxu0  ;;  %9060 = vmatprep.subr.bf16.mxu0 %v9659_v16  ;;  %9012 = vmatprep.subr.bf16.mxu1 %v9658_v3 }
 0x197   : > { %v2659_v48 = vadd.f32 %v2552_v52, %v10754_v40  ;;  %v10963_v17 = vadd.f32 %v8820_v32, %v2661_v21  ;;  %v2886_v12 = vpop.f32.mrf.mxu1  ;;  %9061 = vmatpush3.bf16.msra.mxu0 %v9659_v16  ;;  %v292_v52 = vmul.u32 18, %v291_v25  ;;  %v270_v16 = vmul.u32 18, %v269_v59  ;;  %9013 = vmatpush3.bf16.msra.mxu1 %v9658_v3  ;;  %v9661_v59 = vld [vmem:[%s14353_s3] sm:$0xff]  }
 0x198   : > { %v8769_v47 = vpop.f32.mrf.mxu0  ;;  %9062 = vmatprep.subr.bf16.mxu0 %v9660_v35  ;;  %v2270_v25 = vadd.f32 %v10727_v26, %v10723_v49  ;;  %v302_v49 = vshrl.u32 %v10957_v58, 4  ;;  %v280_v26 = vshrl.u32 %v10972_v42, 4 }
 0x199   : > { %v2662_v11 = vadd.f32 %v8769_v47, %v10761_v56  ;;  %v10975_v24 = vadd.f32 %v2886_v12, %v2659_v48  ;;  %v8821_v40 = vpop.f32.mrf.mxu1  ;;  %v10990_v56 = vmul.u32.u64.low 3817748708, %v10967_v41  ;;  %v10991_v12 = vmul.u32.u64.high 3817748708, %v10967_v41, %v10990_v56 }
 0x19a   : > { %v10977_v21 = vpop.f32.mrf.mxu0 }
 0x19b   : > { %14716 = vst [vmem:[#allocation11_spill] sm:$0xff] %v10975_v24  ;;  %v10985_v32 = vadd.f32 %v8821_v40, %v2662_v11  ;;  %v10987_v60 = vpop.f32.mrf.mxu1  ;;  %9063 = vmatpush3.bf16.msra.mxu0 %v9660_v35  ;;  %v1666_v11 = vadd.f32 %v10682_v9, %v10672_v14  ;;  %v2266_v40 = vadd.f32 %v10705_v5, %v10701_v2 }
 0x19c   : > { %v8772_v48 = vpop.f32.mrf.mxu0  ;;  %v11009_v14 = vsub.s32 %v10916_v0, %v292_v52  ;;  %v11013_v9 = vadd.f32 %v10763_v39, %v10759_v29  ;;  %v11016_v5 = vsub.s32 %v10900_v7, %v270_v16  ;;  %9064 = vmatprep.subr.bf16.mxu0 %v9661_v59  ;;  %v11028_v29 = vadd.s32 32, %v10900_v7 }
 0x19d   : > { %14717 = vst [vmem:[#allocation12_spill] sm:$0xff] %v10985_v32  ;;  %v2665_v47 = vadd.f32 %v8772_v48, %v10769_v19  ;;  %v8824_v24 = vpop.f32.mrf.mxu1  ;;  %v2274_v19 = vadd.f32 %v10745_v30, %v10741_v34  ;;  %v11022_v34 = vadd.f32 %v10784_v51, %v10780_v38  ;;  %v11032_v39 = vadd.f32 %v10805_v45, %v10801_v8 }
 0x19e   : > { %v2568_v32 = vpop.f32.mrf.mxu0  ;;  %14718 = vst [vmem:[#allocation13_spill] sm:$0xff] %v11009_v14  ;;  %14719 = vst [vmem:[#allocation14_spill] sm:$0xff] %v11016_v5  ;;  %v2008_v0 = vadd.f32 %v10859_v20, %v1666_v11  ;;  %v2648_v58 = vadd.f32 %v10879_v44, %v2266_v40  ;;  %v11039_v38 = vadd.s32 56, %v10900_v7  ;;  %vm661_vm6 = vcmp.ne.s32.totalorder %v11009_v14, 0 }
 0x19f   : > { %v2663_v3 = vadd.f32 %v2568_v32, %v10775_v6  ;;  %v11006_v35 = vadd.f32 %v8824_v24, %v2665_v47  ;;  %v2902_v56 = vpop.f32.mrf.mxu1  ;;  %9065 = vmatpush3.bf16.msra.mxu0 %v9661_v59  ;;  %vm697_vm7 = vcmp.lt.s32.totalorder %v11009_v14, 0  ;;  %v335_v8 = vshrl.u32 %v10991_v12, 4 }
 0x1a0   : > { %v8773_v2 = vpop.f32.mrf.mxu0  ;;  %vm659_vm8 = vcmp.ne.s32.totalorder %v11016_v5, 0  ;;  %vm695_vm9 = vcmp.lt.s32.totalorder %v11016_v5, 0  ;;  %v303_v20 = vmul.u32 18, %v302_v49  ;;  %v281_v44 = vmul.u32 18, %v280_v26  ;;  %vm11076_vm10 = vmand %vm697_vm7, %vm661_vm6 }
 0x1a1   : > { %v2666_v30 = vadd.f32 %v8773_v2, %v10782_v62  ;;  %v11025_v6 = vadd.f32 %v2902_v56, %v2663_v3  ;;  %v8825_v24 = vpop.f32.mrf.mxu1  ;;  %v11052_v48 = vmul.u32.u64.low 3817748708, %v11028_v29  ;;  %v11053_v16 = vmul.u32.u64.high 3817748708, %v11028_v29, %v11052_v48  ;;  %vm11092_vm11 = vmand %vm695_vm9, %vm659_vm8 }
 0x1a2   : > { %v11036_v42 = vpop.f32.mrf.mxu0  ;;  %v11056_v47 = vadd.s32 40, %v10900_v7  ;;  %v2652_v11 = vadd.f32 %v10906_v23, %v2270_v25  ;;  %v11060_v40 = vadd.s32 18, %v11009_v14  ;;  %v14721_v23 = vmov 0 }
 0x1a3   : > { %v11041_v62 = vadd.f32 %v8825_v24, %v2666_v30  ;;  %v11043_v51 = vpop.f32.mrf.mxu1  ;;  %v11063_v59 = vmul.u32.u64.low 3817748708, %v11039_v38  ;;  %v11064_v3 = vmul.u32.u64.high 3817748708, %v11039_v38, %v11063_v59  ;;  %v14722_v23 = vsel %vm11076_vm10, 4294967295, %v14721_v23 }
 0x1a4   : > { %v8776_v45 = vpop.f32.mrf.mxu0  ;;  %14720 = vst [vmem:[#allocation15_spill] sm:$0xff] %v11060_v40  ;;  %14723 = vst [vmem:[#allocation16_spill] sm:$0xff] %v14722_v23  ;;  %v11081_v25 = vadd.s32 18, %v11016_v5  ;;  %v336_v26 = vmul.u32 18, %v335_v8  ;;  %v11085_v30 = vadd.f32 %v10826_v28, %v10822_v55  ;;  %v11100_v8 = vsub.s32 %v10952_v18, %v281_v44 }
 0x1a5   : > { %v2669_v32 = vadd.f32 %v8776_v45, %v10790_v4  ;;  %v8828_v52 = vpop.f32.mrf.mxu1  ;;  %v9662_v4 = vld [vmem:[%s14353_s3 + $0xb8] sm:$0xff]   ;;  %v14725_v45 = vmov 0  ;;  %v11111_v48 = vadd.f32 %v10844_v37, %v10840_v54  ;;  %v11117_v18 = vadd.f32 %v10887_v63, %v2648_v58 }
 0x1a6   : > { %v2584_v12 = vpop.f32.mrf.mxu0  ;;  %14724 = vst [vmem:[#allocation17_spill] sm:$0xff] %v11081_v25  ;;  %v14726_v45 = vsel %vm11092_vm11, 4294967295, %v14725_v45  ;;  %14729 = vst [vmem:[#allocation4_spill] sm:$0xff] %v11100_v8  ;;  %9102 = vmatprep.subr.bf16.mxu1 %v9662_v4  ;;  %vm660_vm14 = vcmp.ne.s32.totalorder %v11100_v8, 0  ;;  %vm696_vm15 = vcmp.lt.s32.totalorder %v11100_v8, 0  ;;  %v11155_v4 = vadd.s32 18, %v11100_v8 }
 0x1a7   : > { %v2667_v56 = vadd.f32 %v2584_v12, %v10793_v46  ;;  %v11070_v2 = vadd.f32 %v8828_v52, %v2669_v32  ;;  %v2918_v49 = vpop.f32.mrf.mxu1  ;;  %v2656_v46 = vadd.f32 %v10936_v57, %v2274_v19  ;;  %14727 = vst [vmem:[#allocation18_spill] sm:$0xff] %v14726_v45  ;;  %v11097_v32 = vsub.s32 %v10939_v1, %v303_v20  ;;  %vm11190_vm3 = vmand %vm696_vm15, %vm660_vm14 }
 0x1a8   : > { %v8777_v24 = vpop.f32.mrf.mxu0  ;;  %v11106_v19 = vmul.u32.u64.low 3817748708, %v11056_v47  ;;  %v11107_v52 = vmul.u32.u64.high 3817748708, %v11056_v47, %v11106_v19  ;;  %v11114_v1 = vadd.f32 %v10864_v15, %v2008_v0  ;;  %v11120_v20 = vadd.f32 %v10913_v50, %v2652_v11  ;;  %14732 = vst [vmem:[#allocation21_spill] sm:$0xff] %v11155_v4 }
 0x1a9   : > { %14728 = vst [vmem:[#allocation19_spill] sm:$0xff] %v11097_v32  ;;  %v2670_v55 = vadd.f32 %v8777_v24, %v10803_v31  ;;  %v11103_v28 = vadd.f32 %v2918_v49, %v2667_v56  ;;  %v8829_v57 = vpop.f32.mrf.mxu1  ;;  %v11137_v15 = vsub.s32 %v10967_v41, %v336_v26  ;;  %v11140_v63 = vadd.f32 %v10946_v43, %v2656_v46 }
 0x1aa   : > { %v11122_v31 = vpop.f32.mrf.mxu0  ;;  %vm662_vm12 = vcmp.ne.s32.totalorder %v11097_v32, 0  ;;  %vm698_vm13 = vcmp.lt.s32.totalorder %v11097_v32, 0  ;;  %v11145_v0 = vadd.s32 80, %v10900_v7  ;;  %v11149_v59 = vadd.s32 18, %v11097_v32 }
 0x1ab   : > { %v11124_v44 = vadd.f32 %v8829_v57, %v2670_v55  ;;  %v11126_v12 = vpop.f32.mrf.mxu1  ;;  %14730 = vst [vmem:[#allocation3_spill] sm:$0xff] %v11137_v15  ;;  %v313_v41 = vshrl.u32 %v11053_v16, 4  ;;  %v346_v56 = vshrl.u32 %v11064_v3, 4  ;;  %v11159_v49 = vadd.s32 64, %v10900_v7  ;;  %vm11171_vm1 = vmand %vm698_vm13, %vm662_vm12  ;;  %v14736_v55 = vld [vmem:[#allocation6_spill] sm:$0xff] }
 0x1ac   : > { %v8780_v50 = vpop.f32.mrf.mxu0  ;;  %14731 = vst [vmem:[#allocation20_spill] sm:$0xff] %v11149_v59  ;;  %vm665_vm0 = vcmp.ne.s32.totalorder %v11137_v15, 0  ;;  %v14733_v3 = vmov 0  ;;  %vm701_vm2 = vcmp.lt.s32.totalorder %v11137_v15, 0  ;;  %v14759_v5 = vmov 0 }
 0x1ad   : > { %v2673_v58 = vadd.f32 %v8780_v50, %v10811_v10  ;;  %v8832_v11 = vpop.f32.mrf.mxu1  ;;  %v2660_v10 = vadd.f32 %v10977_v21, %v11013_v9  ;;  %v14734_v3 = vsel %vm11171_vm1, 4294967295, %v14733_v3  ;;  %v347_v54 = vmul.u32 18, %v346_v56  ;;  %vm11223_vm6 = vmand %vm701_vm2, %vm665_vm0 }
 0x1ae   : > { %v2600_v43 = vpop.f32.mrf.mxu0  ;;  %14735 = vst [vmem:[#allocation23_spill] sm:$0xff] %v14734_v3  ;;  %v11177_v21 = vmul.u32.u64.low 3817748708, %v11145_v0  ;;  %v11178_v9 = vmul.u32.u64.high 3817748708, %v11145_v0, %v11177_v21 }
 0x1af   : > { %v2671_v26 = vadd.f32 %v2600_v43, %v10814_v53  ;;  %v11164_v46 = vadd.f32 %v8832_v11, %v2673_v58  ;;  %v2934_v24 = vpop.f32.mrf.mxu1  ;;  %v11181_v53 = vadd.s32 88, %v10900_v7  ;;  %v14738_v58 = vmov 0 }
 0x1b0   : > { %v8781_v16 = vpop.f32.mrf.mxu0  ;;  %v14739_v58 = vsel %vm11190_vm3, 4294967295, %v14738_v58  ;;  %v314_v11 = vmul.u32 18, %v313_v41  ;;  %v324_v43 = vshrl.u32 %v11107_v52, 4  ;;  %v11213_v52 = vadd.s32 18, %v11137_v15 }
 0x1b1   : > { %v2674_v57 = vadd.f32 %v8781_v16, %v14736_v55  ;;  %v11184_v19 = vadd.f32 %v2934_v24, %v2671_v26  ;;  %v8833_v50 = vpop.f32.mrf.mxu1  ;;  %14740 = vst [vmem:[#allocation27_spill] sm:$0xff] %v14739_v58  ;;  %v11198_v37 = vmul.u32.u64.low 3817748708, %v11159_v49  ;;  %v11199_v16 = vmul.u32.u64.high 3817748708, %v11159_v49, %v11198_v37 }
 0x1b2   : > { %v11195_v21 = vpop.f32.mrf.mxu0  ;;  %v11202_v26 = vadd.s32 72, %v10900_v7  ;;  %14742 = vst [vmem:[#allocation29_spill] sm:$0xff] %v11213_v52  ;;  %v11233_v3 = vsub.s32 %v11028_v29, %v314_v11  ;;  %v325_v58 = vmul.u32 18, %v324_v43  ;;  %v11236_v37 = vadd.f32 %v10987_v60, %v2660_v10 }
 0x1b3   : > { %14737 = vst [vmem:[#allocation6_spill] sm:$0xff] %v11184_v19  ;;  %v11204_v24 = vadd.f32 %v8833_v50, %v2674_v57  ;;  %v11206_v55 = vpop.f32.mrf.mxu1  ;;  %v14743_v57 = vmov 0  ;;  %v11228_v50 = vmul.u32.u64.low 3817748708, %v11181_v53  ;;  %v11229_v41 = vmul.u32.u64.high 3817748708, %v11181_v53, %v11228_v50 }
 0x1b4   : > { %v8784_v56 = vpop.f32.mrf.mxu0  ;;  %v14744_v57 = vsel %vm11223_vm6, 4294967295, %v14743_v57  ;;  %14746 = vst [vmem:[#allocation31_spill] sm:$0xff] %v11233_v3  ;;  %v11239_v4 = vsub.s32 %v11039_v38, %v347_v54  ;;  %v11242_v14 = vmul.u32.u64.low 3817748708, %v11202_v26  ;;  %v11243_v40 = vmul.u32.u64.high 3817748708, %v11202_v26, %v11242_v14 }
 0x1b5   : > { %14741 = vst [vmem:[#allocation28_spill] sm:$0xff] %v11204_v24  ;;  %14745 = vst [vmem:[#allocation30_spill] sm:$0xff] %v14744_v57  ;;  %v2677_v32 = vadd.f32 %v8784_v56, %v10832_v36  ;;  %v8836_v59 = vpop.f32.mrf.mxu1  ;;  %v11253_v60 = vadd.s32 112, %v10900_v7  ;;  %v2664_v38 = vadd.f32 %v11036_v42, %v11022_v34  ;;  %v14396_v10 = vmov 0.0|0.0  }
 0x1b6   : > { %v2616_v8 = vpop.f32.mrf.mxu0  ;;  %14747 = vst [vmem:[#allocation32_spill] sm:$0xff] %v11239_v4  ;;  %v11258_v14 = vrot.slane %v14396_v10, 3  ;;  %vm663_vm7 = vcmp.ne.s32.totalorder %v11233_v3, 0  ;;  %v11269_v34 = vsub.s32 %v11056_v47, %v325_v58  ;;  %vm699_vm8 = vcmp.lt.s32.totalorder %v11233_v3, 0 }
 0x1b7   : > { %v2675_v50 = vadd.f32 %v2616_v8, %v10835_v27  ;;  %v11246_v23 = vadd.f32 %v8836_v59, %v2677_v32  ;;  %v2950_v36 = vpop.f32.mrf.mxu1  ;;  %v379_v27 = vshrl.u32 %v11178_v9, 4  ;;  %v14397_v32 = vmov 0   ;;  %v14751_v59 = vld [vmem:[#allocation8_spill] sm:$0xff]  ;;  %vm11315_vm15 = vmand %vm699_vm8, %vm663_vm7 }
 0x1b8   : > { %v8785_v54 = vpop.f32.mrf.mxu0  ;;  %14749 = vst [vmem:[#allocation34_spill] sm:$0xff] %v11258_v14  ;;  %v11262_v8 = vrot.slane %v14397_v32, 2  ;;  %14753 = vst [vmem:[#allocation36_spill] sm:$0xff] %v11269_v34  ;;  %v11275_v9 = vadd.s32 18, %v11233_v3  ;;  %vm666_vm9 = vcmp.ne.s32.totalorder %v11239_v4, 0  ;;  %v357_v10 = vshrl.u32 %v11199_v16, 4 }
 0x1b9   : > { %14748 = vst [vmem:[#allocation33_spill] sm:$0xff] %v11246_v23  ;;  %v2678_v11 = vadd.f32 %v8785_v54, %v14751_v59  ;;  %v11265_v43 = vadd.f32 %v2950_v36, %v2675_v50  ;;  %v8837_v56 = vpop.f32.mrf.mxu1  ;;  %v11284_v36 = vmul.u32.u64.low 3817748708, %v11253_v60  ;;  %v11285_v59 = vmul.u32.u64.high 3817748708, %v11253_v60, %v11284_v36 }
 0x1ba   : > { %14750 = vst [vmem:[#allocation35_spill] sm:$0xff] %v11262_v8  ;;  %v11271_v42 = vpop.f32.mrf.mxu0  ;;  %14754 = vst [vmem:[#allocation37_spill] sm:$0xff] %v11275_v9  ;;  %v11288_v47 = vadd.s32 96, %v10900_v7  ;;  %vm702_vm12 = vcmp.lt.s32.totalorder %v11239_v4, 0  ;;  %v380_v29 = vmul.u32 18, %v379_v27  ;;  %v390_v32 = vshrl.u32 %v11229_v41, 4 }
 0x1bb   : > { %14752 = vst [vmem:[#allocation8_spill] sm:$0xff] %v11265_v43  ;;  %v11279_v54 = vadd.f32 %v8837_v56, %v2678_v11  ;;  %v11281_v50 = vpop.f32.mrf.mxu1  ;;  %v11293_v14 = vadd.s32 120, %v10900_v7  ;;  %v11297_v56 = vadd.s32 18, %v11239_v4  ;;  %vm664_vm13 = vcmp.ne.s32.totalorder %v11269_v34, 0  ;;  %vm11327_vm0 = vmand %vm702_vm12, %vm666_vm9 }
 0x1bc   : > { %v8788_v58 = vpop.f32.mrf.mxu0  ;;  %v11301_v36 = vadd.s32 104, %v10900_v7  ;;  %vm700_vm14 = vcmp.lt.s32.totalorder %v11269_v34, 0  ;;  %v11305_v27 = vadd.s32 18, %v11269_v34  ;;  %v358_v41 = vmul.u32 18, %v357_v10 }
 0x1bd   : > { %14755 = vst [vmem:[#allocation38_spill] sm:$0xff] %v11279_v54  ;;  %v2681_v16 = vadd.f32 %v8788_v58, %v10853_v33  ;;  %v8840_v11 = vpop.f32.mrf.mxu1  ;;  %14756 = vst [vmem:[#allocation39_spill] sm:$0xff] %v11297_v56  ;;  %v368_v52 = vshrl.u32 %v11243_v40, 4  ;;  %v14760_v5 = vsel %vm11315_vm15, 4294967295, %v14759_v5  ;;  %v11332_v40 = vsub.s32 %v11145_v0, %v380_v29 }
 0x1be   : > { %v2632_v15 = vpop.f32.mrf.mxu0  ;;  %14757 = vst [vmem:[#allocation40_spill] sm:$0xff] %v11305_v27  ;;  %14761 = vst [vmem:[#allocation42_spill] sm:$0xff] %v14760_v5  ;;  %v11320_v25 = vmul.u32.u64.low 3817748708, %v11288_v47  ;;  %v11321_v45 = vmul.u32.u64.high 3817748708, %v11288_v47, %v11320_v25  ;;  %v14767_v43 = vmov 0  ;;  %v14789_v9 = vmov 0 }
 0x1bf   : > { %v2679_v33 = vadd.f32 %v2632_v15, %v10856_v22  ;;  %v11309_v58 = vadd.f32 %v8840_v11, %v2681_v16  ;;  %v2966_v57 = vpop.f32.mrf.mxu1  ;;  %v14762_v22 = vmov 0  ;;  %14765 = vst [vmem:[#allocation44_spill] sm:$0xff] %v11332_v40  ;;  %v391_v15 = vmul.u32 18, %v390_v32  ;;  %vm11345_vm2 = vmand %vm700_vm14, %vm664_vm13 }
 0x1c0   : > { %v8789_v10 = vpop.f32.mrf.mxu0  ;;  %v14763_v22 = vsel %vm11327_vm0, 4294967295, %v14762_v22  ;;  %v11335_v16 = vmul.u32.u64.low 3817748708, %v11293_v14  ;;  %v11336_v11 = vmul.u32.u64.high 3817748708, %v11293_v14, %v11335_v16  ;;  %v14768_v43 = vsel %vm11345_vm2, 4294967295, %v14767_v43 }
 0x1c1   : > { %14758 = vst [vmem:[#allocation41_spill] sm:$0xff] %v11309_v58  ;;  %14764 = vst [vmem:[#allocation43_spill] sm:$0xff] %v14763_v22  ;;  %v2682_v58 = vadd.f32 %v8789_v10, %v10862_v61  ;;  %v11339_v25 = vadd.f32 %v2966_v57, %v2679_v33  ;;  %v8841_v54 = vpop.f32.mrf.mxu1  ;;  %v11350_v0 = vmul.u32.u64.low 3817748708, %v11301_v36  ;;  %v11351_v29 = vmul.u32.u64.high 3817748708, %v11301_v36, %v11350_v0 }
 0x1c2   : > { %14769 = vst [vmem:[#allocation46_spill] sm:$0xff] %v14768_v43  ;;  %v11354_v32 = vadd.f32 %v11043_v51, %v2664_v38  ;;  %v11356_v16 = vpop.f32.mrf.mxu0  ;;  %v14771_v57 = vmov 0   ;;  %v11366_v10 = vadd.s32 144, %v10900_v7  ;;  %v369_v38 = vmul.u32 18, %v368_v52 }
 0x1c3   : > { %14766 = vst [vmem:[#allocation45_spill] sm:$0xff] %v11339_v25  ;;  %v11363_v33 = vrot.slane %v14771_v57, 3  ;;  %v11368_v25 = vadd.f32 %v8841_v54, %v2682_v58  ;;  %v11370_v23 = vpop.f32.mrf.mxu1  ;;  %v423_v0 = vshrl.u32 %v11285_v59, 4  ;;  %v2668_v61 = vadd.f32 %v11122_v31, %v11032_v39 }
 0x1c4   : > { %14770 = vst [vmem:[#allocation47_spill] sm:$0xff] %v11354_v32  ;;  %v8860_v3 = vpop.f32.mrf.mxu0  ;;  %vm669_vm7 = vcmp.ne.s32.totalorder %v11332_v40, 0  ;;  %v11385_v58 = vsub.s32 %v11159_v49, %v358_v41  ;;  %vm705_vm8 = vcmp.lt.s32.totalorder %v11332_v40, 0  ;;  %v11394_v39 = vadd.s32 18, %v11332_v40 }
 0x1c5   : > { %14772 = vst [vmem:[#allocation48_spill] sm:$0xff] %v11363_v33  ;;  %14773 = vst [vmem:[#allocation49_spill] sm:$0xff] %v11368_v25  ;;  %v11388_v22 = vadd.f32 %v8860_v3, %v10873_v13  ;;  %v11390_v52 = vpop.f32.mrf.mxu1  ;;  %v11397_v31 = vsub.s32 %v11181_v53, %v391_v15  ;;  %v11402_v49 = vmul.u32.u64.low 3817748708, %v11366_v10  ;;  %v11403_v41 = vmul.u32.u64.high 3817748708, %v11366_v10, %v11402_v49  ;;  %v14777_v3 = vld [vmem:[#allocation7_spill] sm:$0xff] }
 0x1c6   : > { %14774 = vst [vmem:[#allocation50_spill] sm:$0xff] %v11385_v58  ;;  %14775 = vst [vmem:[#allocation51_spill] sm:$0xff] %v11394_v39  ;;  %v3128_v59 = vpop.f32.mrf.mxu0  ;;  %v11406_v13 = vadd.s32 128, %v10900_v7  ;;  %v11414_v56 = vsub.s32 %v11202_v26, %v369_v38  ;;  %v424_v53 = vmul.u32 18, %v423_v0  ;;  %v401_v15 = vshrl.u32 %v11321_v45, 4 }
 0x1c7   : > { %14776 = vst [vmem:[#allocation52_spill] sm:$0xff] %v11397_v31  ;;  %v11409_v54 = vadd.f32 %v3128_v59, %v14777_v3  ;;  %v11411_v4 = vpop.f32.mrf.mxu1  ;;  %vm667_vm9 = vcmp.ne.s32.totalorder %v11385_v58, 0  ;;  %vm703_vm12 = vcmp.lt.s32.totalorder %v11385_v58, 0  ;;  %v434_v49 = vshrl.u32 %v11336_v11, 4  ;;  %v14779_v59 = vld [vmem:[#allocation5_spill] sm:$0xff]  ;;  %vm11439_vm4 = vmand %vm705_vm8, %vm669_vm7 }
 0x1c8   : > { %14778 = vst [vmem:[#allocation7_spill] sm:$0xff] %v11414_v56  ;;  %v8861_v34 = vpop.f32.mrf.mxu0  ;;  %v11421_v51 = vadd.s32 152, %v10900_v7  ;;  %vm670_vm13 = vcmp.ne.s32.totalorder %v11397_v31, 0  ;;  %vm706_vm14 = vcmp.lt.s32.totalorder %v11397_v31, 0  ;;  %v412_v45 = vshrl.u32 %v11351_v29, 4  ;;  %vm11456_vm5 = vmand %vm703_vm12, %vm667_vm9 }
 0x1c9   : > { %v11424_v3 = vadd.f32 %v8861_v34, %v14779_v59  ;;  %v11426_v8 = vpop.f32.mrf.mxu1  ;;  %v2672_v26 = vadd.f32 %v11195_v21, %v11085_v30  ;;  %v14780_v34 = vmov 0  ;;  %v11444_v11 = vadd.s32 18, %v11385_v58  ;;  %vm11471_vm8 = vmand %vm706_vm14, %vm670_vm13 }
 0x1ca   : > { %v11433_v38 = vpop.f32.mrf.mxu0  ;;  %v14781_v34 = vsel %vm11439_vm4, 4294967295, %v14780_v34  ;;  %v11447_v0 = vmul.u32.u64.low 3817748708, %v11406_v13  ;;  %v11448_v59 = vmul.u32.u64.high 3817748708, %v11406_v13, %v11447_v0  ;;  %v14784_v30 = vmov 0 }
 0x1cb   : > { %14782 = vst [vmem:[#allocation5_spill] sm:$0xff] %v14781_v34  ;;  %14783 = vst [vmem:[#allocation53_spill] sm:$0xff] %v11444_v11  ;;  %v11450_v29 = vpop.f32.mrf.mxu1  ;;  %v14785_v30 = vsel %vm11456_vm5, 4294967295, %v14784_v30  ;;  %v11461_v21 = vadd.s32 18, %v11397_v31  ;;  %vm668_vm7 = vcmp.ne.s32.totalorder %v11414_v56, 0  ;;  %v11465_v27 = vsub.s32 %v11253_v60, %v424_v53  ;;  %v14793_v53 = vld [vmem:[#allocation22_spill] sm:$0xff] }
 0x1cc   : > { %14786 = vst [vmem:[#allocation54_spill] sm:$0xff] %v14785_v30  ;;  %v402_v43 = vmul.u32 18, %v401_v15  ;;  %v8864_v0 = vpop.f32.mrf.mxu0  ;;  %v14790_v9 = vsel %vm11471_vm8, 4294967295, %v14789_v9  ;;  %vm704_vm9 = vcmp.lt.s32.totalorder %v11414_v56, 0  ;;  %v435_v5 = vmul.u32 18, %v434_v49  ;;  %v14816_v34 = vld [vmem:[#allocation9_spill] sm:$0xff] }
 0x1cd   : > { %14787 = vst [vmem:[#allocation55_spill] sm:$0xff] %v11461_v21  ;;  %14788 = vst [vmem:[#allocation56_spill] sm:$0xff] %v11465_v27  ;;  %v11477_v25 = vmul.u32.u64.low 3817748708, %v11421_v51  ;;  %v11478_v33 = vmul.u32.u64.high 3817748708, %v11421_v51, %v11477_v25  ;;  %v11481_v60 = vadd.f32 %v11126_v12, %v2668_v61  ;;  %v11484_v15 = vadd.f32 %v8864_v0, %v14793_v53  ;;  %v11486_v24 = vpop.f32.mrf.mxu1  ;;  %v14795_v0 = vld [vmem:[#allocation24_spill] sm:$0xff] }
 0x1ce   : > { %14791 = vst [vmem:[#allocation57_spill] sm:$0xff] %v14790_v9  ;;  %v413_v32 = vmul.u32 18, %v412_v45  ;;  %v11489_v19 = vadd.s32 136, %v10900_v7  ;;  %v3144_v57 = vpop.f32.mrf.mxu0  ;;  %v11500_v25 = vadd.s32 18, %v11414_v56  ;;  %v467_v61 = vshrl.u32 %v11403_v41, 4  ;;  %vm11519_vm12 = vmand %vm704_vm9, %vm668_vm7 }
 0x1cf   : > { %14792 = vst [vmem:[#allocation58_spill] sm:$0xff] %v11481_v60  ;;  %v11504_v45 = vadd.f32 %v11206_v55, %v2672_v26  ;;  %v11507_v53 = vadd.f32 %v3144_v57, %v14795_v0  ;;  %v11509_v60 = vpop.f32.mrf.mxu1  ;;  %v14796_v12 = vmov 0  ;;  %v11524_v55 = vsub.s32 %v11288_v47, %v402_v43  ;;  %v14801_v0 = vld [vmem:[#allocation25_spill] sm:$0xff] }
 0x1d0   : > { %14794 = vst [vmem:[#allocation22_spill] sm:$0xff] %v11500_v25  ;;  %v14797_v12 = vsel %vm11519_vm12, 4294967295, %v14796_v12  ;;  %v2676_v57 = vadd.f32 %v11271_v42, %v11111_v48  ;;  %v8865_v41 = vpop.f32.mrf.mxu0  ;;  %vm673_vm13 = vcmp.ne.s32.totalorder %v11465_v27, 0  ;;  %vm709_vm14 = vcmp.lt.s32.totalorder %v11465_v27, 0  ;;  %v11548_v48 = vld [vmem:[%s14353_s3 + $0xf8] sm:$0xff]  }
 0x1d1   : > { %14798 = vst [vmem:[#allocation24_spill] sm:$0xff] %v14797_v12  ;;  %14799 = vst [vmem:[#allocation59_spill] sm:$0xff] %v11524_v55  ;;  %v11531_v26 = vsub.s32 %v11293_v14, %v435_v5  ;;  %v11534_v49 = vadd.f32 %v8865_v41, %v14801_v0  ;;  %v11536_v31 = vpop.f32.mrf.mxu1  ;;  %v11539_v21 = vsub.s32 %v11301_v36, %v413_v32  ;;  %v468_v14 = vmul.u32 18, %v467_v61 }
 0x1d2   : > { %v11542_v43 = vmul.u32.u64.low 3817748708, %v11489_v19  ;;  %v11543_v47 = vmul.u32.u64.high 3817748708, %v11489_v19, %v11542_v43  ;;  %14803 = vst [vmem:[#allocation61_spill] sm:$0xff] %v11548_v48  ;;  %v11550_v42 = vpop.f32.mrf.mxu0  ;;  %v445_v36 = vshrl.u32 %v11448_v59, 4  ;;  %v11558_v32 = vadd.s32 176, %v10900_v7  ;;  %9154 = vmatprep.subr.bf16.mxu0 %v11548_v48  ;;  %vm11577_vm8 = vmand %vm709_vm14, %vm673_vm13  ;;  %v14809_v48 = vld [vmem:[#allocation26_spill] sm:$0xff] }
 0x1d3   : > { %14800 = vst [vmem:[#allocation60_spill] sm:$0xff] %v11531_v26  ;;  %14802 = vst [vmem:[#allocation25_spill] sm:$0xff] %v11539_v21  ;;  %v11560_v41 = vpop.f32.mrf.mxu1  ;;  %v11563_v0 = vadd.s32 18, %v11465_v27  ;;  %v11568_v43 = vadd.s32 18, %v11524_v55  ;;  %v2680_v59 = vadd.f32 %v11356_v16, %v11114_v1  ;;  %v14806_v5 = vmov 0 }
 0x1d4   : > { %v8868_v61 = vpop.f32.mrf.mxu0  ;;  %v14807_v5 = vsel %vm11577_vm8, 4294967295, %v14806_v5  ;;  %v478_v9 = vshrl.u32 %v11478_v33, 4  ;;  %v11584_v56 = vadd.s32 160, %v10900_v7  ;;  %vm710_vm9 = vcmp.lt.s32.totalorder %v11531_v26, 0 }
 0x1d5   : > { %14804 = vst [vmem:[#allocation62_spill] sm:$0xff] %v11563_v0  ;;  %14805 = vst [vmem:[#allocation63_spill] sm:$0xff] %v11568_v43  ;;  %v11587_v25 = vadd.f32 %v8868_v61, %v14809_v48  ;;  %v11589_v1 = vpop.f32.mrf.mxu1  ;;  %vm672_vm12 = vcmp.ne.s32.totalorder %v11539_v21, 0  ;;  %vm708_vm13 = vcmp.lt.s32.totalorder %v11539_v21, 0  ;;  %vm14810_vm14 = vcmp.ne.s32.totalorder %v11524_v55, 0 }
 0x1d6   : > { %14808 = vst [vmem:[#allocation64_spill] sm:$0xff] %v14807_v5  ;;  %v3160_v16 = vpop.f32.mrf.mxu0  ;;  %vm14811_vm7 = vcmp.lt.s32.totalorder %v11524_v55, 0  ;;  %v14812_v33 = vmov 0  ;;  %v11603_v48 = vsub.s32 %v11366_v10, %v468_v14  ;;  %v446_v61 = vmul.u32 18, %v445_v36 }
 0x1d7   : > { %vm11598_vm4 = vmand %vm14811_vm7, %vm14810_vm14  ;;  %v11606_v12 = vmul.u32.u64.low 3817748708, %v11558_v32  ;;  %v11607_v40 = vmul.u32.u64.high 3817748708, %v11558_v32, %v11606_v12  ;;  %v11610_v39 = vadd.f32 %v11281_v50, %v2676_v57  ;;  %v11613_v58 = vadd.f32 %v3160_v16, %v14816_v34  ;;  %v11615_v11 = vpop.f32.mrf.mxu1  ;;  %v14823_v16 = vld [vmem:[#allocation10_spill] sm:$0xff] }
 0x1d8   : > { %v14813_v33 = vsel %vm11598_vm4, 4294967295, %v14812_v33  ;;  %14815 = vst [vmem:[#allocation65_spill] sm:$0xff] %v11603_v48  ;;  %v11622_v10 = vadd.s32 18, %v11531_v26  ;;  %v8869_v14 = vpop.f32.mrf.mxu0  ;;  %vm14818_vm7 = vcmp.ne.s32.totalorder %v11531_v26, 0  ;;  %v14819_v50 = vmov 0 }
 0x1d9   : > { %14814 = vst [vmem:[#allocation26_spill] sm:$0xff] %v14813_v33  ;;  %vm11628_vm14 = vmand %vm710_vm9, %vm14818_vm7  ;;  %v11633_v34 = vadd.s32 18, %v11539_v21  ;;  %v479_v12 = vmul.u32 18, %v478_v9  ;;  %v11636_v57 = vmul.u32.u64.low 3817748708, %v11584_v56  ;;  %v11637_v36 = vmul.u32.u64.high 3817748708, %v11584_v56, %v11636_v57  ;;  %v11642_v27 = vpop.f32.mrf.mxu1 }
 0x1da   : > { %14817 = vst [vmem:[#allocation9_spill] sm:$0xff] %v11622_v10  ;;  %v14820_v50 = vsel %vm11628_vm14, 4294967295, %v14819_v50  ;;  %v11640_v30 = vadd.f32 %v8869_v14, %v14823_v16  ;;  %vm11652_vm9 = vmand %vm708_vm13, %vm672_vm12  ;;  %v14824_v9 = vmov 0  ;;  %v456_v57 = vshrl.u32 %v11543_v47, 4  ;;  %v11663_v5 = vpop.f32.mrf.mxu0  ;;  %v14833_v10 = vld [vmem:[#allocation11_spill] sm:$0xff] }
 0x1db   : > { %14821 = vst [vmem:[#allocation66_spill] sm:$0xff] %v14820_v50  ;;  %14822 = vst [vmem:[#allocation67_spill] sm:$0xff] %v11633_v34  ;;  %v14825_v9 = vsel %vm11652_vm9, 4294967295, %v14824_v9  ;;  %v11658_v14 = vadd.s32 184, %v10900_v7  ;;  %v11661_v16 = vadd.f32 %v11370_v23, %v2680_v59  ;;  %vm677_vm7 = vcmp.ne.s32.totalorder %v11603_v48, 0  ;;  %v11680_v59 = vpop.f32.mrf.mxu1 }
 0x1dc   : > { %14826 = vst [vmem:[#allocation10_spill] sm:$0xff] %v14825_v9  ;;  %vm713_vm8 = vcmp.lt.s32.totalorder %v11603_v48, 0  ;;  %v11668_v0 = vsub.s32 %v11406_v13, %v446_v61  ;;  %v11672_v55 = vadd.f32 %v11390_v52, %v11388_v22  ;;  %v11676_v47 = vadd.f32 %v11411_v4, %v11409_v54  ;;  %v8872_v13 = vpop.f32.mrf.mxu0 }
 0x1dd   : > { %v3272_v23 = vadd.f32 %v11433_v38, %v11117_v18  ;;  %v11691_v52 = vadd.s32 18, %v11603_v48  ;;  %v11694_v4 = vsub.s32 %v11421_v51, %v479_v12  ;;  %v11697_v18 = vadd.s32 168, %v10900_v7  ;;  %v11702_v38 = vpop.f32.mrf.mxu1  ;;  %vm11708_vm12 = vmand %vm713_vm8, %vm677_vm7 }
 0x1de   : > { %14827 = vst [vmem:[#allocation68_spill] sm:$0xff] %v11668_v0  ;;  %v11700_v54 = vadd.f32 %v8872_v13, %v10963_v17  ;;  %v14830_v61 = vmov 0  ;;  %v457_v43 = vmul.u32 18, %v456_v57  ;;  %v11718_v22 = vadd.f32 %v11426_v8, %v11424_v3  ;;  %v3176_v17 = vpop.f32.mrf.mxu0 }
 0x1df   : > { %14828 = vst [vmem:[#allocation69_spill] sm:$0xff] %v11691_v52  ;;  %14829 = vst [vmem:[#allocation70_spill] sm:$0xff] %v11694_v4  ;;  %v14831_v61 = vsel %vm11708_vm12, 4294967295, %v14830_v61  ;;  %v11713_v51 = vmul.u32.u64.low 3817748708, %v11658_v14  ;;  %v11714_v12 = vmul.u32.u64.high 3817748708, %v11658_v14, %v11713_v51  ;;  %vm675_vm13 = vcmp.ne.s32.totalorder %v11668_v0, 0  ;;  %v11729_v50 = vpop.f32.mrf.mxu1 }
 0x1e0   : > { %14832 = vst [vmem:[#allocation71_spill] sm:$0xff] %v14831_v61  ;;  %vm711_vm14 = vcmp.lt.s32.totalorder %v11668_v0, 0  ;;  %v511_v13 = vshrl.u32 %v11607_v40, 4  ;;  %v11724_v26 = vadd.f32 %v11450_v29, %v3272_v23  ;;  %v11727_v57 = vadd.f32 %v3176_v17, %v14833_v10  ;;  %v8873_v21 = vpop.f32.mrf.mxu0  ;;  %v14836_v23 = vld [vmem:[#allocation12_spill] sm:$0xff] }
 0x1e1   : > { %v11732_v51 = vadd.s32 208, %v10900_v7  ;;  %v11735_v8 = vadd.s32 192, %v10900_v7  ;;  %v11739_v3 = vadd.f32 %v11486_v24, %v11484_v15  ;;  %v11746_v29 = vadd.s32 18, %v11668_v0  ;;  %v11752_v34 = vpop.f32.mrf.mxu1  ;;  %vm11756_vm8 = vmand %vm711_vm14, %vm675_vm13 }
 0x1e2   : > { %v489_v10 = vshrl.u32 %v11637_v36, 4  ;;  %v11750_v17 = vadd.f32 %v8873_v21, %v14836_v23  ;;  %v14837_v24 = vmov 0  ;;  %vm678_vm7 = vcmp.ne.s32.totalorder %v11694_v4, 0  ;;  %v11767_v36 = vpop.f32.mrf.mxu0 }
 0x1e3   : > { %14834 = vst [vmem:[#allocation11_spill] sm:$0xff] %v11739_v3  ;;  %14835 = vst [vmem:[#allocation72_spill] sm:$0xff] %v11746_v29  ;;  %v14838_v24 = vsel %vm11756_vm8, 4294967295, %v14837_v24  ;;  %v11762_v15 = vsub.s32 %v11489_v19, %v457_v43  ;;  %v11765_v40 = vadd.s32 216, %v10900_v7  ;;  %vm714_vm12 = vcmp.lt.s32.totalorder %v11694_v4, 0  ;;  %v11780_v43 = vpop.f32.mrf.mxu1 }
 0x1e4   : > { %14839 = vst [vmem:[#allocation12_spill] sm:$0xff] %v14838_v24  ;;  %v512_v21 = vmul.u32 18, %v511_v13  ;;  %v11771_v23 = vmul.u32.u64.low 3817748708, %v11697_v18  ;;  %v11772_v48 = vmul.u32.u64.high 3817748708, %v11697_v18, %v11771_v23  ;;  %v11776_v52 = vadd.f32 %v11509_v60, %v11507_v53  ;;  %v8876_v33 = vpop.f32.mrf.mxu0  ;;  %vm11803_vm14 = vmand %vm714_vm12, %vm678_vm7 }
 0x1e5   : > { %14840 = vst [vmem:[#allocation73_spill] sm:$0xff] %v11762_v15  ;;  %v3276_v19 = vadd.f32 %v11550_v42, %v11120_v20  ;;  %v11783_v61 = vmul.u32.u64.low 3817748708, %v11732_v51  ;;  %v11784_v9 = vmul.u32.u64.high 3817748708, %v11732_v51, %v11783_v61  ;;  %v11791_v23 = vadd.s32 18, %v11694_v4  ;;  %v11799_v42 = vpop.f32.mrf.mxu1 }
 0x1e6   : > { %14841 = vst [vmem:[#allocation74_spill] sm:$0xff] %v11776_v52  ;;  %v490_v60 = vmul.u32 18, %v489_v10  ;;  %v11794_v53 = vadd.s32 200, %v10900_v7  ;;  %v11797_v20 = vadd.f32 %v8876_v33, %v11006_v35  ;;  %v14843_v61 = vmov 0  ;;  %v3192_v35 = vpop.f32.mrf.mxu0 }
 0x1e7   : > { %14842 = vst [vmem:[#allocation75_spill] sm:$0xff] %v11791_v23  ;;  %v14844_v61 = vsel %vm11803_vm14, 4294967295, %v14843_v61  ;;  %vm676_vm13 = vcmp.ne.s32.totalorder %v11762_v15, 0  ;;  %vm712_vm8 = vcmp.lt.s32.totalorder %v11762_v15, 0  ;;  %v522_v10 = vshrl.u32 %v11714_v12, 4  ;;  %v11827_v3 = vpop.f32.mrf.mxu1 }
 0x1e8   : > { %14845 = vst [vmem:[#allocation76_spill] sm:$0xff] %v14844_v61  ;;  %v11812_v13 = vadd.f32 %v11536_v31, %v11534_v49  ;;  %v11815_v33 = vsub.s32 %v11558_v32, %v512_v21  ;;  %v11818_v0 = vmul.u32.u64.low 3817748708, %v11735_v8  ;;  %v11819_v29 = vmul.u32.u64.high 3817748708, %v11735_v8, %v11818_v0  ;;  %v8877_v32 = vpop.f32.mrf.mxu0  ;;  %vm11847_vm12 = vmand %vm712_vm8, %vm676_vm13 }
 0x1e9   : > { %v11822_v24 = vadd.f32 %v11560_v41, %v3276_v19  ;;  %v11825_v52 = vadd.f32 %v3192_v35, %v11025_v6  ;;  %v11830_v12 = vadd.s32 18, %v11762_v15  ;;  %v11833_v31 = vadd.s32 240, %v10900_v7  ;;  %v11864_v19 = vpop.f32.mrf.mxu1 }
 0x1ea   : > { %14846 = vst [vmem:[#allocation77_spill] sm:$0xff] %v11815_v33  ;;  %v11837_v49 = vadd.f32 %v11589_v1, %v11587_v25  ;;  %v14849_v6 = vmov 0  ;;  %v11852_v0 = vsub.s32 %v11584_v56, %v490_v60  ;;  %v11855_v25 = vadd.s32 224, %v10900_v7  ;;  %v11869_v4 = vpop.f32.mrf.mxu0 }
 0x1eb   : > { %14847 = vst [vmem:[#allocation78_spill] sm:$0xff] %v11830_v12  ;;  %v14850_v6 = vsel %vm11847_vm12, 4294967295, %v14849_v6  ;;  %v11859_v1 = vadd.f32 %v11615_v11, %v11613_v58  ;;  %v11862_v21 = vadd.f32 %v8877_v32, %v11041_v62  ;;  %v523_v35 = vmul.u32 18, %v522_v10  ;;  %v11883_v60 = vpop.f32.mrf.mxu1 }
 0x1ec   : > { %14848 = vst [vmem:[#allocation79_spill] sm:$0xff] %v11837_v49  ;;  %14851 = vst [vmem:[#allocation80_spill] sm:$0xff] %v14850_v6  ;;  %v11867_v41 = vadd.s32 248, %v10900_v7  ;;  %vm681_vm8 = vcmp.ne.s32.totalorder %v11815_v33, 0  ;;  %vm717_vm7 = vcmp.lt.s32.totalorder %v11815_v33, 0  ;;  %v500_v56 = vshrl.u32 %v11772_v48, 4  ;;  %v8880_v48 = vpop.f32.mrf.mxu0 }
 0x1ed   : > { %14852 = vst [vmem:[#allocation81_spill] sm:$0xff] %v11852_v0  ;;  %14853 = vst [vmem:[#allocation82_spill] sm:$0xff] %v11859_v1  ;;  %v11875_v58 = vadd.s32 232, %v10900_v7  ;;  %v3280_v62 = vadd.f32 %v11663_v5, %v11140_v63  ;;  %v11881_v11 = vadd.f32 %v11642_v27, %v11640_v30  ;;  %v555_v32 = vshrl.u32 %v11784_v9, 4  ;;  %v11901_v30 = vpop.f32.mrf.mxu1 }
 0x1ee   : > { %v11891_v23 = vadd.s32 18, %v11815_v33  ;;  %vm679_vm13 = vcmp.ne.s32.totalorder %v11852_v0, 0  ;;  %v11895_v63 = vmul.u32.u64.low 3817748708, %v11765_v40  ;;  %v11896_v5 = vmul.u32.u64.high 3817748708, %v11765_v40, %v11895_v63  ;;  %vm11905_vm14 = vmand %vm717_vm7, %vm681_vm8  ;;  %v3208_v15 = vpop.f32.mrf.mxu0 }
 0x1ef   : > { %14854 = vst [vmem:[#allocation83_spill] sm:$0xff] %v11881_v11  ;;  %v11899_v27 = vadd.f32 %v8880_v48, %v11070_v2  ;;  %v14856_v10 = vmov 0  ;;  %vm715_vm12 = vcmp.lt.s32.totalorder %v11852_v0, 0  ;;  %v11911_v9 = vsub.s32 %v11658_v14, %v523_v35  ;;  %v11927_v1 = vpop.f32.mrf.mxu1 }
 0x1f0   : > { %14855 = vst [vmem:[#allocation84_spill] sm:$0xff] %v11891_v23  ;;  %v14857_v10 = vsel %vm11905_vm14, 4294967295, %v14856_v10  ;;  %v533_v61 = vshrl.u32 %v11819_v29, 4  ;;  %v501_v63 = vmul.u32 18, %v500_v56  ;;  %v11919_v12 = vadd.s32 272, %v10900_v7  ;;  %vm11946_vm8 = vmand %vm715_vm12, %vm679_vm13 }
 0x1f1   : > { %14858 = vst [vmem:[#allocation85_spill] sm:$0xff] %v14857_v10  ;;  %14859 = vst [vmem:[#allocation86_spill] sm:$0xff] %v11911_v9  ;;  %v11915_v2 = vmul.u32.u64.low 3817748708, %v11794_v53  ;;  %v11916_v48 = vmul.u32.u64.high 3817748708, %v11794_v53, %v11915_v2  ;;  %v11922_v6 = vadd.f32 %v11680_v59, %v3280_v62  ;;  %v11925_v11 = vadd.f32 %v3208_v15, %v11103_v28 }
 0x1f2   : > { %v11930_v14 = vadd.s32 18, %v11852_v0  ;;  %v556_v29 = vmul.u32 18, %v555_v32  ;;  %v11934_v35 = vadd.f32 %v11702_v38, %v11700_v54  ;;  %v3284_v56 = vadd.f32 %v11767_v36, %v11236_v37  ;;  %v8881_v2 = vpop.f32.mrf.mxu0  ;;  %v11956_v37 = vpop.f32.mrf.mxu1 }
 0x1f3   : > { %14860 = vst [vmem:[#allocation87_spill] sm:$0xff] %v11922_v6  ;;  %v14863_v59 = vmov 0  ;;  %v11951_v54 = vadd.s32 256, %v10900_v7  ;;  %v11954_v38 = vadd.f32 %v8881_v2, %v11124_v44  ;;  %vm682_vm7 = vcmp.ne.s32.totalorder %v11911_v9, 0 }
 0x1f4   : > { %14861 = vst [vmem:[#allocation88_spill] sm:$0xff] %v11930_v14  ;;  %14862 = vst [vmem:[#allocation89_spill] sm:$0xff] %v11934_v35  ;;  %v14864_v59 = vsel %vm11946_vm8, 4294967295, %v14863_v59  ;;  %v534_v15 = vmul.u32 18, %v533_v61  ;;  %v11960_v36 = vadd.s32 280, %v10900_v7  ;;  %v11962_v62 = vpop.f32.mrf.mxu0  ;;  %vm718_vm12 = vcmp.lt.s32.totalorder %v11911_v9, 0  ;;  %v11976_v2 = vpop.f32.mrf.mxu1 }
 0x1f5   : > { %14865 = vst [vmem:[#allocation90_spill] sm:$0xff] %v14864_v59  ;;  %v11966_v32 = vsub.s32 %v11697_v18, %v501_v63  ;;  %v11969_v28 = vmul.u32.u64.low 3817748708, %v11833_v31  ;;  %v11970_v33 = vmul.u32.u64.high 3817748708, %v11833_v31, %v11969_v28  ;;  %v11974_v44 = vadd.f32 %v11729_v50, %v11727_v57  ;;  %vm12008_vm13 = vmand %vm718_vm12, %vm682_vm7  ;;  %v14889_v35 = vld [vmem:[#allocation48_spill] sm:$0xff] }
 0x1f6   : > { %v11983_v23 = vsub.s32 %v11732_v51, %v556_v29  ;;  %v11986_v18 = vadd.s32 264, %v10900_v7  ;;  %v11990_v63 = vadd.f32 %v11752_v34, %v11750_v17  ;;  %v11993_v50 = vadd.f32 %v11780_v43, %v3284_v56  ;;  %v8884_v57 = vpop.f32.mrf.mxu0  ;;  %v12002_v51 = vpop.f32.mrf.mxu1 }
 0x1f7   : > { %14866 = vst [vmem:[#allocation91_spill] sm:$0xff] %v11974_v44  ;;  %v11996_v28 = vadd.s32 18, %v11911_v9  ;;  %v566_v10 = vshrl.u32 %v11896_v5, 4  ;;  %v12000_v61 = vadd.f32 %v8884_v57, %v11164_v46  ;;  %v14872_v7 = vmov 0  ;;  %v14878_v57 = vld [vmem:[#allocation6_spill] sm:$0xff] }
 0x1f8   : > { %14867 = vst [vmem:[#allocation92_spill] sm:$0xff] %v11983_v23  ;;  %14868 = vst [vmem:[#allocation93_spill] sm:$0xff] %v11986_v18  ;;  %v14873_v7 = vsel %vm12008_vm13, 4294967295, %v14872_v7  ;;  %v12013_v34 = vsub.s32 %v11735_v8, %v534_v15  ;;  %v12016_v17 = vmul.u32.u64.low 3817748708, %v11855_v25  ;;  %v12017_v43 = vmul.u32.u64.high 3817748708, %v11855_v25, %v12016_v17  ;;  %v3224_v5 = vpop.f32.mrf.mxu0  ;;  %v12028_v14 = vpop.f32.mrf.mxu1  ;;  %v14879_v15 = vld [vmem:[#allocation47_spill] sm:$0xff] }
 0x1f9   : > { %14869 = vst [vmem:[#allocation94_spill] sm:$0xff] %v11990_v63  ;;  %14870 = vst [vmem:[#allocation95_spill] sm:$0xff] %v11993_v50  ;;  %vm680_vm14 = vcmp.ne.s32.totalorder %v11966_v32, 0  ;;  %vm716_vm8 = vcmp.lt.s32.totalorder %v11966_v32, 0  ;;  %v544_v46 = vshrl.u32 %v11916_v48, 4  ;;  %v14876_v29 = vmov 0  }
 0x1fa   : > { %14871 = vst [vmem:[#allocation96_spill] sm:$0xff] %v11996_v28  ;;  %14874 = vst [vmem:[#allocation97_spill] sm:$0xff] %v14873_v7  ;;  %v12023_v56 = vrot.slane %v14876_v29, 4  ;;  %v12026_v0 = vadd.f32 %v3224_v5, %v14878_v57  ;;  %v599_v8 = vshrl.u32 %v11970_v33, 4  ;;  %v3288_v17 = vadd.f32 %v11869_v4, %v14879_v15  ;;  %v8885_v59 = vpop.f32.mrf.mxu0  ;;  %v14880_v29 = vld [vmem:[#allocation28_spill] sm:$0xff]  ;;  %v12045_v63 = vpop.f32.mrf.mxu1 }
 0x1fb   : > { %14875 = vst [vmem:[#allocation98_spill] sm:$0xff] %v12013_v34  ;;  %v12040_v5 = vadd.s32 18, %v11966_v32  ;;  %v567_v57 = vmul.u32 18, %v566_v10  ;;  %v12043_v50 = vadd.f32 %v8885_v59, %v14880_v29  ;;  %vm12051_vm12 = vmand %vm716_vm8, %vm680_vm14  ;;  %v14881_v4 = vmov 0 }
 0x1fc   : > { %14877 = vst [vmem:[#allocation99_spill] sm:$0xff] %v12023_v56  ;;  %v14882_v4 = vsel %vm12051_vm12, 4294967295, %v14881_v4  ;;  %v12056_v33 = vadd.s32 18, %v11983_v23  ;;  %vm683_vm7 = vcmp.ne.s32.totalorder %v12013_v34, 0  ;;  %v577_v10 = vshrl.u32 %v12017_v43, 4  ;;  %v3227_v15 = vpop.f32.mrf.mxu0  ;;  %v12081_v7 = vpop.f32.mrf.mxu1 }
 0x1fd   : > { %vm14884_vm13 = vcmp.ne.s32.totalorder %v11983_v23, 0  ;;  %vm14885_vm9 = vcmp.lt.s32.totalorder %v11983_v23, 0  ;;  %v14886_v59 = vmov 0  ;;  %vm719_vm14 = vcmp.lt.s32.totalorder %v12013_v34, 0 }
 0x1fe   : > { %14883 = vst [vmem:[#allocation6_spill] sm:$0xff] %v12056_v33  ;;  %vm12064_vm4 = vmand %vm14885_vm9, %vm14884_vm13  ;;  %v545_v29 = vmul.u32 18, %v544_v46  ;;  %v12070_v48 = vmul.u32.u64.low 3817748708, %v11867_v41  ;;  %v12071_v9 = vmul.u32.u64.high 3817748708, %v11867_v41, %v12070_v48  ;;  %v12075_v28 = vadd.f32 %v11799_v42, %v11797_v20  ;;  %v8888_v49 = vpop.f32.mrf.mxu0  ;;  %v14896_v20 = vld [vmem:[#allocation58_spill] sm:$0xff] }
 0x1ff   : > { %v14887_v59 = vsel %vm12064_vm4, 4294967295, %v14886_v59  ;;  %v12079_v43 = vadd.f32 %v11827_v3, %v11825_v52  ;;  %v600_v44 = vmul.u32 18, %v599_v8  ;;  %v12087_v46 = vadd.f32 %v11864_v19, %v11862_v21  ;;  %v14892_v8 = vld [vmem:[#allocation33_spill] sm:$0xff]  ;;  %v12105_v21 = vpop.f32.mrf.mxu1  ;;  %vm12115_vm9 = vmand %vm719_vm14, %vm683_vm7 }
 0x200   : > { %14888 = vst [vmem:[#allocation47_spill] sm:$0xff] %v14887_v59  ;;  %v12094_v42 = vadd.s32 18, %v12013_v34  ;;  %v12097_v52 = vsub.s32 %v11765_v40, %v567_v57  ;;  %v12100_v3 = vadd.f32 %v11883_v60, %v3288_v17  ;;  %v12103_v48 = vadd.f32 %v8888_v49, %v14892_v8  ;;  %v3240_v17 = vpop.f32.mrf.mxu0  ;;  %v12909_v59 = vld [vmem:[%s14353_s3 + $0x178] sm:$0xff]  }
 0x201   : > { %v14893_v40 = vmov 0  ;;  %v578_v60 = vmul.u32 18, %v577_v10  ;;  %v12121_v49 = vadd.f32 %v11901_v30, %v11899_v27  ;;  %v12124_v57 = vsub.s32 %v11794_v53, %v545_v29  ;;  %v14897_v10 = vld [vmem:[#allocation8_spill] sm:$0xff]  ;;  %v3622_v27 = vpop.f32.mrf.mxu1 }
 0x202   : > { %14890 = vst [vmem:[#allocation28_spill] sm:$0xff] %v12094_v42  ;;  %14891 = vst [vmem:[#allocation100_spill] sm:$0xff] %v12097_v52  ;;  %v14894_v40 = vsel %vm12115_vm9, 4294967295, %v14893_v40  ;;  %v12127_v8 = vmul.u32.u64.low 3817748708, %v11875_v58  ;;  %v12128_v6 = vmul.u32.u64.high 3817748708, %v11875_v58, %v12127_v8  ;;  %v12132_v19 = vadd.f32 %v11927_v1, %v11925_v11  ;;  %v8889_v53 = vpop.f32.mrf.mxu0  ;;  %v14898_v11 = vld [vmem:[#allocation38_spill] sm:$0xff] }
 0x203   : > { %14895 = vst [vmem:[#allocation33_spill] sm:$0xff] %v14894_v40  ;;  %v3292_v56 = vadd.f32 %v11962_v62, %v14896_v20  ;;  %v12137_v23 = vadd.f32 %v3240_v17, %v14897_v10  ;;  %v12140_v30 = vsub.s32 %v11833_v31, %v600_v44  ;;  %vm686_vm8 = vcmp.ne.s32.totalorder %v12097_v52, 0  ;;  %v12152_v20 = vpop.f32.mrf.mxu1  ;;  %v14913_v42 = vld [vmem:[#allocation45_spill] sm:$0xff] }
 0x204   : > { %vm722_vm13 = vcmp.lt.s32.totalorder %v12097_v52, 0  ;;  %v610_v1 = vshrl.u32 %v12071_v9, 4  ;;  %v12150_v62 = vadd.f32 %v8889_v53, %v14898_v11  ;;  %v12155_v31 = vsub.s32 %v11855_v25, %v578_v60  ;;  %v3243_v8 = vpop.f32.mrf.mxu0 }
 0x205   : > { %v12158_v44 = vmul.u32.u64.low 3817748708, %v11919_v12  ;;  %v12159_v17 = vmul.u32.u64.high 3817748708, %v11919_v12, %v12158_v44  ;;  %v12162_v10 = vadd.s32 18, %v12097_v52  ;;  %v588_v9 = vshrl.u32 %v12128_v6, 4  ;;  %v12174_v60 = vpop.f32.mrf.mxu1  ;;  %vm12180_vm4 = vmand %vm722_vm13, %vm686_vm8 }
 0x206   : > { %v12169_v53 = vadd.f32 %v11956_v37, %v11954_v38  ;;  %v12172_v25 = vadd.f32 %v11976_v2, %v3292_v56  ;;  %v14901_v11 = vmov 0  ;;  %v3296_v6 = vadd.f32 %v3227_v15, %v11504_v45  ;;  %v8892_v38 = vpop.f32.mrf.mxu0  ;;  %v14904_v44 = vld [vmem:[#allocation41_spill] sm:$0xff] }
 0x207   : > { %14899 = vst [vmem:[#allocation58_spill] sm:$0xff] %v12162_v10  ;;  %v14902_v11 = vsel %vm12180_vm4, 4294967295, %v14901_v11  ;;  %v12188_v37 = vadd.s32 18, %v12124_v57  ;;  %v12191_v2 = vadd.s32 18, %v12140_v30  ;;  %v611_v56 = vmul.u32 18, %v610_v1  ;;  %v12196_v33 = vpop.f32.mrf.mxu1 }
 0x208   : > { %14900 = vst [vmem:[#allocation8_spill] sm:$0xff] %v12172_v25  ;;  %14903 = vst [vmem:[#allocation38_spill] sm:$0xff] %v14902_v11  ;;  %v12194_v29 = vadd.f32 %v8892_v38, %v14904_v44  ;;  %vm14905_vm8 = vcmp.ne.s32.totalorder %v12124_v57, 0  ;;  %vm14906_vm13 = vcmp.lt.s32.totalorder %v12124_v57, 0  ;;  %vm687_vm14 = vcmp.ne.s32.totalorder %v12155_v31, 0  ;;  %v3256_v15 = vpop.f32.mrf.mxu0 }
 0x209   : > { %vm12202_vm7 = vmand %vm14906_vm13, %vm14905_vm8  ;;  %vm723_vm9 = vcmp.lt.s32.totalorder %v12155_v31, 0  ;;  %v643_v45 = vshrl.u32 %v12159_v17, 4  ;;  %vm14909_vm12 = vcmp.ne.s32.totalorder %v12140_v30, 0  ;;  %vm14910_vm5 = vcmp.lt.s32.totalorder %v12140_v30, 0  ;;  %v12232_v1 = vpop.f32.mrf.mxu1 }
 0x20a   : > { %vm12217_vm8 = vmand %vm14910_vm5, %vm14909_vm12  ;;  %v14911_v38 = vmov 0  ;;  %v589_v44 = vmul.u32 18, %v588_v9  ;;  %v12222_v25 = vmul.u32.u64.low 3817748708, %v11951_v54  ;;  %v12223_v34 = vmul.u32.u64.high 3817748708, %v11951_v54, %v12222_v25  ;;  %v8893_v40 = vpop.f32.mrf.mxu0 }
 0x20b   : > { %v14912_v38 = vsel %vm12217_vm8, 4294967295, %v14911_v38  ;;  %v12227_v17 = vadd.f32 %v12002_v51, %v12000_v61  ;;  %v12230_v11 = vadd.f32 %v3256_v15, %v14913_v42  ;;  %v12235_v52 = vadd.s32 18, %v12155_v31  ;;  %vm12253_vm5 = vmand %vm723_vm9, %vm687_vm14 }
 0x20c   : > { %v644_v10 = vmul.u32 18, %v643_v45  ;;  %v12239_v9 = vadd.f32 %v12028_v14, %v12026_v0  ;;  %v12243_v25 = vadd.f32 %v12045_v63, %v12043_v50  ;;  %v14916_v51 = vmov 0  ;;  %v14919_v50 = vld [vmem:[#allocation49_spill] sm:$0xff]  ;;  %v8945_v45 = vpop.f32.mrf.mxu1  ;;  %v3259_v61 = vpop.f32.mrf.mxu0 }
 0x20d   : > { %v14917_v51 = vsel %vm12253_vm5, 4294967295, %v14916_v51  ;;  %v12258_v0 = vsub.s32 %v11867_v41, %v611_v56  ;;  %v12261_v14 = vadd.f32 %v12081_v7, %v3296_v6  ;;  %v12265_v63 = vadd.f32 %v12105_v21, %v12103_v48  ;;  %v14921_v41 = vld [vmem:[#allocation17_spill] sm:$0xff]  ;;  %v14922_v56 = vld [vmem:[#allocation14_spill] sm:$0xff] }
 0x20e   : > { %14914 = vst [vmem:[#allocation41_spill] sm:$0xff] %v12239_v9  ;;  %14915 = vst [vmem:[#allocation45_spill] sm:$0xff] %v12243_v25  ;;  %v3306_v42 = vadd.f32 %v8893_v40, %v14919_v50  ;;  %v14923_v9 = vsel %vm11092_vm11, %v14921_v41, %v14922_v56  ;;  %v14924_v7 = vmov 0  ;;  %v12282_v48 = vsub.s32 %v11875_v58, %v589_v44  ;;  %v14930_v44 = vld [vmem:[#allocation15_spill] sm:$0xff]  ;;  %v14931_v56 = vld [vmem:[#allocation13_spill] sm:$0xff] }
 0x20f   : > { %14918 = vst [vmem:[#allocation101_spill] sm:$0xff] %v12258_v0  ;;  %vm12277_vm12 = vcmp.lt.s32.totalorder %v14923_v9, 16  ;;  %v621_v21 = vshrl.u32 %v12223_v34, 4  ;;  %v12286_v40 = vmul.u32.u64.low 3817748708, %v11960_v36  ;;  %v12287_v6 = vmul.u32.u64.high 3817748708, %v11960_v36, %v12286_v40 }
 0x210   : > { %v14925_v7 = vsel %vm12277_vm12, 4294967295, %v14924_v7  ;;  %v12290_v50 = vadd.f32 %v3622_v27, %v12137_v23  ;;  %v12292_v25 = vadd.f32 %v8945_v45, %v3306_v42  ;;  %v12299_v41 = vsub.s32 %v11919_v12, %v644_v10  ;;  %v8964_v27 = vpop.f32.mrf.mxu0  ;;  %v12314_v42 = vld [vmem:[%s14352_s2] ss:$0 sm:$0xff] }
 0x211   : > { %14926 = vst [vmem:[#allocation49_spill] sm:$0xff] %v14925_v7  ;;  %v3300_v58 = vadd.f32 %v3243_v8, %v11610_v39  ;;  %v14932_v40 = vsel %vm11076_vm10, %v14930_v44, %v14931_v56  ;;  %v14933_v23 = vmov 0  ;;  %vm726_vm14 = vcmp.lt.s32.totalorder %v12258_v0, 0  ;;  %v14938_v56 = vld [vmem:[#allocation21_spill] sm:$0xff] }
 0x212   : > { %14927 = vst [vmem:[#allocation18_spill] sm:$0xff] %v12292_v25  ;;  %14928 = vst [vmem:[#allocation17_spill] sm:$0xff] %v12299_v41  ;;  %vm12307_vm11 = vcmp.lt.s32.totalorder %v14932_v40, 16  ;;  %v622_v39 = vmul.u32 18, %v621_v21  ;;  %v3989_v12 = vadd.f32 %v8964_v27, %v11672_v55  ;;  %v12320_v8 = vadd.s32 18, %v12258_v0  ;;  %v3844_v34 = vpop.f32.mrf.mxu0  ;;  %v14939_v40 = vld [vmem:[#allocation4_spill] sm:$0xff] }
 0x213   : > { %v14934_v23 = vsel %vm12307_vm11, 4294967295, %v14933_v23  ;;  %v12323_v10 = vmul.u32.u64.low 3817748708, %v11986_v18  ;;  %v12324_v45 = vmul.u32.u64.high 3817748708, %v11986_v18, %v12323_v10  ;;  %v14940_v15 = vsel %vm11190_vm3, %v14938_v56, %v14939_v40 }
 0x214   : > { %14935 = vst [vmem:[#allocation14_spill] sm:$0xff] %v14934_v23  ;;  %14936 = vst [vmem:[#allocation16_spill] sm:$0xff] %v12320_v8  ;;  %vm12331_vm10 = vcmp.lt.s32.totalorder %v14940_v15, 16  ;;  %v14941_v9 = vmov 0  ;;  %v12338_v55 = vsub.s32 %v11951_v54, %v622_v39  ;;  %v654_v21 = vshrl.u32 %v12287_v6, 4  ;;  %v8965_v54 = vpop.f32.mrf.mxu0  ;;  %v15014_v23 = vld [vmem:[#allocation53_spill] sm:$0xff] }
 0x215   : > { %v14942_v9 = vsel %vm12331_vm10, 4294967295, %v14941_v9  ;;  %v4032_v27 = vadd.f32 %v12314_v42, %v3989_v12  ;;  %v3987_v10 = vadd.f32 %v3844_v34, %v11676_v47  ;;  %vm14945_vm8 = vcmp.ne.s32.totalorder %v12258_v0, 0  ;;  %v3641_v12 = vpop.f32.mrf.mxu1  ;;  %v14992_v0 = vld [vmem:[#allocation36_spill] sm:$0xff] }
 0x216   : > { %14943 = vst [vmem:[#allocation15_spill] sm:$0xff] %v14942_v9  ;;  %14944 = vst [vmem:[#allocation13_spill] sm:$0xff] %v12338_v55  ;;  %vm693_vm5 = vcmp.ne.s32.totalorder %v12299_v41, 0  ;;  %v3304_v44 = vadd.f32 %v3259_v61, %v11661_v16  ;;  %v12353_v39 = vadd.s32 18, %v12282_v48  ;;  %v12359_v47 = vadd.f32 %v12152_v20, %v12150_v62  ;;  %v14955_v62 = vld [vmem:[#allocation20_spill] sm:$0xff]  ;;  %v14956_v20 = vld [vmem:[#allocation19_spill] sm:$0xff] }
 0x217   : > { %vm12345_vm3 = vmand %vm726_vm14, %vm14945_vm8  ;;  %v12362_v6 = vadd.f32 %v12174_v60, %v3300_v58  ;;  %v4030_v34 = vadd.f32 %v12314_v42, %v3987_v10  ;;  %v3990_v16 = vadd.f32 %v8965_v54, %v11718_v22  ;;  %vm14950_vm8 = vcmp.ne.s32.totalorder %v12282_v48, 0  ;;  %v3847_v58 = vpop.f32.mrf.mxu0  ;;  %v14962_v22 = vld [vmem:[#allocation37_spill] sm:$0xff]  ;;  %v14963_v54 = vld [vmem:[#allocation31_spill] sm:$0xff] }
 0x218   : > { %14948 = vst [vmem:[#allocation27_spill] sm:$0xff] %v12359_v47  ;;  %vm14951_vm14 = vcmp.lt.s32.totalorder %v12282_v48, 0  ;;  %v14957_v40 = vsel %vm11171_vm1, %v14955_v62, %v14956_v20  ;;  %v14958_v60 = vmov 0  ;;  %v14964_v18 = vsel %vm11315_vm15, %v14962_v22, %v14963_v54 }
 0x219   : > { %14949 = vst [vmem:[#allocation21_spill] sm:$0xff] %v12362_v6  ;;  %vm12370_vm13 = vmand %vm14951_vm14, %vm14950_vm8  ;;  %vm12379_vm4 = vcmp.lt.s32.totalorder %v14957_v40, 16  ;;  %vm12388_vm9 = vcmp.lt.s32.totalorder %v14964_v18, 16  ;;  %v14965_v25 = vmov 0  ;;  %vm14968_vm1 = vcmp.lt.s32.totalorder %v12299_v41, 0 }
 0x21a   : > { %v14959_v60 = vsel %vm12379_vm4, 4294967295, %v14958_v60  ;;  %v14966_v25 = vsel %vm12388_vm9, 4294967295, %v14965_v25  ;;  %vm12400_vm8 = vmand %vm14968_vm1, %vm693_vm5  ;;  %v14969_v62 = vmov 0  ;;  %v12405_v20 = vadd.s32 18, %v12299_v41 }
 0x21b   : > { %14960 = vst [vmem:[#allocation4_spill] sm:$0xff] %v14959_v60  ;;  %14967 = vst [vmem:[#allocation23_spill] sm:$0xff] %v14966_v25  ;;  %v14970_v62 = vsel %vm12400_vm8, 4294967295, %v14969_v62  ;;  %v12408_v18 = vadd.s32 18, %v12338_v55  ;;  %v655_v40 = vmul.u32 18, %v654_v21  ;;  %v12412_v10 = vadd.f32 %v12196_v33, %v12194_v29  ;;  %v15036_v60 = vld [vmem:[#allocation24_spill] sm:$0xff] }
 0x21c   : > { %14971 = vst [vmem:[#allocation20_spill] sm:$0xff] %v14970_v62  ;;  %14972 = vst [vmem:[#allocation19_spill] sm:$0xff] %v12405_v20  ;;  %v4068_v22 = vmax.f32 %v4032_v27, 0.0  ;;  %v4066_v54 = vmax.f32 %v4030_v34, 0.0  ;;  %v3988_v56 = vadd.f32 %v3847_v58, %v11724_v26  ;;  %vm14975_vm15 = vcmp.ne.s32.totalorder %v12338_v55, 0  ;;  %v14982_v27 = vld [vmem:[#allocation29_spill] sm:$0xff] }
 0x21d   : > { %14973 = vst [vmem:[#allocation42_spill] sm:$0xff] %v12408_v18  ;;  %14974 = vst [vmem:[#allocation37_spill] sm:$0xff] %v12412_v10  ;;  %vm14976_vm5 = vcmp.lt.s32.totalorder %v12338_v55, 0  ;;  %v12425_v47 = vadd.f32 %v12232_v1, %v12230_v11  ;;  %v12427_v21 = vadd.f32 %v3641_v12, %v3304_v44  ;;  %v4033_v33 = vadd.f32 %v12314_v42, %v3990_v16  ;;  %v14983_v26 = vld [vmem:[#allocation3_spill] sm:$0xff]  ;;  %v8968_v10 = vpop.f32.mrf.mxu0  ;;  %v15080_v62 = vld [vmem:[#allocation10_spill] sm:$0xff] }
 0x21e   : > { %vm12419_vm14 = vmand %vm14976_vm5, %vm14975_vm15  ;;  %v14984_v34 = vsel %vm11223_vm6, %v14982_v27, %v14983_v26  ;;  %v14985_v58 = vmov 0  ;;  %v4174_v1 = vsel %vm12277_vm12, %v4066_v54, 0.0  ;;  %v4031_v44 = vadd.f32 %v12314_v42, %v3988_v56  ;;  %v14988_v12 = vld [vmem:[#allocation11_spill] sm:$0xff]  ;;  %v14998_v54 = vld [vmem:[#allocation74_spill] sm:$0xff] }
 0x21f   : > { %14979 = vst [vmem:[#allocation31_spill] sm:$0xff] %v12425_v47  ;;  %14980 = vst [vmem:[#allocation102_spill] sm:$0xff] %v12427_v21  ;;  %vm12435_vm1 = vcmp.lt.s32.totalorder %v14984_v34, 16  ;;  %v3993_v16 = vadd.f32 %v8968_v10, %v14988_v12  ;;  %v632_v29 = vshrl.u32 %v12324_v45, 4  ;;  %v14500_v27 = vmov 0.0   ;;  %v3860_v34 = vpop.f32.mrf.mxu0  ;;  %v14991_v47 = vld [vmem:[#allocation40_spill] sm:$0xff] }
 0x220   : > { %v14986_v58 = vsel %vm12435_vm1, 4294967295, %v14985_v58  ;;  %v12449_v26 = vpack.c.bf16 %v4174_v1, %v14500_v27  ;;  %v14993_v8 = vsel %vm11345_vm2, %v14991_v47, %v14992_v0  ;;  %v14994_v11 = vmov 0  ;;  %v15000_v27 = vld [vmem:[#allocation39_spill] sm:$0xff]  ;;  %v15001_v56 = vld [vmem:[#allocation32_spill] sm:$0xff]  ;;  %v15012_v45 = vld [vmem:[#allocation54_spill] sm:$0xff] }
 0x221   : > { %14987 = vst [vmem:[#allocation30_spill] sm:$0xff] %v14986_v58  ;;  %vm12456_vm6 = vcmp.lt.s32.totalorder %v14993_v8, 16  ;;  %v12469_v10 = vsub.s32 %v11960_v36, %v655_v40  ;;  %v4176_v0 = vsel %vm12307_vm11, %v4068_v22, 0.0  ;;  %v4067_v8 = vmax.f32 %v4031_v44, 0.0  ;;  %v8969_v36 = vpop.f32.mrf.mxu0  ;;  %v15066_v20 = vld [vmem:[#allocation87_spill] sm:$0xff]  ;;  %v15115_v55 = vld [vmem:[#allocation65_spill] sm:$0xff] }
 0x222   : > { %14989 = vst [vmem:[#allocation29_spill] sm:$0xff] %v12449_v26  ;;  %v14995_v11 = vsel %vm12456_vm6, 4294967295, %v14994_v11  ;;  %v4036_v47 = vadd.f32 %v12314_v42, %v3993_v16  ;;  %v3991_v21 = vadd.f32 %v3860_v34, %v14998_v54  ;;  %v4069_v1 = vmax.f32 %v4033_v33, 0.0  ;;  %v15010_v54 = vld [vmem:[#allocation34_spill] sm:$0xff] }
 0x223   : > { %14996 = vst [vmem:[#allocation3_spill] sm:$0xff] %v14995_v11  ;;  %14997 = vst [vmem:[#allocation11_spill] sm:$0xff] %v12469_v10  ;;  %v15002_v7 = vsel %vm11327_vm0, %v15000_v27, %v15001_v56  ;;  %v15003_v41 = vmov 0  ;;  %v4368_v40 = vrot.slane %v12449_v26, 3  ;;  %v12486_v22 = vshrl.u32 %v12449_v26, 16  ;;  %v3863_v56 = vpop.f32.mrf.mxu0  ;;  %v15061_v11 = vld [vmem:[#allocation59_spill] sm:$0xff] }
 0x224   : > { %vm12480_vm2 = vcmp.lt.s32.totalorder %v15002_v7, 16  ;;  %v12489_v44 = vshll.u32 %v12449_v26, 16  ;;  %v4175_v33 = vsel %vm12331_vm10, %v4067_v8, 0.0  ;;  %v4034_v16 = vadd.f32 %v12314_v42, %v3991_v21  ;;  %v15015_v26 = vld [vmem:[#allocation50_spill] sm:$0xff] }
 0x225   : > { %v15004_v41 = vsel %vm12480_vm2, 4294967295, %v15003_v41  ;;  %15006 = vst [vmem:[#allocation40_spill] sm:$0xff] %v12486_v22  ;;  %v3994_v27 = vadd.f32 %v8969_v36, %v11812_v13  ;;  %v12495_v7 = vmul.u32 18, %v632_v29  ;;  %v12497_v34 = vpack.c.bf16 %v4176_v0, %v4175_v33 }
 0x226   : > { %15005 = vst [vmem:[#allocation46_spill] sm:$0xff] %v15004_v41  ;;  %15007 = vst [vmem:[#allocation36_spill] sm:$0xff] %v12489_v44  ;;  %vm15011_vm0 = vcmask 1044480   ;;  %vm15013_vm15 = vnez %v15012_v45  ;;  %v15017_v9 = vmov 0  ;;  %v4658_v8 = vrot.slane %v12486_v22, 2 }
 0x227   : > { %15008 = vst [vmem:[#allocation74_spill] sm:$0xff] %v12495_v7  ;;  %15009 = vst [vmem:[#allocation43_spill] sm:$0xff] %v12497_v34  ;;  %v4369_v12 = vsel %vm15011_vm0, %v15010_v54, %v4368_v40  ;;  %v15016_v10 = vsel %vm15013_vm15, %v15014_v23, %v15015_v26  ;;  %v4661_v13 = vrot.slane %v12489_v44, 3  ;;  %v4072_v29 = vmax.f32 %v4036_v47, 0.0  ;;  %v8972_v26 = vpop.f32.mrf.mxu0  ;;  %v15024_v44 = vld [vmem:[#allocation5_spill] sm:$0xff]  ;;  %v15044_v7 = vld [vmem:[#allocation82_spill] sm:$0xff] }
 0x228   : > { %vm12506_vm5 = vcmp.lt.s32.totalorder %v15016_v10, 16  ;;  %v4070_v0 = vmax.f32 %v4034_v16, 0.0  ;;  %v4037_v21 = vadd.f32 %v12314_v42, %v3994_v27  ;;  %v3992_v36 = vadd.f32 %v3863_v56, %v11822_v24  ;;  %9014 = vmatprep.mubr.bf16.mxu1 %v4369_v12  ;;  %v15022_v24 = vld [vmem:[#allocation79_spill] sm:$0xff] }
 0x229   : > { %v15018_v9 = vsel %vm12506_vm5, 4294967295, %v15017_v9  ;;  %v12515_v45 = vshrl.u32 %v12497_v34, 16  ;;  %v12518_v23 = vshll.u32 %v12497_v34, 16  ;;  %v4370_v10 = vrot.slane %v12497_v34, 3  ;;  %v9663_v56 = vld [vmem:[%s14353_s3 + $0xb0] sm:$0xff]  }
 0x22a   : > { %15019 = vst [vmem:[#allocation39_spill] sm:$0xff] %v15018_v9  ;;  %v4662_v33 = vor.u32 %v4661_v13, %v4658_v8  ;;  %v4177_v54 = vsel %vm12379_vm4, %v4069_v1, 0.0  ;;  %v4178_v47 = vsel %vm12388_vm9, %v4070_v0, 0.0  ;;  %v4035_v16 = vadd.f32 %v12314_v42, %v3992_v36  ;;  %v15026_v34 = vld [vmem:[#allocation51_spill] sm:$0xff]  ;;  %v15027_v8 = vld [vmem:[#allocation44_spill] sm:$0xff]  ;;  %v3876_v0 = vpop.f32.mrf.mxu0  ;;  %v15083_v9 = vld [vmem:[#allocation25_spill] sm:$0xff] }
 0x22b   : > { %15020 = vst [vmem:[#allocation32_spill] sm:$0xff] %v12515_v45  ;;  %15021 = vst [vmem:[#allocation34_spill] sm:$0xff] %v12518_v23  ;;  %v3997_v27 = vadd.f32 %v8972_v26, %v15022_v24  ;;  %v12530_v12 = vpack.c.bf16 %v4178_v47, %v4177_v54  ;;  %vm15025_vm0 = vnez %v15024_v44  ;;  %v15029_v1 = vmov 0  ;;  %v15033_v26 = vld [vmem:[#allocation35_spill] sm:$0xff]  ;;  %v15038_v54 = vld [vmem:[#allocation22_spill] sm:$0xff] }
 0x22c   : > { %v15028_v13 = vsel %vm15025_vm0, %v15026_v34, %v15027_v8  ;;  %vm15032_vm9 = vcmask 1044480   ;;  %v15034_v24 = vor.u32 %v14889_v35, %v15033_v26  ;;  %vm15035_vm10 = vsmask.f32 5376  ;;  %v15039_v47 = vld [vmem:[#allocation7_spill] sm:$0xff]  ;;  %v15048_v35 = vld [vmem:[#allocation52_spill] sm:$0xff] }
 0x22d   : > { %15023 = vst [vmem:[#allocation54_spill] sm:$0xff] %v12530_v12  ;;  %vm12537_vm15 = vcmp.lt.s32.totalorder %v15028_v13, 16  ;;  %v4371_v36 = vsel %vm15032_vm9, %v4368_v40, %v4370_v10  ;;  %vm15037_vm4 = vnez %v15036_v60  ;;  %v15041_v22 = vmov 0  ;;  %v15047_v60 = vld [vmem:[#allocation55_spill] sm:$0xff] }
 0x22e   : > { %v15030_v1 = vsel %vm12537_vm15, 4294967295, %v15029_v1  ;;  %v4663_v25 = vsel %vm15035_vm10, %v15034_v24, %v4662_v33  ;;  %v15040_v44 = vsel %vm15037_vm4, %v15038_v54, %v15039_v47  ;;  %v4667_v34 = vrot.slane %v12515_v45, 2  ;;  %9015 = vmatmul.mubr.bf16.vlgmr.msra.gmra.mxu1 %v4371_v36  ;;  %v15045_v24 = vld [vmem:[#allocation57_spill] sm:$0xff]  ;;  %v15058_v45 = vld [vmem:[#allocation26_spill] sm:$0xff] }
 0x22f   : > { %15031 = vst [vmem:[#allocation53_spill] sm:$0xff] %v15030_v1  ;;  %vm12551_vm12 = vcmp.lt.s32.totalorder %v15040_v44, 16  ;;  %v4180_v8 = vsel %vm12435_vm1, %v4072_v29, 0.0  ;;  %v4073_v40 = vmax.f32 %v4037_v21, 0.0  ;;  %v4071_v13 = vmax.f32 %v4035_v16, 0.0  ;;  %9066 = vmatprep.mubr.bf16.mxu0 %v4663_v25  ;;  %v8973_v44 = vpop.f32.mrf.mxu0  ;;  %v9736_v29 = vld [vmem:[%s14353_s3 + $0xb8] sm:$0xff]  }
 0x230   : > { %v15042_v22 = vsel %vm12551_vm12, 4294967295, %v15041_v22  ;;  %v3995_v26 = vadd.f32 %v3876_v0, %v15044_v7  ;;  %vm15046_vm9 = vnez %v15045_v24  ;;  %v15050_v47 = vmov 0  ;;  %9103 = vmatpush3.bf16.msra.mxu1 %v9736_v29  ;;  %v15055_v24 = vld [vmem:[#allocation83_spill] sm:$0xff]  ;;  %v15094_v1 = vld [vmem:[#allocation66_spill] sm:$0xff] }
 0x231   : > { %15043 = vst [vmem:[#allocation50_spill] sm:$0xff] %v15042_v22  ;;  %v15049_v54 = vsel %vm15046_vm9, %v15047_v60, %v15048_v35  ;;  %v4372_v21 = vrot.slane %v12530_v12, 3  ;;  %v4670_v7 = vrot.slane %v12518_v23, 3  ;;  %v12574_v25 = vshrl.u32 %v12530_v12, 16  ;;  %9104 = vmatprep.subr.bf16.mxu1 %v9663_v56  ;;  %v3879_v58 = vpop.f32.mrf.mxu0  ;;  %v15097_v22 = vld [vmem:[#allocation60_spill] sm:$0xff] }
 0x232   : > { %vm12564_vm4 = vcmp.lt.s32.totalorder %v15049_v54, 16  ;;  %v12577_v16 = vshll.u32 %v12530_v12, 16  ;;  %v4179_v35 = vsel %vm12456_vm6, %v4071_v13, 0.0  ;;  %v4040_v0 = vadd.f32 %v12314_v42, %v3997_v27  ;;  %v9664_v54 = vld [vmem:[%s14353_s3 + $0xa8] sm:$0xff]   ;;  %v15060_v13 = vld [vmem:[#allocation63_spill] sm:$0xff] }
 0x233   : > { %v15051_v47 = vsel %vm12564_vm4, 4294967295, %v15050_v47  ;;  %15053 = vst [vmem:[#allocation5_spill] sm:$0xff] %v12574_v25  ;;  %v4038_v36 = vadd.f32 %v12314_v42, %v3995_v26  ;;  %v3998_v60 = vadd.f32 %v8973_v44, %v15055_v24  ;;  %v12587_v29 = vpack.c.bf16 %v4180_v8, %v4179_v35 }
 0x234   : > { %15052 = vst [vmem:[#allocation79_spill] sm:$0xff] %v15051_v47  ;;  %15054 = vst [vmem:[#allocation51_spill] sm:$0xff] %v12577_v16  ;;  %vm15057_vm10 = vcmask 1044480   ;;  %v4671_v23 = vor.u32 %v4670_v7, %v4667_v34  ;;  %vm15059_vm0 = vnez %v15058_v45  ;;  %v15063_v26 = vmov 0  ;;  %v9669_v45 = vld [vmem:[%s14353_s3 + $0xf0] sm:$0xff]   ;;  %v15068_v34 = vld [vmem:[#allocation64_spill] sm:$0xff]  ;;  %9105 = vmatpush3.bf16.msra.mxu1 %v9663_v56 }
 0x235   : > { %15056 = vst [vmem:[#allocation44_spill] sm:$0xff] %v12587_v29  ;;  %v4373_v12 = vsel %vm15057_vm10, %v4370_v10, %v4372_v21  ;;  %v15062_v27 = vsel %vm15059_vm0, %v15060_v13, %v15061_v11  ;;  %v4676_v44 = vrot.slane %v12574_v25, 2  ;;  %v4181_v24 = vsel %vm12480_vm2, %v4073_v40, 0.0  ;;  %v15070_v7 = vld [vmem:[#allocation62_spill] sm:$0xff]  ;;  %v15071_v13 = vld [vmem:[#allocation56_spill] sm:$0xff]  ;;  %v8976_v40 = vpop.f32.mrf.mxu0  ;;  %9106 = vmatprep.subr.bf16.mxu1 %v9664_v54 }
 0x236   : > { %vm12595_vm9 = vcmp.lt.s32.totalorder %v15062_v27, 16  ;;  %v4074_v8 = vmax.f32 %v4038_v36, 0.0  ;;  %v4041_v35 = vadd.f32 %v12314_v42, %v3998_v60  ;;  %v3996_v10 = vadd.f32 %v3879_v58, %v15066_v20  ;;  %9018 = vmatprep.mubr.bf16.mxu1 %v4373_v12  ;;  %v15105_v47 = vld [vmem:[#allocation72_spill] sm:$0xff] }
 0x237   : > { %v15064_v26 = vsel %vm12595_vm9, 4294967295, %v15063_v26  ;;  %vm15067_vm10 = vsmask.f32 5376  ;;  %vm15069_vm0 = vnez %v15068_v34  ;;  %v15073_v41 = vmov 0  ;;  %v15077_v34 = vld [vmem:[#allocation89_spill] sm:$0xff] }
 0x238   : > { %15065 = vst [vmem:[#allocation35_spill] sm:$0xff] %v15064_v26  ;;  %v4672_v11 = vsel %vm15067_vm10, %v4662_v33, %v4671_v23  ;;  %v15072_v27 = vsel %vm15069_vm0, %v15070_v7, %v15071_v13  ;;  %v4374_v36 = vrot.slane %v12587_v29, 3  ;;  %v4679_v20 = vrot.slane %v12577_v16, 3  ;;  %v9665_v13 = vld [vmem:[%s14353_s3 + $0xa0] sm:$0xff]   ;;  %v3892_v16 = vpop.f32.mrf.mxu0  ;;  %9107 = vmatpush3.bf16.msra.mxu1 %v9664_v54 }
 0x239   : > { %vm12613_vm6 = vcmp.lt.s32.totalorder %v15072_v27, 16  ;;  %v12620_v58 = vshrl.u32 %v12587_v29, 16  ;;  %v4076_v12 = vmax.f32 %v4040_v0, 0.0  ;;  %v4182_v33 = vsel %vm12506_vm5, %v4074_v8, 0.0  ;;  %9067 = vmatmul.mubr.bf16.vlgmr.msra.gmra.mxu0 %v4672_v11  ;;  %v15082_v8 = vld [vmem:[#allocation67_spill] sm:$0xff]  ;;  %9108 = vmatprep.subr.bf16.mxu1 %v9665_v13 }
 0x23a   : > { %v15074_v41 = vsel %vm12613_vm6, 4294967295, %v15073_v41  ;;  %v4039_v60 = vadd.f32 %v12314_v42, %v3996_v10  ;;  %v4001_v7 = vadd.f32 %v8976_v40, %v15077_v34  ;;  %v12629_v27 = vpack.c.bf16 %v4182_v33, %v4181_v24  ;;  %v15088_v40 = vld [vmem:[#allocation61_spill] sm:$0xff]  ;;  %v15089_v33 = vld [vmem:[#allocation91_spill] sm:$0xff] }
 0x23b   : > { %15075 = vst [vmem:[#allocation24_spill] sm:$0xff] %v15074_v41  ;;  %15076 = vst [vmem:[#allocation22_spill] sm:$0xff] %v12620_v58  ;;  %v4077_v56 = vmax.f32 %v4041_v35, 0.0  ;;  %vm15079_vm10 = vcmask 1044480   ;;  %v4680_v0 = vor.u32 %v4679_v20, %v4676_v44  ;;  %vm15081_vm0 = vnez %v15080_v62  ;;  %9155 = vmatpush3.bf16.msra.mxu0 %v15088_v40  ;;  %v9670_v62 = vld [vmem:[%s14353_s3 + $0xe8] sm:$0xff]   ;;  %v8977_v44 = vpop.f32.mrf.mxu0  ;;  %v9666_v40 = vld [vmem:[%s14353_s3 + $0x98] sm:$0xff]  }
 0x23c   : > { %15078 = vst [vmem:[#allocation7_spill] sm:$0xff] %v12629_v27  ;;  %v4375_v25 = vsel %vm15079_vm10, %v4372_v21, %v4374_v36  ;;  %v15084_v10 = vsel %vm15081_vm0, %v15082_v8, %v15083_v9  ;;  %v15085_v11 = vmov 0  ;;  %v4075_v34 = vmax.f32 %v4039_v60, 0.0  ;;  %9156 = vmatprep.subr.bf16.mxu0 %v9669_v45  ;;  %9109 = vmatpush3.bf16.msra.mxu1 %v9665_v13 }
 0x23d   : > { %vm12637_vm5 = vcmp.lt.s32.totalorder %v15084_v10, 16  ;;  %v4044_v24 = vadd.f32 %v12314_v42, %v4001_v7  ;;  %v3999_v35 = vadd.f32 %v3892_v16, %v15089_v33  ;;  %9019 = vmatmul.mubr.bf16.gmra.mxu1 %v4375_v25  ;;  %v4685_v21 = vrot.slane %v12620_v58, 2  ;;  %9110 = vmatprep.subr.bf16.mxu1 %v9666_v40 }
 0x23e   : > { %v15086_v11 = vsel %vm12637_vm5, 4294967295, %v15085_v11  ;;  %vm15090_vm10 = vsmask.f32 5376  ;;  %v4376_v20 = vrot.slane %v12629_v27, 3  ;;  %v12651_v8 = vshll.u32 %v12587_v29, 16  ;;  %v15103_v29 = vld [vmem:[#allocation12_spill] sm:$0xff] }
 0x23f   : > { %15087 = vst [vmem:[#allocation82_spill] sm:$0xff] %v15086_v11  ;;  %v4681_v9 = vsel %vm15090_vm10, %v4671_v23, %v4680_v0  ;;  %v12654_v60 = vshrl.u32 %v12629_v27, 16  ;;  %v4184_v25 = vsel %vm12537_vm15, %v4076_v12, 0.0  ;;  %v4183_v16 = vsel %vm12551_vm12, %v4075_v34, 0.0  ;;  %v15092_v23 = vld [vmem:[#allocation94_spill] sm:$0xff]  ;;  %v15096_v12 = vld [vmem:[#allocation9_spill] sm:$0xff]  ;;  %9157 = vmatpush3.bf16.msra.mxu0 %v9669_v45 }
 0x240   : > { %15091 = vst [vmem:[#allocation57_spill] sm:$0xff] %v12651_v8  ;;  %v4042_v7 = vadd.f32 %v12314_v42, %v3999_v35  ;;  %9070 = vmatprep.mubr.bf16.mxu0 %v4681_v9  ;;  %v4002_v10 = vadd.f32 %v8977_v44, %v15092_v23  ;;  %v4185_v33 = vsel %vm12564_vm4, %v4077_v56, 0.0  ;;  %v12667_v54 = vpack.c.bf16 %v4184_v25, %v4183_v16  ;;  %v3895_v9 = vpop.f32.mrf.mxu0  ;;  %v15106_v56 = vld [vmem:[#allocation68_spill] sm:$0xff] }
 0x241   : > { %vm15095_vm0 = vnez %v15094_v1  ;;  %v15099_v35 = vmov 0  ;;  %vm15102_vm12 = vcmask 1044480   ;;  %v4688_v23 = vrot.slane %v12651_v8, 3  ;;  %9158 = vmatprep.subr.bf16.mxu0 %v9670_v62  ;;  %v15112_v8 = vld [vmem:[#allocation71_spill] sm:$0xff]  ;;  %9111 = vmatpush3.bf16.msra.mxu1 %v9666_v40 }
 0x242   : > { %15093 = vst [vmem:[#allocation55_spill] sm:$0xff] %v12667_v54  ;;  %v15098_v34 = vsel %vm15095_vm0, %v15096_v12, %v15097_v22  ;;  %v4377_v44 = vsel %vm15102_vm12, %v4374_v36, %v4376_v20  ;;  %vm15104_vm15 = vnez %v15103_v29  ;;  %v15108_v16 = vmov 0  ;;  %v15111_v12 = vld [vmem:[#allocation95_spill] sm:$0xff]  ;;  %v15114_v29 = vld [vmem:[#allocation69_spill] sm:$0xff] }
 0x243   : > { %vm12674_vm10 = vcmp.lt.s32.totalorder %v15098_v34, 16  ;;  %v15107_v25 = vsel %vm15104_vm15, %v15105_v47, %v15106_v56  ;;  %v4080_v22 = vmax.f32 %v4044_v24, 0.0  ;;  %v4078_v1 = vmax.f32 %v4042_v7, 0.0  ;;  %9022 = vmatprep.mubr.bf16.mxu1 %v4377_v44  ;;  %v8980_v56 = vpop.f32.mrf.mxu0  ;;  %v9668_v44 = vld [vmem:[%s14353_s3 + $0x90] sm:$0xff]   ;;  %9159 = vmatpush3.bf16.msra.mxu0 %v9670_v62 }
 0x244   : > { %v15100_v35 = vsel %vm12674_vm10, 4294967295, %v15099_v35  ;;  %vm12685_vm4 = vcmp.lt.s32.totalorder %v15107_v25, 16  ;;  %v4000_v34 = vadd.f32 %v3895_v9, %v15111_v12  ;;  %v4694_v58 = vrot.slane %v12654_v60, 2  ;;  %9112 = vmatprep.subr.bf16.mxu1 %v9668_v44 }
 0x245   : > { %15101 = vst [vmem:[#allocation52_spill] sm:$0xff] %v15100_v35  ;;  %v15109_v16 = vsel %vm12685_vm4, 4294967295, %v15108_v16  ;;  %v4689_v36 = vor.u32 %v4688_v23, %v4685_v21  ;;  %vm15113_vm12 = vnez %v15112_v8  ;;  %v15117_v47 = vmov 0  ;;  %v9672_v21 = vld [vmem:[%s14353_s3 + $0xe0] sm:$0xff]   ;;  %v3908_v25 = vpop.f32.mrf.mxu0  ;;  %9113 = vmatpush3.bf16.msra.mxu1 %v9668_v44 }
 0x246   : > { %15110 = vst [vmem:[#allocation83_spill] sm:$0xff] %v15109_v16  ;;  %v15116_v18 = vsel %vm15113_vm12, %v15114_v29, %v15115_v55  ;;  %v4378_v45 = vrot.slane %v12667_v54, 3  ;;  %v12702_v24 = vshll.u32 %v12629_v27, 16  ;;  %v12705_v7 = vshrl.u32 %v12667_v54, 16  ;;  %v15123_v29 = vld [vmem:[#allocation80_spill] sm:$0xff]  ;;  %v15133_v27 = vld [vmem:[#allocation75_spill] sm:$0xff]  ;;  %9160 = vmatprep.subr.bf16.mxu0 %v9672_v21 }
 0x247   : > { %vm12696_vm15 = vcmp.lt.s32.totalorder %v15116_v18, 16  ;;  %v4186_v55 = vsel %vm12595_vm9, %v4078_v1, 0.0  ;;  %v4045_v18 = vadd.f32 %v12314_v42, %v4002_v10  ;;  %v4043_v8 = vadd.f32 %v12314_v42, %v4000_v34  ;;  %v15125_v10 = vld [vmem:[#allocation78_spill] sm:$0xff]  ;;  %v15126_v34 = vld [vmem:[#allocation73_spill] sm:$0xff]  ;;  %v8981_v62 = vpop.f32.mrf.mxu0  ;;  %9161 = vmatpush3.bf16.msra.mxu0 %v9672_v21  ;;  %v9675_v21 = vld [vmem:[%s14353_s3 + $0xd0] sm:$0xff]  }
 0x248   : > { %v15118_v47 = vsel %vm12696_vm15, 4294967295, %v15117_v47  ;;  %15120 = vst [vmem:[#allocation63_spill] sm:$0xff] %v12705_v7  ;;  %v4005_v9 = vadd.f32 %v8980_v56, %v12075_v28  ;;  %v12718_v23 = vpack.c.bf16 %v4186_v55, %v4185_v33  ;;  %vm15121_vm0 = vsmask.f32 5376  ;;  %v9674_v44 = vld [vmem:[%s14353_s3 + $0x80] sm:$0xff]  }
 0x249   : > { %15119 = vst [vmem:[#allocation26_spill] sm:$0xff] %v15118_v47  ;;  %v4690_v13 = vsel %vm15121_vm0, %v4680_v0, %v4689_v36  ;;  %vm15122_vm12 = vcmask 1044480   ;;  %v4697_v1 = vrot.slane %v12702_v24, 3  ;;  %vm15124_vm9 = vnez %v15123_v29  ;;  %v15131_v29 = vld [vmem:[#allocation76_spill] sm:$0xff] }
 0x24a   : > { %v4379_v12 = vsel %vm15122_vm12, %v4376_v20, %v4378_v45  ;;  %v15127_v26 = vsel %vm15124_vm9, %v15125_v10, %v15126_v34  ;;  %v15128_v28 = vmov 0  ;;  %v4188_v33 = vsel %vm12613_vm6, %v4080_v22, 0.0  ;;  %9071 = vmatmul.mubr.bf16.gmra.mxu0 %v4690_v13  ;;  %v15134_v10 = vld [vmem:[#allocation70_spill] sm:$0xff] }
 0x24b   : > { %vm12728_vm2 = vcmp.lt.s32.totalorder %v15127_v26, 16  ;;  %v4079_v56 = vmax.f32 %v4043_v8, 0.0  ;;  %v4048_v0 = vadd.f32 %v12314_v42, %v4005_v9  ;;  %v4003_v20 = vadd.f32 %v3908_v25, %v12079_v43  ;;  %9023 = vmatmul.mubr.bf16.gmra.mxu1 %v4379_v12  ;;  %v9673_v43 = vld [vmem:[%s14353_s3 + $0xd8] sm:$0xff]   ;;  %v9671_v12 = vld [vmem:[%s14353_s3 + $0x88] sm:$0xff]  }
 0x24c   : > { %v15129_v28 = vsel %vm12728_vm2, 4294967295, %v15128_v28  ;;  %v4698_v55 = vor.u32 %v4697_v1, %v4694_v58  ;;  %vm15132_vm0 = vnez %v15131_v29  ;;  %v15136_v34 = vmov 0  ;;  %v3911_v29 = vpop.f32.mrf.mxu0  ;;  %9162 = vmatprep.subr.bf16.mxu0 %v9673_v43  ;;  %9114 = vmatprep.subr.bf16.mxu1 %v9671_v12 }
 0x24d   : > { %15130 = vst [vmem:[#allocation59_spill] sm:$0xff] %v15129_v28  ;;  %v15135_v26 = vsel %vm15132_vm0, %v15133_v27, %v15134_v10  ;;  %v4380_v22 = vrot.slane %v12718_v23, 3  ;;  %v4703_v8 = vrot.slane %v12705_v7, 2  ;;  %v12748_v9 = vshll.u32 %v12667_v54, 16  ;;  %9163 = vmatpush3.bf16.msra.mxu0 %v9673_v43  ;;  %9115 = vmatpush3.bf16.msra.mxu1 %v9671_v12 }
 0x24e   : > { %vm12741_vm9 = vcmp.lt.s32.totalorder %v15135_v26, 16  ;;  %v4081_v58 = vmax.f32 %v4045_v18, 0.0  ;;  %v4187_v27 = vsel %vm12637_vm5, %v4079_v56, 0.0  ;;  %v4046_v13 = vadd.f32 %v12314_v42, %v4003_v20  ;;  %v15143_v26 = vld [vmem:[#allocation90_spill] sm:$0xff]  ;;  %v15145_v56 = vld [vmem:[#allocation88_spill] sm:$0xff]  ;;  %v15146_v20 = vld [vmem:[#allocation81_spill] sm:$0xff]  ;;  %v8984_v41 = vpop.f32.mrf.mxu0  ;;  %9164 = vmatprep.subr.bf16.mxu0 %v9675_v21  ;;  %9116 = vmatprep.subr.bf16.mxu1 %v9674_v44 }
 0x24f   : > { %v15137_v34 = vsel %vm12741_vm9, 4294967295, %v15136_v34  ;;  %15139 = vst [vmem:[#allocation64_spill] sm:$0xff] %v12748_v9  ;;  %v4006_v25 = vadd.f32 %v8981_v62, %v12087_v46  ;;  %v12760_v1 = vpack.c.bf16 %v4188_v33, %v4187_v27  ;;  %vm15141_vm12 = vsmask.f32 5376 }
 0x250   : > { %15138 = vst [vmem:[#allocation87_spill] sm:$0xff] %v15137_v34  ;;  %v4699_v40 = vsel %vm15141_vm12, %v4689_v36, %v4698_v55  ;;  %vm15142_vm0 = vcmask 1044480   ;;  %v4706_v18 = vrot.slane %v12748_v9, 3  ;;  %vm15144_vm5 = vnez %v15143_v26 }
 0x251   : > { %15140 = vst [vmem:[#allocation62_spill] sm:$0xff] %v12760_v1  ;;  %v4381_v10 = vsel %vm15142_vm0, %v4378_v45, %v4380_v22  ;;  %v15147_v11 = vsel %vm15144_vm5, %v15145_v56, %v15146_v20  ;;  %v15148_v46 = vmov 0  ;;  %v4084_v62 = vmax.f32 %v4048_v0, 0.0  ;;  %9074 = vmatprep.mubr.bf16.mxu0 %v4699_v40  ;;  %vm15154_vm5 = vmmov %vm15141_vm12  ;;  %v3924_v20 = vpop.f32.mrf.mxu0  ;;  %9165 = vmatpush3.bf16.msra.mxu0 %v9675_v21  ;;  %v15193_v21 = vld [vmem:[#allocation6_spill] sm:$0xff] }
 0x252   : > { %vm12770_vm6 = vcmp.lt.s32.totalorder %v15147_v11, 16  ;;  %v4082_v33 = vmax.f32 %v4046_v13, 0.0  ;;  %v4049_v36 = vadd.f32 %v12314_v42, %v4006_v25  ;;  %v4004_v27 = vadd.f32 %v3911_v29, %v12100_v3  ;;  %9026 = vmatprep.mubr.bf16.mxu1 %v4381_v10  ;;  %v15155_v29 = vld [vmem:[#allocation85_spill] sm:$0xff]  ;;  %v15157_v10 = vld [vmem:[#allocation84_spill] sm:$0xff]  ;;  %9117 = vmatpush3.bf16.msra.mxu1 %v9674_v44 }
 0x253   : > { %v15149_v46 = vsel %vm12770_vm6, 4294967295, %v15148_v46  ;;  %v4707_v45 = vor.u32 %v4706_v18, %v4703_v8  ;;  %v4382_v26 = vrot.slane %v12760_v1, 3  ;;  %v12778_v54 = vshrl.u32 %v12718_v23, 16 }
 0x254   : > { %15150 = vst [vmem:[#allocation56_spill] sm:$0xff] %v15149_v46  ;;  %v12781_v11 = vshll.u32 %v12718_v23, 16  ;;  %v4189_v3 = vsel %vm12674_vm10, %v4081_v58, 0.0  ;;  %v4190_v0 = vsel %vm12685_vm4, %v4082_v33, 0.0  ;;  %v4047_v8 = vadd.f32 %v12314_v42, %v4004_v27  ;;  %v15158_v58 = vld [vmem:[#allocation77_spill] sm:$0xff] }
 0x255   : > { %15151 = vst [vmem:[#allocation89_spill] sm:$0xff] %v12778_v54  ;;  %v4009_v13 = vadd.f32 %v8984_v41, %v12121_v49  ;;  %v12795_v25 = vpack.c.bf16 %v4190_v0, %v4189_v3  ;;  %v4708_v40 = vsel %vm15154_vm5, %v4698_v55, %v4707_v45  ;;  %vm15156_vm12 = vnez %v15155_v29  ;;  %v15169_v29 = vld [vmem:[#allocation97_spill] sm:$0xff] }
 0x256   : > { %15152 = vst [vmem:[#allocation10_spill] sm:$0xff] %v12781_v11  ;;  %v15159_v18 = vsel %vm15156_vm12, %v15157_v10, %v15158_v58  ;;  %v15160_v56 = vmov 0  ;;  %vm15163_vm4 = vcmask 1044480   ;;  %v4712_v41 = vrot.slane %v12778_v54, 2  ;;  %9075 = vmatmul.mubr.bf16.gmra.mxu0 %v4708_v40  ;;  %v15172_v10 = vld [vmem:[#allocation86_spill] sm:$0xff] }
 0x257   : > { %15153 = vst [vmem:[#allocation67_spill] sm:$0xff] %v12795_v25  ;;  %vm12803_vm0 = vcmp.lt.s32.totalorder %v15159_v18, 16  ;;  %v4383_v49 = vsel %vm15163_vm4, %v4380_v22, %v4382_v26  ;;  %vm15164_vm10 = vnez %v14882_v4  ;;  %v15166_v55 = vmov 0  ;;  %v15171_v4 = vld [vmem:[#allocation96_spill] sm:$0xff] }
 0x258   : > { %v15161_v56 = vsel %vm12803_vm0, 4294967295, %v15160_v56  ;;  %v15165_v33 = vsel %vm15164_vm10, %v12040_v5, %v11966_v32  ;;  %v4192_v27 = vsel %vm12696_vm15, %v4084_v62, 0.0  ;;  %v4085_v3 = vmax.f32 %v4049_v36, 0.0  ;;  %9027 = vmatmul.mubr.bf16.gmra.mxu1 %v4383_v49  ;;  %v9676_v5 = vld [vmem:[%s14353_s3 + $0xc8] sm:$0xff]   ;;  %v8985_v62 = vpop.f32.mrf.mxu0 }
 0x259   : > { %15162 = vst [vmem:[#allocation25_spill] sm:$0xff] %v15161_v56  ;;  %vm12814_vm5 = vcmp.lt.s32.totalorder %v15165_v33, 16  ;;  %v4083_v0 = vmax.f32 %v4047_v8, 0.0  ;;  %v4007_v22 = vadd.f32 %v3924_v20, %v12132_v19  ;;  %vm15170_vm4 = vnez %v15169_v29  ;;  %v12849_v33 = vld [vmem:[%s14353_s3 + $0x138] sm:$0xff]   ;;  %9166 = vmatprep.subr.bf16.mxu0 %v9676_v5 }
 0x25a   : > { %v15167_v55 = vsel %vm12814_vm5, 4294967295, %v15166_v55  ;;  %v15173_v58 = vsel %vm15170_vm4, %v15171_v4, %v15172_v10  ;;  %v15174_v32 = vmov 0  ;;  %v4715_v43 = vrot.slane %v12781_v11, 3  ;;  %v3927_v12 = vpop.f32.mrf.mxu0  ;;  %9206 = vmatprep.subr.bf16.mxu1 %v12849_v33  ;;  %9167 = vmatpush3.bf16.msra.mxu0 %v9676_v5  ;;  %v15298_v56 = vld [vmem:[#allocation32_spill] sm:$0xff] }
 0x25b   : > { %15168 = vst [vmem:[#allocation61_spill] sm:$0xff] %v15167_v55  ;;  %vm12826_vm10 = vcmp.lt.s32.totalorder %v15173_v58, 16  ;;  %v4384_v36 = vrot.slane %v12795_v25, 3  ;;  %v12836_v19 = vshrl.u32 %v12760_v1, 16  ;;  %v12839_v8 = vshll.u32 %v12760_v1, 16  ;;  %v15181_v58 = vld [vmem:[#allocation33_spill] sm:$0xff] }
 0x25c   : > { %v15175_v32 = vsel %vm12826_vm10, 4294967295, %v15174_v32  ;;  %v4191_v40 = vsel %vm12728_vm2, %v4083_v0, 0.0  ;;  %v4052_v18 = vadd.f32 %v12314_v42, %v4009_v13  ;;  %v4050_v20 = vadd.f32 %v12314_v42, %v4007_v22  ;;  %v15183_v13 = vld [vmem:[#allocation28_spill] sm:$0xff]  ;;  %v15184_v22 = vld [vmem:[#allocation98_spill] sm:$0xff] }
 0x25d   : > { %15176 = vst [vmem:[#allocation91_spill] sm:$0xff] %v15175_v32  ;;  %15177 = vst [vmem:[#allocation94_spill] sm:$0xff] %v12836_v19  ;;  %v4010_v49 = vadd.f32 %v8985_v62, %v12169_v53  ;;  %v12851_v29 = vpack.c.bf16 %v4192_v27, %v4191_v40  ;;  %v4716_v4 = vor.u32 %v4715_v43, %v4712_v41  ;;  %vm15180_vm12 = vcmask 1044480   ;;  %v15189_v43 = vld [vmem:[#allocation8_spill] sm:$0xff]  ;;  %v9677_v40 = vld [vmem:[%s14353_s3 + $0xc0] sm:$0xff]  }
 0x25e   : > { %15178 = vst [vmem:[#allocation66_spill] sm:$0xff] %v12839_v8  ;;  %v4385_v10 = vsel %vm15180_vm12, %v4382_v26, %v4384_v36  ;;  %v4721_v0 = vrot.slane %v12836_v19, 2  ;;  %vm15182_vm4 = vnez %v15181_v58  ;;  %v15186_v53 = vmov 0  ;;  %9168 = vmatprep.subr.bf16.mxu0 %v9677_v40  ;;  %v15311_v1 = vld [vmem:[#allocation22_spill] sm:$0xff] }
 0x25f   : > { %15179 = vst [vmem:[#allocation9_spill] sm:$0xff] %v12851_v29  ;;  %v15185_v28 = vsel %vm15182_vm4, %v15183_v13, %v15184_v22  ;;  %v4193_v27 = vsel %vm12741_vm9, %v4085_v3, 0.0  ;;  %v4086_v62 = vmax.f32 %v4050_v20, 0.0  ;;  %v4053_v41 = vadd.f32 %v12314_v42, %v4010_v49  ;;  %9030 = vmatprep.mubr.bf16.mxu1 %v4385_v10  ;;  %v15191_v13 = vld [vmem:[#allocation47_spill] sm:$0xff]  ;;  %v15194_v22 = vld [vmem:[#allocation92_spill] sm:$0xff]  ;;  %v8988_v49 = vpop.f32.mrf.mxu0  ;;  %9169 = vmatpush3.bf16.msra.mxu0 %v9677_v40 }
 0x260   : > { %vm12860_vm2 = vcmp.lt.s32.totalorder %v15185_v28, 16  ;;  %v4008_v26 = vadd.f32 %v3927_v12, %v15189_v43  ;;  %vm15190_vm12 = vsmask.f32 5376  ;;  %v4724_v58 = vrot.slane %v12839_v8, 3  ;;  %9258 = vmatprep.subr.bf16.mxu0 %v12909_v59 }
 0x261   : > { %v15187_v53 = vsel %vm12860_vm2, 4294967295, %v15186_v53  ;;  %v4717_v28 = vsel %vm15190_vm12, %v4707_v45, %v4716_v4  ;;  %vm15192_vm4 = vnez %v15191_v13  ;;  %v15196_v20 = vmov 0  ;;  %v3940_v16 = vpop.f32.mrf.mxu0 }
 0x262   : > { %15188 = vst [vmem:[#allocation60_spill] sm:$0xff] %v15187_v53  ;;  %v15195_v3 = vsel %vm15192_vm4, %v15193_v21, %v15194_v22  ;;  %v4386_v12 = vrot.slane %v12851_v29, 3  ;;  %v12884_v10 = vshrl.u32 %v12795_v25, 16  ;;  %v4088_v43 = vmax.f32 %v4052_v18, 0.0  ;;  %9078 = vmatprep.mubr.bf16.mxu0 %v4717_v28 }
 0x263   : > { %vm12878_vm9 = vcmp.lt.s32.totalorder %v15195_v3, 16  ;;  %v4194_v45 = vsel %vm12770_vm6, %v4086_v62, 0.0  ;;  %v4051_v13 = vadd.f32 %v12314_v42, %v4008_v26  ;;  %v4013_v21 = vadd.f32 %v8988_v49, %v12227_v17  ;;  %v8989_v5 = vpop.f32.mrf.mxu0 }
 0x264   : > { %v15197_v20 = vsel %vm12878_vm9, 4294967295, %v15196_v20  ;;  %15199 = vst [vmem:[#allocation72_spill] sm:$0xff] %v12884_v10  ;;  %v12891_v22 = vpack.c.bf16 %v4194_v45, %v4193_v27  ;;  %v4089_v3 = vmax.f32 %v4053_v41, 0.0  ;;  %v4725_v34 = vor.u32 %v4724_v58, %v4721_v0  ;;  %v15206_v27 = vld [vmem:[#allocation41_spill] sm:$0xff] }
 0x265   : > { %15198 = vst [vmem:[#allocation12_spill] sm:$0xff] %v15197_v20  ;;  %vm15201_vm12 = vcmask 1044480   ;;  %v15202_v44 = vsel %vm12202_vm7, %v12188_v37, %v12124_v57  ;;  %v15203_v18 = vmov 0  ;;  %v4087_v17 = vmax.f32 %v4051_v13, 0.0  ;;  %v15210_v58 = vld [vmem:[#allocation45_spill] sm:$0xff] }
 0x266   : > { %15200 = vst [vmem:[#allocation68_spill] sm:$0xff] %v12891_v22  ;;  %v4387_v47 = vsel %vm15201_vm12, %v4384_v36, %v4386_v12  ;;  %vm12899_vm4 = vcmp.lt.s32.totalorder %v15202_v44, 16  ;;  %v4056_v62 = vadd.f32 %v12314_v42, %v4013_v21  ;;  %v4011_v26 = vadd.f32 %v3940_v16, %v15206_v27  ;;  %v15212_v21 = vld [vmem:[#allocation38_spill] sm:$0xff]  ;;  %v15215_v27 = vld [vmem:[#allocation100_spill] sm:$0xff] }
 0x267   : > { %v15204_v18 = vsel %vm12899_vm4, 4294967295, %v15203_v18  ;;  %9031 = vmatmul.mubr.bf16.gmra.mxu1 %v4387_v47  ;;  %v4730_v0 = vrot.slane %v12884_v10, 2  ;;  %vm15207_vm7 = vsmask.f32 5376  ;;  %v12913_v37 = vshll.u32 %v12795_v25, 16  ;;  %v15214_v44 = vld [vmem:[#allocation58_spill] sm:$0xff] }
 0x268   : > { %15205 = vst [vmem:[#allocation95_spill] sm:$0xff] %v15204_v18  ;;  %v4726_v57 = vsel %vm15207_vm7, %v4716_v4, %v4725_v34  ;;  %v4388_v36 = vrot.slane %v12891_v22, 3  ;;  %v12917_v41 = vshrl.u32 %v12851_v29, 16  ;;  %v4196_v16 = vsel %vm12803_vm0, %v4088_v43, 0.0 }
 0x269   : > { %15208 = vst [vmem:[#allocation71_spill] sm:$0xff] %v12913_v37  ;;  %v4195_v47 = vsel %vm12814_vm5, %v4087_v17, 0.0  ;;  %9079 = vmatmul.mubr.bf16.gmra.mxu0 %v4726_v57  ;;  %v4054_v28 = vadd.f32 %v12314_v42, %v4011_v26  ;;  %v4014_v4 = vadd.f32 %v8989_v5, %v15210_v58  ;;  %v4197_v49 = vsel %vm12826_vm10, %v4089_v3, 0.0  ;;  %v3943_v17 = vpop.f32.mrf.mxu0 }
 0x26a   : > { %15209 = vst [vmem:[#allocation69_spill] sm:$0xff] %v12917_v41  ;;  %v12927_v45 = vpack.c.bf16 %v4196_v16, %v4195_v47  ;;  %v4733_v13 = vrot.slane %v12913_v37, 3  ;;  %vm15213_vm12 = vnez %v15212_v21  ;;  %v15217_v55 = vmov 0 }
 0x26b   : > { %v15216_v43 = vsel %vm15213_vm12, %v15214_v44, %v15215_v27  ;;  %vm15220_vm5 = vcmask 1044480   ;;  %vm15221_vm6 = vnez %v14917_v51  ;;  %v15223_v57 = vmov 0  ;;  %v8992_v40 = vpop.f32.mrf.mxu0 }
 0x26c   : > { %15211 = vst [vmem:[#allocation65_spill] sm:$0xff] %v12927_v45  ;;  %vm12935_vm7 = vcmp.lt.s32.totalorder %v15216_v43, 16  ;;  %v4389_v26 = vsel %vm15220_vm5, %v4386_v12, %v4388_v36  ;;  %v15222_v3 = vsel %vm15221_vm6, %v12235_v52, %v12155_v31  ;;  %v4092_v5 = vmax.f32 %v4056_v62, 0.0 }
 0x26d   : > { %v15218_v55 = vsel %vm12935_vm7, 4294967295, %v15217_v55  ;;  %vm12945_vm10 = vcmp.lt.s32.totalorder %v15222_v3, 16  ;;  %v4090_v16 = vmax.f32 %v4054_v28, 0.0  ;;  %v4012_v47 = vadd.f32 %v3943_v17, %v12261_v14  ;;  %9034 = vmatprep.mubr.bf16.mxu1 %v4389_v26  ;;  %v3956_v44 = vpop.f32.mrf.mxu0 }
 0x26e   : > { %15219 = vst [vmem:[#allocation80_spill] sm:$0xff] %v15218_v55  ;;  %v15224_v57 = vsel %vm12945_vm10, 4294967295, %v15223_v57  ;;  %v4739_v58 = vrot.slane %v12917_v41, 2  ;;  %v4734_v12 = vor.u32 %v4733_v13, %v4730_v0  ;;  %v12953_v51 = vshll.u32 %v12851_v29, 16  ;;  %v15296_v55 = vld [vmem:[#allocation40_spill] sm:$0xff] }
 0x26f   : > { %15225 = vst [vmem:[#allocation78_spill] sm:$0xff] %v15224_v57  ;;  %vm15227_vm6 = vnez %v14912_v38  ;;  %v15229_v31 = vmov 0  ;;  %v4390_v14 = vrot.slane %v12927_v45, 3  ;;  %v12966_v62 = vshrl.u32 %v12891_v22, 16 }
 0x270   : > { %15226 = vst [vmem:[#allocation73_spill] sm:$0xff] %v12953_v51  ;;  %v15228_v52 = vsel %vm15227_vm6, %v12191_v2, %v12140_v30  ;;  %v4198_v0 = vsel %vm12860_vm2, %v4090_v16, 0.0  ;;  %v4057_v28 = vadd.f32 %v12314_v42, %v4014_v4  ;;  %v4055_v38 = vadd.f32 %v12314_v42, %v4012_v47  ;;  %v8993_v16 = vpop.f32.mrf.mxu0 }
 0x271   : > { %vm12960_vm5 = vcmp.lt.s32.totalorder %v15228_v52, 16  ;;  %15232 = vst [vmem:[#allocation75_spill] sm:$0xff] %v12966_v62  ;;  %v4017_v13 = vadd.f32 %v8992_v40, %v12265_v63  ;;  %v12973_v30 = vpack.c.bf16 %v4198_v0, %v4197_v49  ;;  %vm15234_vm12 = vsmask.f32 5376  ;;  %v15247_v40 = vld [vmem:[#allocation27_spill] sm:$0xff] }
 0x272   : > { %v15230_v31 = vsel %vm12960_vm5, 4294967295, %v15229_v31  ;;  %v4735_v2 = vsel %vm15234_vm12, %v4725_v34, %v4734_v12  ;;  %v4742_v21 = vrot.slane %v12953_v51, 3  ;;  %vm15235_vm6 = vcmask 1044480  }
 0x273   : > { %15231 = vst [vmem:[#allocation76_spill] sm:$0xff] %v15230_v31  ;;  %15233 = vst [vmem:[#allocation70_spill] sm:$0xff] %v12973_v30  ;;  %v4391_v27 = vsel %vm15235_vm6, %v4388_v36, %v4390_v14  ;;  %v15236_v43 = vsel %vm12370_vm13, %v12353_v39, %v12282_v48  ;;  %v15237_v4 = vmov 0  ;;  %v4200_v63 = vsel %vm12878_vm9, %v4092_v5, 0.0  ;;  %9082 = vmatprep.mubr.bf16.mxu0 %v4735_v2  ;;  %v15241_v48 = vld [vmem:[#allocation16_spill] sm:$0xff]  ;;  %v15242_v39 = vld [vmem:[#allocation101_spill] sm:$0xff]  ;;  %v3959_v2 = vpop.f32.mrf.mxu0 }
 0x274   : > { %vm12983_vm2 = vcmp.lt.s32.totalorder %v15236_v43, 16  ;;  %v4091_v49 = vmax.f32 %v4055_v38, 0.0  ;;  %v4060_v34 = vadd.f32 %v12314_v42, %v4017_v13  ;;  %v4015_v17 = vadd.f32 %v3956_v44, %v12290_v50  ;;  %9035 = vmatmul.mubr.bf16.gmra.mxu1 %v4391_v27  ;;  %v15250_v44 = vld [vmem:[#allocation42_spill] sm:$0xff] }
 0x275   : > { %v15238_v4 = vsel %vm12983_vm2, 4294967295, %v15237_v4  ;;  %v4743_v36 = vor.u32 %v4742_v21, %v4739_v58  ;;  %v4748_v61 = vrot.slane %v12966_v62, 2  ;;  %v12993_v26 = vshll.u32 %v12891_v22, 16  ;;  %v15302_v22 = vld [vmem:[#allocation51_spill] sm:$0xff] }
 0x276   : > { %15239 = vst [vmem:[#allocation90_spill] sm:$0xff] %v15238_v4  ;;  %v15243_v3 = vsel %vm12345_vm3, %v15241_v48, %v15242_v39  ;;  %v15244_v5 = vmov 0  ;;  %v4392_v47 = vrot.slane %v12973_v30, 3  ;;  %v4093_v50 = vmax.f32 %v4057_v28, 0.0  ;;  %vm15249_vm3 = vmmov %vm15235_vm6  ;;  %v15251_v28 = vld [vmem:[#allocation13_spill] sm:$0xff] }
 0x277   : > { %15240 = vst [vmem:[#allocation88_spill] sm:$0xff] %v12993_v26  ;;  %vm13000_vm13 = vcmp.lt.s32.totalorder %v15243_v3, 16  ;;  %v4199_v58 = vsel %vm12899_vm4, %v4091_v49, 0.0  ;;  %v4058_v52 = vadd.f32 %v12314_v42, %v4015_v17  ;;  %v4018_v0 = vadd.f32 %v8993_v16, %v15247_v40  ;;  %v8996_v3 = vpop.f32.mrf.mxu0  ;;  %v15259_v40 = vld [vmem:[#allocation37_spill] sm:$0xff] }
 0x278   : > { %v15245_v5 = vsel %vm13000_vm13, 4294967295, %v15244_v5  ;;  %v13009_v38 = vpack.c.bf16 %v4200_v63, %v4199_v58  ;;  %v4744_v15 = vsel %vm15234_vm12, %v4734_v12, %v4743_v36  ;;  %v4751_v13 = vrot.slane %v12993_v26, 3  ;;  %v15256_v12 = vld [vmem:[#allocation21_spill] sm:$0xff] }
 0x279   : > { %15246 = vst [vmem:[#allocation81_spill] sm:$0xff] %v15245_v5  ;;  %v4393_v21 = vsel %vm15249_vm3, %v4390_v14, %v4392_v47  ;;  %v15252_v27 = vsel %vm12419_vm14, %v15250_v44, %v15251_v28  ;;  %v15253_v43 = vmov 0  ;;  %9083 = vmatmul.mubr.bf16.gmra.mxu0 %v4744_v15  ;;  %v4096_v49 = vmax.f32 %v4060_v34, 0.0  ;;  %vm15261_vm14 = vmmov %vm15234_vm12 }
 0x27a   : > { %15248 = vst [vmem:[#allocation85_spill] sm:$0xff] %v13009_v38  ;;  %vm13019_vm6 = vcmp.lt.s32.totalorder %v15252_v27, 16  ;;  %v4094_v63 = vmax.f32 %v4058_v52, 0.0  ;;  %v4061_v17 = vadd.f32 %v12314_v42, %v4018_v0  ;;  %v4016_v48 = vadd.f32 %v3959_v2, %v15256_v12  ;;  %9038 = vmatprep.mubr.bf16.mxu1 %v4393_v21  ;;  %v3972_v21 = vpop.f32.mrf.mxu0  ;;  %v15264_v12 = vld [vmem:[#allocation17_spill] sm:$0xff] }
 0x27b   : > { %v15254_v43 = vsel %vm13019_vm6, 4294967295, %v15253_v43  ;;  %v4752_v39 = vor.u32 %v4751_v13, %v4748_v61  ;;  %v13026_v14 = vshrl.u32 %v12927_v45, 16  ;;  %v13029_v6 = vshll.u32 %v12927_v45, 16 }
 0x27c   : > { %15255 = vst [vmem:[#allocation84_spill] sm:$0xff] %v15254_v43  ;;  %v4394_v16 = vrot.slane %v13009_v38, 3  ;;  %v4201_v58 = vsel %vm12935_vm7, %v4093_v50, 0.0  ;;  %v4202_v34 = vsel %vm12945_vm10, %v4094_v63, 0.0  ;;  %v4059_v52 = vadd.f32 %v12314_v42, %v4016_v48  ;;  %v15263_v63 = vld [vmem:[#allocation19_spill] sm:$0xff] }
 0x27d   : > { %15257 = vst [vmem:[#allocation77_spill] sm:$0xff] %v13026_v14  ;;  %15258 = vst [vmem:[#allocation97_spill] sm:$0xff] %v13029_v6  ;;  %v4021_v0 = vadd.f32 %v8996_v3, %v15259_v40  ;;  %v13038_v61 = vpack.c.bf16 %v4202_v34, %v4201_v58  ;;  %v4753_v15 = vsel %vm15261_vm14, %v4743_v36, %v4752_v39  ;;  %v4757_v13 = vrot.slane %v13026_v14, 2  ;;  %v15269_v36 = vld [vmem:[#allocation31_spill] sm:$0xff] }
 0x27e   : > { %v4760_v2 = vrot.slane %v13029_v6, 3  ;;  %v4204_v44 = vsel %vm12960_vm5, %v4096_v49, 0.0  ;;  %9086 = vmatprep.mubr.bf16.mxu0 %v4753_v15  ;;  %v4097_v50 = vmax.f32 %v4061_v17, 0.0  ;;  %v4095_v28 = vmax.f32 %v4059_v52, 0.0  ;;  %v8997_v17 = vpop.f32.mrf.mxu0 }
 0x27f   : > { %15260 = vst [vmem:[#allocation96_spill] sm:$0xff] %v13038_v61  ;;  %v15265_v48 = vsel %vm12400_vm8, %v15263_v63, %v15264_v12  ;;  %v15266_v3 = vmov 0  ;;  %v4019_v58 = vadd.f32 %v3972_v21, %v15269_v36  ;;  %v4395_v40 = vsel %vm15249_vm3, %v4392_v47, %v4394_v16  ;;  %v15272_v63 = vld [vmem:[#allocation18_spill] sm:$0xff]  ;;  %vm15273_vm8 = vmmov %vm15261_vm14 }
 0x280   : > { %vm13050_vm12 = vcmp.lt.s32.totalorder %v15265_v48, 16  ;;  %v4761_v34 = vor.u32 %v4760_v2, %v4757_v13  ;;  %v13057_v57 = vshrl.u32 %v12973_v30, 16  ;;  %v13060_v49 = vshll.u32 %v12973_v30, 16  ;;  %9039 = vmatmul.mubr.bf16.gmra.mxu1 %v4395_v40  ;;  %v3975_v48 = vpop.f32.mrf.mxu0  ;;  %v15276_v40 = vld [vmem:[#allocation93_spill] sm:$0xff] }
 0x281   : > { %v15267_v3 = vsel %vm13050_vm12, 4294967295, %v15266_v3  ;;  %v4203_v52 = vsel %vm12983_vm2, %v4095_v28, 0.0  ;;  %v4064_v15 = vadd.f32 %v12314_v42, %v4021_v0  ;;  %v4062_v27 = vadd.f32 %v12314_v42, %v4019_v58  ;;  %v15274_v0 = vld [vmem:[#allocation11_spill] sm:$0xff]  ;;  %v15275_v58 = vld [vmem:[#allocation74_spill] sm:$0xff] }
 0x282   : > { %15268 = vst [vmem:[#allocation86_spill] sm:$0xff] %v15267_v3  ;;  %15270 = vst [vmem:[#allocation33_spill] sm:$0xff] %v13057_v57  ;;  %v4022_v21 = vadd.f32 %v8997_v17, %v15272_v63  ;;  %v13067_v13 = vpack.c.bf16 %v4204_v44, %v4203_v52  ;;  %v4762_v47 = vsel %vm15273_vm8, %v4752_v39, %v4761_v34  ;;  %v4766_v2 = vrot.slane %v13057_v57, 2  ;;  %v15277_v44 = vld [vmem:[#allocation102_spill] sm:$0xff] }
 0x283   : > { %15271 = vst [vmem:[#allocation28_spill] sm:$0xff] %v13060_v49  ;;  %v4769_v12 = vrot.slane %v13060_v49, 3  ;;  %v4205_v36 = vsel %vm13000_vm13, %v4097_v50, 0.0  ;;  %9087 = vmatmul.mubr.bf16.gmra.mxu0 %v4762_v47  ;;  %v4098_v28 = vmax.f32 %v4062_v27, 0.0  ;;  %v634_v4 = vsub.s32 %v15276_v40, %v15275_v58 }
 0x284   : > { %v4020_v52 = vadd.f32 %v3975_v48, %v15277_v44  ;;  %v4396_v39 = vrot.slane %v13038_v61, 3  ;;  %v13080_v63 = vshrl.u32 %v13009_v38, 16  ;;  %v4100_v31 = vmax.f32 %v4064_v15, 0.0 }
 0x285   : > { %v4770_v17 = vor.u32 %v4769_v12, %v4766_v2  ;;  %v4206_v5 = vsel %vm13019_vm6, %v4098_v28, 0.0  ;;  %vm692_vm3 = vcmp.ne.s32.totalorder %v634_v4, 0  ;;  %vm728_vm8 = vcmp.lt.s32.totalorder %v634_v4, 0 }
 0x286   : > { %15278 = vst [vmem:[#allocation98_spill] sm:$0xff] %v13080_v63  ;;  %v13084_v50 = vpack.c.bf16 %v4206_v5, %v4205_v36  ;;  %vm764_vm2 = vmand %vm728_vm8, %vm692_vm3  ;;  %v800_v47 = vadd.s32 18, %v634_v4  ;;  %v4063_v2 = vadd.f32 %v12314_v42, %v4020_v52  ;;  %vm730_vm13 = vcmp.lt.s32.totalorder %v15274_v0, 0 }
 0x287   : > { %v4771_v27 = vsel %vm15261_vm14, %v4761_v34, %v4770_v17  ;;  %vm15279_vm10 = vcmask 1044480   ;;  %v4775_v15 = vrot.slane %v13080_v63, 2  ;;  %v13092_v48 = vshll.u32 %v13009_v38, 16 }
 0x288   : > { %9090 = vmatprep.mubr.bf16.mxu0 %v4771_v27  ;;  %v4397_v12 = vsel %vm15279_vm10, %v4394_v16, %v4396_v39  ;;  %v802_v28 = vadd.s32 18, %v15274_v0  ;;  %v836_v5 = vsel %vm764_vm2, %v800_v47, %v634_v4  ;;  %v4099_v36 = vmax.f32 %v4063_v2, 0.0  ;;  %vm15286_vm2 = vmmov %vm15279_vm10 }
 0x289   : > { %15280 = vst [vmem:[#allocation8_spill] sm:$0xff] %v13092_v48  ;;  %9042 = vmatprep.mubr.bf16.mxu1 %v4397_v12  ;;  %v4398_v34 = vrot.slane %v13067_v13, 3  ;;  %vm13096_vm14 = vcmp.lt.s32.totalorder %v836_v5, 16  ;;  %v15281_v58 = vmov 0  ;;  %v4778_v40 = vrot.slane %v13092_v48, 3 }
 0x28a   : > { %v15282_v58 = vsel %vm13096_vm14, 4294967295, %v15281_v58  ;;  %v13102_v16 = vshrl.u32 %v13038_v61, 16  ;;  %v13105_v44 = vshll.u32 %v13038_v61, 16  ;;  %v4208_v52 = vsel %vm13050_vm12, %v4100_v31, 0.0 }
 0x28b   : > { %15283 = vst [vmem:[#allocation47_spill] sm:$0xff] %v15282_v58  ;;  %v4065_v4 = vadd.f32 %v12314_v42, %v4022_v21  ;;  %v4207_v27 = vsel %vm13096_vm14, %v4099_v36, 0.0  ;;  %v4399_v47 = vsel %vm15286_vm2, %v4396_v39, %v4398_v34  ;;  %v4779_v12 = vor.u32 %v4778_v40, %v4775_v15  ;;  %vm15295_vm14 = vmmov %vm15286_vm2 }
 0x28c   : > { %15284 = vst [vmem:[#allocation6_spill] sm:$0xff] %v13102_v16  ;;  %15285 = vst [vmem:[#allocation92_spill] sm:$0xff] %v13105_v44  ;;  %v13113_v2 = vpack.c.bf16 %v4208_v52, %v4207_v27  ;;  %9043 = vmatmul.mubr.bf16.gmra.mxu1 %v4399_v47  ;;  %v4784_v5 = vrot.slane %v13102_v16, 2  ;;  %v4787_v43 = vrot.slane %v13105_v44, 3  ;;  %v4400_v18 = vrot.slane %v13084_v50, 3 }
 0x28d   : > { %v13119_v3 = vshrl.u32 %v13067_v13, 16  ;;  %v13122_v42 = vshll.u32 %v13067_v13, 16  ;;  %v13125_v31 = vshrl.u32 %v13084_v50, 16  ;;  %vm15290_vm10 = vsmask.f32 5376 }
 0x28e   : > { %v4780_v21 = vsel %vm15290_vm10, %v4770_v17, %v4779_v12  ;;  %v4788_v39 = vor.u32 %v4787_v43, %v4784_v5  ;;  %v4402_v15 = vrot.slane %v13113_v2, 3  ;;  %v13130_v36 = vshll.u32 %v13084_v50, 16 }
 0x28f   : > { %15287 = vst [vmem:[#allocation41_spill] sm:$0xff] %v13119_v3  ;;  %15288 = vst [vmem:[#allocation45_spill] sm:$0xff] %v13122_v42  ;;  %vm15292_vm3 = vcmp.ne.s32.totalorder %v15274_v0, 0  ;;  %9091 = vmatmul.mubr.bf16.gmra.mxu0 %v4780_v21  ;;  %v4401_v52 = vsel %vm15286_vm2, %v4398_v34, %v4400_v18  ;;  %v4793_v27 = vrot.slane %v13119_v3, 2  ;;  %v4796_v43 = vrot.slane %v13122_v42, 3  ;;  %v15297_v21 = vld [vmem:[#allocation36_spill] sm:$0xff] }
 0x290   : > { %15289 = vst [vmem:[#allocation38_spill] sm:$0xff] %v13125_v31  ;;  %15291 = vst [vmem:[#allocation58_spill] sm:$0xff] %v13130_v36  ;;  %v4802_v17 = vrot.slane %v13125_v31, 2  ;;  %v4789_v47 = vsel %vm15290_vm10, %v4779_v12, %v4788_v39  ;;  %9046 = vmatprep.mubr.bf16.mxu1 %v4401_v52  ;;  %v4403_v5 = vsel %vm15295_vm14, %v4400_v18, %v4402_v15  ;;  %v4805_v58 = vrot.slane %v13130_v36, 3 }
 0x291   : > { %vm13136_vm8 = vmand %vm730_vm13, %vm15292_vm3  ;;  %v5081_v53 = vrot.slane %v15296_v55, 3  ;;  %9094 = vmatprep.mubr.bf16.mxu0 %v4789_v47  ;;  %v4797_v20 = vor.u32 %v4796_v43, %v4793_v27  ;;  %v5082_v32 = vrot.slane %v15297_v21, 4  ;;  %v13150_v34 = vshrl.u32 %v13113_v2, 16  ;;  %v15299_v47 = vld [vmem:[#allocation34_spill] sm:$0xff]  ;;  %v15300_v43 = vld [vmem:[#allocation5_spill] sm:$0xff] }
 0x292   : > { %v13153_v46 = vshll.u32 %v13113_v2, 16  ;;  %v838_v12 = vsel %vm13136_vm8, %v802_v28, %v15274_v0  ;;  %v4101_v52 = vmax.f32 %v4065_v4, 0.0  ;;  %v4806_v18 = vor.u32 %v4805_v58, %v4802_v17  ;;  %vm15301_vm14 = vmmov %vm15290_vm10  ;;  %v15308_v28 = vld [vmem:[#allocation48_spill] sm:$0xff] }
 0x293   : > { %vm5077_vm13 = vsmask.f32 4352  ;;  %v5083_v15 = vor.u32 %v5082_v32, %v5081_v53  ;;  %v5085_v35 = vrot.slane %v15298_v56, 3  ;;  %v5086_v27 = vrot.slane %v15299_v47, 4  ;;  %vm15306_vm8 = vmmov %vm15290_vm10  ;;  %v15307_v53 = vld [vmem:[#allocation99_spill] sm:$0xff] }
 0x294   : > { %v5089_v61 = vrot.slane %v15300_v43, 3  ;;  %v4798_v38 = vsel %vm15301_vm14, %v4788_v39, %v4797_v20  ;;  %9047 = vmatmul.mubr.bf16.gmra.mxu1 %v4403_v5  ;;  %v4811_v30 = vrot.slane %v13150_v34, 2  ;;  %v4814_v45 = vrot.slane %v13153_v46, 3  ;;  %vm15313_vm2 = vmmov %vm15306_vm8 }
 0x295   : > { %v5090_v40 = vrot.slane %v15302_v22, 4  ;;  %vm13165_vm3 = vcmp.lt.s32.totalorder %v838_v12, 16  ;;  %v15303_v0 = vmov 0  ;;  %v4807_v32 = vsel %vm15306_vm8, %v4797_v20, %v4806_v18  ;;  %v9679_v12 = vld [vmem:[%s14353_s3 + $0x130] sm:$0xff]  }
 0x296   : > { %v15304_v0 = vsel %vm13165_vm3, 4294967295, %v15303_v0  ;;  %v15309_v58 = vor.u32 %v15307_v53, %v15308_v28  ;;  %v5087_v39 = vor.u32 %v5086_v27, %v5085_v35  ;;  %v4209_v17 = vsel %vm13165_vm3, %v4101_v52, 0.0 }
 0x297   : > { %15305 = vst [vmem:[#allocation100_spill] sm:$0xff] %v15304_v0  ;;  %9095 = vmatmul.mubr.bf16.gmra.mxu0 %v4798_v38  ;;  %v4815_v5 = vor.u32 %v4814_v45, %v4811_v30  ;;  %v5091_v29 = vor.u32 %v5090_v40, %v5089_v61  ;;  %v15310_v25 = vmov 0.0   ;;  %v5097_v45 = vrot.slane %v12654_v60, 3 }
 0x298   : > { %v5084_v4 = vsel %vm5077_vm13, %v15309_v58, %v5083_v15  ;;  %9098 = vmatprep.mubr.bf16.mxu0 %v4807_v32  ;;  %v13180_v20 = vpack.c.bf16 %v15310_v25, %v4209_v17  ;;  %v5088_v28 = vsel %vm5077_vm13, %v5083_v15, %v5087_v39  ;;  %v5093_v58 = vrot.slane %v15311_v1, 3  ;;  %v9680_v25 = vld [vmem:[%s14353_s3 + $0x128] sm:$0xff]  }
 0x299   : > { %9118 = vmatprep.mubr.bf16.mxu1 %v5084_v4  ;;  %v15312_v4 = vld [vmem:[#allocation57_spill] sm:$0xff]  ;;  %v4816_v35 = vsel %vm15313_vm2, %v4806_v18, %v4815_v5  ;;  %v5092_v52 = vsel %vm5077_vm13, %v5087_v39, %v5091_v29  ;;  %v5098_v30 = vrot.slane %v12702_v24, 4  ;;  %v5149_v40 = vrot.slane %v13150_v34, 3 }
 0x29a   : > { %v5094_v38 = vrot.slane %v15312_v4, 4  ;;  %v13194_v15 = vshrl.u32 %v13180_v20, 16  ;;  %v13197_v27 = vshll.u32 %v13180_v20, 16  ;;  %v5101_v39 = vrot.slane %v12705_v7, 3 }
 0x29b   : > { %v5099_v18 = vor.u32 %v5098_v30, %v5097_v45  ;;  %v5102_v17 = vrot.slane %v12748_v9, 4  ;;  %v5150_v5 = vrot.slane %v13153_v46, 4  ;;  %v9682_v30 = vld [vmem:[%s14353_s3 + $0x118] sm:$0xff]   ;;  %vm5738_vm10 = vcmask 1043456  }
 0x29c   : > { %9119 = vmatmul.mubr.bf16.vlgmr.msra.gmra.mxu1 %v5088_v28  ;;  %v5095_v61 = vor.u32 %v5094_v38, %v5093_v58  ;;  %v5106_v58 = vrot.slane %v12781_v11, 4  ;;  %v5452_v38 = vrot.slane %v13194_v15, 3  ;;  %v5455_v45 = vrot.slane %v13197_v27, 4 }
 0x29d   : > { %9122 = vmatprep.mubr.bf16.mxu1 %v5092_v52  ;;  %9207 = vmatpush3.bf16.msra.mxu1 %v12849_v33  ;;  %v9681_v33 = vld [vmem:[%s14353_s3 + $0x120] sm:$0xff]   ;;  %vm6072_vm14 = vsmask.f32 3328  ;;  %vm6733_vm8 = vcmask 1042432  }
 0x29e   : > { %9208 = vmatprep.subr.bf16.mxu1 %v9679_v12  ;;  %v5096_v32 = vsel %vm5077_vm13, %v5091_v29, %v5095_v61  ;;  %v9685_v29 = vld [vmem:[%s14353_s3 + $0x170] sm:$0xff]   ;;  %v5456_v0 = vor.u32 %v5455_v45, %v5452_v38  ;;  %v9689_v38 = vld [vmem:[%s14353_s3 + $0x158] sm:$0xff]  }
 0x29f   : > { %9099 = vmatmul.mubr.bf16.gmra.mxu0 %v4816_v35  ;;  %v13214_v35 = vor.u32 %v5150_v5, %v5149_v40  ;;  %v9684_v40 = vld [vmem:[%s14353_s3 + $0x110] sm:$0xff]   ;;  %v9688_v5 = vld [vmem:[%s14353_s3 + $0x160] sm:$0xff]  }
 0x2a0   : > { %9170 = vmatprep.mubr.bf16.mxu0 %v5088_v28  ;;  %v5100_v28 = vsel %vm5077_vm13, %v5095_v61, %v5099_v18  ;;  %v5103_v61 = vor.u32 %v5102_v17, %v5101_v39  ;;  %v5109_v39 = vrot.slane %v12836_v19, 3  ;;  %v5114_v17 = vrot.slane %v12913_v37, 4 }
 0x2a1   : > { %9209 = vmatpush3.bf16.msra.mxu1 %v9679_v12  ;;  %v5105_v12 = vrot.slane %v12778_v54, 3 }
 0x2a2   : > { %9210 = vmatprep.subr.bf16.mxu1 %v9680_v25 }
 0x2a3   : > { %v5107_v11 = vor.u32 %v5106_v58, %v5105_v12 }
 0x2a4   : > { %9123 = vmatmul.mubr.bf16.gmra.mxu1 %v5096_v32 }
 0x2a5   : > { %9126 = vmatprep.mubr.bf16.mxu1 %v5100_v28  ;;  %9211 = vmatpush3.bf16.msra.mxu1 %v9680_v25  ;;  %v13223_v25 = vsel %vm5077_vm13, %v13214_v35, %v5456_v0  ;;  %v5113_v0 = vrot.slane %v12884_v10, 3 }
 0x2a6   : > { %9212 = vmatprep.subr.bf16.mxu1 %v9681_v33 }
 0x2a7   : > { %9171 = vmatmul.mubr.bf16.vlgmr.msra.gmra.mxu0 %v5092_v52  ;;  %v9686_v52 = vld [vmem:[%s14353_s3 + $0x168] sm:$0xff]   ;;  %v5115_v58 = vor.u32 %v5114_v17, %v5113_v0 }
 0x2a8   : > { %9174 = vmatprep.mubr.bf16.mxu0 %v5096_v32  ;;  %9259 = vmatpush3.bf16.msra.mxu0 %v12909_v59  ;;  %v5104_v32 = vsel %vm5077_vm13, %v5099_v18, %v5103_v61  ;;  %v5110_v59 = vrot.slane %v12839_v8, 4  ;;  %v9687_v18 = vld [vmem:[%s14353_s3 + $0x108] sm:$0xff]  }
 0x2a9   : > { %9213 = vmatpush3.bf16.msra.mxu1 %v9681_v33  ;;  %9260 = vmatprep.subr.bf16.mxu0 %v9685_v29  ;;  %v5108_v33 = vsel %vm5077_vm13, %v5103_v61, %v5107_v11  ;;  %v9692_v0 = vld [vmem:[%s14353_s3 + $0x148] sm:$0xff]  }
 0x2aa   : > { %9214 = vmatprep.subr.bf16.mxu1 %v9682_v30  ;;  %v5111_v12 = vor.u32 %v5110_v59, %v5109_v39 }
 0x2ac   : > { %9127 = vmatmul.mubr.bf16.gmra.mxu1 %v5104_v32  ;;  %9261 = vmatpush3.bf16.msra.mxu0 %v9685_v29  ;;  %v9690_v29 = vld [vmem:[%s14353_s3 + $0x100] sm:$0xff]   ;;  %v5112_v45 = vsel %vm5077_vm13, %v5107_v11, %v5111_v12  ;;  %v5116_v61 = vsel %vm5077_vm13, %v5111_v12, %v5115_v58  ;;  %v13261_v11 = vld [vmem:[%s14353_s3 + $0x1b8] sm:$0xff]  }
 0x2ad   : > { %9130 = vmatprep.mubr.bf16.mxu1 %v5108_v33  ;;  %9215 = vmatpush3.bf16.msra.mxu1 %v9682_v30  ;;  %v5117_v30 = vrot.slane %v12917_v41, 3 }
 0x2ae   : > { %9216 = vmatprep.subr.bf16.mxu1 %v9684_v40  ;;  %9262 = vmatprep.subr.bf16.mxu0 %v9686_v52 }
 0x2af   : > { %9175 = vmatmul.mubr.bf16.gmra.mxu0 %v5100_v28  ;;  %v5118_v28 = vrot.slane %v12953_v51, 4 }
 0x2b0   : > { %9178 = vmatprep.mubr.bf16.mxu0 %v5104_v32  ;;  %9263 = vmatpush3.bf16.msra.mxu0 %v9686_v52  ;;  %v5122_v52 = vrot.slane %v12993_v26, 4  ;;  %v9691_v32 = vld [vmem:[%s14353_s3 + $0x150] sm:$0xff]  }
 0x2b1   : > { %9217 = vmatpush3.bf16.msra.mxu1 %v9684_v40  ;;  %9264 = vmatprep.subr.bf16.mxu0 %v9688_v5  ;;  %v5121_v40 = vrot.slane %v12966_v62, 3  ;;  %v5119_v39 = vor.u32 %v5118_v28, %v5117_v30  ;;  %v5772_v30 = vrot.slane %v13113_v2, 4 }
 0x2b2   : > { %9218 = vmatprep.subr.bf16.mxu1 %v9687_v18 }
 0x2b3   : > { %v5123_v59 = vor.u32 %v5122_v52, %v5121_v40  ;;  %v5120_v17 = vsel %vm5077_vm13, %v5115_v58, %v5119_v39  ;;  %v9693_v58 = vld [vmem:[%s14353_s3 + $0x140] sm:$0xff]   ;;  %v6140_v40 = vrot.slane %v13150_v34, 4 }
 0x2b4   : > { %9131 = vmatmul.mubr.bf16.gmra.mxu1 %v5112_v45  ;;  %9265 = vmatpush3.bf16.msra.mxu0 %v9688_v5  ;;  %v5125_v5 = vrot.slane %v13026_v14, 3  ;;  %v6145_v14 = vrot.slane %v13197_v27, 5 }
 0x2b5   : > { %9134 = vmatprep.mubr.bf16.mxu1 %v5116_v61  ;;  %9219 = vmatpush3.bf16.msra.mxu1 %v9687_v18  ;;  %v5126_v18 = vrot.slane %v13029_v6, 4  ;;  %v5124_v12 = vsel %vm5077_vm13, %v5119_v39, %v5123_v59  ;;  %v6141_v39 = vrot.slane %v13153_v46, 5  ;;  %v6144_v6 = vrot.slane %v13194_v15, 4 }
 0x2b6   : > { %9266 = vmatprep.subr.bf16.mxu0 %v9689_v38  ;;  %9220 = vmatprep.subr.bf16.mxu1 %v9690_v29 }
 0x2b7   : > { %9179 = vmatmul.mubr.bf16.gmra.mxu0 %v5108_v33  ;;  %v5129_v33 = vrot.slane %v13057_v57, 3  ;;  %v5127_v52 = vor.u32 %v5126_v18, %v5125_v5  ;;  %v13297_v5 = vor.u32 %v6141_v39, %v6140_v40  ;;  %v5141_v40 = vrot.slane %v13119_v3, 3 }
 0x2b8   : > { %9182 = vmatprep.mubr.bf16.mxu0 %v5112_v45  ;;  %9267 = vmatpush3.bf16.msra.mxu0 %v9689_v38  ;;  %v5130_v38 = vrot.slane %v13060_v49, 4  ;;  %v5770_v45 = vrot.slane %v13084_v50, 4  ;;  %v5774_v49 = vrot.slane %v13180_v20, 4 }
 0x2b9   : > { %9221 = vmatpush3.bf16.msra.mxu1 %v9690_v29  ;;  %9268 = vmatprep.subr.bf16.mxu0 %v9691_v32  ;;  %v14622_v29 = vrot.slane %v13067_v13, 4  ;;  %15315 = vst [vmem:[#allocation101_spill] sm:$0xff] %v13297_v5 }
 0x2ba   : > { %9310 = vmatprep.subr.bf16.mxu1 %v13261_v11  ;;  %v5131_v57 = vor.u32 %v5130_v38, %v5129_v33  ;;  %v13300_v18 = vsel %vm5738_vm10, %v5772_v30, %v5774_v49  ;;  %v5134_v33 = vrot.slane %v13092_v48, 4 }
 0x2bb   : > { %v13282_v28 = vsel %vm5738_vm10, %v14622_v29, %v5770_v45  ;;  %v5137_v29 = vrot.slane %v13102_v16, 3 }
 0x2bc   : > { %9135 = vmatmul.mubr.bf16.gmra.mxu1 %v5120_v17  ;;  %9269 = vmatpush3.bf16.msra.mxu0 %v9691_v32  ;;  %v13286_v32 = vsel %vm5738_vm10, %v5770_v45, %v5772_v30  ;;  %v6146_v45 = vor.u32 %v6145_v14, %v6144_v6  ;;  %v5132_v38 = vsel %vm5077_vm13, %v5127_v52, %v5131_v57  ;;  %v6763_v30 = vrot.slane %v13084_v50, 5 }
 0x2bd   : > { %9138 = vmatprep.mubr.bf16.mxu1 %v5124_v12  ;;  %9270 = vmatprep.subr.bf16.mxu0 %v9692_v0  ;;  %15314 = vst [vmem:[#allocation16_spill] sm:$0xff] %v13286_v32  ;;  %v5138_v32 = vrot.slane %v13105_v44, 4  ;;  %v5145_v50 = vrot.slane %v13125_v31, 3 }
 0x2be   : > { %v13310_v49 = vsel %vm6072_vm14, %v13297_v5, %v6146_v45 }
 0x2bf   : > { %9183 = vmatmul.mubr.bf16.gmra.mxu0 %v5116_v61  ;;  %v13295_v61 = vld [vmem:[%s14353_s3 + $0x1f8] sm:$0xff]   ;;  %15316 = vst [vmem:[#allocation27_spill] sm:$0xff] %v13310_v49  ;;  %v5139_v6 = vor.u32 %v5138_v32, %v5137_v29 }
 0x2c0   : > { %9186 = vmatprep.mubr.bf16.mxu0 %v5120_v17  ;;  %9271 = vmatpush3.bf16.msra.mxu0 %v9692_v0  ;;  %v5128_v17 = vsel %vm5077_vm13, %v5123_v59, %v5127_v52  ;;  %v5133_v0 = vrot.slane %v13080_v63, 3  ;;  %v14624_v59 = vrot.slane %v13067_v13, 5  ;;  %v5142_v52 = vrot.slane %v13122_v42, 4 }
 0x2c1   : > { %9272 = vmatprep.subr.bf16.mxu0 %v9693_v58 }
 0x2c2   : > { %v5135_v14 = vor.u32 %v5134_v33, %v5133_v0  ;;  %v13321_v39 = vsel %vm6733_vm8, %v14624_v59, %v6763_v30  ;;  %v5146_v0 = vrot.slane %v13130_v36, 4 }
 0x2c3   : > { %15317 = vst [vmem:[#allocation42_spill] sm:$0xff] %v13321_v39 }
 0x2c4   : > { %9139 = vmatmul.mubr.bf16.gmra.mxu1 %v5128_v17  ;;  %9273 = vmatpush3.bf16.msra.mxu0 %v9693_v58  ;;  %v6765_v58 = vrot.slane %v13113_v2, 5  ;;  %v5136_v32 = vsel %vm5077_vm13, %v5131_v57, %v5135_v14  ;;  %v5140_v2 = vsel %vm5077_vm13, %v5135_v14, %v5139_v6 }
 0x2c5   : > { %9142 = vmatprep.mubr.bf16.mxu1 %v5132_v38  ;;  %9362 = vmatprep.subr.bf16.mxu0 %v13295_v61 }
 0x2c6   : > { %v13329_v33 = vsel %vm6733_vm8, %v6763_v30, %v6765_v58  ;;  %v5143_v30 = vor.u32 %v5142_v52, %v5141_v40  ;;  %v7132_v40 = vrot.slane %v13153_v46, 6  ;;  %v7135_v52 = vrot.slane %v13194_v15, 5  ;;  %v15326_v46 = vld [vmem:[#allocation54_spill] sm:$0xff]  ;;  %v15327_v15 = vld [vmem:[#allocation44_spill] sm:$0xff] }
 0x2c7   : > { %9187 = vmatmul.mubr.bf16.gmra.mxu0 %v5124_v12  ;;  %v6767_v12 = vrot.slane %v13180_v20, 5  ;;  %15319 = vst [vmem:[#allocation13_spill] sm:$0xff] %v13329_v33  ;;  %v15321_v20 = vmov 0.0|0.0   ;;  %v5147_v33 = vor.u32 %v5146_v0, %v5145_v50  ;;  %v5742_v0 = vrot.slane %v15326_v46, 4 }
 0x2c8   : > { %9190 = vmatprep.mubr.bf16.mxu0 %v5128_v17  ;;  %v15318_v17 = vmov 0   ;;  %v6769_v39 = vrot.slane %v15321_v20, 5  ;;  %v5144_v14 = vsel %vm5077_vm13, %v5139_v6, %v5143_v30 }
 0x2c9   : > { %v6450_v29 = vrot.slane %v15318_v17, 5  ;;  %v13333_v49 = vsel %vm6733_vm8, %v6765_v58, %v6767_v12  ;;  %v5148_v58 = vsel %vm5077_vm13, %v5143_v30, %v5147_v33  ;;  %v9695_v30 = vld [vmem:[%s14353_s3 + $0x1b0] sm:$0xff]  }
 0x2ca   : > { %15320 = vst [vmem:[#allocation21_spill] sm:$0xff] %v13333_v49  ;;  %v13341_v5 = vsel %vm6733_vm8, %v6767_v12, %v6769_v39  ;;  %v15324_v49 = vld [vmem:[#allocation29_spill] sm:$0xff]  ;;  %v7136_v39 = vrot.slane %v13197_v27, 6  ;;  %v7140_v12 = vrot.slane %v15318_v17, 6 }
 0x2cb   : > { %v6451_v59 = vor.u32 %v6450_v29, %v15307_v53  ;;  %15322 = vst [vmem:[#allocation37_spill] sm:$0xff] %v13341_v5  ;;  %v15323_v53 = vld [vmem:[#allocation43_spill] sm:$0xff]  ;;  %v15343_v5 = vld [vmem:[#allocation28_spill] sm:$0xff] }
 0x2cc   : > { %9143 = vmatmul.mubr.bf16.gmra.mxu1 %v5136_v32  ;;  %v5740_v20 = vrot.slane %v15323_v53, 4  ;;  %v7141_v50 = vor.u32 %v7140_v12, %v6450_v29  ;;  %v6073_v29 = vrot.slane %v15296_v55, 4  ;;  %v6081_v55 = vrot.slane %v15302_v22, 5 }
 0x2cd   : > { %9146 = vmatprep.mubr.bf16.mxu1 %v5140_v2  ;;  %v13338_v57 = vsel %vm6072_vm14, %v6146_v45, %v6451_v59  ;;  %v5739_v45 = vrot.slane %v15324_v49, 4  ;;  %v7131_v59 = vrot.slane %v13150_v34, 5  ;;  %v7137_v49 = vor.u32 %v7136_v39, %v7135_v52 }
 0x2ce   : > { %v6076_v34 = vrot.slane %v15298_v56, 4  ;;  %v6085_v52 = vrot.slane %v15312_v4, 5 }
 0x2cf   : > { %9191 = vmatmul.mubr.bf16.gmra.mxu0 %v5132_v38  ;;  %v5152_v38 = vsel %vm5077_vm13, %v5147_v33, %v13214_v35  ;;  %v5741_v6 = vsel %vm5738_vm10, %v5739_v45, %v5740_v20  ;;  %v6077_v35 = vrot.slane %v15299_v47, 5  ;;  %vm7067_vm13 = vsmask.f32 2304 }
 0x2d0   : > { %9194 = vmatprep.mubr.bf16.mxu0 %v5136_v32  ;;  %v13355_v32 = vor.u32 %v7132_v40, %v7131_v59  ;;  %v5744_v33 = vrot.slane %v15327_v15, 4  ;;  %v13366_v17 = vsel %vm7067_vm13, %v7137_v49, %v7141_v50  ;;  %v6084_v40 = vrot.slane %v15311_v1, 4  ;;  %v9697_v50 = vld [vmem:[%s14353_s3 + $0x1a0] sm:$0xff]  }
 0x2d1   : > { %15329 = vst [vmem:[#allocation17_spill] sm:$0xff] %v13366_v17 }
 0x2d2   : > { %15325 = vst [vmem:[#allocation20_spill] sm:$0xff] %v13355_v32  ;;  %v13363_v27 = vsel %vm7067_vm13, %v13355_v32, %v7137_v49  ;;  %v5745_v45 = vsel %vm5738_vm10, %v5742_v0, %v5744_v33 }
 0x2d3   : > { %15328 = vst [vmem:[#allocation19_spill] sm:$0xff] %v13363_v27 }
 0x2d4   : > { %9147 = vmatmul.mubr.bf16.gmra.mxu1 %v5144_v14 }
 0x2d5   : > { %9150 = vmatprep.mubr.bf16.mxu1 %v5148_v58 }
 0x2d7   : > { %9195 = vmatmul.mubr.bf16.gmra.mxu0 %v5140_v2  ;;  %v6074_v2 = vrot.slane %v15297_v21, 5  ;;  %v9696_v21 = vld [vmem:[%s14353_s3 + $0x1a8] sm:$0xff]  }
 0x2d8   : > { %9198 = vmatprep.mubr.bf16.mxu0 %v5144_v14  ;;  %v6078_v14 = vor.u32 %v6077_v35, %v6076_v34  ;;  %v6086_v34 = vor.u32 %v6085_v52, %v6084_v40  ;;  %v9702_v40 = vld [vmem:[%s14353_s3 + $0x1e8] sm:$0xff]  }
 0x2d9   : > { %v6075_v59 = vor.u32 %v6074_v2, %v6073_v29  ;;  %v6088_v2 = vrot.slane %v12654_v60, 4 }
 0x2dc   : > { %9151 = vmatmul.mubr.bf16.gmra.mxu1 %v5152_v38 }
 0x2dd   : > { %9222 = vmatprep.mubr.bf16.mxu1 %v5741_v6  ;;  %v15330_v6 = vld [vmem:[#allocation7_spill] sm:$0xff] }
 0x2de   : > { %v5746_v39 = vrot.slane %v15330_v6, 4 }
 0x2df   : > { %9199 = vmatmul.mubr.bf16.gmra.mxu0 %v5148_v58  ;;  %v5743_v58 = vsel %vm5738_vm10, %v5740_v20, %v5742_v0  ;;  %v6079_v20 = vsel %vm6072_vm14, %v6075_v59, %v6078_v14  ;;  %v9701_v0 = vld [vmem:[%s14353_s3 + $0x1f0] sm:$0xff]   ;;  %v6093_v59 = vrot.slane %v12748_v9, 5 }
 0x2e0   : > { %9202 = vmatprep.mubr.bf16.mxu0 %v5152_v38  ;;  %v6080_v38 = vrot.slane %v15300_v43, 4 }
 0x2e2   : > { %v6082_v49 = vor.u32 %v6081_v55, %v6080_v38  ;;  %v15332_v38 = vld [vmem:[#allocation62_spill] sm:$0xff] }
 0x2e3   : > { %v5752_v55 = vrot.slane %v15332_v38, 4 }
 0x2e4   : > { %9223 = vmatmul.mubr.bf16.vlgmr.msra.gmra.mxu1 %v5743_v58  ;;  %v13396_v29 = vsel %vm6072_vm14, %v6078_v14, %v6082_v49  ;;  %v13405_v58 = vsel %vm6072_vm14, %v6082_v49, %v6086_v34  ;;  %v5750_v14 = vrot.slane %v12718_v23, 4 }
 0x2e5   : > { %9226 = vmatprep.mubr.bf16.mxu1 %v5745_v45  ;;  %9311 = vmatpush3.bf16.msra.mxu1 %v13261_v11  ;;  %v15331_v11 = vld [vmem:[#allocation55_spill] sm:$0xff]  ;;  %v6092_v45 = vrot.slane %v12705_v7, 4 }
 0x2e6   : > { %9312 = vmatprep.subr.bf16.mxu1 %v9695_v30  ;;  %v5748_v12 = vrot.slane %v15331_v11, 4  ;;  %v5753_v49 = vsel %vm5738_vm10, %v5750_v14, %v5752_v55 }
 0x2e7   : > { %9203 = vmatmul.mubr.bf16.gmra.mxu0 %v13223_v25  ;;  %v5747_v25 = vsel %vm5738_vm10, %v5744_v33, %v5746_v39  ;;  %v9698_v33 = vld [vmem:[%s14353_s3 + $0x198] sm:$0xff]   ;;  %v6094_v52 = vor.u32 %v6093_v59, %v6092_v45  ;;  %v15335_v59 = vld [vmem:[#allocation9_spill] sm:$0xff] }
 0x2e8   : > { %9274 = vmatprep.mubr.bf16.mxu0 %v6079_v20  ;;  %v5749_v35 = vsel %vm5738_vm10, %v5746_v39, %v5748_v12  ;;  %v9700_v20 = vld [vmem:[%s14353_s3 + $0x190] sm:$0xff]   ;;  %v5751_v39 = vsel %vm5738_vm10, %v5748_v12, %v5750_v14  ;;  %v9703_v12 = vld [vmem:[%s14353_s3 + $0x188] sm:$0xff]   ;;  %v5756_v14 = vrot.slane %v15335_v59, 4 }
 0x2e9   : > { %9313 = vmatpush3.bf16.msra.mxu1 %v9695_v30  ;;  %v6089_v30 = vrot.slane %v12702_v24, 5 }
 0x2ea   : > { %9314 = vmatprep.subr.bf16.mxu1 %v9696_v21 }
 0x2ec   : > { %9227 = vmatmul.mubr.bf16.gmra.mxu1 %v5747_v25  ;;  %v6096_v25 = vrot.slane %v12778_v54, 4  ;;  %v6129_v54 = vrot.slane %v13105_v44, 5 }
 0x2ed   : > { %9230 = vmatprep.mubr.bf16.mxu1 %v5749_v35  ;;  %9315 = vmatpush3.bf16.msra.mxu1 %v9696_v21  ;;  %v6090_v21 = vor.u32 %v6089_v30, %v6088_v2  ;;  %v15333_v35 = vld [vmem:[#allocation10_spill] sm:$0xff]  ;;  %v6100_v30 = vrot.slane %v12836_v19, 4 }
 0x2ee   : > { %9316 = vmatprep.subr.bf16.mxu1 %v9697_v50  ;;  %v6097_v2 = vrot.slane %v15333_v35, 5  ;;  %v6121_v35 = vrot.slane %v15343_v5, 5 }
 0x2ef   : > { %9275 = vmatmul.mubr.bf16.vlgmr.msra.gmra.mxu0 %v13396_v29 }
 0x2f0   : > { %9278 = vmatprep.mubr.bf16.mxu0 %v13405_v58  ;;  %9363 = vmatpush3.bf16.msra.mxu0 %v13295_v61  ;;  %v9704_v61 = vld [vmem:[%s14353_s3 + $0x1e0] sm:$0xff]  }
 0x2f1   : > { %9317 = vmatpush3.bf16.msra.mxu1 %v9697_v50  ;;  %9364 = vmatprep.subr.bf16.mxu0 %v9701_v0  ;;  %v13425_v50 = vsel %vm6072_vm14, %v6086_v34, %v6090_v21  ;;  %v6101_v34 = vrot.slane %v12839_v8, 5 }
 0x2f2   : > { %9318 = vmatprep.subr.bf16.mxu1 %v9698_v33 }
 0x2f3   : > { %v6102_v17 = vor.u32 %v6101_v34, %v6100_v30  ;;  %v15337_v30 = vld [vmem:[#allocation65_spill] sm:$0xff] }
 0x2f4   : > { %9231 = vmatmul.mubr.bf16.gmra.mxu1 %v5751_v39  ;;  %9365 = vmatpush3.bf16.msra.mxu0 %v9701_v0  ;;  %v13434_v0 = vsel %vm6072_vm14, %v6090_v21, %v6094_v52  ;;  %v6098_v39 = vor.u32 %v6097_v2, %v6096_v25  ;;  %v9705_v21 = vld [vmem:[%s14353_s3 + $0x1d8] sm:$0xff]   ;;  %v6104_v25 = vrot.slane %v12884_v10, 4  ;;  %v6105_v2 = vrot.slane %v12913_v37, 5  ;;  %v15341_v10 = vld [vmem:[#allocation85_spill] sm:$0xff] }
 0x2f5   : > { %9234 = vmatprep.mubr.bf16.mxu1 %v5753_v49  ;;  %9319 = vmatpush3.bf16.msra.mxu1 %v9698_v33  ;;  %v15334_v33 = vld [vmem:[#allocation67_spill] sm:$0xff]  ;;  %v9706_v49 = vld [vmem:[%s14353_s3 + $0x180] sm:$0xff]   ;;  %v5760_v34 = vrot.slane %v15337_v30, 4 }
 0x2f6   : > { %9320 = vmatprep.subr.bf16.mxu1 %v9700_v20  ;;  %9366 = vmatprep.subr.bf16.mxu0 %v9702_v40  ;;  %v5754_v45 = vrot.slane %v15334_v33, 4  ;;  %v6106_v37 = vor.u32 %v6105_v2, %v6104_v25  ;;  %v6112_v25 = vrot.slane %v12966_v62, 4  ;;  %v6113_v2 = vrot.slane %v12993_v26, 5 }
 0x2f7   : > { %9279 = vmatmul.mubr.bf16.gmra.mxu0 %v13425_v50 }
 0x2f8   : > { %9282 = vmatprep.mubr.bf16.mxu0 %v13434_v0  ;;  %9367 = vmatpush3.bf16.msra.mxu0 %v9702_v40  ;;  %v5755_v27 = vsel %vm5738_vm10, %v5752_v55, %v5754_v45  ;;  %v5757_v32 = vsel %vm5738_vm10, %v5754_v45, %v5756_v14  ;;  %v13453_v40 = vsel %vm6072_vm14, %v6094_v52, %v6098_v39  ;;  %v6108_v55 = vrot.slane %v12917_v41, 4  ;;  %v9708_v45 = vld [vmem:[%s14353_s3 + $0x1c8] sm:$0xff]  }
 0x2f9   : > { %9321 = vmatpush3.bf16.msra.mxu1 %v9700_v20  ;;  %9368 = vmatprep.subr.bf16.mxu0 %v9704_v61  ;;  %v9707_v20 = vld [vmem:[%s14353_s3 + $0x1d0] sm:$0xff]   ;;  %v6109_v52 = vrot.slane %v12953_v51, 5  ;;  %v6114_v62 = vor.u32 %v6113_v2, %v6112_v25  ;;  %v6124_v25 = vrot.slane %v13080_v63, 4 }
 0x2fa   : > { %9322 = vmatprep.subr.bf16.mxu1 %v9703_v12 }
 0x2fc   : > { %9235 = vmatmul.mubr.bf16.gmra.mxu1 %v5755_v27  ;;  %9369 = vmatpush3.bf16.msra.mxu0 %v9704_v61  ;;  %v13460_v27 = vld [vmem:[%s14353_s3 + $0x238] sm:$0xff]  }
 0x2fd   : > { %9238 = vmatprep.mubr.bf16.mxu1 %v5757_v32  ;;  %9323 = vmatpush3.bf16.msra.mxu1 %v9703_v12  ;;  %v13464_v32 = vsel %vm6072_vm14, %v6098_v39, %v6102_v17  ;;  %v15336_v61 = vld [vmem:[#allocation68_spill] sm:$0xff]  ;;  %v6110_v39 = vor.u32 %v6109_v52, %v6108_v55  ;;  %v15340_v52 = vld [vmem:[#allocation70_spill] sm:$0xff] }
 0x2fe   : > { %9370 = vmatprep.subr.bf16.mxu0 %v9705_v21  ;;  %9324 = vmatprep.subr.bf16.mxu1 %v9706_v49  ;;  %v5758_v12 = vrot.slane %v15336_v61, 4 }
 0x2ff   : > { %9283 = vmatmul.mubr.bf16.gmra.mxu0 %v13453_v40 }
 0x300   : > { %9286 = vmatprep.mubr.bf16.mxu0 %v13464_v32  ;;  %9371 = vmatpush3.bf16.msra.mxu0 %v9705_v21  ;;  %v5759_v41 = vsel %vm5738_vm10, %v5756_v14, %v5758_v12  ;;  %v5761_v51 = vsel %vm5738_vm10, %v5758_v12, %v5760_v34  ;;  %v9709_v21 = vld [vmem:[%s14353_s3 + $0x1c0] sm:$0xff]   ;;  %v5762_v12 = vrot.slane %v15340_v52, 4 }
 0x301   : > { %9325 = vmatpush3.bf16.msra.mxu1 %v9706_v49  ;;  %9372 = vmatprep.subr.bf16.mxu0 %v9707_v20  ;;  %v13481_v49 = vsel %vm6072_vm14, %v6102_v17, %v6106_v37  ;;  %v15338_v14 = vld [vmem:[#allocation77_spill] sm:$0xff]  ;;  %v5764_v17 = vrot.slane %v15341_v10, 4 }
 0x302   : > { %9414 = vmatprep.subr.bf16.mxu1 %v13460_v27  ;;  %v5763_v26 = vsel %vm5738_vm10, %v5760_v34, %v5762_v12  ;;  %v15344_v34 = vld [vmem:[#allocation96_spill] sm:$0xff] }
 0x303   : > { %v5766_v2 = vrot.slane %v15344_v34, 4 }
 0x304   : > { %9239 = vmatmul.mubr.bf16.gmra.mxu1 %v5759_v41  ;;  %9373 = vmatpush3.bf16.msra.mxu0 %v9707_v20  ;;  %v13487_v41 = vsel %vm6072_vm14, %v6106_v37, %v6110_v39  ;;  %v6116_v20 = vrot.slane %v15338_v14, 4  ;;  %v5765_v37 = vsel %vm5738_vm10, %v5762_v12, %v5764_v17  ;;  %v13497_v14 = vsel %vm6072_vm14, %v6110_v39, %v6114_v62 }
 0x305   : > { %9242 = vmatprep.mubr.bf16.mxu1 %v5761_v51  ;;  %9374 = vmatprep.subr.bf16.mxu0 %v9708_v45  ;;  %v15339_v51 = vld [vmem:[#allocation97_spill] sm:$0xff]  ;;  %v5767_v12 = vsel %vm5738_vm10, %v5764_v17, %v5766_v2 }
 0x306   : > { %v6117_v55 = vrot.slane %v15339_v51, 5  ;;  %v15342_v51 = vld [vmem:[#allocation33_spill] sm:$0xff] }
 0x307   : > { %9287 = vmatmul.mubr.bf16.gmra.mxu0 %v13481_v49  ;;  %v6120_v19 = vrot.slane %v15342_v51, 4  ;;  %v6128_v51 = vrot.slane %v13102_v16, 4 }
 0x308   : > { %9290 = vmatprep.mubr.bf16.mxu0 %v13487_v41  ;;  %9375 = vmatpush3.bf16.msra.mxu0 %v9708_v45  ;;  %v6118_v8 = vor.u32 %v6117_v55, %v6116_v20 }
 0x309   : > { %9376 = vmatprep.subr.bf16.mxu0 %v9709_v21  ;;  %v6122_v39 = vor.u32 %v6121_v35, %v6120_v19 }
 0x30a   : > { %v13503_v45 = vsel %vm6072_vm14, %v6114_v62, %v6118_v8 }
 0x30b   : > { %v13514_v63 = vsel %vm6072_vm14, %v6118_v8, %v6122_v39 }
 0x30c   : > { %9243 = vmatmul.mubr.bf16.gmra.mxu1 %v5763_v26  ;;  %9377 = vmatpush3.bf16.msra.mxu0 %v9709_v21  ;;  %v6125_v26 = vrot.slane %v13092_v48, 5  ;;  %v9016_v21 = vpop.f32.mrf.mxu1  ;;  %v9068_v48 = vpop.f32.mrf.mxu0 }
 0x30d   : > { %9246 = vmatprep.mubr.bf16.mxu1 %v5765_v37  ;;  %v15345_v37 = vrot.slane %v13067_v13, 4  ;;  %v13522_v17 = vadd.f32 %v9068_v48, %v9016_v21 }
 0x30e   : > { %v4504_v20 = vpop.f32.mrf.mxu1  ;;  %v6126_v55 = vor.u32 %v6125_v26, %v6124_v25  ;;  %v6132_v25 = vrot.slane %v13119_v3, 4  ;;  %v6133_v26 = vrot.slane %v13122_v42, 5  ;;  %v4917_v8 = vpop.f32.mrf.mxu0 }
 0x30f   : > { %9291 = vmatmul.mubr.bf16.gmra.mxu0 %v13497_v14  ;;  %v5769_v62 = vsel %vm5738_vm10, %v5766_v2, %v15345_v37  ;;  %v6130_v37 = vor.u32 %v6129_v54, %v6128_v51  ;;  %v6137_v54 = vrot.slane %v13130_v36, 5 }
 0x310   : > { %9294 = vmatprep.mubr.bf16.mxu0 %v13503_v45  ;;  %v9017_v5 = vpop.f32.mrf.mxu1  ;;  %v13520_v35 = vsel %vm6072_vm14, %v6122_v39, %v6126_v55  ;;  %v6134_v16 = vor.u32 %v6133_v26, %v6132_v25  ;;  %v15346_v39 = vld [vmem:[#allocation16_spill] sm:$0xff] }
 0x311   : > { %v13536_v42 = vsel %vm6072_vm14, %v6126_v55, %v6130_v37 }
 0x312   : > { %v4507_v19 = vpop.f32.mrf.mxu1 }
 0x314   : > { %9247 = vmatmul.mubr.bf16.gmra.mxu1 %v5767_v12  ;;  %v9020_v2 = vpop.f32.mrf.mxu1  ;;  %v13527_v12 = vadd.f32 %v4917_v8, %v4504_v20  ;;  %v6136_v20 = vrot.slane %v13125_v31, 4 }
 0x315   : > { %9250 = vmatprep.mubr.bf16.mxu1 %v5769_v62  ;;  %v9069_v62 = vpop.f32.mrf.mxu0 }
 0x316   : > { %v4520_v44 = vpop.f32.mrf.mxu1  ;;  %v13529_v9 = vadd.f32 %v9069_v62, %v9017_v5  ;;  %v13542_v5 = vsel %vm6072_vm14, %v6130_v37, %v6134_v16 }
 0x317   : > { %9295 = vmatmul.mubr.bf16.gmra.mxu0 %v13514_v63  ;;  %v4920_v48 = vpop.f32.mrf.mxu0 }
 0x318   : > { %9298 = vmatprep.mubr.bf16.mxu0 %v13520_v35  ;;  %v9021_v21 = vpop.f32.mrf.mxu1  ;;  %v13533_v3 = vadd.f32 %v4920_v48, %v4507_v19  ;;  %v6138_v19 = vor.u32 %v6137_v54, %v6136_v20 }
 0x31a   : > { %v4523_v51 = vpop.f32.mrf.mxu1  ;;  %v13554_v37 = vsel %vm6072_vm14, %v6134_v16, %v6138_v19  ;;  %v9711_v16 = vld [vmem:[%s14353_s3 + $0x230] sm:$0xff]  }
 0x31c   : > { %9251 = vmatmul.mubr.bf16.gmra.mxu1 %v13282_v28  ;;  %v9072_v28 = vpop.f32.mrf.mxu0  ;;  %v9024_v25 = vpop.f32.mrf.mxu1 }
 0x31d   : > { %9254 = vmatprep.mubr.bf16.mxu1 %v15346_v39  ;;  %v13545_v26 = vadd.f32 %v9072_v28, %v9020_v2  ;;  %v15347_v2 = vld [vmem:[#allocation101_spill] sm:$0xff] }
 0x31e   : > { %v4933_v8 = vpop.f32.mrf.mxu0  ;;  %v4536_v55 = vpop.f32.mrf.mxu1  ;;  %v13559_v20 = vsel %vm6072_vm14, %v6138_v19, %v15347_v2 }
 0x31f   : > { %9299 = vmatmul.mubr.bf16.gmra.mxu0 %v13536_v42  ;;  %v13547_v62 = vadd.f32 %v4933_v8, %v4520_v44  ;;  %v6735_v8 = vrot.slane %v15326_v46, 5  ;;  %v9712_v46 = vld [vmem:[%s14353_s3 + $0x228] sm:$0xff]  }
 0x320   : > { %9302 = vmatprep.mubr.bf16.mxu0 %v13542_v5  ;;  %v9073_v48 = vpop.f32.mrf.mxu0  ;;  %v9025_v39 = vpop.f32.mrf.mxu1 }
 0x321   : > { %v13550_v36 = vadd.f32 %v9073_v48, %v9021_v21 }
 0x322   : > { %v4936_v31 = vpop.f32.mrf.mxu0  ;;  %v4539_v7 = vpop.f32.mrf.mxu1 }
 0x323   : > { %v13561_v44 = vadd.f32 %v4936_v31, %v4523_v51  ;;  %v6734_v51 = vrot.slane %v15323_v53, 5 }
 0x324   : > { %9255 = vmatmul.mubr.bf16.gmra.mxu1 %v13300_v18  ;;  %v9076_v18 = vpop.f32.mrf.mxu0  ;;  %v9028_v21 = vpop.f32.mrf.mxu1 }
 0x325   : > { %9326 = vmatprep.mubr.bf16.mxu1 %v13396_v29  ;;  %v13564_v54 = vadd.f32 %v9076_v18, %v9024_v25 }
 0x326   : > { %v4949_v29 = vpop.f32.mrf.mxu0  ;;  %v4552_v28 = vpop.f32.mrf.mxu1 }
 0x327   : > { %9303 = vmatmul.mubr.bf16.gmra.mxu0 %v13554_v37  ;;  %15348 = vst [vmem:[#allocation31_spill] sm:$0xff] %v13564_v54  ;;  %v13570_v48 = vadd.f32 %v4949_v29, %v4536_v55  ;;  %v15351_v55 = vld [vmem:[#allocation27_spill] sm:$0xff] }
 0x328   : > { %9306 = vmatprep.mubr.bf16.mxu0 %v13559_v20  ;;  %v9077_v19 = vpop.f32.mrf.mxu0  ;;  %v9029_v31 = vpop.f32.mrf.mxu1 }
 0x329   : > { %15349 = vst [vmem:[#allocation18_spill] sm:$0xff] %v13570_v48  ;;  %v13574_v2 = vadd.f32 %v9077_v19, %v9025_v39  ;;  %v9713_v19 = vld [vmem:[%s14353_s3 + $0x220] sm:$0xff]   ;;  %v6739_v48 = vrot.slane %v15330_v6, 5 }
 0x32a   : > { %v4952_v25 = vpop.f32.mrf.mxu0  ;;  %v4555_v18 = vpop.f32.mrf.mxu1 }
 0x32b   : > { %15350 = vst [vmem:[#allocation11_spill] sm:$0xff] %v13574_v2  ;;  %v13583_v29 = vadd.f32 %v4952_v25, %v4539_v7 }
 0x32c   : > { %9327 = vmatmul.mubr.bf16.vlgmr.msra.gmra.mxu1 %v13405_v58  ;;  %v6736_v58 = vsel %vm6733_vm8, %v6734_v51, %v6735_v8  ;;  %v9032_v53 = vpop.f32.mrf.mxu1  ;;  %v9080_v39 = vpop.f32.mrf.mxu0 }
 0x32d   : > { %9330 = vmatprep.mubr.bf16.mxu1 %v13425_v50  ;;  %9415 = vmatpush3.bf16.msra.mxu1 %v13460_v27  ;;  %v6737_v50 = vrot.slane %v15327_v15, 5  ;;  %v13589_v2 = vadd.f32 %v9080_v39, %v9028_v21  ;;  %v9714_v21 = vld [vmem:[%s14353_s3 + $0x218] sm:$0xff]   ;;  %v6743_v39 = vrot.slane %v12718_v23, 5 }
 0x32e   : > { %9416 = vmatprep.subr.bf16.mxu1 %v9711_v16  ;;  %v4568_v27 = vpop.f32.mrf.mxu1  ;;  %v4965_v54 = vpop.f32.mrf.mxu0 }
 0x32f   : > { %9307 = vmatmul.mubr.bf16.gmra.mxu0 %v15351_v55  ;;  %v13593_v51 = vadd.f32 %v4965_v54, %v4552_v28  ;;  %v6738_v15 = vsel %vm6733_vm8, %v6735_v8, %v6737_v50  ;;  %v6740_v6 = vsel %vm6733_vm8, %v6737_v50, %v6739_v48 }
 0x330   : > { %9378 = vmatprep.mubr.bf16.mxu0 %v6736_v58  ;;  %v9033_v7 = vpop.f32.mrf.mxu1 }
 0x331   : > { %9417 = vmatpush3.bf16.msra.mxu1 %v9711_v16  ;;  %v9081_v16 = vpop.f32.mrf.mxu0 }
 0x332   : > { %9418 = vmatprep.subr.bf16.mxu1 %v9712_v46  ;;  %v4571_v25 = vpop.f32.mrf.mxu1  ;;  %v13601_v58 = vadd.f32 %v9081_v16, %v9029_v31  ;;  %v9716_v16 = vld [vmem:[%s14353_s3 + $0x208] sm:$0xff]  }
 0x334   : > { %9331 = vmatmul.mubr.bf16.gmra.mxu1 %v13434_v0  ;;  %v4968_v0 = vpop.f32.mrf.mxu0  ;;  %v9036_v54 = vpop.f32.mrf.mxu1 }
 0x335   : > { %9334 = vmatprep.mubr.bf16.mxu1 %v13453_v40  ;;  %9419 = vmatpush3.bf16.msra.mxu1 %v9712_v46  ;;  %v13603_v28 = vadd.f32 %v4968_v0, %v4555_v18  ;;  %v6741_v40 = vrot.slane %v15331_v11, 5  ;;  %v9715_v46 = vld [vmem:[%s14353_s3 + $0x210] sm:$0xff]   ;;  %v9717_v0 = vld [vmem:[%s14353_s3 + $0x200] sm:$0xff]  }
 0x336   : > { %9420 = vmatprep.subr.bf16.mxu1 %v9713_v19  ;;  %v4584_v8 = vpop.f32.mrf.mxu1 }
 0x337   : > { %9379 = vmatmul.mubr.bf16.vlgmr.msra.gmra.mxu0 %v6738_v15  ;;  %v6742_v18 = vsel %vm6733_vm8, %v6739_v48, %v6741_v40  ;;  %v6744_v23 = vsel %vm6733_vm8, %v6741_v40, %v6743_v39  ;;  %v6745_v48 = vrot.slane %v15332_v38, 5  ;;  %v6747_v40 = vrot.slane %v15334_v33, 5 }
 0x338   : > { %9382 = vmatprep.mubr.bf16.mxu0 %v6740_v6  ;;  %v9037_v31 = vpop.f32.mrf.mxu1 }
 0x339   : > { %9421 = vmatpush3.bf16.msra.mxu1 %v9713_v19  ;;  %v9084_v15 = vpop.f32.mrf.mxu0  ;;  %v6746_v38 = vsel %vm6733_vm8, %v6743_v39, %v6745_v48  ;;  %v6751_v39 = vrot.slane %v15336_v61, 5  ;;  %v6753_v61 = vrot.slane %v15337_v30, 5 }
 0x33a   : > { %9422 = vmatprep.subr.bf16.mxu1 %v9714_v21  ;;  %v13611_v50 = vadd.f32 %v9084_v15, %v9032_v53  ;;  %v4587_v19 = vpop.f32.mrf.mxu1 }
 0x33b   : > { %v4981_v11 = vpop.f32.mrf.mxu0 }
 0x33c   : > { %9335 = vmatmul.mubr.bf16.gmra.mxu1 %v13464_v32  ;;  %v13619_v6 = vadd.f32 %v4981_v11, %v4568_v27 }
 0x33d   : > { %9338 = vmatprep.mubr.bf16.mxu1 %v13481_v49  ;;  %9423 = vmatpush3.bf16.msra.mxu1 %v9714_v21  ;;  %v9085_v32 = vpop.f32.mrf.mxu0 }
 0x33e   : > { %9424 = vmatprep.subr.bf16.mxu1 %v9715_v46  ;;  %v13621_v53 = vadd.f32 %v9085_v32, %v9033_v7 }
 0x33f   : > { %9383 = vmatmul.mubr.bf16.gmra.mxu0 %v6742_v18  ;;  %v4984_v49 = vpop.f32.mrf.mxu0 }
 0x340   : > { %9386 = vmatprep.mubr.bf16.mxu0 %v6744_v23  ;;  %v9040_v21 = vpop.f32.mrf.mxu1  ;;  %v13627_v15 = vadd.f32 %v4984_v49, %v4571_v25  ;;  %v6748_v25 = vsel %vm6733_vm8, %v6745_v48, %v6747_v40 }
 0x341   : > { %9425 = vmatpush3.bf16.msra.mxu1 %v9715_v46 }
 0x342   : > { %9426 = vmatprep.subr.bf16.mxu1 %v9716_v16  ;;  %v4600_v18 = vpop.f32.mrf.mxu1 }
 0x343   : > { %v9088_v27 = vpop.f32.mrf.mxu0 }
 0x344   : > { %9339 = vmatmul.mubr.bf16.gmra.mxu1 %v13487_v41  ;;  %v13631_v7 = vadd.f32 %v9088_v27, %v9036_v54  ;;  %v9041_v11 = vpop.f32.mrf.mxu1 }
 0x345   : > { %9342 = vmatprep.mubr.bf16.mxu1 %v13497_v14  ;;  %9427 = vmatpush3.bf16.msra.mxu1 %v9716_v16  ;;  %v4997_v46 = vpop.f32.mrf.mxu0  ;;  %v6749_v14 = vrot.slane %v15335_v59, 5 }
 0x346   : > { %9428 = vmatprep.subr.bf16.mxu1 %v9717_v0  ;;  %v13636_v23 = vadd.f32 %v4997_v46, %v4584_v8  ;;  %v4603_v32 = vpop.f32.mrf.mxu1 }
 0x347   : > { %9387 = vmatmul.mubr.bf16.gmra.mxu0 %v6746_v38  ;;  %v9089_v33 = vpop.f32.mrf.mxu0  ;;  %v6750_v8 = vsel %vm6733_vm8, %v6747_v40, %v6749_v14 }
 0x348   : > { %9390 = vmatprep.mubr.bf16.mxu0 %v6748_v25  ;;  %v13638_v41 = vadd.f32 %v9089_v33, %v9037_v31  ;;  %v6752_v31 = vsel %vm6733_vm8, %v6749_v14, %v6751_v39 }
 0x349   : > { %9429 = vmatpush3.bf16.msra.mxu1 %v9717_v0  ;;  %v5000_v54 = vpop.f32.mrf.mxu0 }
 0x34a   : > { %v13641_v16 = vadd.f32 %v5000_v54, %v4587_v19  ;;  %v6754_v54 = vsel %vm6733_vm8, %v6751_v39, %v6753_v61 }
 0x34c   : > { %v9044_v49 = vpop.f32.mrf.mxu1  ;;  %9343 = vmatmul.mubr.bf16.gmra.mxu1 %v13503_v45 }
 0x34d   : > { %9346 = vmatprep.mubr.bf16.mxu1 %v13514_v63  ;;  %v6755_v63 = vrot.slane %v15340_v52, 5 }
 0x34e   : > { %v4616_v48 = vpop.f32.mrf.mxu1 }
 0x34f   : > { %v9092_v27 = vpop.f32.mrf.mxu0  ;;  %9391 = vmatmul.mubr.bf16.gmra.mxu0 %v6750_v8  ;;  %v6756_v30 = vsel %vm6733_vm8, %v6753_v61, %v6755_v63 }
 0x350   : > { %v13648_v0 = vadd.f32 %v9092_v27, %v9040_v21  ;;  %9394 = vmatprep.mubr.bf16.mxu0 %v6752_v31  ;;  %v9045_v59 = vpop.f32.mrf.mxu1 }
 0x351   : > { %v5013_v19 = vpop.f32.mrf.mxu0 }
 0x352   : > { %v13650_v38 = vadd.f32 %v5013_v19, %v4600_v18  ;;  %v4619_v46 = vpop.f32.mrf.mxu1 }
 0x353   : > { %v9093_v45 = vpop.f32.mrf.mxu0 }
 0x354   : > { %v13654_v25 = vadd.f32 %v9093_v45, %v9041_v11  ;;  %v9048_v40 = vpop.f32.mrf.mxu1  ;;  %9347 = vmatmul.mubr.bf16.gmra.mxu1 %v13520_v35  ;;  %v6757_v35 = vrot.slane %v15341_v10, 5 }
 0x355   : > { %v5016_v33 = vpop.f32.mrf.mxu0  ;;  %9350 = vmatprep.mubr.bf16.mxu1 %v13536_v42 }
 0x356   : > { %v13658_v21 = vadd.f32 %v5016_v33, %v4603_v32  ;;  %v4632_v18 = vpop.f32.mrf.mxu1  ;;  %v6759_v32 = vrot.slane %v15344_v34, 5 }
 0x357   : > { %v9096_v14 = vpop.f32.mrf.mxu0  ;;  %9395 = vmatmul.mubr.bf16.gmra.mxu0 %v6754_v54 }
 0x358   : > { %v13662_v8 = vadd.f32 %v9096_v14, %v9044_v49  ;;  %9398 = vmatprep.mubr.bf16.mxu0 %v6756_v30  ;;  %v9049_v52 = vpop.f32.mrf.mxu1  ;;  %v6760_v54 = vsel %vm6733_vm8, %v6757_v35, %v6759_v32 }
 0x359   : > { %v5029_v11 = vpop.f32.mrf.mxu0 }
 0x35a   : > { %v13664_v27 = vadd.f32 %v5029_v11, %v4616_v48  ;;  %v4635_v31 = vpop.f32.mrf.mxu1  ;;  %v6758_v48 = vsel %vm6733_vm8, %v6755_v63, %v6757_v35 }
 0x35b   : > { %v9097_v42 = vpop.f32.mrf.mxu0 }
 0x35c   : > { %v13668_v19 = vadd.f32 %v9097_v42, %v9045_v59  ;;  %v9120_v39 = vpop.f32.mrf.mxu1  ;;  %9351 = vmatmul.mubr.bf16.gmra.mxu1 %v13542_v5 }
 0x35d   : > { %v5032_v45 = vpop.f32.mrf.mxu0  ;;  %v5398_v49 = vadd.f32 %v9120_v39, %v13522_v17  ;;  %9354 = vmatprep.mubr.bf16.mxu1 %v13554_v37 }
 0x35e   : > { %v13673_v61 = vadd.f32 %v5032_v45, %v4619_v46  ;;  %v5253_v33 = vpop.f32.mrf.mxu1  ;;  %v7068_v45 = vrot.slane %v15298_v56, 5 }
 0x35f   : > { %v9100_v10 = vpop.f32.mrf.mxu0  ;;  %9399 = vmatmul.mubr.bf16.gmra.mxu0 %v6758_v48  ;;  %v5396_v34 = vadd.f32 %v5253_v33, %v13527_v12  ;;  %v7071_v12 = vrot.slane %v15300_v43, 5 }
 0x360   : > { %v13678_v59 = vadd.f32 %v9100_v10, %v9048_v40  ;;  %9402 = vmatprep.mubr.bf16.mxu0 %v6760_v54  ;;  %v9121_v5 = vpop.f32.mrf.mxu1  ;;  %v7072_v40 = vrot.slane %v15302_v22, 6 }
 0x361   : > { %v5045_v14 = vpop.f32.mrf.mxu0  ;;  %v5399_v17 = vadd.f32 %v9121_v5, %v13529_v9  ;;  %v7075_v5 = vrot.slane %v15311_v1, 5 }
 0x362   : > { %v13681_v30 = vadd.f32 %v5045_v14, %v4632_v18  ;;  %v5256_v37 = vpop.f32.mrf.mxu1  ;;  %v15352_v18 = vrot.slane %v13067_v13, 5 }
 0x363   : > { %v9101_v46 = vpop.f32.mrf.mxu0  ;;  %v5397_v63 = vadd.f32 %v5256_v37, %v13533_v3 }
 0x364   : > { %v13684_v11 = vadd.f32 %v9101_v46, %v9049_v52  ;;  %v9124_v42 = vpop.f32.mrf.mxu1  ;;  %9355 = vmatmul.mubr.bf16.gmra.mxu1 %v13559_v20  ;;  %v6762_v3 = vsel %vm6733_vm8, %v6759_v32, %v15352_v18  ;;  %v7069_v20 = vrot.slane %v15299_v47, 6 }
 0x365   : > { %v5048_v35 = vpop.f32.mrf.mxu0  ;;  %v5402_v39 = vadd.f32 %v9124_v42, %v13545_v26  ;;  %9358 = vmatprep.mubr.bf16.mxu1 %v15351_v55  ;;  %v15353_v26 = vld [vmem:[#allocation42_spill] sm:$0xff]  ;;  %v15354_v42 = vld [vmem:[#allocation31_spill] sm:$0xff] }
 0x366   : > { %v13691_v9 = vadd.f32 %v5048_v35, %v4635_v31  ;;  %v5269_v52 = vpop.f32.mrf.mxu1  ;;  %v7073_v31 = vor.u32 %v7072_v40, %v7071_v12  ;;  %v7070_v54 = vor.u32 %v7069_v20, %v7068_v45  ;;  %v15358_v45 = vld [vmem:[#allocation11_spill] sm:$0xff] }
 0x367   : > { %v9172_v48 = vpop.f32.mrf.mxu0  ;;  %9403 = vmatmul.mubr.bf16.gmra.mxu0 %v6762_v3  ;;  %v5400_v22 = vadd.f32 %v5269_v52, %v13547_v62  ;;  %v7076_v62 = vrot.slane %v15312_v4, 6  ;;  %v15355_v4 = vld [vmem:[#allocation13_spill] sm:$0xff] }
 0x368   : > { %v13699_v43 = vadd.f32 %v9172_v48, %v5398_v49  ;;  %9406 = vmatprep.mubr.bf16.mxu0 %v15353_v26  ;;  %v9125_v55 = vpop.f32.mrf.mxu1  ;;  %v7074_v37 = vsel %vm7067_vm13, %v7070_v54, %v7073_v31  ;;  %v15357_v3 = vld [vmem:[#allocation21_spill] sm:$0xff] }
 0x369   : > { %v5541_v33 = vpop.f32.mrf.mxu0  ;;  %v5403_v13 = vadd.f32 %v9125_v55, %v13550_v36  ;;  %v7079_v36 = vrot.slane %v12654_v60, 5  ;;  %v7077_v18 = vor.u32 %v7076_v62, %v7075_v5 }
 0x36a   : > { %v13703_v10 = vadd.f32 %v5541_v33, %v5396_v34  ;;  %v5272_v32 = vpop.f32.mrf.mxu1  ;;  %v7080_v34 = vrot.slane %v12702_v24, 6 }
 0x36b   : > { %v9173_v56 = vpop.f32.mrf.mxu0  ;;  %v5401_v47 = vadd.f32 %v5272_v32, %v13561_v44  ;;  %v7078_v33 = vsel %vm7067_vm13, %v7073_v31, %v7077_v18  ;;  %v15359_v32 = vld [vmem:[#allocation63_spill] sm:$0xff] }
 0x36c   : > { %v13708_v49 = vadd.f32 %v9173_v56, %v5399_v17  ;;  %v9128_v14 = vpop.f32.mrf.mxu1  ;;  %9359 = vmatmul.mubr.bf16.gmra.mxu1 %v13338_v57  ;;  %v15356_v17 = vld [vmem:[#allocation18_spill] sm:$0xff]  ;;  %v7081_v52 = vor.u32 %v7080_v34, %v7079_v36  ;;  %v7083_v54 = vrot.slane %v15359_v32, 5  ;;  %v15360_v56 = vld [vmem:[#allocation64_spill] sm:$0xff] }
 0x36d   : > { %v5544_v46 = vpop.f32.mrf.mxu0  ;;  %v5406_v12 = vadd.f32 %v9128_v14, %v15354_v42  ;;  %9430 = vmatprep.mubr.bf16.mxu1 %v7074_v37  ;;  %v15361_v37 = vld [vmem:[#allocation89_spill] sm:$0xff] }
 0x36e   : > { %v13715_v44 = vadd.f32 %v5544_v46, %v5397_v63  ;;  %v5285_v1 = vpop.f32.mrf.mxu1  ;;  %v7082_v14 = vsel %vm7067_vm13, %v7077_v18, %v7081_v52  ;;  %v7087_v36 = vrot.slane %v15361_v37, 5 }
 0x36f   : > { %v9176_v40 = vpop.f32.mrf.mxu0  ;;  %9407 = vmatmul.mubr.bf16.gmra.mxu0 %v15355_v4  ;;  %v5404_v35 = vadd.f32 %v5285_v1, %v15356_v17 }
 0x370   : > { %v13719_v57 = vadd.f32 %v9176_v40, %v5402_v39  ;;  %9410 = vmatprep.mubr.bf16.mxu0 %v15357_v3  ;;  %v9129_v60 = vpop.f32.mrf.mxu1  ;;  %v7084_v39 = vrot.slane %v15360_v56, 6  ;;  %v15363_v40 = vld [vmem:[#allocation37_spill] sm:$0xff]  ;;  %v15365_v56 = vld [vmem:[#allocation66_spill] sm:$0xff] }
 0x371   : > { %v5557_v24 = vpop.f32.mrf.mxu0  ;;  %v5407_v20 = vadd.f32 %v9129_v60, %v15358_v45 }
 0x372   : > { %v13723_v48 = vadd.f32 %v5557_v24, %v5400_v22  ;;  %v5288_v63 = vpop.f32.mrf.mxu1  ;;  %v15362_v22 = vld [vmem:[#allocation10_spill] sm:$0xff]  ;;  %v7085_v4 = vor.u32 %v7084_v39, %v7083_v54 }
 0x373   : > { %v9177_v26 = vpop.f32.mrf.mxu0  ;;  %v5405_v55 = vadd.f32 %v5288_v63, %v13583_v29  ;;  %v7088_v34 = vrot.slane %v15362_v22, 6 }
 0x374   : > { %v13729_v5 = vadd.f32 %v9177_v26, %v5403_v13  ;;  %v9132_v62 = vpop.f32.mrf.mxu1  ;;  %9431 = vmatmul.mubr.bf16.vlgmr.msra.gmra.mxu1 %v7078_v33  ;;  %v7086_v26 = vsel %vm7067_vm13, %v7081_v52, %v7085_v4  ;;  %v15364_v33 = vld [vmem:[#allocation94_spill] sm:$0xff] }
 0x375   : > { %v5560_v46 = vpop.f32.mrf.mxu0  ;;  %v5410_v42 = vadd.f32 %v9132_v62, %v13589_v2  ;;  %9434 = vmatprep.mubr.bf16.mxu1 %v7082_v14  ;;  %v7089_v3 = vor.u32 %v7088_v34, %v7087_v36  ;;  %v7091_v32 = vrot.slane %v15364_v33, 5  ;;  %v15366_v62 = vld [vmem:[#allocation72_spill] sm:$0xff]  ;;  %v15369_v33 = vld [vmem:[#allocation73_spill] sm:$0xff] }
 0x376   : > { %v13735_v29 = vadd.f32 %v5560_v46, %v5401_v47  ;;  %v5301_v31 = vpop.f32.mrf.mxu1 }
 0x377   : > { %v9180_v1 = vpop.f32.mrf.mxu0  ;;  %9411 = vmatmul.mubr.bf16.gmra.mxu0 %v15363_v40  ;;  %v5408_v13 = vadd.f32 %v5301_v31, %v13593_v51  ;;  %v7092_v51 = vrot.slane %v15365_v56, 6  ;;  %v7090_v39 = vsel %vm7067_vm13, %v7085_v4, %v7089_v3 }
 0x378   : > { %v13739_v17 = vadd.f32 %v9180_v1, %v5406_v12  ;;  %v9133_v18 = vpop.f32.mrf.mxu1 }
 0x379   : > { %v5573_v60 = vpop.f32.mrf.mxu0  ;;  %v5411_v24 = vadd.f32 %v9133_v18, %v13601_v58  ;;  %v7095_v58 = vrot.slane %v15366_v62, 5 }
 0x37a   : > { %v13742_v45 = vadd.f32 %v5573_v60, %v5404_v35  ;;  %v5304_v2 = vpop.f32.mrf.mxu1  ;;  %v15367_v35 = vld [vmem:[#allocation71_spill] sm:$0xff] }
 0x37b   : > { %v9181_v63 = vpop.f32.mrf.mxu0  ;;  %v5409_v47 = vadd.f32 %v5304_v2, %v13603_v28  ;;  %v7096_v14 = vrot.slane %v15367_v35, 6 }
 0x37c   : > { %v13748_v54 = vadd.f32 %v9181_v63, %v5407_v20  ;;  %v9136_v12 = vpop.f32.mrf.mxu1  ;;  %9435 = vmatmul.mubr.bf16.gmra.mxu1 %v7086_v26  ;;  %v7093_v20 = vor.u32 %v7092_v51, %v7091_v32  ;;  %v15368_v63 = vld [vmem:[#allocation69_spill] sm:$0xff]  ;;  %v15370_v51 = vld [vmem:[#allocation75_spill] sm:$0xff] }
 0x37d   : > { %v5576_v37 = vpop.f32.mrf.mxu0  ;;  %v5414_v36 = vadd.f32 %v9136_v12, %v13611_v50  ;;  %9438 = vmatprep.mubr.bf16.mxu1 %v7090_v39  ;;  %v7097_v1 = vor.u32 %v7096_v14, %v7095_v58  ;;  %v7099_v26 = vrot.slane %v15368_v63, 5  ;;  %v15373_v63 = vld [vmem:[#allocation97_spill] sm:$0xff] }
 0x37e   : > { %v13754_v28 = vadd.f32 %v5576_v37, %v5405_v55  ;;  %v5317_v52 = vpop.f32.mrf.mxu1  ;;  %v7094_v55 = vsel %vm7067_vm13, %v7089_v3, %v7093_v20 }
 0x37f   : > { %v9184_v22 = vpop.f32.mrf.mxu0  ;;  %v5412_v34 = vadd.f32 %v5317_v52, %v13619_v6  ;;  %v7100_v6 = vrot.slane %v15369_v33, 6  ;;  %v7098_v56 = vsel %vm7067_vm13, %v7093_v20, %v7097_v1 }
 0x380   : > { %v13757_v46 = vadd.f32 %v9184_v22, %v5410_v42  ;;  %v9137_v31 = vpop.f32.mrf.mxu1 }
 0x381   : > { %v5589_v40 = vpop.f32.mrf.mxu0  ;;  %v5415_v4 = vadd.f32 %v9137_v31, %v13621_v53  ;;  %v7103_v53 = vrot.slane %v15370_v51, 5 }
 0x382   : > { %v13760_v18 = vadd.f32 %v5589_v40, %v5408_v13  ;;  %v5320_v60 = vpop.f32.mrf.mxu1  ;;  %v15371_v13 = vld [vmem:[#allocation88_spill] sm:$0xff] }
 0x383   : > { %v9185_v2 = vpop.f32.mrf.mxu0  ;;  %v5413_v50 = vadd.f32 %v5320_v60, %v13627_v15  ;;  %v7104_v12 = vrot.slane %v15371_v13, 6 }
 0x384   : > { %v13766_v32 = vadd.f32 %v9185_v2, %v5411_v24  ;;  %v9140_v42 = vpop.f32.mrf.mxu1  ;;  %9439 = vmatmul.mubr.bf16.gmra.mxu1 %v7094_v55  ;;  %v7101_v24 = vor.u32 %v7100_v6, %v7099_v26  ;;  %v15372_v2 = vld [vmem:[#allocation77_spill] sm:$0xff] }
 0x385   : > { %v5592_v39 = vpop.f32.mrf.mxu0  ;;  %v5418_v62 = vadd.f32 %v9140_v42, %v13631_v7  ;;  %9442 = vmatprep.mubr.bf16.mxu1 %v7098_v56  ;;  %v7105_v52 = vor.u32 %v7104_v12, %v7103_v53  ;;  %v7107_v55 = vrot.slane %v15372_v2, 5  ;;  %v15374_v6 = vld [vmem:[#allocation33_spill] sm:$0xff]  ;;  %v15377_v2 = vld [vmem:[#allocation8_spill] sm:$0xff] }
 0x386   : > { %v13772_v15 = vadd.f32 %v5592_v39, %v5409_v47  ;;  %v5333_v3 = vpop.f32.mrf.mxu1  ;;  %v7102_v47 = vsel %vm7067_vm13, %v7097_v1, %v7101_v24 }
 0x387   : > { %v9188_v58 = vpop.f32.mrf.mxu0  ;;  %v5416_v35 = vadd.f32 %v5333_v3, %v13636_v23  ;;  %v7108_v23 = vrot.slane %v15373_v63, 6  ;;  %v7106_v33 = vsel %vm7067_vm13, %v7101_v24, %v7105_v52 }
 0x388   : > { %v13775_v14 = vadd.f32 %v9188_v58, %v5414_v36  ;;  %v9141_v37 = vpop.f32.mrf.mxu1 }
 0x389   : > { %v5605_v22 = vpop.f32.mrf.mxu0  ;;  %v5419_v20 = vadd.f32 %v9141_v37, %v13638_v41  ;;  %v7111_v41 = vrot.slane %v15374_v6, 5 }
 0x38a   : > { %v13778_v31 = vadd.f32 %v5605_v22, %v5412_v34  ;;  %v5336_v40 = vpop.f32.mrf.mxu1  ;;  %v15375_v34 = vld [vmem:[#allocation28_spill] sm:$0xff] }
 0x38b   : > { %v9189_v60 = vpop.f32.mrf.mxu0  ;;  %v5417_v7 = vadd.f32 %v5336_v40, %v13641_v16  ;;  %v7112_v42 = vrot.slane %v15375_v34, 6 }
 0x38c   : > { %v13784_v26 = vadd.f32 %v9189_v60, %v5415_v4  ;;  %v9144_v36 = vpop.f32.mrf.mxu1  ;;  %9443 = vmatmul.mubr.bf16.gmra.mxu1 %v7102_v47  ;;  %v7109_v4 = vor.u32 %v7108_v23, %v7107_v55  ;;  %v15376_v60 = vld [vmem:[#allocation98_spill] sm:$0xff] }
 0x38d   : > { %v5608_v56 = vpop.f32.mrf.mxu0  ;;  %v5422_v51 = vadd.f32 %v9144_v36, %v13648_v0  ;;  %9446 = vmatprep.mubr.bf16.mxu1 %v7106_v33  ;;  %v7113_v3 = vor.u32 %v7112_v42, %v7111_v41  ;;  %v7115_v47 = vrot.slane %v15376_v60, 5  ;;  %v15378_v23 = vld [vmem:[#allocation6_spill] sm:$0xff]  ;;  %v15381_v60 = vld [vmem:[#allocation45_spill] sm:$0xff] }
 0x38e   : > { %v13790_v16 = vadd.f32 %v5608_v56, %v5413_v50  ;;  %v5349_v1 = vpop.f32.mrf.mxu1  ;;  %v7110_v50 = vsel %vm7067_vm13, %v7105_v52, %v7109_v4 }
 0x38f   : > { %v9192_v53 = vpop.f32.mrf.mxu0  ;;  %v5420_v13 = vadd.f32 %v5349_v1, %v13650_v38  ;;  %v7116_v38 = vrot.slane %v15377_v2, 6  ;;  %v7114_v63 = vsel %vm7067_vm13, %v7109_v4, %v7113_v3 }
 0x390   : > { %v13793_v12 = vadd.f32 %v9192_v53, %v5418_v62  ;;  %v9145_v39 = vpop.f32.mrf.mxu1 }
 0x391   : > { %v5621_v58 = vpop.f32.mrf.mxu0  ;;  %v5423_v24 = vadd.f32 %v9145_v39, %v13654_v25  ;;  %v7119_v25 = vrot.slane %v15378_v23, 5 }
 0x392   : > { %v13796_v37 = vadd.f32 %v5621_v58, %v5416_v35  ;;  %v5352_v22 = vpop.f32.mrf.mxu1  ;;  %v15379_v35 = vld [vmem:[#allocation92_spill] sm:$0xff] }
 0x393   : > { %v9193_v40 = vpop.f32.mrf.mxu0  ;;  %v5421_v0 = vadd.f32 %v5352_v22, %v13658_v21  ;;  %v7120_v36 = vrot.slane %v15379_v35, 6 }
 0x394   : > { %v13802_v55 = vadd.f32 %v9193_v40, %v5419_v20  ;;  %v9148_v62 = vpop.f32.mrf.mxu1  ;;  %9447 = vmatmul.mubr.bf16.gmra.mxu1 %v7110_v50  ;;  %v7117_v20 = vor.u32 %v7116_v38, %v7115_v47  ;;  %v15380_v40 = vld [vmem:[#allocation41_spill] sm:$0xff]  ;;  %v15382_v38 = vld [vmem:[#allocation38_spill] sm:$0xff] }
 0x395   : > { %v5624_v33 = vpop.f32.mrf.mxu0  ;;  %v5426_v6 = vadd.f32 %v9148_v62, %v13662_v8  ;;  %9450 = vmatprep.mubr.bf16.mxu1 %v7114_v63  ;;  %v7121_v1 = vor.u32 %v7120_v36, %v7119_v25  ;;  %v7123_v50 = vrot.slane %v15380_v40, 5 }
 0x396   : > { %v13808_v21 = vadd.f32 %v5624_v33, %v5417_v7  ;;  %v5365_v52 = vpop.f32.mrf.mxu1  ;;  %v7118_v7 = vsel %vm7067_vm13, %v7113_v3, %v7117_v20 }
 0x397   : > { %v9196_v41 = vpop.f32.mrf.mxu0  ;;  %v5424_v34 = vadd.f32 %v5365_v52, %v13664_v27  ;;  %v7124_v27 = vrot.slane %v15381_v60, 6  ;;  %v7122_v2 = vsel %vm7067_vm13, %v7117_v20, %v7121_v1 }
 0x398   : > { %v13811_v42 = vadd.f32 %v9196_v41, %v5422_v51  ;;  %v9149_v56 = vpop.f32.mrf.mxu1 }
 0x399   : > { %v5637_v53 = vpop.f32.mrf.mxu0  ;;  %v5427_v4 = vadd.f32 %v9149_v56, %v13668_v19  ;;  %v7127_v19 = vrot.slane %v15382_v38, 5 }
 0x39a   : > { %v13814_v39 = vadd.f32 %v5637_v53, %v5420_v13  ;;  %v5368_v58 = vpop.f32.mrf.mxu1  ;;  %v15383_v13 = vld [vmem:[#allocation58_spill] sm:$0xff] }
 0x39b   : > { %v9197_v22 = vpop.f32.mrf.mxu0  ;;  %v5425_v8 = vadd.f32 %v5368_v58, %v13673_v61  ;;  %v7128_v62 = vrot.slane %v15383_v13, 6 }
 0x39c   : > { %v13820_v47 = vadd.f32 %v9197_v22, %v5423_v24  ;;  %v9152_v51 = vpop.f32.mrf.mxu1  ;;  %9451 = vmatmul.mubr.bf16.gmra.mxu1 %v7118_v7  ;;  %v7125_v24 = vor.u32 %v7124_v27, %v7123_v50 }
 0x39d   : > { %v5640_v63 = vpop.f32.mrf.mxu0  ;;  %v5430_v23 = vadd.f32 %v9152_v51, %v13678_v59  ;;  %9454 = vmatprep.mubr.bf16.mxu1 %v7122_v2  ;;  %v7129_v52 = vor.u32 %v7128_v62, %v7127_v19 }
 0x39e   : > { %v13826_v61 = vadd.f32 %v5640_v63, %v5421_v0  ;;  %v5381_v3 = vpop.f32.mrf.mxu1  ;;  %v7126_v0 = vsel %vm7067_vm13, %v7121_v1, %v7125_v24 }
 0x39f   : > { %v9200_v25 = vpop.f32.mrf.mxu0  ;;  %v5428_v35 = vadd.f32 %v5381_v3, %v13681_v30  ;;  %v7130_v30 = vsel %vm7067_vm13, %v7125_v24, %v7129_v52 }
 0x3a0   : > { %v13829_v36 = vadd.f32 %v9200_v25, %v5426_v6  ;;  %v9153_v33 = vpop.f32.mrf.mxu1 }
 0x3a1   : > { %v5653_v41 = vpop.f32.mrf.mxu0  ;;  %v5431_v20 = vadd.f32 %v9153_v33, %v13684_v11 }
 0x3a2   : > { %v13832_v56 = vadd.f32 %v5653_v41, %v5424_v34  ;;  %v5384_v53 = vpop.f32.mrf.mxu1 }
 0x3a3   : > { %v9201_v58 = vpop.f32.mrf.mxu0  ;;  %v5429_v59 = vadd.f32 %v5384_v53, %v13691_v9 }
 0x3a4   : > { %v13836_v22 = vadd.f32 %v9201_v58, %v5427_v4  ;;  %v9224_v7 = vpop.f32.mrf.mxu1  ;;  %9455 = vmatmul.mubr.bf16.gmra.mxu1 %v7126_v0  ;;  %v15386_v0 = vld [vmem:[#allocation17_spill] sm:$0xff] }
 0x3a5   : > { %v5656_v6 = vpop.f32.mrf.mxu0  ;;  %v6021_v40 = vadd.f32 %v9224_v7, %v13699_v43  ;;  %9458 = vmatprep.mubr.bf16.mxu1 %v7130_v30  ;;  %v15384_v43 = vld [vmem:[#allocation20_spill] sm:$0xff] }
 0x3a6   : > { %v13840_v50 = vadd.f32 %v5656_v6, %v5425_v8  ;;  %v5876_v11 = vpop.f32.mrf.mxu1  ;;  %v7134_v8 = vsel %vm7067_vm13, %v7129_v52, %v15384_v43 }
 0x3a7   : > { %v9204_v34 = vpop.f32.mrf.mxu0  ;;  %v6019_v60 = vadd.f32 %v5876_v11, %v13703_v10 }
 0x3a8   : > { %v13843_v27 = vadd.f32 %v9204_v34, %v5430_v23  ;;  %v9225_v9 = vpop.f32.mrf.mxu1  ;;  %v15385_v23 = vld [vmem:[#allocation19_spill] sm:$0xff] }
 0x3a9   : > { %v5669_v1 = vpop.f32.mrf.mxu0  ;;  %v6022_v4 = vadd.f32 %v9225_v9, %v13708_v49 }
 0x3aa   : > { %v13846_v51 = vadd.f32 %v5669_v1, %v5428_v35  ;;  %v5879_v2 = vpop.f32.mrf.mxu1 }
 0x3ab   : > { %v9205_v38 = vpop.f32.mrf.mxu0  ;;  %v6020_v19 = vadd.f32 %v5879_v2, %v13715_v44 }
 0x3ac   : > { %v13851_v13 = vadd.f32 %v9205_v38, %v5431_v20  ;;  %v9228_v62 = vpop.f32.mrf.mxu1  ;;  %9459 = vmatmul.mubr.bf16.gmra.mxu1 %v7134_v8 }
 0x3ad   : > { %v5672_v10 = vpop.f32.mrf.mxu0  ;;  %v6025_v63 = vadd.f32 %v9228_v62, %v13719_v57  ;;  %9462 = vmatprep.mubr.bf16.mxu1 %v15385_v23 }
 0x3ae   : > { %v13855_v3 = vadd.f32 %v5672_v10, %v5429_v59  ;;  %v5892_v49 = vpop.f32.mrf.mxu1 }
 0x3af   : > { %v9276_v25 = vpop.f32.mrf.mxu0  ;;  %v6023_v35 = vadd.f32 %v5892_v49, %v13723_v48 }
 0x3b0   : > { %v13858_v24 = vadd.f32 %v9276_v25, %v6021_v40  ;;  %v9229_v44 = vpop.f32.mrf.mxu1 }
 0x3b1   : > { %v6248_v33 = vpop.f32.mrf.mxu0  ;;  %v6026_v52 = vadd.f32 %v9229_v44, %v13729_v5 }
 0x3b2   : > { %v13861_v41 = vadd.f32 %v6248_v33, %v6019_v60  ;;  %v5895_v20 = vpop.f32.mrf.mxu1 }
 0x3b3   : > { %v9277_v53 = vpop.f32.mrf.mxu0  ;;  %v6024_v57 = vadd.f32 %v5895_v20, %v13735_v29 }
 0x3b4   : > { %v13864_v58 = vadd.f32 %v9277_v53, %v6022_v4  ;;  %v9232_v59 = vpop.f32.mrf.mxu1  ;;  %9463 = vmatmul.mubr.bf16.gmra.mxu1 %v15386_v0 }
 0x3b5   : > { %v6251_v7 = vpop.f32.mrf.mxu0  ;;  %v6029_v48 = vadd.f32 %v9232_v59, %v13739_v17 }
 0x3b6   : > { %v13868_v30 = vadd.f32 %v6251_v7, %v6020_v19  ;;  %v5908_v6 = vpop.f32.mrf.mxu1 }
 0x3b7   : > { %v9280_v40 = vpop.f32.mrf.mxu0  ;;  %v6027_v5 = vadd.f32 %v5908_v6, %v13742_v45 }
 0x3b8   : > { %v13871_v11 = vadd.f32 %v9280_v40, %v6025_v63  ;;  %v9233_v34 = vpop.f32.mrf.mxu1 }
 0x3b9   : > { %v6264_v60 = vpop.f32.mrf.mxu0  ;;  %v6030_v29 = vadd.f32 %v9233_v34, %v13748_v54 }
 0x3ba   : > { %v13874_v9 = vadd.f32 %v6264_v60, %v6023_v35  ;;  %v5911_v1 = vpop.f32.mrf.mxu1 }
 0x3bb   : > { %v9281_v4 = vpop.f32.mrf.mxu0  ;;  %v6028_v2 = vadd.f32 %v5911_v1, %v13754_v28 }
 0x3bc   : > { %v13877_v38 = vadd.f32 %v9281_v4, %v6026_v52  ;;  %v9236_v17 = vpop.f32.mrf.mxu1 }
 0x3bd   : > { %v6267_v19 = vpop.f32.mrf.mxu0  ;;  %v6033_v43 = vadd.f32 %v9236_v17, %v13757_v46 }
 0x3be   : > { %v13880_v8 = vadd.f32 %v6267_v19, %v6024_v57  ;;  %v5924_v45 = vpop.f32.mrf.mxu1 }
 0x3bf   : > { %v9284_v62 = vpop.f32.mrf.mxu0  ;;  %v6031_v10 = vadd.f32 %v5924_v45, %v13760_v18 }
 0x3c0   : > { %v13883_v63 = vadd.f32 %v9284_v62, %v6029_v48  ;;  %v9237_v54 = vpop.f32.mrf.mxu1 }
 0x3c1   : > { %v6280_v23 = vpop.f32.mrf.mxu0  ;;  %v6034_v49 = vadd.f32 %v9237_v54, %v13766_v32 }
 0x3c2   : > { %v13886_v25 = vadd.f32 %v6280_v23, %v6027_v5  ;;  %v5927_v28 = vpop.f32.mrf.mxu1 }
 0x3c3   : > { %v9285_v35 = vpop.f32.mrf.mxu0  ;;  %v6032_v44 = vadd.f32 %v5927_v28, %v13772_v15 }
 0x3c4   : > { %v13889_v33 = vadd.f32 %v9285_v35, %v6030_v29  ;;  %v9240_v46 = vpop.f32.mrf.mxu1 }
 0x3c5   : > { %v6283_v52 = vpop.f32.mrf.mxu0  ;;  %v6037_v20 = vadd.f32 %v9240_v46, %v13775_v14 }
 0x3c6   : > { %v13892_v53 = vadd.f32 %v6283_v52, %v6028_v2  ;;  %v5940_v18 = vpop.f32.mrf.mxu1 }
 0x3c7   : > { %v9288_v57 = vpop.f32.mrf.mxu0  ;;  %v6035_v59 = vadd.f32 %v5940_v18, %v13778_v31 }
 0x3c8   : > { %v13895_v0 = vadd.f32 %v9288_v57, %v6033_v43  ;;  %v9241_v32 = vpop.f32.mrf.mxu1 }
 0x3c9   : > { %v6296_v7 = vpop.f32.mrf.mxu0  ;;  %v6038_v48 = vadd.f32 %v9241_v32, %v13784_v26 }
 0x3ca   : > { %v13898_v6 = vadd.f32 %v6296_v7, %v6031_v10  ;;  %v5943_v15 = vpop.f32.mrf.mxu1 }
 0x3cb   : > { %v9289_v40 = vpop.f32.mrf.mxu0  ;;  %v6036_v5 = vadd.f32 %v5943_v15, %v13790_v16 }
 0x3cc   : > { %v13901_v34 = vadd.f32 %v9289_v40, %v6034_v49  ;;  %v9244_v14 = vpop.f32.mrf.mxu1 }
 0x3cd   : > { %v6299_v60 = vpop.f32.mrf.mxu0  ;;  %v6041_v29 = vadd.f32 %v9244_v14, %v13793_v12 }
 0x3ce   : > { %v13904_v1 = vadd.f32 %v6299_v60, %v6032_v44  ;;  %v5956_v31 = vpop.f32.mrf.mxu1 }
 0x3cf   : > { %v9292_v4 = vpop.f32.mrf.mxu0  ;;  %v6039_v2 = vadd.f32 %v5956_v31, %v13796_v37 }
 0x3d0   : > { %v13907_v17 = vadd.f32 %v9292_v4, %v6037_v20  ;;  %v9245_v26 = vpop.f32.mrf.mxu1 }
 0x3d1   : > { %v6312_v19 = vpop.f32.mrf.mxu0  ;;  %v6042_v43 = vadd.f32 %v9245_v26, %v13802_v55 }
 0x3d2   : > { %v13910_v45 = vadd.f32 %v6312_v19, %v6035_v59  ;;  %v5959_v16 = vpop.f32.mrf.mxu1 }
 0x3d3   : > { %v9293_v62 = vpop.f32.mrf.mxu0  ;;  %v6040_v10 = vadd.f32 %v5959_v16, %v13808_v21 }
 0x3d4   : > { %v13913_v54 = vadd.f32 %v9293_v62, %v6038_v48  ;;  %v9248_v12 = vpop.f32.mrf.mxu1 }
 0x3d5   : > { %v6315_v23 = vpop.f32.mrf.mxu0  ;;  %v6045_v49 = vadd.f32 %v9248_v12, %v13811_v42 }
 0x3d6   : > { %v13916_v28 = vadd.f32 %v6315_v23, %v6036_v5  ;;  %v5972_v37 = vpop.f32.mrf.mxu1 }
 0x3d7   : > { %v9296_v35 = vpop.f32.mrf.mxu0  ;;  %v6043_v44 = vadd.f32 %v5972_v37, %v13814_v39 }
 0x3d8   : > { %v13919_v46 = vadd.f32 %v9296_v35, %v6041_v29  ;;  %v9249_v55 = vpop.f32.mrf.mxu1 }
 0x3d9   : > { %v6328_v52 = vpop.f32.mrf.mxu0  ;;  %v6046_v20 = vadd.f32 %v9249_v55, %v13820_v47 }
 0x3da   : > { %v13922_v18 = vadd.f32 %v6328_v52, %v6039_v2  ;;  %v5975_v21 = vpop.f32.mrf.mxu1 }
 0x3db   : > { %v9297_v57 = vpop.f32.mrf.mxu0  ;;  %v6044_v59 = vadd.f32 %v5975_v21, %v13826_v61 }
 0x3dc   : > { %v13925_v32 = vadd.f32 %v9297_v57, %v6042_v43  ;;  %v9252_v42 = vpop.f32.mrf.mxu1 }
 0x3dd   : > { %v6331_v7 = vpop.f32.mrf.mxu0  ;;  %v6049_v48 = vadd.f32 %v9252_v42, %v13829_v36 }
 0x3de   : > { %v13928_v15 = vadd.f32 %v6331_v7, %v6040_v10  ;;  %v5988_v39 = vpop.f32.mrf.mxu1 }
 0x3df   : > { %v9300_v40 = vpop.f32.mrf.mxu0  ;;  %v6047_v5 = vadd.f32 %v5988_v39, %v13832_v56 }
 0x3e0   : > { %v13931_v14 = vadd.f32 %v9300_v40, %v6045_v49  ;;  %v9253_v47 = vpop.f32.mrf.mxu1 }
 0x3e1   : > { %v6344_v60 = vpop.f32.mrf.mxu0  ;;  %v6050_v29 = vadd.f32 %v9253_v47, %v13836_v22 }
 0x3e2   : > { %v13934_v31 = vadd.f32 %v6344_v60, %v6043_v44  ;;  %v5991_v61 = vpop.f32.mrf.mxu1 }
 0x3e3   : > { %v9301_v4 = vpop.f32.mrf.mxu0  ;;  %v6048_v2 = vadd.f32 %v5991_v61, %v13840_v50 }
 0x3e4   : > { %v13937_v26 = vadd.f32 %v9301_v4, %v6046_v20  ;;  %v9256_v36 = vpop.f32.mrf.mxu1 }
 0x3e5   : > { %v6347_v19 = vpop.f32.mrf.mxu0  ;;  %v6053_v43 = vadd.f32 %v9256_v36, %v13843_v27 }
 0x3e6   : > { %v13940_v16 = vadd.f32 %v6347_v19, %v6044_v59  ;;  %v6004_v56 = vpop.f32.mrf.mxu1 }
 0x3e7   : > { %v9304_v62 = vpop.f32.mrf.mxu0  ;;  %v6051_v10 = vadd.f32 %v6004_v56, %v13846_v51 }
 0x3e8   : > { %v13943_v12 = vadd.f32 %v9304_v62, %v6049_v48  ;;  %v9257_v22 = vpop.f32.mrf.mxu1 }
 0x3e9   : > { %v6360_v23 = vpop.f32.mrf.mxu0  ;;  %v6054_v49 = vadd.f32 %v9257_v22, %v13851_v13 }
 0x3ea   : > { %v13946_v37 = vadd.f32 %v6360_v23, %v6047_v5  ;;  %v6007_v50 = vpop.f32.mrf.mxu1 }
 0x3eb   : > { %v9305_v35 = vpop.f32.mrf.mxu0  ;;  %v6052_v44 = vadd.f32 %v6007_v50, %v13855_v3 }
 0x3ec   : > { %v13949_v55 = vadd.f32 %v9305_v35, %v6050_v29  ;;  %v9328_v27 = vpop.f32.mrf.mxu1 }
 0x3ed   : > { %v6363_v52 = vpop.f32.mrf.mxu0  ;;  %v13952_v20 = vadd.f32 %v9328_v27, %v13858_v24 }
 0x3ee   : > { %v13954_v51 = vadd.f32 %v6363_v52, %v6048_v2  ;;  %v6536_v21 = vpop.f32.mrf.mxu1 }
 0x3ef   : > { %v9308_v57 = vpop.f32.mrf.mxu0  ;;  %v13957_v59 = vadd.f32 %v6536_v21, %v13861_v41 }
 0x3f0   : > { %v13959_v13 = vadd.f32 %v9308_v57, %v6053_v43  ;;  %v9329_v42 = vpop.f32.mrf.mxu1 }
 0x3f1   : > { %v6376_v7 = vpop.f32.mrf.mxu0  ;;  %v13962_v3 = vadd.f32 %v9329_v42, %v13864_v58 }
 0x3f2   : > { %v13964_v48 = vadd.f32 %v6376_v7, %v6051_v10  ;;  %v6539_v39 = vpop.f32.mrf.mxu1 }
 0x3f3   : > { %v9309_v40 = vpop.f32.mrf.mxu0  ;;  %v13967_v24 = vadd.f32 %v6539_v39, %v13868_v30 }
 0x3f4   : > { %v13969_v5 = vadd.f32 %v9309_v40, %v6054_v49  ;;  %v9332_v47 = vpop.f32.mrf.mxu1 }
 0x3f5   : > { %v6379_v60 = vpop.f32.mrf.mxu0  ;;  %v13972_v41 = vadd.f32 %v9332_v47, %v13871_v11 }
 0x3f6   : > { %v13974_v29 = vadd.f32 %v6379_v60, %v6052_v44  ;;  %v6552_v61 = vpop.f32.mrf.mxu1 }
 0x3f7   : > { %v13976_v4 = vpop.f32.mrf.mxu0  ;;  %v13979_v58 = vadd.f32 %v6552_v61, %v13874_v9 }
 0x3f8   : > { %v9333_v2 = vpop.f32.mrf.mxu1 }
 0x3f9   : > { %v13981_v36 = vpop.f32.mrf.mxu0  ;;  %v13984_v30 = vadd.f32 %v9333_v2, %v13877_v38 }
 0x3fa   : > { %v6555_v19 = vpop.f32.mrf.mxu1 }
 0x3fb   : > { %v13986_v43 = vpop.f32.mrf.mxu0  ;;  %v13989_v11 = vadd.f32 %v6555_v19, %v13880_v8 }
 0x3fc   : > { %v9336_v56 = vpop.f32.mrf.mxu1 }
 0x3fd   : > { %v13991_v62 = vpop.f32.mrf.mxu0  ;;  %v13994_v10 = vadd.f32 %v9336_v56, %v13883_v63 }
 0x3fe   : > { %v6568_v9 = vpop.f32.mrf.mxu1 }
 0x3ff   : > { %v13996_v22 = vpop.f32.mrf.mxu0  ;;  %v13999_v23 = vadd.f32 %v6568_v9, %v13886_v25 }
 0x400   : > { %v9337_v38 = vpop.f32.mrf.mxu1 }
 0x401   : > { %v14001_v49 = vpop.f32.mrf.mxu0  ;;  %v14004_v50 = vadd.f32 %v9337_v38, %v13889_v33 }
 0x402   : > { %v6571_v8 = vpop.f32.mrf.mxu1 }
 0x403   : > { %v14006_v35 = vpop.f32.mrf.mxu0  ;;  %v14009_v44 = vadd.f32 %v6571_v8, %v13892_v53 }
 0x404   : > { %v9340_v63 = vpop.f32.mrf.mxu1 }
 0x405   : > { %v14011_v27 = vpop.f32.mrf.mxu0  ;;  %v14014_v52 = vadd.f32 %v9340_v63, %v13895_v0 }
 0x406   : > { %v6584_v25 = vpop.f32.mrf.mxu1 }
 0x407   : > { %v14017_v21 = vadd.f32 %v6584_v25, %v13898_v6  ;;  %v14019_v42 = vpop.f32.mrf.mxu0 }
 0x408   : > { %v9341_v57 = vpop.f32.mrf.mxu1 }
 0x409   : > { %v14022_v33 = vadd.f32 %v9341_v57, %v13901_v34  ;;  %v14027_v40 = vpop.f32.mrf.mxu0 }
 0x40a   : > { %v6587_v7 = vpop.f32.mrf.mxu1 }
 0x40b   : > { %v14025_v53 = vadd.f32 %v6587_v7, %v13904_v1  ;;  %v14035_v61 = vpop.f32.mrf.mxu0 }
 0x40c   : > { %v9344_v39 = vpop.f32.mrf.mxu1 }
 0x40d   : > { %v14030_v0 = vadd.f32 %v9344_v39, %v13907_v17  ;;  %v14043_v56 = vpop.f32.mrf.mxu0 }
 0x40e   : > { %v6600_v47 = vpop.f32.mrf.mxu1 }
 0x40f   : > { %v14033_v6 = vadd.f32 %v6600_v47, %v13910_v45  ;;  %v14051_v8 = vpop.f32.mrf.mxu0 }
 0x410   : > { %v9345_v60 = vpop.f32.mrf.mxu1 }
 0x411   : > { %v14038_v34 = vadd.f32 %v9345_v60, %v13913_v54  ;;  %v14059_v57 = vpop.f32.mrf.mxu0 }
 0x412   : > { %v6603_v2 = vpop.f32.mrf.mxu1 }
 0x413   : > { %v14041_v1 = vadd.f32 %v6603_v2, %v13916_v28  ;;  %v14067_v47 = vpop.f32.mrf.mxu0 }
 0x414   : > { %v9348_v19 = vpop.f32.mrf.mxu1 }
 0x415   : > { %v14046_v17 = vadd.f32 %v9348_v19, %v13919_v46  ;;  %v14075_v19 = vpop.f32.mrf.mxu0 }
 0x416   : > { %v6616_v9 = vpop.f32.mrf.mxu1 }
 0x417   : > { %v14049_v45 = vadd.f32 %v6616_v9, %v13922_v18 }
 0x418   : > { %v9349_v38 = vpop.f32.mrf.mxu1 }
 0x419   : > { %v14054_v54 = vadd.f32 %v9349_v38, %v13925_v32 }
 0x41a   : > { %v6619_v63 = vpop.f32.mrf.mxu1 }
 0x41b   : > { %v14057_v28 = vadd.f32 %v6619_v63, %v13928_v15  ;;  %v14083_v63 = vpop.f32.mrf.mxu0 }
 0x41c   : > { %v9352_v25 = vpop.f32.mrf.mxu1 }
 0x41d   : > { %v14062_v46 = vadd.f32 %v9352_v25, %v13931_v14 }
 0x41e   : > { %v6632_v7 = vpop.f32.mrf.mxu1 }
 0x41f   : > { %v14065_v18 = vadd.f32 %v6632_v7, %v13934_v31 }
 0x420   : > { %v9353_v39 = vpop.f32.mrf.mxu1 }
 0x421   : > { %v14070_v32 = vadd.f32 %v9353_v39, %v13937_v26  ;;  %v14091_v39 = vpop.f32.mrf.mxu0 }
 0x422   : > { %v6635_v60 = vpop.f32.mrf.mxu1 }
 0x423   : > { %v14073_v15 = vadd.f32 %v6635_v60, %v13940_v16 }
 0x424   : > { %v9356_v2 = vpop.f32.mrf.mxu1 }
 0x425   : > { %v14078_v14 = vadd.f32 %v9356_v2, %v13943_v12 }
 0x426   : > { %v6648_v9 = vpop.f32.mrf.mxu1 }
 0x427   : > { %v14081_v31 = vadd.f32 %v6648_v9, %v13946_v37  ;;  %v14099_v9 = vpop.f32.mrf.mxu0 }
 0x428   : > { %v9357_v38 = vpop.f32.mrf.mxu1 }
 0x429   : > { %v14086_v26 = vadd.f32 %v9357_v38, %v13949_v55 }
 0x42a   : > { %v6651_v25 = vpop.f32.mrf.mxu1 }
 0x42b   : > { %v14089_v16 = vadd.f32 %v6651_v25, %v13954_v51  ;;  %v7016_v51 = vadd.f32 %v13976_v4, %v13952_v20  ;;  %v7017_v20 = vadd.f32 %v13986_v43, %v13962_v3  ;;  %v7020_v3 = vadd.f32 %v13996_v22, %v13972_v41 }
 0x42c   : > { %v9360_v7 = vpop.f32.mrf.mxu1 }
 0x42d   : > { %15387 = vst [vmem:[#allocation74_spill] sm:$0xff] %v14089_v16  ;;  %v14094_v12 = vadd.f32 %v9360_v7, %v13959_v13  ;;  %v14112_v13 = vld [vmem:[%s14354_s4] ss:$0 sm:$0xff]  ;;  %v14116_v7 = vpop.f32.mrf.mxu0 }
 0x42e   : > { %v6664_v60 = vpop.f32.mrf.mxu1 }
 0x42f   : > { %v14097_v37 = vadd.f32 %v6664_v60, %v13964_v48  ;;  %v7014_v48 = vadd.f32 %v13981_v36, %v13957_v59 }
 0x430   : > { %v9361_v2 = vpop.f32.mrf.mxu1 }
 0x431   : > { %v14102_v55 = vadd.f32 %v9361_v2, %v13969_v5 }
 0x432   : > { %v6667_v38 = vpop.f32.mrf.mxu1 }
 0x433   : > { %v14107_v25 = vadd.f32 %v6667_v38, %v13974_v29  ;;  %v7015_v38 = vadd.f32 %v13991_v62, %v13967_v24 }
 0x434   : > { %v9432_v16 = vpop.f32.mrf.mxu1 }
 0x435   : > { %15388 = vst [vmem:[#allocation93_spill] sm:$0xff] %v14107_v25  ;;  %v7388_v5 = vadd.f32 %v9432_v16, %v7016_v51  ;;  %v14124_v25 = vpop.f32.mrf.mxu0 }
 0x436   : > { %v7243_v60 = vpop.f32.mrf.mxu1 }
 0x437   : > { %v7431_v29 = vadd.f32 %v14112_v13, %v7388_v5  ;;  %v7386_v4 = vadd.f32 %v7243_v60, %v7014_v48  ;;  %v7018_v60 = vadd.f32 %v14001_v49, %v13979_v58 }
 0x438   : > { %v9433_v2 = vpop.f32.mrf.mxu1 }
 0x439   : > { %v7467_v59 = vmax.f32 %v7431_v29, 0.0  ;;  %v7429_v36 = vadd.f32 %v14112_v13, %v7386_v4  ;;  %v7389_v16 = vadd.f32 %v9433_v2, %v7017_v20  ;;  %v14140_v4 = vpop.f32.mrf.mxu0  ;;  %v15390_v20 = vld [vmem:[#allocation49_spill] sm:$0xff] }
 0x43a   : > { %v7246_v43 = vpop.f32.mrf.mxu1  ;;  %vm15391_vm2 = vnez %v15390_v20  ;;  %v7024_v20 = vadd.f32 %v14019_v42, %v13994_v10 }
 0x43b   : > { %v7503_v24 = vsel %vm12307_vm11, %v7467_v59, 0.0  ;;  %v7465_v62 = vmax.f32 %v7429_v36, 0.0  ;;  %v7432_v48 = vadd.f32 %v14112_v13, %v7389_v16  ;;  %v7387_v5 = vadd.f32 %v7246_v43, %v7015_v38  ;;  %v15392_v36 = vld [vmem:[#allocation4_spill] sm:$0xff] }
 0x43c   : > { %7539 = vst [vmem:[%s14129_s27 + $0x10] sm:$0xff] %v7503_v24  ;;  %v9436_v29 = vpop.f32.mrf.mxu1  ;;  %v7021_v59 = vadd.f32 %v14006_v35, %v13984_v30  ;;  %vm15393_vm11 = vnez %v15392_v36  ;;  %v7019_v24 = vadd.f32 %v14011_v27, %v13989_v11  ;;  %v15397_v36 = vld [vmem:[#allocation23_spill] sm:$0xff] }
 0x43d   : > { %v7501_v2 = vsel %vm15391_vm2, %v7465_v62, 0.0  ;;  %v7468_v41 = vmax.f32 %v7432_v48, 0.0  ;;  %v7430_v22 = vadd.f32 %v14112_v13, %v7387_v5  ;;  %v7392_v51 = vadd.f32 %v9436_v29, %v7020_v3  ;;  %v14154_v3 = vpop.f32.mrf.mxu0  ;;  %v15394_v48 = vld [vmem:[#allocation15_spill] sm:$0xff] }
 0x43e   : > { %7537 = vst [vmem:[%s14129_s27] sm:$0xff] %v7501_v2  ;;  %v7259_v38 = vpop.f32.mrf.mxu1  ;;  %vm15395_vm10 = vnez %v15394_v48  ;;  %vm15398_vm14 = vnez %v15397_v36  ;;  %v7028_v2 = vadd.f32 %v14051_v8, %v14014_v52 }
 0x43f   : > { %v7504_v58 = vsel %vm15393_vm11, %v7468_v41, 0.0  ;;  %v7466_v49 = vmax.f32 %v7430_v22, 0.0  ;;  %v7435_v16 = vadd.f32 %v14112_v13, %v7392_v51  ;;  %v7390_v43 = vadd.f32 %v7259_v38, %v7018_v60 }
 0x440   : > { %7540 = vst [vmem:[%s14129_s27 + $0x18] sm:$0xff] %v7504_v58  ;;  %v9437_v62 = vpop.f32.mrf.mxu1  ;;  %v7022_v51 = vadd.f32 %v14027_v40, %v13999_v23 }
 0x441   : > { %v7502_v30 = vsel %vm15395_vm10, %v7466_v49, 0.0  ;;  %v7471_v35 = vmax.f32 %v7435_v16, 0.0  ;;  %v7433_v5 = vadd.f32 %v14112_v13, %v7390_v43  ;;  %v7393_v29 = vadd.f32 %v9437_v62, %v7021_v59  ;;  %v14168_v59 = vpop.f32.mrf.mxu0 }
 0x442   : > { %7538 = vst [vmem:[%s14129_s27 + $0x8] sm:$0xff] %v7502_v30  ;;  %v7262_v60 = vpop.f32.mrf.mxu1  ;;  %v7025_v16 = vadd.f32 %v14035_v61, %v14004_v50  ;;  %v7023_v30 = vadd.f32 %v14043_v56, %v14009_v44 }
 0x443   : > { %v7507_v11 = vsel %vm12435_vm1, %v7471_v35, 0.0  ;;  %v7469_v27 = vmax.f32 %v7433_v5, 0.0  ;;  %v7436_v41 = vadd.f32 %v14112_v13, %v7393_v29  ;;  %v7391_v22 = vadd.f32 %v7262_v60, %v7019_v24  ;;  %v15399_v24 = vld [vmem:[#allocation46_spill] sm:$0xff]  ;;  %v14182_v5 = vpop.f32.mrf.mxu0  ;;  %v15401_v29 = vld [vmem:[#allocation3_spill] sm:$0xff] }
 0x444   : > { %7543 = vst [vmem:[%s14129_s27 + $0x30] sm:$0xff] %v7507_v11  ;;  %v9440_v38 = vpop.f32.mrf.mxu1  ;;  %vm15400_vm1 = vnez %v15399_v24  ;;  %vm15402_vm8 = vnez %v15401_v29 }
 0x445   : > { %v7505_v10 = vsel %vm15398_vm14, %v7469_v27, 0.0  ;;  %v7472_v42 = vmax.f32 %v7436_v41, 0.0  ;;  %v7434_v58 = vadd.f32 %v14112_v13, %v7391_v22  ;;  %v7396_v49 = vadd.f32 %v9440_v38, %v7024_v20  ;;  %v15403_v27 = vld [vmem:[#allocation53_spill] sm:$0xff]  ;;  %v14196_v36 = vpop.f32.mrf.mxu0 }
 0x446   : > { %7541 = vst [vmem:[%s14129_s27 + $0x20] sm:$0xff] %v7505_v10  ;;  %v7275_v43 = vpop.f32.mrf.mxu1  ;;  %vm15404_vm13 = vnez %v15403_v27  ;;  %v15405_v10 = vld [vmem:[#allocation39_spill] sm:$0xff] }
 0x447   : > { %v7508_v23 = vsel %vm15400_vm1, %v7472_v42, 0.0  ;;  %v7470_v40 = vmax.f32 %v7434_v58, 0.0  ;;  %v7439_v62 = vadd.f32 %v14112_v13, %v7396_v49  ;;  %v7394_v48 = vadd.f32 %v7275_v43, %v7022_v51  ;;  %v15407_v43 = vld [vmem:[#allocation79_spill] sm:$0xff] }
 0x448   : > { %7544 = vst [vmem:[%s14129_s27 + $0x38] sm:$0xff] %v7508_v23  ;;  %v9441_v35 = vpop.f32.mrf.mxu1  ;;  %v7026_v51 = vadd.f32 %v14059_v57, %v14017_v21  ;;  %vm15406_vm2 = vnez %v15405_v10  ;;  %v7029_v49 = vadd.f32 %v14067_v47, %v14022_v33  ;;  %vm15408_vm11 = vnez %v15407_v43  ;;  %v15415_v10 = vld [vmem:[#allocation52_spill] sm:$0xff] }
 0x449   : > { %v7506_v50 = vsel %vm15402_vm8, %v7470_v40, 0.0  ;;  %v7475_v61 = vmax.f32 %v7439_v62, 0.0  ;;  %v7437_v20 = vadd.f32 %v14112_v13, %v7394_v48  ;;  %v7397_v60 = vadd.f32 %v9441_v35, %v7025_v16  ;;  %v14210_v48 = vpop.f32.mrf.mxu0 }
 0x44a   : > { %7542 = vst [vmem:[%s14129_s27 + $0x28] sm:$0xff] %v7506_v50  ;;  %v7278_v11 = vpop.f32.mrf.mxu1  ;;  %v7027_v40 = vadd.f32 %v14075_v19, %v14025_v53  ;;  %v7032_v50 = vadd.f32 %v14083_v63, %v14030_v0  ;;  %vm15416_vm8 = vnez %v15415_v10 }
 0x44b   : > { %v7511_v44 = vsel %vm15404_vm13, %v7475_v61, 0.0  ;;  %v7473_v56 = vmax.f32 %v7437_v20, 0.0  ;;  %v7440_v41 = vadd.f32 %v14112_v13, %v7397_v60  ;;  %v7395_v22 = vadd.f32 %v7278_v11, %v7023_v30  ;;  %v15409_v30 = vld [vmem:[#allocation50_spill] sm:$0xff]  ;;  %v15411_v20 = vld [vmem:[#allocation24_spill] sm:$0xff] }
 0x44c   : > { %7547 = vst [vmem:[%s14129_s27 + $0x50] sm:$0xff] %v7511_v44  ;;  %v9444_v38 = vpop.f32.mrf.mxu1  ;;  %vm15410_vm10 = vnez %v15409_v30  ;;  %vm15412_vm14 = vnez %v15411_v20  ;;  %v7030_v11 = vadd.f32 %v14091_v39, %v14033_v6  ;;  %v14224_v44 = vpop.f32.mrf.mxu0  ;;  %v7034_v30 = vadd.f32 %v14140_v4, %v14049_v45 }
 0x44d   : > { %v7509_v52 = vsel %vm15406_vm2, %v7473_v56, 0.0  ;;  %v7476_v8 = vmax.f32 %v7440_v41, 0.0  ;;  %v7438_v42 = vadd.f32 %v14112_v13, %v7395_v22  ;;  %v7400_v58 = vadd.f32 %v9444_v38, %v7028_v2  ;;  %v15413_v56 = vld [vmem:[#allocation35_spill] sm:$0xff] }
 0x44e   : > { %7545 = vst [vmem:[%s14129_s27 + $0x40] sm:$0xff] %v7509_v52  ;;  %v7291_v16 = vpop.f32.mrf.mxu1  ;;  %vm15414_vm1 = vnez %v15413_v56  ;;  %v15424_v56 = vld [vmem:[#allocation59_spill] sm:$0xff] }
 0x44f   : > { %v7512_v21 = vsel %vm15408_vm11, %v7476_v8, 0.0  ;;  %v7474_v57 = vmax.f32 %v7438_v42, 0.0  ;;  %v7443_v24 = vadd.f32 %v14112_v13, %v7400_v58  ;;  %v7398_v23 = vadd.f32 %v7291_v16, %v7026_v51  ;;  %v15417_v16 = vld [vmem:[#allocation82_spill] sm:$0xff] }
 0x450   : > { %7548 = vst [vmem:[%s14129_s27 + $0x58] sm:$0xff] %v7512_v21  ;;  %v9445_v62 = vpop.f32.mrf.mxu1  ;;  %v7033_v51 = vadd.f32 %v14099_v9, %v14038_v34  ;;  %v7031_v42 = vadd.f32 %v14116_v7, %v14041_v1  ;;  %vm15418_vm13 = vnez %v15417_v16  ;;  %vm15425_vm11 = vnez %v15424_v56 }
 0x451   : > { %v7510_v33 = vsel %vm15410_vm10, %v7474_v57, 0.0  ;;  %v7479_v47 = vmax.f32 %v7443_v24, 0.0  ;;  %v7441_v35 = vadd.f32 %v14112_v13, %v7398_v23  ;;  %v7401_v29 = vadd.f32 %v9445_v62, %v7029_v49  ;;  %v14238_v49 = vpop.f32.mrf.mxu0 }
 0x452   : > { %7546 = vst [vmem:[%s14129_s27 + $0x48] sm:$0xff] %v7510_v33  ;;  %v7294_v61 = vpop.f32.mrf.mxu1  ;;  %v7036_v57 = vadd.f32 %v14124_v25, %v14046_v17  ;;  %v7041_v16 = vadd.f32 %v14210_v48, %v14070_v32 }
 0x453   : > { %v7515_v53 = vsel %vm15412_vm14, %v7479_v47, 0.0  ;;  %v7477_v19 = vmax.f32 %v7441_v35, 0.0  ;;  %v7444_v60 = vadd.f32 %v14112_v13, %v7401_v29  ;;  %v7399_v2 = vadd.f32 %v7294_v61, %v7027_v40  ;;  %v6983_v47 = vpop.f32.mrf.mxu0  ;;  %v15420_v35 = vld [vmem:[#allocation83_spill] sm:$0xff] }
 0x454   : > { %7551 = vst [vmem:[%s14129_s27 + $0x70] sm:$0xff] %v7515_v53  ;;  %v9448_v27 = vpop.f32.mrf.mxu1  ;;  %vm15421_vm2 = vnez %v15420_v35  ;;  %v7037_v61 = vadd.f32 %v14154_v3, %v14054_v54  ;;  %v15422_v53 = vld [vmem:[#allocation87_spill] sm:$0xff] }
 0x455   : > { %v7513_v0 = vsel %vm15414_vm1, %v7477_v19, 0.0  ;;  %v7480_v63 = vmax.f32 %v7444_v60, 0.0  ;;  %v7442_v41 = vadd.f32 %v14112_v13, %v7399_v2  ;;  %v7404_v22 = vadd.f32 %v9448_v27, %v7032_v50  ;;  %v9409_v27 = vpop.f32.mrf.mxu0 }
 0x456   : > { %7549 = vst [vmem:[%s14129_s27 + $0x60] sm:$0xff] %v7513_v0  ;;  %v7307_v38 = vpop.f32.mrf.mxu1  ;;  %v7035_v2 = vadd.f32 %v14168_v59, %v14057_v28 }
 0x457   : > { %v7516_v6 = vsel %vm15416_vm8, %v7480_v63, 0.0  ;;  %v7478_v39 = vmax.f32 %v7442_v41, 0.0  ;;  %v7447_v52 = vadd.f32 %v14112_v13, %v7404_v22  ;;  %v7402_v8 = vadd.f32 %v7307_v38, %v7030_v11 }
 0x458   : > { %7552 = vst [vmem:[%s14129_s27 + $0x78] sm:$0xff] %v7516_v6  ;;  %v9449_v58 = vpop.f32.mrf.mxu1  ;;  %v7040_v41 = vadd.f32 %v14182_v5, %v14062_v46  ;;  %v7038_v6 = vadd.f32 %v14196_v36, %v14065_v18 }
 0x459   : > { %v7514_v34 = vsel %vm15418_vm13, %v7478_v39, 0.0  ;;  %v7483_v9 = vmax.f32 %v7447_v52, 0.0  ;;  %v7445_v43 = vadd.f32 %v14112_v13, %v7402_v8  ;;  %v7405_v21 = vadd.f32 %v9449_v58, %v7033_v51  ;;  %v6986_v52 = vpop.f32.mrf.mxu0  ;;  %v15427_v8 = vld [vmem:[#allocation56_spill] sm:$0xff] }
 0x45a   : > { %7550 = vst [vmem:[%s14129_s27 + $0x68] sm:$0xff] %v7514_v34  ;;  %v7310_v24 = vpop.f32.mrf.mxu1  ;;  %vm15428_vm10 = vnez %v15427_v8 }
 0x45b   : > { %v7519_v1 = vsel %vm12696_vm15, %v7483_v9, 0.0  ;;  %v7481_v7 = vmax.f32 %v7445_v43, 0.0  ;;  %v7448_v40 = vadd.f32 %v14112_v13, %v7405_v21  ;;  %v7403_v62 = vadd.f32 %v7310_v24, %v7031_v42  ;;  %v15429_v9 = vld [vmem:[#allocation91_spill] sm:$0xff]  ;;  %v9412_v23 = vpop.f32.mrf.mxu0 }
 0x45c   : > { %7555 = vst [vmem:[%s14129_s27 + $0x90] sm:$0xff] %v7519_v1  ;;  %v9452_v33 = vpop.f32.mrf.mxu1  ;;  %vm15423_vm15 = vnez %v15422_v53  ;;  %v15431_v1 = vld [vmem:[#allocation61_spill] sm:$0xff] }
 0x45d   : > { %v7517_v17 = vsel %vm15421_vm2, %v7481_v7, 0.0  ;;  %v7484_v25 = vmax.f32 %v7448_v40, 0.0  ;;  %v7446_v29 = vadd.f32 %v14112_v13, %v7403_v62  ;;  %v7408_v50 = vadd.f32 %v9452_v33, %v7036_v57 }
 0x45e   : > { %7553 = vst [vmem:[%s14129_s27 + $0x80] sm:$0xff] %v7517_v17  ;;  %v7323_v20 = vpop.f32.mrf.mxu1  ;;  %v7039_v57 = vadd.f32 %v14224_v44, %v14073_v15  ;;  %vm15432_vm14 = vnez %v15431_v1  ;;  %v7044_v62 = vadd.f32 %v14238_v49, %v14078_v14 }
 0x45f   : > { %v7520_v45 = vsel %vm15423_vm15, %v7484_v25, 0.0  ;;  %v7482_v4 = vmax.f32 %v7446_v29, 0.0  ;;  %v7451_v19 = vadd.f32 %v14112_v13, %v7408_v50  ;;  %v7406_v60 = vadd.f32 %v7323_v20, %v7034_v30  ;;  %v6999_v50 = vpop.f32.mrf.mxu0 }
 0x460   : > { %7556 = vst [vmem:[%s14129_s27 + $0x98] sm:$0xff] %v7520_v45  ;;  %v9453_v11 = vpop.f32.mrf.mxu1  ;;  %v7042_v25 = vadd.f32 %v6983_v47, %v14081_v31  ;;  %v7045_v45 = vadd.f32 %v9409_v27, %v14086_v26 }
 0x461   : > { %v7518_v54 = vsel %vm15425_vm11, %v7482_v4, 0.0  ;;  %v7487_v3 = vmax.f32 %v7451_v19, 0.0  ;;  %v7449_v0 = vadd.f32 %v14112_v13, %v7406_v60  ;;  %v7409_v63 = vadd.f32 %v9453_v11, %v7037_v61  ;;  %v15434_v61 = vld [vmem:[#allocation60_spill] sm:$0xff]  ;;  %v15437_v11 = vld [vmem:[#allocation74_spill] sm:$0xff] }
 0x462   : > { %7554 = vst [vmem:[%s14129_s27 + $0x88] sm:$0xff] %v7518_v54  ;;  %v7326_v22 = vpop.f32.mrf.mxu1  ;;  %vm15435_vm1 = vnez %v15434_v61  ;;  %v7043_v56 = vadd.f32 %v6986_v52, %v15437_v11 }
 0x463   : > { %v7523_v28 = vsel %vm12803_vm0, %v7487_v3, 0.0  ;;  %v7485_v59 = vmax.f32 %v7449_v0, 0.0  ;;  %v7452_v38 = vadd.f32 %v14112_v13, %v7409_v63  ;;  %v7407_v10 = vadd.f32 %v7326_v22, %v7035_v2  ;;  %v9413_v3 = vpop.f32.mrf.mxu0 }
 0x464   : > { %7559 = vst [vmem:[%s14129_s27 + $0xb0] sm:$0xff] %v7523_v28  ;;  %v9456_v39 = vpop.f32.mrf.mxu1  ;;  %vm15430_vm0 = vnez %v15429_v9  ;;  %v7048_v22 = vadd.f32 %v9412_v23, %v14094_v12  ;;  %v15442_v9 = vld [vmem:[#allocation81_spill] sm:$0xff]  ;;  %v15445_v23 = vld [vmem:[#allocation90_spill] sm:$0xff] }
 0x465   : > { %v7521_v46 = vsel %vm15428_vm10, %v7485_v59, 0.0  ;;  %v7488_v5 = vmax.f32 %v7452_v38, 0.0  ;;  %v7450_v42 = vadd.f32 %v14112_v13, %v7407_v10  ;;  %v7412_v58 = vadd.f32 %v9456_v39, %v7040_v41  ;;  %v7002_v8 = vpop.f32.mrf.mxu0 }
 0x466   : > { %7557 = vst [vmem:[%s14129_s27 + $0xa0] sm:$0xff] %v7521_v46  ;;  %v7339_v34 = vpop.f32.mrf.mxu1  ;;  %v7046_v39 = vadd.f32 %v6999_v50, %v14097_v37  ;;  %v15440_v46 = vld [vmem:[#allocation78_spill] sm:$0xff] }
 0x467   : > { %v7524_v18 = vsel %vm15430_vm0, %v7488_v5, 0.0  ;;  %v7486_v36 = vmax.f32 %v7450_v42, 0.0  ;;  %v7455_v43 = vadd.f32 %v14112_v13, %v7412_v58  ;;  %v7410_v21 = vadd.f32 %v7339_v34, %v7038_v6 }
 0x468   : > { %7560 = vst [vmem:[%s14129_s27 + $0xb8] sm:$0xff] %v7524_v18  ;;  %v9457_v24 = vpop.f32.mrf.mxu1 }
 0x469   : > { %v7522_v32 = vsel %vm15432_vm14, %v7486_v36, 0.0  ;;  %v7491_v48 = vmax.f32 %v7455_v43, 0.0  ;;  %v7453_v7 = vadd.f32 %v14112_v13, %v7410_v21  ;;  %v7413_v40 = vadd.f32 %v9457_v24, %v7041_v16  ;;  %v15444_v21 = vld [vmem:[#allocation93_spill] sm:$0xff] }
 0x46a   : > { %7558 = vst [vmem:[%s14129_s27 + $0xa8] sm:$0xff] %v7522_v32  ;;  %v7342_v30 = vpop.f32.mrf.mxu1  ;;  %v7049_v16 = vadd.f32 %v9413_v3, %v14102_v55 }
 0x46b   : > { %v7527_v15 = vsel %vm12878_vm9, %v7491_v48, 0.0  ;;  %v7489_v44 = vmax.f32 %v7453_v7, 0.0  ;;  %v7456_v35 = vadd.f32 %v14112_v13, %v7413_v40  ;;  %v7411_v17 = vadd.f32 %v7342_v30, %v7039_v57 }
 0x46c   : > { %7563 = vst [vmem:[%s14129_s27 + $0xd0] sm:$0xff] %v7527_v15  ;;  %v9460_v29 = vpop.f32.mrf.mxu1  ;;  %vm15441_vm9 = vnez %v15440_v46  ;;  %v7047_v57 = vadd.f32 %v7002_v8, %v15444_v21 }
 0x46d   : > { %v7525_v20 = vsel %vm15435_vm1, %v7489_v44, 0.0  ;;  %v7492_v14 = vmax.f32 %v7456_v35, 0.0  ;;  %v7454_v49 = vadd.f32 %v14112_v13, %v7411_v17  ;;  %v7416_v53 = vadd.f32 %v9460_v29, %v7044_v62 }
 0x46e   : > { %7561 = vst [vmem:[%s14129_s27 + $0xc0] sm:$0xff] %v7525_v20  ;;  %v7355_v4 = vpop.f32.mrf.mxu1  ;;  %v15450_v20 = vld [vmem:[#allocation47_spill] sm:$0xff] }
 0x46f   : > { %v7528_v60 = vsel %vm12935_vm7, %v7492_v14, 0.0  ;;  %v7490_v31 = vmax.f32 %v7454_v49, 0.0  ;;  %v7459_v47 = vadd.f32 %v14112_v13, %v7416_v53  ;;  %v7414_v2 = vadd.f32 %v7355_v4, %v7042_v25 }
 0x470   : > { %7564 = vst [vmem:[%s14129_s27 + $0xd8] sm:$0xff] %v7528_v60  ;;  %v9461_v54 = vpop.f32.mrf.mxu1  ;;  %vm15446_vm7 = vnez %v15445_v23 }
 0x471   : > { %v7526_v63 = vsel %vm12899_vm4, %v7490_v31, 0.0  ;;  %v7495_v26 = vmax.f32 %v7459_v47, 0.0  ;;  %v7457_v27 = vadd.f32 %v14112_v13, %v7414_v2  ;;  %v7417_v41 = vadd.f32 %v9461_v54, %v7045_v45 }
 0x472   : > { %7562 = vst [vmem:[%s14129_s27 + $0xc8] sm:$0xff] %v7526_v63  ;;  %v7358_v51 = vpop.f32.mrf.mxu1  ;;  %vm15443_vm4 = vnez %v15442_v9 }
 0x473   : > { %v7531_v59 = vsel %vm12960_vm5, %v7495_v26, 0.0  ;;  %v7493_v38 = vmax.f32 %v7457_v27, 0.0  ;;  %v7460_v10 = vadd.f32 %v14112_v13, %v7417_v41  ;;  %v7415_v6 = vadd.f32 %v7358_v51, %v7043_v56 }
 0x474   : > { %7567 = vst [vmem:[%s14129_s27 + $0xf0] sm:$0xff] %v7531_v59  ;;  %v9464_v52 = vpop.f32.mrf.mxu1  ;;  %vm15451_vm5 = vnez %v15450_v20 }
 0x475   : > { %v7529_v5 = vsel %vm15441_vm9, %v7493_v38, 0.0  ;;  %v7496_v12 = vmax.f32 %v7460_v10, 0.0  ;;  %v7458_v42 = vadd.f32 %v14112_v13, %v7415_v6  ;;  %v7420_v58 = vadd.f32 %v9464_v52, %v7048_v22 }
 0x476   : > { %7565 = vst [vmem:[%s14129_s27 + $0xe0] sm:$0xff] %v7529_v5  ;;  %v7371_v34 = vpop.f32.mrf.mxu1 }
 0x477   : > { %v7532_v18 = vsel %vm15443_vm4, %v7496_v12, 0.0  ;;  %v7494_v37 = vmax.f32 %v7458_v42, 0.0  ;;  %v7463_v36 = vadd.f32 %v14112_v13, %v7420_v58  ;;  %v7418_v43 = vadd.f32 %v7371_v34, %v7046_v39 }
 0x478   : > { %7568 = vst [vmem:[%s14129_s27 + $0xf8] sm:$0xff] %v7532_v18  ;;  %v9465_v24 = vpop.f32.mrf.mxu1 }
 0x479   : > { %v7530_v1 = vsel %vm15446_vm7, %v7494_v37, 0.0  ;;  %v7499_v32 = vmax.f32 %v7463_v36, 0.0  ;;  %v7461_v55 = vadd.f32 %v14112_v13, %v7418_v43  ;;  %v7421_v48 = vadd.f32 %v9465_v24, %v7049_v16 }
 0x47a   : > { %7566 = vst [vmem:[%s14129_s27 + $0xe8] sm:$0xff] %v7530_v1  ;;  %v7374_v7 = vpop.f32.mrf.mxu1 }
 0x47b   : > { %v7535_v62 = vsel %vm13050_vm12, %v7499_v32, 0.0  ;;  %v7497_v30 = vmax.f32 %v7461_v55, 0.0  ;;  %v7464_v33 = vadd.f32 %v14112_v13, %v7421_v48  ;;  %v7419_v15 = vadd.f32 %v7374_v7, %v7047_v57 }
 0x47c   : > { %7571 = vst [vmem:[%s14129_s27 + $0x110] sm:$0xff] %v7535_v62 }
 0x47d   : > { %v7533_v35 = vsel %vm13019_vm6, %v7497_v30, 0.0  ;;  %v7500_v17 = vmax.f32 %v7464_v33, 0.0  ;;  %v7462_v25 = vadd.f32 %v14112_v13, %v7419_v15 }
 0x47e   : > { %7569 = vst [vmem:[%s14129_s27 + $0x100] sm:$0xff] %v7533_v35 }
 0x47f   : > { %v7536_v50 = vsel %vm13165_vm3, %v7500_v17, 0.0  ;;  %v7498_v61 = vmax.f32 %v7462_v25, 0.0 }
 0x480   : > { %7572 = vst [vmem:[%s14129_s27 + $0x118] sm:$0xff] %v7536_v50 }
 0x481   : > { %v7534_v14 = vsel %vm15451_vm5, %v7498_v61, 0.0 }
 0x482   : > { %7570 = vst [vmem:[%s14129_s27 + $0x108] sm:$0xff] %v7534_v14 }
 0x483 PF: > { %s15_s18 = sadd.s32 1, %s9743_s18  }
 0x484   : > { %p12_p4 = scmp.ge.s32.totalorder %s15_s18, 4  }
 0x486   :  { %14 = sbr.rel (!%p12_p4) target bundleno = 1 (0x1), region = 86 }

</bundles_post_ra>
